<compile_context>
chip_gen: v6e
topology: v6e:2x2x1
jax: 0.10.0
libtpu: 0.0.40
codegen_flags: <defaults>
</compile_context>

<pallas_src>
import functools

import jax
import jax.numpy as jnp
from jax import lax
from jax.experimental import pallas as pl
from jax.experimental.pallas import tpu as pltpu

EPS = 2.220446049250313e-16  # sys.float_info.epsilon, as in normalize_feat
INV_TEMP = 1.0 / 0.005       # softmax temperature from the trainer


def _largest_tile(n, cap):
    """Largest t <= cap with n % t == 0 and t % 8 == 0; fall back to full n."""
    t = min(cap, n)
    while t >= 8:
        if n % t == 0 and t % 8 == 0:
            return t
        t -= 1
    return n  # block == full dim is always legal


# --------------------------------------------------------------------------
# Fused encoder: content + style 1x1 convs share one input load, row-tiled.
# --------------------------------------------------------------------------
def _encode_kernel(x_ref, wc_ref, bc_ref, ws_ref, bs_ref, c_ref, s_ref):
    x = x_ref[...]
    c = jnp.dot(x, wc_ref[...], preferred_element_type=jnp.float32) + bc_ref[...]
    s = jnp.dot(x, ws_ref[...], preferred_element_type=jnp.float32) + bs_ref[...]
    c_ref[...] = jnp.maximum(c, 0.0)
    s_ref[...] = jnp.maximum(s, 0.0)


def encode_pallas(p, x2d):
    """x2d: (rows, Cin) channels-last.  Returns content (rows, Cc), style (rows, Cs)."""
    rows, cin = x2d.shape
    cc = p["Wc"].shape[1]
    cs = p["Ws"].shape[1]
    tile = _largest_tile(rows, 1024)
    wspec = lambda shape: pl.BlockSpec(shape, lambda r: (0, 0))
    return pl.pallas_call(
        _encode_kernel,
        out_shape=(jax.ShapeDtypeStruct((rows, cc), jnp.float32),
                   jax.ShapeDtypeStruct((rows, cs), jnp.float32)),
        grid=(rows // tile,),
        in_specs=[
            pl.BlockSpec((tile, cin), lambda r: (r, 0)),
            wspec((cin, cc)), wspec((1, cc)),
            wspec((cin, cs)), wspec((1, cs)),
        ],
        out_specs=[
            pl.BlockSpec((tile, cc), lambda r: (r, 0)),
            pl.BlockSpec((tile, cs), lambda r: (r, 0)),
        ],
        compiler_params=pltpu.CompilerParams(dimension_semantics=("parallel",)),
    )(x2d, p["Wc"], p["bc"].reshape(1, cc), p["Ws"], p["bs"].reshape(1, cs))


# --------------------------------------------------------------------------
# Fused decoder: concat(content, style) @ Wd1 + relu, @ Wd2 + tanh.
# The concat is realized by splitting Wd1 (two matmuls into one accumulator),
# and the output is written lane-dense (padded to a multiple of 128 channels).
# --------------------------------------------------------------------------
def _decode_kernel(c_ref, s_ref, w1c_ref, w1s_ref, b1_ref, w2_ref, b2_ref, o_ref):
    h = (jnp.dot(c_ref[...], w1c_ref[...], preferred_element_type=jnp.float32)
         + jnp.dot(s_ref[...], w1s_ref[...], preferred_element_type=jnp.float32)
         + b1_ref[...])
    h = jnp.maximum(h, 0.0)
    y = jnp.dot(h, w2_ref[...], preferred_element_type=jnp.float32) + b2_ref[...]
    o_ref[...] = jnp.tanh(y)


def decode_pallas(p, style2d, content2d):
    """style2d: (rows, Cs); content2d: (rows, Cc).  Returns (rows, out_dim)."""
    rows, cs = style2d.shape
    cc = content2d.shape[1]
    hidden = p["Wd1"].shape[1]
    out_dim = p["Wd2"].shape[1]
    out_pad = 128 * ((out_dim + 127) // 128)  # lane-dense store, slice outside

    w1c = p["Wd1"][:cc]
    w1s = p["Wd1"][cc:]
    w2p = jnp.zeros((hidden, out_pad), jnp.float32).at[:, :out_dim].set(p["Wd2"])
    b2p = jnp.zeros((1, out_pad), jnp.float32).at[:, :out_dim].set(p["bd2"])

    tile = _largest_tile(rows, 1024)
    wspec = lambda shape: pl.BlockSpec(shape, lambda r: (0, 0))
    y_pad = pl.pallas_call(
        _decode_kernel,
        out_shape=jax.ShapeDtypeStruct((rows, out_pad), jnp.float32),
        grid=(rows // tile,),
        in_specs=[
            pl.BlockSpec((tile, cc), lambda r: (r, 0)),
            pl.BlockSpec((tile, cs), lambda r: (r, 0)),
            wspec((cc, hidden)), wspec((cs, hidden)), wspec((1, hidden)),
            wspec((hidden, out_pad)), wspec((1, out_pad)),
        ],
        out_specs=pl.BlockSpec((tile, out_pad), lambda r: (r, 0)),
        compiler_params=pltpu.CompilerParams(dimension_semantics=("parallel",)),
    )(content2d, style2d, w1c, w1s, p["bd1"].reshape(1, hidden), w2p, b2p)
    return y_pad[:, :out_dim]


# --------------------------------------------------------------------------
# warp_style: normalize -> temperature-scaled correlation -> softmax -> warp,
# as a single batched kernel with an online (flash-style) softmax over the
# reference-pixel axis.  Grid = (B, HW/tq, HW/tk), k innermost / "arbitrary".
# --------------------------------------------------------------------------
def _warp_style_kernel(curc_ref, refc_ref, refs_ref, o_ref,
                       m_sc, l_sc, acc_sc, *, use_bf16):
    ki = pl.program_id(2)

    @pl.when(ki == 0)
    def _():
        m_sc[...] = jnp.full_like(m_sc, -jnp.inf)
        l_sc[...] = jnp.zeros_like(l_sc)
        acc_sc[...] = jnp.zeros_like(acc_sc)

    cur = curc_ref[...]   # (tq, Cc)
    ref = refc_ref[...]   # (tk, Cc)
    # normalize_feat: per-pixel L2 norm over channels, eps added to the norm.
    cur_n = cur / (jnp.sqrt(jnp.sum(cur * cur, axis=1, keepdims=True)) + EPS)
    ref_n = ref / (jnp.sqrt(jnp.sum(ref * ref, axis=1, keepdims=True)) + EPS)
    cur_n = cur_n * INV_TEMP  # fold the 1/0.005 temperature into one operand

    # Correlation: contract the channel axis of both operands directly (no .T).
    s = lax.dot_general(cur_n, ref_n, (((1,), (1,)), ((), ())),
                        preferred_element_type=jnp.float32)  # (tq, tk)

    # Online softmax accumulation.
    m_prev = m_sc[...]
    m_new = jnp.maximum(m_prev, jnp.max(s, axis=-1, keepdims=True))
    alpha = jnp.exp(m_prev - m_new)
    p = jnp.exp(s - m_new)
    l_sc[...] = alpha * l_sc[...] + jnp.sum(p, axis=-1, keepdims=True)

    sty = refs_ref[...]   # (tk, Cs)
    if use_bf16:          # cast only at the MXU boundary; elementwise stays f32
        p = p.astype(jnp.bfloat16)
        sty = sty.astype(jnp.bfloat16)
    acc_sc[...] = alpha * acc_sc[...] + jnp.dot(
        p, sty, preferred_element_type=jnp.float32)
    m_sc[...] = m_new

    @pl.when(ki == pl.num_programs(2) - 1)
    def _():
        o_ref[...] = acc_sc[...] * pl.reciprocal(l_sc[...], approx=True)


def warp_style_pallas(cur_content, ref_content, ref_style, *, use_bf16=True):
    """cur_content/ref_content: (B, HW, Cc); ref_style: (B, HW, Cs).
    Returns the warped style (B, HW, Cs) (the trainer's 2nd output)."""
    B, HW, cc = cur_content.shape
    cs = ref_style.shape[2]
    tq = _largest_tile(HW, 256)
    tk = _largest_tile(HW, 128)
    nq, nk = HW // tq, HW // tk

    cost = pl.CostEstimate(
        flops=2 * B * HW * HW * (cc + cs),
        transcendentals=B * HW * HW,
        bytes_accessed=4 * B * HW * (2 * cc + 2 * cs),
    )
    return pl.pallas_call(
        functools.partial(_warp_style_kernel, use_bf16=use_bf16),
        out_shape=jax.ShapeDtypeStruct((B, HW, cs), jnp.float32),
        grid=(B, nq, nk),
        in_specs=[
            pl.BlockSpec((pl.Squeezed(), tq, cc), lambda b, qi, ki: (b, qi, 0)),
            pl.BlockSpec((pl.Squeezed(), tk, cc), lambda b, qi, ki: (b, ki, 0)),
            pl.BlockSpec((pl.Squeezed(), tk, cs), lambda b, qi, ki: (b, ki, 0)),
        ],
        out_specs=pl.BlockSpec((pl.Squeezed(), tq, cs),
                               lambda b, qi, ki: (b, qi, 0)),
        scratch_shapes=[
            pltpu.VMEM((tq, 1), jnp.float32),   # running max m
            pltpu.VMEM((tq, 1), jnp.float32),   # running sum l
            pltpu.VMEM((tq, cs), jnp.float32),  # output accumulator
        ],
        compiler_params=pltpu.CompilerParams(
            dimension_semantics=("parallel", "parallel", "arbitrary"),
            vmem_limit_bytes=48 * 1024 * 1024,
        ),
        cost_estimate=cost,
    )(cur_content, ref_content, ref_style)


# --------------------------------------------------------------------------
# Synthetic MUNIT trainer (forward pass only)
# --------------------------------------------------------------------------
class MUNITTrainerPallas:
    def __init__(self, key, input_dim=3, content_dim=32, style_dim=32, hidden=32):
        def gen_params(k):
            ks = jax.random.split(k, 4)
            scale = 0.1
            return {
                "Wc": scale * jax.random.normal(ks[0], (input_dim, content_dim), jnp.float32),
                "bc": jnp.zeros((content_dim,), jnp.float32),
                "Ws": scale * jax.random.normal(ks[1], (input_dim, style_dim), jnp.float32),
                "bs": jnp.zeros((style_dim,), jnp.float32),
                "Wd1": scale * jax.random.normal(ks[2], (content_dim + style_dim, hidden), jnp.float32),
                "bd1": jnp.zeros((hidden,), jnp.float32),
                "Wd2": scale * jax.random.normal(ks[3], (hidden, input_dim), jnp.float32),
                "bd2": jnp.zeros((input_dim,), jnp.float32),
            }

        ka, kb = jax.random.split(key)
        self.gen_a = gen_params(ka)
        self.gen_b = gen_params(kb)

    def forward(self, x_a, x_b):
        B, C, H, W = x_a.shape
        HW = H * W
        # NCHW -> flattened channels-last, exactly once on entry.
        xa2d = jnp.transpose(x_a, (0, 2, 3, 1)).reshape(B * HW, C)
        xb2d = jnp.transpose(x_b, (0, 2, 3, 1)).reshape(B * HW, C)

        c_a, s_a = encode_pallas(self.gen_a, xa2d)   # (B*HW, Cc), (B*HW, Cs)
        c_b, s_b = encode_pallas(self.gen_b, xb2d)
        cc, cs = c_a.shape[1], s_a.shape[1]

        c_a3 = c_a.reshape(B, HW, cc)
        c_b3 = c_b.reshape(B, HW, cc)
        s_a3 = s_a.reshape(B, HW, cs)
        s_b3 = s_b.reshape(B, HW, cs)

        s_ab = warp_style_pallas(c_a3, c_b3, s_b3)   # (B, HW, Cs)
        s_ba = warp_style_pallas(c_b3, c_a3, s_a3)

        x_ba2d = decode_pallas(self.gen_a, s_ba.reshape(B * HW, cs), c_b)
        x_ab2d = decode_pallas(self.gen_b, s_ab.reshape(B * HW, cs), c_a)

        # flattened channels-last -> NCHW, exactly once on exit.
        def to_nchw(y2d):
            return jnp.transpose(y2d.reshape(B, H, W, -1), (0, 3, 1, 2))

        return to_nchw(x_ab2d), to_nchw(x_ba2d)


# --------------------------------------------------------------------------
# Pure-JAX (f32) reference of the same forward, for a correctness check.
# --------------------------------------------------------------------------
def _reference_forward(trainer, x_a, x_b):
    def enc(p, x):
        B, C, H, W = x.shape
        x2 = jnp.transpose(x, (0, 2, 3, 1)).reshape(B, H * W, C)
        c = jnp.maximum(jnp.einsum("bpc,cd->bpd", x2, p["Wc"]) + p["bc"], 0.0)
        s = jnp.maximum(jnp.einsum("bpc,cd->bpd", x2, p["Ws"]) + p["bs"], 0.0)
        return c, s

    def warp(cur, ref, sty):
        cn = cur / (jnp.sqrt(jnp.sum(cur * cur, -1, keepdims=True)) + EPS)
        rn = ref / (jnp.sqrt(jnp.sum(ref * ref, -1, keepdims=True)) + EPS)
        f = jnp.einsum("bqc,bkc->bqk", cn, rn) / 0.005
        p = jax.nn.softmax(f, axis=-1)
        return jnp.einsum("bqk,bkc->bqc", p, sty)

    def dec(p, style, content):
        h = jnp.concatenate([content, style], axis=-1)
        h = jnp.maximum(jnp.einsum("bpc,cd->bpd", h, p["Wd1"]) + p["bd1"], 0.0)
        return jnp.tanh(jnp.einsum("bpd,dc->bpc", h, p["Wd2"]) + p["bd2"])

    B, C, H, W = x_a.shape
    c_a, s_a = enc(trainer.gen_a, x_a)
    c_b, s_b = enc(trainer.gen_b, x_b)
    s_ab = warp(c_a, c_b, s_b)
    s_ba = warp(c_b, c_a, s_a)
    x_ba = dec(trainer.gen_a, s_ba, c_b)
    x_ab = dec(trainer.gen_b, s_ab, c_a)

    def to_nchw(y):
        return jnp.transpose(y.reshape(B, H, W, -1), (0, 3, 1, 2))

    return to_nchw(x_ab), to_nchw(x_ba), (c_a, c_b, s_a, s_b, s_ab, s_ba)


if __name__ == "__main__":
    key = jax.random.PRNGKey(0)
    k_params, k_a, k_b = jax.random.split(key, 3)

    B, C, H, W = 2, 3, 16, 16  # small NCHW images; input_dim_a = input_dim_b = 3
    x_a = jax.random.normal(k_a, (B, C, H, W), jnp.float32)
    x_b = jax.random.normal(k_b, (B, C, H, W), jnp.float32)

    trainer = MUNITTrainerPallas(k_params, input_dim=C, content_dim=32,
                                 style_dim=32, hidden=32)

    fwd = jax.jit(trainer.forward)
    x_ab, x_ba = fwd(x_a, x_b)
    jax.block_until_ready((x_ab, x_ba))

    assert x_ab.shape == (B, C, H, W) and x_ba.shape == (B, C, H, W)
    assert x_ab.dtype == jnp.float32 and x_ba.dtype == jnp.float32

    # Correctness check against the pure-JAX f32 reference (warp path exercises
    # multiple online-softmax k-steps at this size: HW=256, tk=128).
    r_ab, r_ba, (c_a_r, c_b_r, s_a_r, s_b_r, s_ab_r, s_ba_r) = _reference_forward(
        trainer, x_a, x_b)
    s_ab_k = warp_style_pallas(c_a_r, c_b_r, s_b_r)
    warp_err = float(jnp.max(jnp.abs(s_ab_k - s_ab_r)))
    img_err = float(max(jnp.max(jnp.abs(x_ab - r_ab)), jnp.max(jnp.abs(x_ba - r_ba))))
    assert warp_err < 2e-2, f"warp_style mismatch: {warp_err}"
    assert img_err < 1e-1, f"forward output mismatch: {img_err}"

    print("KERNEL_OK")
</pallas_src>

<mosaic_0001>
module attributes {stable_mosaic.version = 11 : i64} {
  func.func @_encode_kernel(%arg0: i32, %arg1: memref<512x3xf32, #tpu.memory_space<vmem>>, %arg2: memref<3x32xf32, #tpu.memory_space<vmem>>, %arg3: memref<1x32xf32, #tpu.memory_space<vmem>>, %arg4: memref<3x32xf32, #tpu.memory_space<vmem>>, %arg5: memref<1x32xf32, #tpu.memory_space<vmem>>, %arg6: memref<512x32xf32, #tpu.memory_space<vmem>>, %arg7: memref<512x32xf32, #tpu.memory_space<vmem>>) attributes {dimension_semantics = [#tpu.dimension_semantics<parallel>], iteration_bounds = array<i64: 1>, scalar_prefetch = 0 : i64, scratch_operands = 0 : i64, tpu.core_type = #tpu.core_type<tc>, window_params = [{transform_indices = @transform_0, window_bounds = array<i64: 512, 3>}, {pipeline_mode = #tpu.pipeline_mode<synchronous>, transform_indices = @transform_1, window_bounds = array<i64: 3, 32>}, {pipeline_mode = #tpu.pipeline_mode<synchronous>, transform_indices = @transform_2, window_bounds = array<i64: 1, 32>}, {pipeline_mode = #tpu.pipeline_mode<synchronous>, transform_indices = @transform_3, window_bounds = array<i64: 3, 32>}, {pipeline_mode = #tpu.pipeline_mode<synchronous>, transform_indices = @transform_4, window_bounds = array<i64: 1, 32>}, {transform_indices = @transform_5, window_bounds = array<i64: 512, 32>}, {transform_indices = @transform_6, window_bounds = array<i64: 512, 32>}]} {
    %c0 = arith.constant 0 : index
    %c0_0 = arith.constant 0 : index
    %0 = vector.load %arg1[%c0, %c0_0] : memref<512x3xf32, #tpu.memory_space<vmem>>, vector<512x3xf32>
    %c0_1 = arith.constant 0 : index
    %c0_2 = arith.constant 0 : index
    %1 = vector.load %arg2[%c0_1, %c0_2] : memref<3x32xf32, #tpu.memory_space<vmem>>, vector<3x32xf32>
    %cst = arith.constant dense<0.000000e+00> : vector<512x32xf32>
    %2 = tpu.matmul %0, %1, %cst {dimension_numbers = #tpu.dot_dimension_numbers<[1], [0], [0], [1], [0, 0, 1, 1], [], []>} : vector<512x3xf32>, vector<3x32xf32>, vector<512x32xf32> -> vector<512x32xf32>
    %c0_3 = arith.constant 0 : index
    %c0_4 = arith.constant 0 : index
    %3 = vector.load %arg3[%c0_3, %c0_4] : memref<1x32xf32, #tpu.memory_space<vmem>>, vector<1x32xf32>
    %4 = vector.broadcast %3 : vector<1x32xf32> to vector<512x32xf32>
    %5 = arith.addf %2, %4 : vector<512x32xf32>
    %c0_5 = arith.constant 0 : index
    %c0_6 = arith.constant 0 : index
    %6 = vector.load %arg4[%c0_5, %c0_6] : memref<3x32xf32, #tpu.memory_space<vmem>>, vector<3x32xf32>
    %cst_7 = arith.constant dense<0.000000e+00> : vector<512x32xf32>
    %7 = tpu.matmul %0, %6, %cst_7 {dimension_numbers = #tpu.dot_dimension_numbers<[1], [0], [0], [1], [0, 0, 1, 1], [], []>} : vector<512x3xf32>, vector<3x32xf32>, vector<512x32xf32> -> vector<512x32xf32>
    %c0_8 = arith.constant 0 : index
    %c0_9 = arith.constant 0 : index
    %8 = vector.load %arg5[%c0_8, %c0_9] : memref<1x32xf32, #tpu.memory_space<vmem>>, vector<1x32xf32>
    %9 = vector.broadcast %8 : vector<1x32xf32> to vector<512x32xf32>
    %10 = arith.addf %7, %9 : vector<512x32xf32>
    %cst_10 = arith.constant 0.000000e+00 : f32
    %11 = vector.broadcast %cst_10 : f32 to vector<512x32xf32>
    %12 = arith.maximumf %5, %11 : vector<512x32xf32>
    %c0_11 = arith.constant 0 : index
    %c0_12 = arith.constant 0 : index
    %13 = vector.load %arg6[%c0_11, %c0_12] : memref<512x32xf32, #tpu.memory_space<vmem>>, vector<512x32xf32>
    tpu.vector_store %arg6[%c0_11, %c0_12], %12 {strides = array<i32>} : memref<512x32xf32, #tpu.memory_space<vmem>>, vector<512x32xf32>,
    %cst_13 = arith.constant 0.000000e+00 : f32
    %14 = vector.broadcast %cst_13 : f32 to vector<512x32xf32>
    %15 = arith.maximumf %10, %14 : vector<512x32xf32>
    %c0_14 = arith.constant 0 : index
    %c0_15 = arith.constant 0 : index
    %16 = vector.load %arg7[%c0_14, %c0_15] : memref<512x32xf32, #tpu.memory_space<vmem>>, vector<512x32xf32>
    tpu.vector_store %arg7[%c0_14, %c0_15], %15 {strides = array<i32>} : memref<512x32xf32, #tpu.memory_space<vmem>>, vector<512x32xf32>,
    return
  }
  func.func @transform_0(%arg0: i32) -> (i32, i32) {
    %c0_i32 = arith.constant 0 : i32
    %c0_i32_0 = arith.constant 0 : i32
    return %arg0, %c0_i32 : i32, i32
  }
  func.func @transform_1(%arg0: i32) -> (i32, i32) {
    %c0_i32 = arith.constant 0 : i32
    %c0_i32_0 = arith.constant 0 : i32
    %c0_i32_1 = arith.constant 0 : i32
    return %c0_i32, %c0_i32_0 : i32, i32
  }
  func.func @transform_2(%arg0: i32) -> (i32, i32) {
    %c0_i32 = arith.constant 0 : i32
    %c0_i32_0 = arith.constant 0 : i32
    %c0_i32_1 = arith.constant 0 : i32
    return %c0_i32, %c0_i32_0 : i32, i32
  }
  func.func @transform_3(%arg0: i32) -> (i32, i32) {
    %c0_i32 = arith.constant 0 : i32
    %c0_i32_0 = arith.constant 0 : i32
    %c0_i32_1 = arith.constant 0 : i32
    return %c0_i32, %c0_i32_0 : i32, i32
  }
  func.func @transform_4(%arg0: i32) -> (i32, i32) {
    %c0_i32 = arith.constant 0 : i32
    %c0_i32_0 = arith.constant 0 : i32
    %c0_i32_1 = arith.constant 0 : i32
    return %c0_i32, %c0_i32_0 : i32, i32
  }
  func.func @transform_5(%arg0: i32) -> (i32, i32) {
    %c0_i32 = arith.constant 0 : i32
    %c0_i32_0 = arith.constant 0 : i32
    return %arg0, %c0_i32 : i32, i32
  }
  func.func @transform_6(%arg0: i32) -> (i32, i32) {
    %c0_i32 = arith.constant 0 : i32
    %c0_i32_0 = arith.constant 0 : i32
    return %arg0, %c0_i32 : i32, i32
  }
}

module attributes {stable_mosaic.version = 11 : i64} {
  func.func @_warp_style_kernel(%arg0: i32, %arg1: i32, %arg2: i32, %arg3: memref<1x256x32xf32, #tpu.memory_space<vmem>>, %arg4: memref<1x128x32xf32, #tpu.memory_space<vmem>>, %arg5: memref<1x128x32xf32, #tpu.memory_space<vmem>>, %arg6: memref<1x256x32xf32, #tpu.memory_space<vmem>>, %arg7: memref<256x1xf32, #tpu.memory_space<vmem>>, %arg8: memref<256x1xf32, #tpu.memory_space<vmem>>, %arg9: memref<256x32xf32, #tpu.memory_space<vmem>>) attributes {dimension_semantics = [#tpu.dimension_semantics<parallel>, #tpu.dimension_semantics<parallel>, #tpu.dimension_semantics<arbitrary>], iteration_bounds = array<i64: 2, 1, 2>, scalar_prefetch = 0 : i64, scratch_operands = 3 : i64, tpu.core_type = #tpu.core_type<tc>, window_params = [{transform_indices = @transform_0, window_bounds = array<i64: 1, 256, 32>}, {transform_indices = @transform_1, window_bounds = array<i64: 1, 128, 32>}, {transform_indices = @transform_2, window_bounds = array<i64: 1, 128, 32>}, {transform_indices = @transform_3, window_bounds = array<i64: 1, 256, 32>}]} {
    %c0_i32 = arith.constant 0 : i32
    %0 = arith.cmpi eq, %arg2, %c0_i32 : i32
    %1 = arith.extui %0 : i1 to i32
    %c0_i32_0 = arith.constant 0 : i32
    %2 = arith.cmpi ne, %1, %c0_i32_0 : i32
    scf.if %2 {
      %cst_30 = arith.constant 0xFF800000 : f32
      %55 = vector.broadcast %cst_30 : f32 to vector<256x1xf32>
      %c0_31 = arith.constant 0 : index
      %c0_32 = arith.constant 0 : index
      %56 = vector.load %arg7[%c0_31, %c0_32] : memref<256x1xf32, #tpu.memory_space<vmem>>, vector<256x1xf32>
      tpu.vector_store %arg7[%c0_31, %c0_32], %55 {strides = array<i32>} : memref<256x1xf32, #tpu.memory_space<vmem>>, vector<256x1xf32>,
      %cst_33 = arith.constant 0.000000e+00 : f32
      %57 = vector.broadcast %cst_33 : f32 to vector<256x1xf32>
      %c0_34 = arith.constant 0 : index
      %c0_35 = arith.constant 0 : index
      %58 = vector.load %arg8[%c0_34, %c0_35] : memref<256x1xf32, #tpu.memory_space<vmem>>, vector<256x1xf32>
      tpu.vector_store %arg8[%c0_34, %c0_35], %57 {strides = array<i32>} : memref<256x1xf32, #tpu.memory_space<vmem>>, vector<256x1xf32>,
      %cst_36 = arith.constant 0.000000e+00 : f32
      %59 = vector.broadcast %cst_36 : f32 to vector<256x32xf32>
      %c0_37 = arith.constant 0 : index
      %c0_38 = arith.constant 0 : index
      %60 = vector.load %arg9[%c0_37, %c0_38] : memref<256x32xf32, #tpu.memory_space<vmem>>, vector<256x32xf32>
      tpu.vector_store %arg9[%c0_37, %c0_38], %59 {strides = array<i32>} : memref<256x32xf32, #tpu.memory_space<vmem>>, vector<256x32xf32>,
    } else {
    }
    %c0 = arith.constant 0 : index
    %c0_1 = arith.constant 0 : index
    %c0_2 = arith.constant 0 : index
    %3 = vector.load %arg3[%c0, %c0_1, %c0_2] : memref<1x256x32xf32, #tpu.memory_space<vmem>>, vector<1x256x32xf32>
    %4 = vector.shape_cast %3 : vector<1x256x32xf32> to vector<256x32xf32>
    %c0_3 = arith.constant 0 : index
    %c0_4 = arith.constant 0 : index
    %c0_5 = arith.constant 0 : index
    %5 = vector.load %arg4[%c0_3, %c0_4, %c0_5] : memref<1x128x32xf32, #tpu.memory_space<vmem>>, vector<1x128x32xf32>
    %6 = vector.shape_cast %5 : vector<1x128x32xf32> to vector<128x32xf32>
    %7 = arith.mulf %4, %4 : vector<256x32xf32>
    %cst = arith.constant dense<0.000000e+00> : vector<256xf32>
    %8 = vector.multi_reduction <add>, %7, %cst [1] : vector<256x32xf32> to vector<256xf32>
    %9 = vector.shape_cast %8 : vector<256xf32> to vector<256x1xf32>
    %10 = math.sqrt %9 : vector<256x1xf32>
    %cst_6 = arith.constant 2.22044605E-16 : f32
    %11 = vector.broadcast %cst_6 : f32 to vector<256x1xf32>
    %12 = arith.addf %10, %11 : vector<256x1xf32>
    %13 = vector.broadcast %12 : vector<256x1xf32> to vector<256x32xf32>
    %14 = arith.divf %4, %13 : vector<256x32xf32>
    %15 = arith.mulf %6, %6 : vector<128x32xf32>
    %cst_7 = arith.constant dense<0.000000e+00> : vector<128xf32>
    %16 = vector.multi_reduction <add>, %15, %cst_7 [1] : vector<128x32xf32> to vector<128xf32>
    %17 = vector.shape_cast %16 : vector<128xf32> to vector<128x1xf32>
    %18 = math.sqrt %17 : vector<128x1xf32>
    %cst_8 = arith.constant 2.22044605E-16 : f32
    %19 = vector.broadcast %cst_8 : f32 to vector<128x1xf32>
    %20 = arith.addf %18, %19 : vector<128x1xf32>
    %21 = vector.broadcast %20 : vector<128x1xf32> to vector<128x32xf32>
    %22 = arith.divf %6, %21 : vector<128x32xf32>
    %cst_9 = arith.constant 2.000000e+02 : f32
    %23 = vector.broadcast %cst_9 : f32 to vector<256x32xf32>
    %24 = arith.mulf %14, %23 : vector<256x32xf32>
    %cst_10 = arith.constant dense<0.000000e+00> : vector<256x128xf32>
    %25 = tpu.matmul %24, %22, %cst_10 {dimension_numbers = #tpu.dot_dimension_numbers<[1], [1], [0], [0], [0, 0, 1, 0], [], []>} : vector<256x32xf32>, vector<128x32xf32>, vector<256x128xf32> -> vector<256x128xf32>
    %c0_11 = arith.constant 0 : index
    %c0_12 = arith.constant 0 : index
    %26 = vector.load %arg7[%c0_11, %c0_12] : memref<256x1xf32, #tpu.memory_space<vmem>>, vector<256x1xf32>
    %cst_13 = arith.constant dense<0xFF800000> : vector<256xf32>
    %27 = vector.multi_reduction <maximumf>, %25, %cst_13 [1] : vector<256x128xf32> to vector<256xf32>
    %28 = vector.shape_cast %27 : vector<256xf32> to vector<256x1xf32>
    %29 = arith.maximumf %26, %28 : vector<256x1xf32>
    %30 = arith.subf %26, %29 : vector<256x1xf32>
    %31 = math.exp %30 : vector<256x1xf32>
    %32 = vector.broadcast %29 : vector<256x1xf32> to vector<256x128xf32>
    %33 = arith.subf %25, %32 : vector<256x128xf32>
    %34 = math.exp %33 : vector<256x128xf32>
    %c0_14 = arith.constant 0 : index
    %c0_15 = arith.constant 0 : index
    %35 = vector.load %arg8[%c0_14, %c0_15] : memref<256x1xf32, #tpu.memory_space<vmem>>, vector<256x1xf32>
    %36 = arith.mulf %31, %35 : vector<256x1xf32>
    %cst_16 = arith.constant dense<0.000000e+00> : vector<256xf32>
    %37 = vector.multi_reduction <add>, %34, %cst_16 [1] : vector<256x128xf32> to vector<256xf32>
    %38 = vector.shape_cast %37 : vector<256xf32> to vector<256x1xf32>
    %39 = arith.addf %36, %38 : vector<256x1xf32>
    %c0_17 = arith.constant 0 : index
    %c0_18 = arith.constant 0 : index
    %40 = vector.load %arg8[%c0_17, %c0_18] : memref<256x1xf32, #tpu.memory_space<vmem>>, vector<256x1xf32>
    tpu.vector_store %arg8[%c0_17, %c0_18], %39 {strides = array<i32>} : memref<256x1xf32, #tpu.memory_space<vmem>>, vector<256x1xf32>,
    %c0_19 = arith.constant 0 : index
    %c0_20 = arith.constant 0 : index
    %c0_21 = arith.constant 0 : index
    %41 = vector.load %arg5[%c0_19, %c0_20, %c0_21] : memref<1x128x32xf32, #tpu.memory_space<vmem>>, vector<1x128x32xf32>
    %42 = vector.shape_cast %41 : vector<1x128x32xf32> to vector<128x32xf32>
    %43 = arith.truncf %34 : vector<256x128xf32> to vector<256x128xbf16>
    %44 = arith.truncf %42 : vector<128x32xf32> to vector<128x32xbf16>
    %c0_22 = arith.constant 0 : index
    %c0_23 = arith.constant 0 : index
    %45 = vector.load %arg9[%c0_22, %c0_23] : memref<256x32xf32, #tpu.memory_space<vmem>>, vector<256x32xf32>
    %46 = vector.broadcast %31 : vector<256x1xf32> to vector<256x32xf32>
    %47 = arith.mulf %46, %45 : vector<256x32xf32>
    %cst_24 = arith.constant dense<0.000000e+00> : vector<256x32xf32>
    %48 = tpu.matmul %43, %44, %cst_24 {dimension_numbers = #tpu.dot_dimension_numbers<[1], [0], [0], [1], [0, 0, 1, 1], [], []>} : vector<256x128xbf16>, vector<128x32xbf16>, vector<256x32xf32> -> vector<256x32xf32>
    %49 = arith.addf %47, %48 : vector<256x32xf32>
    %c0_25 = arith.constant 0 : index
    %c0_26 = arith.constant 0 : index
    %50 = vector.load %arg9[%c0_25, %c0_26] : memref<256x32xf32, #tpu.memory_space<vmem>>, vector<256x32xf32>
    tpu.vector_store %arg9[%c0_25, %c0_26], %49 {strides = array<i32>} : memref<256x32xf32, #tpu.memory_space<vmem>>, vector<256x32xf32>,
    %c0_27 = arith.constant 0 : index
    %c0_28 = arith.constant 0 : index
    %51 = vector.load %arg7[%c0_27, %c0_28] : memref<256x1xf32, #tpu.memory_space<vmem>>, vector<256x1xf32>
    tpu.vector_store %arg7[%c0_27, %c0_28], %29 {strides = array<i32>} : memref<256x1xf32, #tpu.memory_space<vmem>>, vector<256x1xf32>,
    %c1_i32 = arith.constant 1 : i32
    %52 = arith.cmpi eq, %arg2, %c1_i32 : i32
    %53 = arith.extui %52 : i1 to i32
    %c0_i32_29 = arith.constant 0 : i32
    %54 = arith.cmpi ne, %53, %c0_i32_29 : i32
    scf.if %54 {
      %c0_30 = arith.constant 0 : index
      %c0_31 = arith.constant 0 : index
      %55 = vector.load %arg9[%c0_30, %c0_31] : memref<256x32xf32, #tpu.memory_space<vmem>>, vector<256x32xf32>
      %c0_32 = arith.constant 0 : index
      %c0_33 = arith.constant 0 : index
      %56 = vector.load %arg8[%c0_32, %c0_33] : memref<256x1xf32, #tpu.memory_space<vmem>>, vector<256x1xf32>
      %57 = tpu.reciprocal %56 {approx = true} : vector<256x1xf32> -> vector<256x1xf32>
      %58 = vector.broadcast %57 : vector<256x1xf32> to vector<256x32xf32>
      %59 = arith.mulf %55, %58 : vector<256x32xf32>
      %c0_34 = arith.constant 0 : index
      %c0_35 = arith.constant 0 : index
      %c0_36 = arith.constant 0 : index
      %60 = vector.load %arg6[%c0_34, %c0_35, %c0_36] : memref<1x256x32xf32, #tpu.memory_space<vmem>>, vector<1x256x32xf32>
      %61 = vector.shape_cast %60 : vector<1x256x32xf32> to vector<256x32xf32>
      %62 = vector.shape_cast %59 : vector<256x32xf32> to vector<1x256x32xf32>
      tpu.vector_store %arg6[%c0_34, %c0_35, %c0_36], %62 {strides = array<i32>} : memref<1x256x32xf32, #tpu.memory_space<vmem>>, vector<1x256x32xf32>,
    } else {
    }
    return
  }
  func.func @transform_0(%arg0: i32, %arg1: i32, %arg2: i32) -> (i32, i32, i32) {
    %c0_i32 = arith.constant 0 : i32
    %c0_i32_0 = arith.constant 0 : i32
    return %arg0, %arg1, %c0_i32 : i32, i32, i32
  }
  func.func @transform_1(%arg0: i32, %arg1: i32, %arg2: i32) -> (i32, i32, i32) {
    %c0_i32 = arith.constant 0 : i32
    %c0_i32_0 = arith.constant 0 : i32
    return %arg0, %arg2, %c0_i32 : i32, i32, i32
  }
  func.func @transform_2(%arg0: i32, %arg1: i32, %arg2: i32) -> (i32, i32, i32) {
    %c0_i32 = arith.constant 0 : i32
    %c0_i32_0 = arith.constant 0 : i32
    return %arg0, %arg2, %c0_i32 : i32, i32, i32
  }
  func.func @transform_3(%arg0: i32, %arg1: i32, %arg2: i32) -> (i32, i32, i32) {
    %c0_i32 = arith.constant 0 : i32
    %c0_i32_0 = arith.constant 0 : i32
    return %arg0, %arg1, %c0_i32 : i32, i32, i32
  }
}

module attributes {stable_mosaic.version = 11 : i64} {
  func.func @_decode_kernel(%arg0: i32, %arg1: memref<512x32xf32, #tpu.memory_space<vmem>>, %arg2: memref<512x32xf32, #tpu.memory_space<vmem>>, %arg3: memref<32x32xf32, #tpu.memory_space<vmem>>, %arg4: memref<32x32xf32, #tpu.memory_space<vmem>>, %arg5: memref<1x32xf32, #tpu.memory_space<vmem>>, %arg6: memref<32x128xf32, #tpu.memory_space<vmem>>, %arg7: memref<1x128xf32, #tpu.memory_space<vmem>>, %arg8: memref<512x128xf32, #tpu.memory_space<vmem>>) attributes {dimension_semantics = [#tpu.dimension_semantics<parallel>], iteration_bounds = array<i64: 1>, scalar_prefetch = 0 : i64, scratch_operands = 0 : i64, tpu.core_type = #tpu.core_type<tc>, window_params = [{transform_indices = @transform_0, window_bounds = array<i64: 512, 32>}, {transform_indices = @transform_1, window_bounds = array<i64: 512, 32>}, {pipeline_mode = #tpu.pipeline_mode<synchronous>, transform_indices = @transform_2, window_bounds = array<i64: 32, 32>}, {pipeline_mode = #tpu.pipeline_mode<synchronous>, transform_indices = @transform_3, window_bounds = array<i64: 32, 32>}, {pipeline_mode = #tpu.pipeline_mode<synchronous>, transform_indices = @transform_4, window_bounds = array<i64: 1, 32>}, {pipeline_mode = #tpu.pipeline_mode<synchronous>, transform_indices = @transform_5, window_bounds = array<i64: 32, 128>}, {pipeline_mode = #tpu.pipeline_mode<synchronous>, transform_indices = @transform_6, window_bounds = array<i64: 1, 128>}, {transform_indices = @transform_7, window_bounds = array<i64: 512, 128>}]} {
    %c0 = arith.constant 0 : index
    %c0_0 = arith.constant 0 : index
    %0 = vector.load %arg1[%c0, %c0_0] : memref<512x32xf32, #tpu.memory_space<vmem>>, vector<512x32xf32>
    %c0_1 = arith.constant 0 : index
    %c0_2 = arith.constant 0 : index
    %1 = vector.load %arg3[%c0_1, %c0_2] : memref<32x32xf32, #tpu.memory_space<vmem>>, vector<32x32xf32>
    %cst = arith.constant dense<0.000000e+00> : vector<512x32xf32>
    %2 = tpu.matmul %0, %1, %cst {dimension_numbers = #tpu.dot_dimension_numbers<[1], [0], [0], [1], [0, 0, 1, 1], [], []>} : vector<512x32xf32>, vector<32x32xf32>, vector<512x32xf32> -> vector<512x32xf32>
    %c0_3 = arith.constant 0 : index
    %c0_4 = arith.constant 0 : index
    %3 = vector.load %arg2[%c0_3, %c0_4] : memref<512x32xf32, #tpu.memory_space<vmem>>, vector<512x32xf32>
    %c0_5 = arith.constant 0 : index
    %c0_6 = arith.constant 0 : index
    %4 = vector.load %arg4[%c0_5, %c0_6] : memref<32x32xf32, #tpu.memory_space<vmem>>, vector<32x32xf32>
    %cst_7 = arith.constant dense<0.000000e+00> : vector<512x32xf32>
    %5 = tpu.matmul %3, %4, %cst_7 {dimension_numbers = #tpu.dot_dimension_numbers<[1], [0], [0], [1], [0, 0, 1, 1], [], []>} : vector<512x32xf32>, vector<32x32xf32>, vector<512x32xf32> -> vector<512x32xf32>
    %6 = arith.addf %2, %5 : vector<512x32xf32>
    %c0_8 = arith.constant 0 : index
    %c0_9 = arith.constant 0 : index
    %7 = vector.load %arg5[%c0_8, %c0_9] : memref<1x32xf32, #tpu.memory_space<vmem>>, vector<1x32xf32>
    %8 = vector.broadcast %7 : vector<1x32xf32> to vector<512x32xf32>
    %9 = arith.addf %6, %8 : vector<512x32xf32>
    %cst_10 = arith.constant 0.000000e+00 : f32
    %10 = vector.broadcast %cst_10 : f32 to vector<512x32xf32>
    %11 = arith.maximumf %9, %10 : vector<512x32xf32>
    %c0_11 = arith.constant 0 : index
    %c0_12 = arith.constant 0 : index
    %12 = vector.load %arg6[%c0_11, %c0_12] : memref<32x128xf32, #tpu.memory_space<vmem>>, vector<32x128xf32>
    %cst_13 = arith.constant dense<0.000000e+00> : vector<512x128xf32>
    %13 = tpu.matmul %11, %12, %cst_13 {dimension_numbers = #tpu.dot_dimension_numbers<[1], [0], [0], [1], [0, 0, 1, 1], [], []>} : vector<512x32xf32>, vector<32x128xf32>, vector<512x128xf32> -> vector<512x128xf32>
    %c0_14 = arith.constant 0 : index
    %c0_15 = arith.constant 0 : index
    %14 = vector.load %arg7[%c0_14, %c0_15] : memref<1x128xf32, #tpu.memory_space<vmem>>, vector<1x128xf32>
    %15 = vector.broadcast %14 : vector<1x128xf32> to vector<512x128xf32>
    %16 = arith.addf %13, %15 : vector<512x128xf32>
    %17 = math.tanh %16 : vector<512x128xf32>
    %c0_16 = arith.constant 0 : index
    %c0_17 = arith.constant 0 : index
    %18 = vector.load %arg8[%c0_16, %c0_17] : memref<512x128xf32, #tpu.memory_space<vmem>>, vector<512x128xf32>
    tpu.vector_store %arg8[%c0_16, %c0_17], %17 {strides = array<i32>} : memref<512x128xf32, #tpu.memory_space<vmem>>, vector<512x128xf32>,
    return
  }
  func.func @transform_0(%arg0: i32) -> (i32, i32) {
    %c0_i32 = arith.constant 0 : i32
    %c0_i32_0 = arith.constant 0 : i32
    return %arg0, %c0_i32 : i32, i32
  }
  func.func @transform_1(%arg0: i32) -> (i32, i32) {
    %c0_i32 = arith.constant 0 : i32
    %c0_i32_0 = arith.constant 0 : i32
    return %arg0, %c0_i32 : i32, i32
  }
  func.func @transform_2(%arg0: i32) -> (i32, i32) {
    %c0_i32 = arith.constant 0 : i32
    %c0_i32_0 = arith.constant 0 : i32
    %c0_i32_1 = arith.constant 0 : i32
    return %c0_i32, %c0_i32_0 : i32, i32
  }
  func.func @transform_3(%arg0: i32) -> (i32, i32) {
    %c0_i32 = arith.constant 0 : i32
    %c0_i32_0 = arith.constant 0 : i32
    %c0_i32_1 = arith.constant 0 : i32
    return %c0_i32, %c0_i32_0 : i32, i32
  }
  func.func @transform_4(%arg0: i32) -> (i32, i32) {
    %c0_i32 = arith.constant 0 : i32
    %c0_i32_0 = arith.constant 0 : i32
    %c0_i32_1 = arith.constant 0 : i32
    return %c0_i32, %c0_i32_0 : i32, i32
  }
  func.func @transform_5(%arg0: i32) -> (i32, i32) {
    %c0_i32 = arith.constant 0 : i32
    %c0_i32_0 = arith.constant 0 : i32
    %c0_i32_1 = arith.constant 0 : i32
    return %c0_i32, %c0_i32_0 : i32, i32
  }
  func.func @transform_6(%arg0: i32) -> (i32, i32) {
    %c0_i32 = arith.constant 0 : i32
    %c0_i32_0 = arith.constant 0 : i32
    %c0_i32_1 = arith.constant 0 : i32
    return %c0_i32, %c0_i32_0 : i32, i32
  }
  func.func @transform_7(%arg0: i32) -> (i32, i32) {
    %c0_i32 = arith.constant 0 : i32
    %c0_i32_0 = arith.constant 0 : i32
    return %arg0, %c0_i32 : i32, i32
  }
}

</mosaic_0001>

<bundles_post_ra>
// kernel: forward.7
= control target key start
LH: loop header
LB: loop body
LE: loop exit
PB: predicated region body
PF: predicated region fallthrough
CT: control target
= control target key end

     0   :  { %vm287_vm0 = vcmask 1042432   ;;  %vm94_vm1 = vcmask 23552   ;;  %vm1136_vm2 = vcmask 261120   ;;  %s2806_s1 = inlined_call_operand.vmem [shape: f32[3,32], index: 1, kind: input, shape index: {}]   ;;  %s2807_s3 = inlined_call_operand.vmem [shape: f32[3,32], index: 3, kind: input, shape index: {}]   ;;  %s2808_s0 = inlined_call_operand.vmem [shape: f32[512,3], index: 0, kind: input, shape index: {}]   ;;  %s2809_s2 = inlined_call_operand.vmem [shape: f32[1,32], index: 2, kind: input, shape index: {}, may-alias: {2,4}]   ;;  %s2810_s4 = inlined_call_operand.vmem [shape: f32[1,32], index: 4, kind: input, shape index: {}, may-alias: {2,4}]   ;;  %s2811_s5 = inlined_call_operand.vmem [shape: f32[512,32], index: 5, kind: output, shape index: {0}]   ;;  %s2812_s6 = inlined_call_operand.vmem [shape: f32[512,32], index: 6, kind: output, shape index: {1}]  }
   0x1   :  { %v86_v0 = vld [vmem:[%s2806_s1] sm:$0x7]  ;;  %v23_v3 = vld [vmem:[%s2808_s0 + $0x8] sm:$0xff]  ;;  %v24_v4 = vld [vmem:[%s2808_s0 + $0x10] sm:$0xff] }
   0x2   :  { %v676_v1 = vld [vmem:[%s2807_s3] sm:$0x7]  ;;  %1599 = vmatprep.subr.msk.mxu0 %vm287_vm0, %v86_v0  ;;  %v25_v5 = vld [vmem:[%s2808_s0 + $0x18] sm:$0xff]  ;;  %v27_v7 = vld [vmem:[%s2808_s0 + $0x28] sm:$0xff] }
   0x3   :  { %v22_v2 = vld [vmem:[%s2808_s0] sm:$0xff]  ;;  %1697 = vmatprep.subr.msk.mxu1 %vm287_vm0, %v676_v1  ;;  %1600 = vmatpush3.msk.msra.mxu0 %vm287_vm0, %v86_v0  ;;  %v28_v8 = vld [vmem:[%s2808_s0 + $0x30] sm:$0xff]  ;;  %v29_v9 = vld [vmem:[%s2808_s0 + $0x38] sm:$0xff] }
   0x4   :  { %1601 = vmatprep.mubr.msk.f32.mxu0 %vm94_vm1, %v22_v2  ;;  %1698 = vmatpush3.msk.msra.mxu1 %vm287_vm0, %v676_v1  ;;  %v26_v6 = vld [vmem:[%s2808_s0 + $0x20] sm:$0xff]  ;;  %v31_v11 = vld [vmem:[%s2808_s0 + $0x48] sm:$0xff]  ;;  %v32_v12 = vld [vmem:[%s2808_s0 + $0x50] sm:$0xff] }
   0x5   :  { %1699 = vmatprep.mubr.msk.f32.mxu1 %vm94_vm1, %v22_v2  ;;  %1602 = vmatmul.mubr.msk.f32.vlgmr.msra.gmra.mxu0 %vm94_vm1, %v23_v3  ;;  %v30_v10 = vld [vmem:[%s2808_s0 + $0x40] sm:$0xff]  ;;  %v33_v13 = vld [vmem:[%s2808_s0 + $0x58] sm:$0xff]  ;;  %v35_v15 = vld [vmem:[%s2808_s0 + $0x68] sm:$0xff] }
   0x6   :  { %1700 = vmatmul.mubr.msk.f32.vlgmr.msra.gmra.mxu1 %vm94_vm1, %v23_v3  ;;  %1604 = vmatprep.mubr.msk.f32.mxu0 %vm94_vm1, %v24_v4  ;;  %v34_v14 = vld [vmem:[%s2808_s0 + $0x60] sm:$0xff]  ;;  %v36_v16 = vld [vmem:[%s2808_s0 + $0x70] sm:$0xff]  ;;  %v37_v17 = vld [vmem:[%s2808_s0 + $0x78] sm:$0xff] }
   0x7   :  { %1702 = vmatprep.mubr.msk.f32.mxu1 %vm94_vm1, %v24_v4  ;;  %v38_v18 = vld [vmem:[%s2808_s0 + $0x80] sm:$0xff]  ;;  %v39_v19 = vld [vmem:[%s2808_s0 + $0x88] sm:$0xff]  ;;  %v40_v20 = vld [vmem:[%s2808_s0 + $0x90] sm:$0xff] }
   0x8   :  { %v41_v21 = vld [vmem:[%s2808_s0 + $0x98] sm:$0xff]  ;;  %v42_v22 = vld [vmem:[%s2808_s0 + $0xa0] sm:$0xff]  ;;  %v43_v23 = vld [vmem:[%s2808_s0 + $0xa8] sm:$0xff] }
   0x9   :  { %1605 = vmatmul.mubr.msk.f32.gmra.mxu0 %vm94_vm1, %v25_v5  ;;  %v44_v24 = vld [vmem:[%s2808_s0 + $0xb0] sm:$0xff]  ;;  %v45_v25 = vld [vmem:[%s2808_s0 + $0xb8] sm:$0xff]  ;;  %v46_v26 = vld [vmem:[%s2808_s0 + $0xc0] sm:$0xff] }
   0xa   :  { %1703 = vmatmul.mubr.msk.f32.gmra.mxu1 %vm94_vm1, %v25_v5  ;;  %1607 = vmatprep.mubr.msk.f32.mxu0 %vm94_vm1, %v26_v6  ;;  %v47_v27 = vld [vmem:[%s2808_s0 + $0xc8] sm:$0xff]  ;;  %v48_v28 = vld [vmem:[%s2808_s0 + $0xd0] sm:$0xff]  ;;  %v49_v29 = vld [vmem:[%s2808_s0 + $0xd8] sm:$0xff] }
   0xb   :  { %1705 = vmatprep.mubr.msk.f32.mxu1 %vm94_vm1, %v26_v6  ;;  %v50_v30 = vld [vmem:[%s2808_s0 + $0xe0] sm:$0xff]  ;;  %v51_v31 = vld [vmem:[%s2808_s0 + $0xe8] sm:$0xff]  ;;  %v52_v32 = vld [vmem:[%s2808_s0 + $0xf0] sm:$0xff] }
   0xc   :  { %v53_v33 = vld [vmem:[%s2808_s0 + $0xf8] sm:$0xff]  ;;  %v54_v34 = vld [vmem:[%s2808_s0 + $0x100] sm:$0xff]  ;;  %v55_v35 = vld [vmem:[%s2808_s0 + $0x108] sm:$0xff] }
   0xd   :  { %1608 = vmatmul.mubr.msk.f32.gmra.mxu0 %vm94_vm1, %v27_v7  ;;  %v56_v36 = vld [vmem:[%s2808_s0 + $0x110] sm:$0xff]  ;;  %v57_v37 = vld [vmem:[%s2808_s0 + $0x118] sm:$0xff]  ;;  %v58_v38 = vld [vmem:[%s2808_s0 + $0x120] sm:$0xff] }
   0xe   :  { %1706 = vmatmul.mubr.msk.f32.gmra.mxu1 %vm94_vm1, %v27_v7  ;;  %1610 = vmatprep.mubr.msk.f32.mxu0 %vm94_vm1, %v28_v8  ;;  %v59_v39 = vld [vmem:[%s2808_s0 + $0x128] sm:$0xff]  ;;  %v60_v40 = vld [vmem:[%s2808_s0 + $0x130] sm:$0xff]  ;;  %v61_v41 = vld [vmem:[%s2808_s0 + $0x138] sm:$0xff] }
   0xf   :  { %1708 = vmatprep.mubr.msk.f32.mxu1 %vm94_vm1, %v28_v8  ;;  %v62_v42 = vld [vmem:[%s2808_s0 + $0x140] sm:$0xff]  ;;  %v63_v43 = vld [vmem:[%s2808_s0 + $0x148] sm:$0xff]  ;;  %v64_v44 = vld [vmem:[%s2808_s0 + $0x150] sm:$0xff] }
  0x10   :  { %v65_v45 = vld [vmem:[%s2808_s0 + $0x158] sm:$0xff]  ;;  %v66_v46 = vld [vmem:[%s2808_s0 + $0x160] sm:$0xff]  ;;  %v67_v47 = vld [vmem:[%s2808_s0 + $0x168] sm:$0xff] }
  0x11   :  { %1611 = vmatmul.mubr.msk.f32.gmra.mxu0 %vm94_vm1, %v29_v9  ;;  %v68_v48 = vld [vmem:[%s2808_s0 + $0x170] sm:$0xff]  ;;  %v69_v49 = vld [vmem:[%s2808_s0 + $0x178] sm:$0xff]  ;;  %v70_v50 = vld [vmem:[%s2808_s0 + $0x180] sm:$0xff] }
  0x12   :  { %1709 = vmatmul.mubr.msk.f32.gmra.mxu1 %vm94_vm1, %v29_v9  ;;  %1613 = vmatprep.mubr.msk.f32.mxu0 %vm94_vm1, %v30_v10  ;;  %v71_v51 = vld [vmem:[%s2808_s0 + $0x188] sm:$0xff]  ;;  %v72_v52 = vld [vmem:[%s2808_s0 + $0x190] sm:$0xff]  ;;  %v73_v53 = vld [vmem:[%s2808_s0 + $0x198] sm:$0xff] }
  0x13   :  { %1711 = vmatprep.mubr.msk.f32.mxu1 %vm94_vm1, %v30_v10  ;;  %v74_v54 = vld [vmem:[%s2808_s0 + $0x1a0] sm:$0xff]  ;;  %v75_v55 = vld [vmem:[%s2808_s0 + $0x1a8] sm:$0xff]  ;;  %v76_v56 = vld [vmem:[%s2808_s0 + $0x1b0] sm:$0xff] }
  0x14   :  { %v77_v57 = vld [vmem:[%s2808_s0 + $0x1b8] sm:$0xff]  ;;  %v78_v58 = vld [vmem:[%s2808_s0 + $0x1c0] sm:$0xff]  ;;  %v79_v59 = vld [vmem:[%s2808_s0 + $0x1c8] sm:$0xff] }
  0x15   :  { %1614 = vmatmul.mubr.msk.f32.gmra.mxu0 %vm94_vm1, %v31_v11  ;;  %v80_v60 = vld [vmem:[%s2808_s0 + $0x1d0] sm:$0xff]  ;;  %v81_v61 = vld [vmem:[%s2808_s0 + $0x1d8] sm:$0xff]  ;;  %v82_v62 = vld [vmem:[%s2808_s0 + $0x1e0] sm:$0xff] }
  0x16   :  { %1712 = vmatmul.mubr.msk.f32.gmra.mxu1 %vm94_vm1, %v31_v11  ;;  %1616 = vmatprep.mubr.msk.f32.mxu0 %vm94_vm1, %v32_v12  ;;  %v83_v63 = vld [vmem:[%s2808_s0 + $0x1e8] sm:$0xff]  ;;  %v84_v0 = vld [vmem:[%s2808_s0 + $0x1f0] sm:$0xff]  ;;  %v85_v1 = vld [vmem:[%s2808_s0 + $0x1f8] sm:$0xff] }
  0x17   :  { %1714 = vmatprep.mubr.msk.f32.mxu1 %vm94_vm1, %v32_v12  ;;  %v2159_v2 = vld [vmem:[%s2809_s2] ss:$0 sm:$0xff] }
  0x18   :  { %v2164_v3 = vld [vmem:[%s2810_s4] ss:$0 sm:$0xff] }
  0x19   :  { %1617 = vmatmul.mubr.msk.f32.gmra.mxu0 %vm94_vm1, %v33_v13 }
  0x1a   :  { %1715 = vmatmul.mubr.msk.f32.gmra.mxu1 %vm94_vm1, %v33_v13  ;;  %1619 = vmatprep.mubr.msk.f32.mxu0 %vm94_vm1, %v34_v14 }
  0x1b   :  { %1717 = vmatprep.mubr.msk.f32.mxu1 %vm94_vm1, %v34_v14 }
  0x1d   :  { %1620 = vmatmul.mubr.msk.f32.gmra.mxu0 %vm94_vm1, %v35_v15 }
  0x1e   :  { %1718 = vmatmul.mubr.msk.f32.gmra.mxu1 %vm94_vm1, %v35_v15  ;;  %1622 = vmatprep.mubr.msk.f32.mxu0 %vm94_vm1, %v36_v16 }
  0x1f   :  { %1720 = vmatprep.mubr.msk.f32.mxu1 %vm94_vm1, %v36_v16 }
  0x21   :  { %1623 = vmatmul.mubr.msk.f32.gmra.mxu0 %vm94_vm1, %v37_v17 }
  0x22   :  { %1721 = vmatmul.mubr.msk.f32.gmra.mxu1 %vm94_vm1, %v37_v17  ;;  %1625 = vmatprep.mubr.msk.f32.mxu0 %vm94_vm1, %v38_v18 }
  0x23   :  { %1723 = vmatprep.mubr.msk.f32.mxu1 %vm94_vm1, %v38_v18 }
  0x25   :  { %1626 = vmatmul.mubr.msk.f32.gmra.mxu0 %vm94_vm1, %v39_v19 }
  0x26   :  { %1724 = vmatmul.mubr.msk.f32.gmra.mxu1 %vm94_vm1, %v39_v19  ;;  %1628 = vmatprep.mubr.msk.f32.mxu0 %vm94_vm1, %v40_v20 }
  0x27   :  { %1726 = vmatprep.mubr.msk.f32.mxu1 %vm94_vm1, %v40_v20 }
  0x29   :  { %1629 = vmatmul.mubr.msk.f32.gmra.mxu0 %vm94_vm1, %v41_v21 }
  0x2a   :  { %1727 = vmatmul.mubr.msk.f32.gmra.mxu1 %vm94_vm1, %v41_v21  ;;  %1631 = vmatprep.mubr.msk.f32.mxu0 %vm94_vm1, %v42_v22 }
  0x2b   :  { %1729 = vmatprep.mubr.msk.f32.mxu1 %vm94_vm1, %v42_v22 }
  0x2d   :  { %1632 = vmatmul.mubr.msk.f32.gmra.mxu0 %vm94_vm1, %v43_v23 }
  0x2e   :  { %1730 = vmatmul.mubr.msk.f32.gmra.mxu1 %vm94_vm1, %v43_v23  ;;  %1634 = vmatprep.mubr.msk.f32.mxu0 %vm94_vm1, %v44_v24 }
  0x2f   :  { %1732 = vmatprep.mubr.msk.f32.mxu1 %vm94_vm1, %v44_v24 }
  0x31   :  { %1635 = vmatmul.mubr.msk.f32.gmra.mxu0 %vm94_vm1, %v45_v25 }
  0x32   :  { %1733 = vmatmul.mubr.msk.f32.gmra.mxu1 %vm94_vm1, %v45_v25  ;;  %1637 = vmatprep.mubr.msk.f32.mxu0 %vm94_vm1, %v46_v26 }
  0x33   :  { %1735 = vmatprep.mubr.msk.f32.mxu1 %vm94_vm1, %v46_v26 }
  0x35   :  { %1638 = vmatmul.mubr.msk.f32.gmra.mxu0 %vm94_vm1, %v47_v27 }
  0x36   :  { %1736 = vmatmul.mubr.msk.f32.gmra.mxu1 %vm94_vm1, %v47_v27  ;;  %1640 = vmatprep.mubr.msk.f32.mxu0 %vm94_vm1, %v48_v28 }
  0x37   :  { %1738 = vmatprep.mubr.msk.f32.mxu1 %vm94_vm1, %v48_v28 }
  0x39   :  { %1641 = vmatmul.mubr.msk.f32.gmra.mxu0 %vm94_vm1, %v49_v29 }
  0x3a   :  { %1739 = vmatmul.mubr.msk.f32.gmra.mxu1 %vm94_vm1, %v49_v29  ;;  %1643 = vmatprep.mubr.msk.f32.mxu0 %vm94_vm1, %v50_v30 }
  0x3b   :  { %1741 = vmatprep.mubr.msk.f32.mxu1 %vm94_vm1, %v50_v30 }
  0x3d   :  { %1644 = vmatmul.mubr.msk.f32.gmra.mxu0 %vm94_vm1, %v51_v31 }
  0x3e   :  { %1742 = vmatmul.mubr.msk.f32.gmra.mxu1 %vm94_vm1, %v51_v31  ;;  %1646 = vmatprep.mubr.msk.f32.mxu0 %vm94_vm1, %v52_v32 }
  0x3f   :  { %1744 = vmatprep.mubr.msk.f32.mxu1 %vm94_vm1, %v52_v32 }
  0x41   :  { %1647 = vmatmul.mubr.msk.f32.gmra.mxu0 %vm94_vm1, %v53_v33 }
  0x42   :  { %1745 = vmatmul.mubr.msk.f32.gmra.mxu1 %vm94_vm1, %v53_v33  ;;  %1649 = vmatprep.mubr.msk.f32.mxu0 %vm94_vm1, %v54_v34 }
  0x43   :  { %1747 = vmatprep.mubr.msk.f32.mxu1 %vm94_vm1, %v54_v34 }
  0x45   :  { %1650 = vmatmul.mubr.msk.f32.gmra.mxu0 %vm94_vm1, %v55_v35 }
  0x46   :  { %1748 = vmatmul.mubr.msk.f32.gmra.mxu1 %vm94_vm1, %v55_v35  ;;  %1652 = vmatprep.mubr.msk.f32.mxu0 %vm94_vm1, %v56_v36 }
  0x47   :  { %1750 = vmatprep.mubr.msk.f32.mxu1 %vm94_vm1, %v56_v36 }
  0x49   :  { %1653 = vmatmul.mubr.msk.f32.gmra.mxu0 %vm94_vm1, %v57_v37 }
  0x4a   :  { %1751 = vmatmul.mubr.msk.f32.gmra.mxu1 %vm94_vm1, %v57_v37  ;;  %1655 = vmatprep.mubr.msk.f32.mxu0 %vm94_vm1, %v58_v38 }
  0x4b   :  { %1753 = vmatprep.mubr.msk.f32.mxu1 %vm94_vm1, %v58_v38 }
  0x4d   :  { %1656 = vmatmul.mubr.msk.f32.gmra.mxu0 %vm94_vm1, %v59_v39 }
  0x4e   :  { %1754 = vmatmul.mubr.msk.f32.gmra.mxu1 %vm94_vm1, %v59_v39  ;;  %1658 = vmatprep.mubr.msk.f32.mxu0 %vm94_vm1, %v60_v40 }
  0x4f   :  { %1756 = vmatprep.mubr.msk.f32.mxu1 %vm94_vm1, %v60_v40 }
  0x51   :  { %1659 = vmatmul.mubr.msk.f32.gmra.mxu0 %vm94_vm1, %v61_v41 }
  0x52   :  { %1757 = vmatmul.mubr.msk.f32.gmra.mxu1 %vm94_vm1, %v61_v41  ;;  %1661 = vmatprep.mubr.msk.f32.mxu0 %vm94_vm1, %v62_v42 }
  0x53   :  { %1759 = vmatprep.mubr.msk.f32.mxu1 %vm94_vm1, %v62_v42 }
  0x55   :  { %1662 = vmatmul.mubr.msk.f32.gmra.mxu0 %vm94_vm1, %v63_v43 }
  0x56   :  { %1760 = vmatmul.mubr.msk.f32.gmra.mxu1 %vm94_vm1, %v63_v43  ;;  %1664 = vmatprep.mubr.msk.f32.mxu0 %vm94_vm1, %v64_v44 }
  0x57   :  { %1762 = vmatprep.mubr.msk.f32.mxu1 %vm94_vm1, %v64_v44 }
  0x59   :  { %1665 = vmatmul.mubr.msk.f32.gmra.mxu0 %vm94_vm1, %v65_v45 }
  0x5a   :  { %1763 = vmatmul.mubr.msk.f32.gmra.mxu1 %vm94_vm1, %v65_v45  ;;  %1667 = vmatprep.mubr.msk.f32.mxu0 %vm94_vm1, %v66_v46 }
  0x5b   :  { %1765 = vmatprep.mubr.msk.f32.mxu1 %vm94_vm1, %v66_v46 }
  0x5d   :  { %1668 = vmatmul.mubr.msk.f32.gmra.mxu0 %vm94_vm1, %v67_v47 }
  0x5e   :  { %1766 = vmatmul.mubr.msk.f32.gmra.mxu1 %vm94_vm1, %v67_v47  ;;  %1670 = vmatprep.mubr.msk.f32.mxu0 %vm94_vm1, %v68_v48 }
  0x5f   :  { %1768 = vmatprep.mubr.msk.f32.mxu1 %vm94_vm1, %v68_v48 }
  0x61   :  { %1671 = vmatmul.mubr.msk.f32.gmra.mxu0 %vm94_vm1, %v69_v49 }
  0x62   :  { %1769 = vmatmul.mubr.msk.f32.gmra.mxu1 %vm94_vm1, %v69_v49  ;;  %1673 = vmatprep.mubr.msk.f32.mxu0 %vm94_vm1, %v70_v50 }
  0x63   :  { %1771 = vmatprep.mubr.msk.f32.mxu1 %vm94_vm1, %v70_v50 }
  0x65   :  { %1674 = vmatmul.mubr.msk.f32.gmra.mxu0 %vm94_vm1, %v71_v51 }
  0x66   :  { %1772 = vmatmul.mubr.msk.f32.gmra.mxu1 %vm94_vm1, %v71_v51  ;;  %1676 = vmatprep.mubr.msk.f32.mxu0 %vm94_vm1, %v72_v52 }
  0x67   :  { %1774 = vmatprep.mubr.msk.f32.mxu1 %vm94_vm1, %v72_v52 }
  0x69   :  { %1677 = vmatmul.mubr.msk.f32.gmra.mxu0 %vm94_vm1, %v73_v53 }
  0x6a   :  { %1775 = vmatmul.mubr.msk.f32.gmra.mxu1 %vm94_vm1, %v73_v53  ;;  %1679 = vmatprep.mubr.msk.f32.mxu0 %vm94_vm1, %v74_v54 }
  0x6b   :  { %1777 = vmatprep.mubr.msk.f32.mxu1 %vm94_vm1, %v74_v54 }
  0x6d   :  { %1680 = vmatmul.mubr.msk.f32.gmra.mxu0 %vm94_vm1, %v75_v55 }
  0x6e   :  { %1778 = vmatmul.mubr.msk.f32.gmra.mxu1 %vm94_vm1, %v75_v55  ;;  %1682 = vmatprep.mubr.msk.f32.mxu0 %vm94_vm1, %v76_v56 }
  0x6f   :  { %1780 = vmatprep.mubr.msk.f32.mxu1 %vm94_vm1, %v76_v56 }
  0x71   :  { %1683 = vmatmul.mubr.msk.f32.gmra.mxu0 %vm94_vm1, %v77_v57 }
  0x72   :  { %1781 = vmatmul.mubr.msk.f32.gmra.mxu1 %vm94_vm1, %v77_v57  ;;  %1685 = vmatprep.mubr.msk.f32.mxu0 %vm94_vm1, %v78_v58 }
  0x73   :  { %1783 = vmatprep.mubr.msk.f32.mxu1 %vm94_vm1, %v78_v58 }
  0x75   :  { %1686 = vmatmul.mubr.msk.f32.gmra.mxu0 %vm94_vm1, %v79_v59 }
  0x76   :  { %1784 = vmatmul.mubr.msk.f32.gmra.mxu1 %vm94_vm1, %v79_v59  ;;  %1688 = vmatprep.mubr.msk.f32.mxu0 %vm94_vm1, %v80_v60 }
  0x77   :  { %1786 = vmatprep.mubr.msk.f32.mxu1 %vm94_vm1, %v80_v60 }
  0x79   :  { %1689 = vmatmul.mubr.msk.f32.gmra.mxu0 %vm94_vm1, %v81_v61 }
  0x7a   :  { %1787 = vmatmul.mubr.msk.f32.gmra.mxu1 %vm94_vm1, %v81_v61  ;;  %1691 = vmatprep.mubr.msk.f32.mxu0 %vm94_vm1, %v82_v62 }
  0x7b   :  { %1789 = vmatprep.mubr.msk.f32.mxu1 %vm94_vm1, %v82_v62 }
  0x7d   :  { %1692 = vmatmul.mubr.msk.f32.gmra.mxu0 %vm94_vm1, %v83_v63 }
  0x7e   :  { %1790 = vmatmul.mubr.msk.f32.gmra.mxu1 %vm94_vm1, %v83_v63  ;;  %1694 = vmatprep.mubr.msk.f32.mxu0 %vm94_vm1, %v84_v0 }
  0x7f   :  { %1792 = vmatprep.mubr.msk.f32.mxu1 %vm94_vm1, %v84_v0 }
  0x81   :  { %1695 = vmatmul.mubr.msk.f32.gmra.mxu0 %vm94_vm1, %v85_v1 }
  0x82   :  { %1793 = vmatmul.mubr.msk.f32.gmra.mxu1 %vm94_vm1, %v85_v1 }
  0xc5   :  { %v1603_v4 = vpop.f32.mrf.mxu0 }
  0xc6   :  { %v1701_v5 = vpop.f32.mrf.mxu1  ;;  %v363_v6 = vadd.f32 %v1603_v4, %v2159_v2 }
  0xc7   :  { %v759_v7 = vadd.f32 %v1701_v5, %v2164_v3  ;;  %v357_v8 = vpop.f32.mrf.mxu0 }
  0xc8   :  { %v753_v9 = vpop.f32.mrf.mxu1  ;;  %v1073_v10 = vmax.f32 %v363_v6, 0.0  ;;  %v358_v12 = vadd.f32 %v2159_v2, %v357_v8 }
  0xc9   :  { %v1202_v11 = vmax.f32 %v759_v7, 0.0  ;;  %v754_v13 = vadd.f32 %v2164_v3, %v753_v9  ;;  %v1606_v14 = vpop.f32.mrf.mxu0 }
  0xca   :  { %v1704_v15 = vpop.f32.mrf.mxu1  ;;  %1138 = vst.msk [vmem:[%s2811_s5 + $0x8] sm:$0xff] %vm1136_vm2, %v1073_v10  ;;  %v1072_v16 = vmax.f32 %v358_v12, 0.0  ;;  %v373_v18 = vadd.f32 %v1606_v14, %v2159_v2 }
  0xcb   :  { %1266 = vst.msk [vmem:[%s2812_s6 + $0x8] sm:$0xff] %vm1136_vm2, %v1202_v11  ;;  %v1201_v17 = vmax.f32 %v754_v13, 0.0  ;;  %v769_v19 = vadd.f32 %v1704_v15, %v2164_v3  ;;  %v367_v20 = vpop.f32.mrf.mxu0 }
  0xcc   :  { %v763_v21 = vpop.f32.mrf.mxu1  ;;  %1137 = vst.msk [vmem:[%s2811_s5] sm:$0xff] %vm1136_vm2, %v1072_v16  ;;  %v1075_v22 = vmax.f32 %v373_v18, 0.0  ;;  %v368_v24 = vadd.f32 %v2159_v2, %v367_v20 }
  0xcd   :  { %1265 = vst.msk [vmem:[%s2812_s6] sm:$0xff] %vm1136_vm2, %v1201_v17  ;;  %v1204_v23 = vmax.f32 %v769_v19, 0.0  ;;  %v764_v25 = vadd.f32 %v2164_v3, %v763_v21  ;;  %v1609_v26 = vpop.f32.mrf.mxu0 }
  0xce   :  { %v1707_v27 = vpop.f32.mrf.mxu1  ;;  %1140 = vst.msk [vmem:[%s2811_s5 + $0x18] sm:$0xff] %vm1136_vm2, %v1075_v22  ;;  %v1074_v28 = vmax.f32 %v368_v24, 0.0  ;;  %v383_v30 = vadd.f32 %v1609_v26, %v2159_v2 }
  0xcf   :  { %1268 = vst.msk [vmem:[%s2812_s6 + $0x18] sm:$0xff] %vm1136_vm2, %v1204_v23  ;;  %v1203_v29 = vmax.f32 %v764_v25, 0.0  ;;  %v779_v31 = vadd.f32 %v1707_v27, %v2164_v3  ;;  %v377_v32 = vpop.f32.mrf.mxu0 }
  0xd0   :  { %v773_v33 = vpop.f32.mrf.mxu1  ;;  %1139 = vst.msk [vmem:[%s2811_s5 + $0x10] sm:$0xff] %vm1136_vm2, %v1074_v28  ;;  %v1077_v34 = vmax.f32 %v383_v30, 0.0  ;;  %v378_v36 = vadd.f32 %v2159_v2, %v377_v32 }
  0xd1   :  { %1267 = vst.msk [vmem:[%s2812_s6 + $0x10] sm:$0xff] %vm1136_vm2, %v1203_v29  ;;  %v1206_v35 = vmax.f32 %v779_v31, 0.0  ;;  %v774_v37 = vadd.f32 %v2164_v3, %v773_v33  ;;  %v1612_v38 = vpop.f32.mrf.mxu0 }
  0xd2   :  { %v1710_v39 = vpop.f32.mrf.mxu1  ;;  %1142 = vst.msk [vmem:[%s2811_s5 + $0x28] sm:$0xff] %vm1136_vm2, %v1077_v34  ;;  %v1076_v40 = vmax.f32 %v378_v36, 0.0  ;;  %v393_v42 = vadd.f32 %v1612_v38, %v2159_v2 }
  0xd3   :  { %1270 = vst.msk [vmem:[%s2812_s6 + $0x28] sm:$0xff] %vm1136_vm2, %v1206_v35  ;;  %v1205_v41 = vmax.f32 %v774_v37, 0.0  ;;  %v789_v43 = vadd.f32 %v1710_v39, %v2164_v3  ;;  %v387_v44 = vpop.f32.mrf.mxu0 }
  0xd4   :  { %v783_v45 = vpop.f32.mrf.mxu1  ;;  %1141 = vst.msk [vmem:[%s2811_s5 + $0x20] sm:$0xff] %vm1136_vm2, %v1076_v40  ;;  %v1079_v46 = vmax.f32 %v393_v42, 0.0  ;;  %v388_v48 = vadd.f32 %v2159_v2, %v387_v44 }
  0xd5   :  { %1269 = vst.msk [vmem:[%s2812_s6 + $0x20] sm:$0xff] %vm1136_vm2, %v1205_v41  ;;  %v1208_v47 = vmax.f32 %v789_v43, 0.0  ;;  %v784_v49 = vadd.f32 %v2164_v3, %v783_v45  ;;  %v1615_v50 = vpop.f32.mrf.mxu0 }
  0xd6   :  { %v1713_v51 = vpop.f32.mrf.mxu1  ;;  %1144 = vst.msk [vmem:[%s2811_s5 + $0x38] sm:$0xff] %vm1136_vm2, %v1079_v46  ;;  %v1078_v52 = vmax.f32 %v388_v48, 0.0  ;;  %v403_v54 = vadd.f32 %v1615_v50, %v2159_v2 }
  0xd7   :  { %1272 = vst.msk [vmem:[%s2812_s6 + $0x38] sm:$0xff] %vm1136_vm2, %v1208_v47  ;;  %v1207_v53 = vmax.f32 %v784_v49, 0.0  ;;  %v799_v55 = vadd.f32 %v1713_v51, %v2164_v3  ;;  %v397_v56 = vpop.f32.mrf.mxu0 }
  0xd8   :  { %v793_v57 = vpop.f32.mrf.mxu1  ;;  %1143 = vst.msk [vmem:[%s2811_s5 + $0x30] sm:$0xff] %vm1136_vm2, %v1078_v52  ;;  %v1081_v58 = vmax.f32 %v403_v54, 0.0  ;;  %v398_v60 = vadd.f32 %v2159_v2, %v397_v56 }
  0xd9   :  { %1271 = vst.msk [vmem:[%s2812_s6 + $0x30] sm:$0xff] %vm1136_vm2, %v1207_v53  ;;  %v1210_v59 = vmax.f32 %v799_v55, 0.0  ;;  %v794_v61 = vadd.f32 %v2164_v3, %v793_v57  ;;  %v1618_v62 = vpop.f32.mrf.mxu0 }
  0xda   :  { %v1716_v63 = vpop.f32.mrf.mxu1  ;;  %1146 = vst.msk [vmem:[%s2811_s5 + $0x48] sm:$0xff] %vm1136_vm2, %v1081_v58  ;;  %v1080_v0 = vmax.f32 %v398_v60, 0.0  ;;  %v413_v4 = vadd.f32 %v1618_v62, %v2159_v2 }
  0xdb   :  { %1274 = vst.msk [vmem:[%s2812_s6 + $0x48] sm:$0xff] %vm1136_vm2, %v1210_v59  ;;  %v1209_v1 = vmax.f32 %v794_v61, 0.0  ;;  %v809_v5 = vadd.f32 %v1716_v63, %v2164_v3  ;;  %v407_v6 = vpop.f32.mrf.mxu0 }
  0xdc   :  { %v803_v7 = vpop.f32.mrf.mxu1  ;;  %1145 = vst.msk [vmem:[%s2811_s5 + $0x40] sm:$0xff] %vm1136_vm2, %v1080_v0  ;;  %v1083_v8 = vmax.f32 %v413_v4, 0.0  ;;  %v408_v10 = vadd.f32 %v2159_v2, %v407_v6 }
  0xdd   :  { %1273 = vst.msk [vmem:[%s2812_s6 + $0x40] sm:$0xff] %vm1136_vm2, %v1209_v1  ;;  %v1212_v9 = vmax.f32 %v809_v5, 0.0  ;;  %v804_v11 = vadd.f32 %v2164_v3, %v803_v7  ;;  %v1621_v12 = vpop.f32.mrf.mxu0 }
  0xde   :  { %v1719_v13 = vpop.f32.mrf.mxu1  ;;  %1148 = vst.msk [vmem:[%s2811_s5 + $0x58] sm:$0xff] %vm1136_vm2, %v1083_v8  ;;  %v1082_v14 = vmax.f32 %v408_v10, 0.0  ;;  %v423_v16 = vadd.f32 %v1621_v12, %v2159_v2 }
  0xdf   :  { %1276 = vst.msk [vmem:[%s2812_s6 + $0x58] sm:$0xff] %vm1136_vm2, %v1212_v9  ;;  %v1211_v15 = vmax.f32 %v804_v11, 0.0  ;;  %v819_v17 = vadd.f32 %v1719_v13, %v2164_v3  ;;  %v417_v18 = vpop.f32.mrf.mxu0 }
  0xe0   :  { %v813_v19 = vpop.f32.mrf.mxu1  ;;  %1147 = vst.msk [vmem:[%s2811_s5 + $0x50] sm:$0xff] %vm1136_vm2, %v1082_v14  ;;  %v1085_v20 = vmax.f32 %v423_v16, 0.0  ;;  %v418_v22 = vadd.f32 %v2159_v2, %v417_v18 }
  0xe1   :  { %1275 = vst.msk [vmem:[%s2812_s6 + $0x50] sm:$0xff] %vm1136_vm2, %v1211_v15  ;;  %v1214_v21 = vmax.f32 %v819_v17, 0.0  ;;  %v814_v23 = vadd.f32 %v2164_v3, %v813_v19  ;;  %v1624_v24 = vpop.f32.mrf.mxu0 }
  0xe2   :  { %v1722_v25 = vpop.f32.mrf.mxu1  ;;  %1150 = vst.msk [vmem:[%s2811_s5 + $0x68] sm:$0xff] %vm1136_vm2, %v1085_v20  ;;  %v1084_v26 = vmax.f32 %v418_v22, 0.0  ;;  %v433_v28 = vadd.f32 %v1624_v24, %v2159_v2 }
  0xe3   :  { %1278 = vst.msk [vmem:[%s2812_s6 + $0x68] sm:$0xff] %vm1136_vm2, %v1214_v21  ;;  %v1213_v27 = vmax.f32 %v814_v23, 0.0  ;;  %v829_v29 = vadd.f32 %v1722_v25, %v2164_v3  ;;  %v427_v30 = vpop.f32.mrf.mxu0 }
  0xe4   :  { %v823_v31 = vpop.f32.mrf.mxu1  ;;  %1149 = vst.msk [vmem:[%s2811_s5 + $0x60] sm:$0xff] %vm1136_vm2, %v1084_v26  ;;  %v1087_v32 = vmax.f32 %v433_v28, 0.0  ;;  %v428_v34 = vadd.f32 %v2159_v2, %v427_v30 }
  0xe5   :  { %1277 = vst.msk [vmem:[%s2812_s6 + $0x60] sm:$0xff] %vm1136_vm2, %v1213_v27  ;;  %v1216_v33 = vmax.f32 %v829_v29, 0.0  ;;  %v824_v35 = vadd.f32 %v2164_v3, %v823_v31  ;;  %v1627_v36 = vpop.f32.mrf.mxu0 }
  0xe6   :  { %v1725_v37 = vpop.f32.mrf.mxu1  ;;  %1152 = vst.msk [vmem:[%s2811_s5 + $0x78] sm:$0xff] %vm1136_vm2, %v1087_v32  ;;  %v1086_v38 = vmax.f32 %v428_v34, 0.0  ;;  %v443_v40 = vadd.f32 %v1627_v36, %v2159_v2 }
  0xe7   :  { %1280 = vst.msk [vmem:[%s2812_s6 + $0x78] sm:$0xff] %vm1136_vm2, %v1216_v33  ;;  %v1215_v39 = vmax.f32 %v824_v35, 0.0  ;;  %v839_v41 = vadd.f32 %v1725_v37, %v2164_v3  ;;  %v437_v42 = vpop.f32.mrf.mxu0 }
  0xe8   :  { %v833_v43 = vpop.f32.mrf.mxu1  ;;  %1151 = vst.msk [vmem:[%s2811_s5 + $0x70] sm:$0xff] %vm1136_vm2, %v1086_v38  ;;  %v1089_v44 = vmax.f32 %v443_v40, 0.0  ;;  %v438_v46 = vadd.f32 %v2159_v2, %v437_v42 }
  0xe9   :  { %1279 = vst.msk [vmem:[%s2812_s6 + $0x70] sm:$0xff] %vm1136_vm2, %v1215_v39  ;;  %v1218_v45 = vmax.f32 %v839_v41, 0.0  ;;  %v834_v47 = vadd.f32 %v2164_v3, %v833_v43  ;;  %v1630_v48 = vpop.f32.mrf.mxu0 }
  0xea   :  { %v1728_v49 = vpop.f32.mrf.mxu1  ;;  %1154 = vst.msk [vmem:[%s2811_s5 + $0x88] sm:$0xff] %vm1136_vm2, %v1089_v44  ;;  %v1088_v50 = vmax.f32 %v438_v46, 0.0  ;;  %v453_v52 = vadd.f32 %v1630_v48, %v2159_v2 }
  0xeb   :  { %1282 = vst.msk [vmem:[%s2812_s6 + $0x88] sm:$0xff] %vm1136_vm2, %v1218_v45  ;;  %v1217_v51 = vmax.f32 %v834_v47, 0.0  ;;  %v849_v53 = vadd.f32 %v1728_v49, %v2164_v3  ;;  %v447_v54 = vpop.f32.mrf.mxu0 }
  0xec   :  { %v843_v55 = vpop.f32.mrf.mxu1  ;;  %1153 = vst.msk [vmem:[%s2811_s5 + $0x80] sm:$0xff] %vm1136_vm2, %v1088_v50  ;;  %v1091_v56 = vmax.f32 %v453_v52, 0.0  ;;  %v448_v58 = vadd.f32 %v2159_v2, %v447_v54 }
  0xed   :  { %1281 = vst.msk [vmem:[%s2812_s6 + $0x80] sm:$0xff] %vm1136_vm2, %v1217_v51  ;;  %v1220_v57 = vmax.f32 %v849_v53, 0.0  ;;  %v844_v59 = vadd.f32 %v2164_v3, %v843_v55  ;;  %v1633_v60 = vpop.f32.mrf.mxu0 }
  0xee   :  { %v1731_v61 = vpop.f32.mrf.mxu1  ;;  %1156 = vst.msk [vmem:[%s2811_s5 + $0x98] sm:$0xff] %vm1136_vm2, %v1091_v56  ;;  %v1090_v62 = vmax.f32 %v448_v58, 0.0  ;;  %v463_v0 = vadd.f32 %v1633_v60, %v2159_v2 }
  0xef   :  { %1284 = vst.msk [vmem:[%s2812_s6 + $0x98] sm:$0xff] %vm1136_vm2, %v1220_v57  ;;  %v1219_v63 = vmax.f32 %v844_v59, 0.0  ;;  %v859_v1 = vadd.f32 %v1731_v61, %v2164_v3  ;;  %v457_v4 = vpop.f32.mrf.mxu0 }
  0xf0   :  { %v853_v5 = vpop.f32.mrf.mxu1  ;;  %1155 = vst.msk [vmem:[%s2811_s5 + $0x90] sm:$0xff] %vm1136_vm2, %v1090_v62  ;;  %v1093_v6 = vmax.f32 %v463_v0, 0.0  ;;  %v458_v8 = vadd.f32 %v2159_v2, %v457_v4 }
  0xf1   :  { %1283 = vst.msk [vmem:[%s2812_s6 + $0x90] sm:$0xff] %vm1136_vm2, %v1219_v63  ;;  %v1222_v7 = vmax.f32 %v859_v1, 0.0  ;;  %v854_v9 = vadd.f32 %v2164_v3, %v853_v5  ;;  %v1636_v10 = vpop.f32.mrf.mxu0 }
  0xf2   :  { %v1734_v11 = vpop.f32.mrf.mxu1  ;;  %1158 = vst.msk [vmem:[%s2811_s5 + $0xa8] sm:$0xff] %vm1136_vm2, %v1093_v6  ;;  %v1092_v12 = vmax.f32 %v458_v8, 0.0  ;;  %v473_v14 = vadd.f32 %v1636_v10, %v2159_v2 }
  0xf3   :  { %1286 = vst.msk [vmem:[%s2812_s6 + $0xa8] sm:$0xff] %vm1136_vm2, %v1222_v7  ;;  %v1221_v13 = vmax.f32 %v854_v9, 0.0  ;;  %v869_v15 = vadd.f32 %v1734_v11, %v2164_v3  ;;  %v467_v16 = vpop.f32.mrf.mxu0 }
  0xf4   :  { %v863_v17 = vpop.f32.mrf.mxu1  ;;  %1157 = vst.msk [vmem:[%s2811_s5 + $0xa0] sm:$0xff] %vm1136_vm2, %v1092_v12  ;;  %v1095_v18 = vmax.f32 %v473_v14, 0.0  ;;  %v468_v20 = vadd.f32 %v2159_v2, %v467_v16 }
  0xf5   :  { %1285 = vst.msk [vmem:[%s2812_s6 + $0xa0] sm:$0xff] %vm1136_vm2, %v1221_v13  ;;  %v1224_v19 = vmax.f32 %v869_v15, 0.0  ;;  %v864_v21 = vadd.f32 %v2164_v3, %v863_v17  ;;  %v1639_v22 = vpop.f32.mrf.mxu0 }
  0xf6   :  { %v1737_v23 = vpop.f32.mrf.mxu1  ;;  %1160 = vst.msk [vmem:[%s2811_s5 + $0xb8] sm:$0xff] %vm1136_vm2, %v1095_v18  ;;  %v1094_v24 = vmax.f32 %v468_v20, 0.0  ;;  %v483_v26 = vadd.f32 %v1639_v22, %v2159_v2 }
  0xf7   :  { %1288 = vst.msk [vmem:[%s2812_s6 + $0xb8] sm:$0xff] %vm1136_vm2, %v1224_v19  ;;  %v1223_v25 = vmax.f32 %v864_v21, 0.0  ;;  %v879_v27 = vadd.f32 %v1737_v23, %v2164_v3  ;;  %v477_v28 = vpop.f32.mrf.mxu0 }
  0xf8   :  { %v873_v29 = vpop.f32.mrf.mxu1  ;;  %1159 = vst.msk [vmem:[%s2811_s5 + $0xb0] sm:$0xff] %vm1136_vm2, %v1094_v24  ;;  %v1097_v30 = vmax.f32 %v483_v26, 0.0  ;;  %v478_v32 = vadd.f32 %v2159_v2, %v477_v28 }
  0xf9   :  { %1287 = vst.msk [vmem:[%s2812_s6 + $0xb0] sm:$0xff] %vm1136_vm2, %v1223_v25  ;;  %v1226_v31 = vmax.f32 %v879_v27, 0.0  ;;  %v874_v33 = vadd.f32 %v2164_v3, %v873_v29  ;;  %v1642_v34 = vpop.f32.mrf.mxu0 }
  0xfa   :  { %v1740_v35 = vpop.f32.mrf.mxu1  ;;  %1162 = vst.msk [vmem:[%s2811_s5 + $0xc8] sm:$0xff] %vm1136_vm2, %v1097_v30  ;;  %v1096_v36 = vmax.f32 %v478_v32, 0.0  ;;  %v493_v38 = vadd.f32 %v1642_v34, %v2159_v2 }
  0xfb   :  { %1290 = vst.msk [vmem:[%s2812_s6 + $0xc8] sm:$0xff] %vm1136_vm2, %v1226_v31  ;;  %v1225_v37 = vmax.f32 %v874_v33, 0.0  ;;  %v889_v39 = vadd.f32 %v1740_v35, %v2164_v3  ;;  %v487_v40 = vpop.f32.mrf.mxu0 }
  0xfc   :  { %v883_v41 = vpop.f32.mrf.mxu1  ;;  %1161 = vst.msk [vmem:[%s2811_s5 + $0xc0] sm:$0xff] %vm1136_vm2, %v1096_v36  ;;  %v1099_v42 = vmax.f32 %v493_v38, 0.0  ;;  %v488_v44 = vadd.f32 %v2159_v2, %v487_v40 }
  0xfd   :  { %1289 = vst.msk [vmem:[%s2812_s6 + $0xc0] sm:$0xff] %vm1136_vm2, %v1225_v37  ;;  %v1228_v43 = vmax.f32 %v889_v39, 0.0  ;;  %v884_v45 = vadd.f32 %v2164_v3, %v883_v41  ;;  %v1645_v46 = vpop.f32.mrf.mxu0 }
  0xfe   :  { %v1743_v47 = vpop.f32.mrf.mxu1  ;;  %1164 = vst.msk [vmem:[%s2811_s5 + $0xd8] sm:$0xff] %vm1136_vm2, %v1099_v42  ;;  %v1098_v48 = vmax.f32 %v488_v44, 0.0  ;;  %v503_v50 = vadd.f32 %v1645_v46, %v2159_v2 }
  0xff   :  { %1292 = vst.msk [vmem:[%s2812_s6 + $0xd8] sm:$0xff] %vm1136_vm2, %v1228_v43  ;;  %v1227_v49 = vmax.f32 %v884_v45, 0.0  ;;  %v899_v51 = vadd.f32 %v1743_v47, %v2164_v3  ;;  %v497_v52 = vpop.f32.mrf.mxu0 }
 0x100   :  { %v893_v53 = vpop.f32.mrf.mxu1  ;;  %1163 = vst.msk [vmem:[%s2811_s5 + $0xd0] sm:$0xff] %vm1136_vm2, %v1098_v48  ;;  %v1101_v54 = vmax.f32 %v503_v50, 0.0  ;;  %v498_v56 = vadd.f32 %v2159_v2, %v497_v52 }
 0x101   :  { %1291 = vst.msk [vmem:[%s2812_s6 + $0xd0] sm:$0xff] %vm1136_vm2, %v1227_v49  ;;  %v1230_v55 = vmax.f32 %v899_v51, 0.0  ;;  %v894_v57 = vadd.f32 %v2164_v3, %v893_v53  ;;  %v1648_v58 = vpop.f32.mrf.mxu0 }
 0x102   :  { %v1746_v59 = vpop.f32.mrf.mxu1  ;;  %1166 = vst.msk [vmem:[%s2811_s5 + $0xe8] sm:$0xff] %vm1136_vm2, %v1101_v54  ;;  %v1100_v60 = vmax.f32 %v498_v56, 0.0  ;;  %v513_v62 = vadd.f32 %v1648_v58, %v2159_v2 }
 0x103   :  { %1294 = vst.msk [vmem:[%s2812_s6 + $0xe8] sm:$0xff] %vm1136_vm2, %v1230_v55  ;;  %v1229_v61 = vmax.f32 %v894_v57, 0.0  ;;  %v909_v63 = vadd.f32 %v1746_v59, %v2164_v3  ;;  %v507_v0 = vpop.f32.mrf.mxu0 }
 0x104   :  { %v903_v1 = vpop.f32.mrf.mxu1  ;;  %1165 = vst.msk [vmem:[%s2811_s5 + $0xe0] sm:$0xff] %vm1136_vm2, %v1100_v60  ;;  %v1103_v4 = vmax.f32 %v513_v62, 0.0  ;;  %v508_v6 = vadd.f32 %v2159_v2, %v507_v0 }
 0x105   :  { %1293 = vst.msk [vmem:[%s2812_s6 + $0xe0] sm:$0xff] %vm1136_vm2, %v1229_v61  ;;  %v1232_v5 = vmax.f32 %v909_v63, 0.0  ;;  %v904_v7 = vadd.f32 %v2164_v3, %v903_v1  ;;  %v1651_v8 = vpop.f32.mrf.mxu0 }
 0x106   :  { %v1749_v9 = vpop.f32.mrf.mxu1  ;;  %1168 = vst.msk [vmem:[%s2811_s5 + $0xf8] sm:$0xff] %vm1136_vm2, %v1103_v4  ;;  %v1102_v10 = vmax.f32 %v508_v6, 0.0  ;;  %v523_v12 = vadd.f32 %v1651_v8, %v2159_v2 }
 0x107   :  { %1296 = vst.msk [vmem:[%s2812_s6 + $0xf8] sm:$0xff] %vm1136_vm2, %v1232_v5  ;;  %v1231_v11 = vmax.f32 %v904_v7, 0.0  ;;  %v919_v13 = vadd.f32 %v1749_v9, %v2164_v3  ;;  %v517_v14 = vpop.f32.mrf.mxu0 }
 0x108   :  { %v913_v15 = vpop.f32.mrf.mxu1  ;;  %1167 = vst.msk [vmem:[%s2811_s5 + $0xf0] sm:$0xff] %vm1136_vm2, %v1102_v10  ;;  %v1105_v16 = vmax.f32 %v523_v12, 0.0  ;;  %v518_v18 = vadd.f32 %v2159_v2, %v517_v14 }
 0x109   :  { %1295 = vst.msk [vmem:[%s2812_s6 + $0xf0] sm:$0xff] %vm1136_vm2, %v1231_v11  ;;  %v1234_v17 = vmax.f32 %v919_v13, 0.0  ;;  %v914_v19 = vadd.f32 %v2164_v3, %v913_v15  ;;  %v1654_v20 = vpop.f32.mrf.mxu0 }
 0x10a   :  { %v1752_v21 = vpop.f32.mrf.mxu1  ;;  %1170 = vst.msk [vmem:[%s2811_s5 + $0x108] sm:$0xff] %vm1136_vm2, %v1105_v16  ;;  %v1104_v22 = vmax.f32 %v518_v18, 0.0  ;;  %v533_v24 = vadd.f32 %v1654_v20, %v2159_v2 }
 0x10b   :  { %1298 = vst.msk [vmem:[%s2812_s6 + $0x108] sm:$0xff] %vm1136_vm2, %v1234_v17  ;;  %v1233_v23 = vmax.f32 %v914_v19, 0.0  ;;  %v929_v25 = vadd.f32 %v1752_v21, %v2164_v3  ;;  %v527_v26 = vpop.f32.mrf.mxu0 }
 0x10c   :  { %v923_v27 = vpop.f32.mrf.mxu1  ;;  %1169 = vst.msk [vmem:[%s2811_s5 + $0x100] sm:$0xff] %vm1136_vm2, %v1104_v22  ;;  %v1107_v28 = vmax.f32 %v533_v24, 0.0  ;;  %v528_v30 = vadd.f32 %v2159_v2, %v527_v26 }
 0x10d   :  { %1297 = vst.msk [vmem:[%s2812_s6 + $0x100] sm:$0xff] %vm1136_vm2, %v1233_v23  ;;  %v1236_v29 = vmax.f32 %v929_v25, 0.0  ;;  %v924_v31 = vadd.f32 %v2164_v3, %v923_v27  ;;  %v1657_v32 = vpop.f32.mrf.mxu0 }
 0x10e   :  { %v1755_v33 = vpop.f32.mrf.mxu1  ;;  %1172 = vst.msk [vmem:[%s2811_s5 + $0x118] sm:$0xff] %vm1136_vm2, %v1107_v28  ;;  %v1106_v34 = vmax.f32 %v528_v30, 0.0  ;;  %v543_v36 = vadd.f32 %v1657_v32, %v2159_v2 }
 0x10f   :  { %1300 = vst.msk [vmem:[%s2812_s6 + $0x118] sm:$0xff] %vm1136_vm2, %v1236_v29  ;;  %v1235_v35 = vmax.f32 %v924_v31, 0.0  ;;  %v939_v37 = vadd.f32 %v1755_v33, %v2164_v3  ;;  %v537_v38 = vpop.f32.mrf.mxu0 }
 0x110   :  { %v933_v39 = vpop.f32.mrf.mxu1  ;;  %1171 = vst.msk [vmem:[%s2811_s5 + $0x110] sm:$0xff] %vm1136_vm2, %v1106_v34  ;;  %v1109_v40 = vmax.f32 %v543_v36, 0.0  ;;  %v538_v42 = vadd.f32 %v2159_v2, %v537_v38 }
 0x111   :  { %1299 = vst.msk [vmem:[%s2812_s6 + $0x110] sm:$0xff] %vm1136_vm2, %v1235_v35  ;;  %v1238_v41 = vmax.f32 %v939_v37, 0.0  ;;  %v934_v43 = vadd.f32 %v2164_v3, %v933_v39  ;;  %v1660_v44 = vpop.f32.mrf.mxu0 }
 0x112   :  { %v1758_v45 = vpop.f32.mrf.mxu1  ;;  %1174 = vst.msk [vmem:[%s2811_s5 + $0x128] sm:$0xff] %vm1136_vm2, %v1109_v40  ;;  %v1108_v46 = vmax.f32 %v538_v42, 0.0  ;;  %v553_v48 = vadd.f32 %v1660_v44, %v2159_v2 }
 0x113   :  { %1302 = vst.msk [vmem:[%s2812_s6 + $0x128] sm:$0xff] %vm1136_vm2, %v1238_v41  ;;  %v1237_v47 = vmax.f32 %v934_v43, 0.0  ;;  %v949_v49 = vadd.f32 %v1758_v45, %v2164_v3  ;;  %v547_v50 = vpop.f32.mrf.mxu0 }
 0x114   :  { %v943_v51 = vpop.f32.mrf.mxu1  ;;  %1173 = vst.msk [vmem:[%s2811_s5 + $0x120] sm:$0xff] %vm1136_vm2, %v1108_v46  ;;  %v1111_v52 = vmax.f32 %v553_v48, 0.0  ;;  %v548_v54 = vadd.f32 %v2159_v2, %v547_v50 }
 0x115   :  { %1301 = vst.msk [vmem:[%s2812_s6 + $0x120] sm:$0xff] %vm1136_vm2, %v1237_v47  ;;  %v1240_v53 = vmax.f32 %v949_v49, 0.0  ;;  %v944_v55 = vadd.f32 %v2164_v3, %v943_v51  ;;  %v1663_v56 = vpop.f32.mrf.mxu0 }
 0x116   :  { %v1761_v57 = vpop.f32.mrf.mxu1  ;;  %1176 = vst.msk [vmem:[%s2811_s5 + $0x138] sm:$0xff] %vm1136_vm2, %v1111_v52  ;;  %v1110_v58 = vmax.f32 %v548_v54, 0.0  ;;  %v563_v60 = vadd.f32 %v1663_v56, %v2159_v2 }
 0x117   :  { %1304 = vst.msk [vmem:[%s2812_s6 + $0x138] sm:$0xff] %vm1136_vm2, %v1240_v53  ;;  %v1239_v59 = vmax.f32 %v944_v55, 0.0  ;;  %v959_v61 = vadd.f32 %v1761_v57, %v2164_v3  ;;  %v557_v62 = vpop.f32.mrf.mxu0 }
 0x118   :  { %v953_v63 = vpop.f32.mrf.mxu1  ;;  %1175 = vst.msk [vmem:[%s2811_s5 + $0x130] sm:$0xff] %vm1136_vm2, %v1110_v58  ;;  %v1113_v0 = vmax.f32 %v563_v60, 0.0  ;;  %v558_v4 = vadd.f32 %v2159_v2, %v557_v62 }
 0x119   :  { %1303 = vst.msk [vmem:[%s2812_s6 + $0x130] sm:$0xff] %vm1136_vm2, %v1239_v59  ;;  %v1242_v1 = vmax.f32 %v959_v61, 0.0  ;;  %v954_v5 = vadd.f32 %v2164_v3, %v953_v63  ;;  %v1666_v6 = vpop.f32.mrf.mxu0 }
 0x11a   :  { %v1764_v7 = vpop.f32.mrf.mxu1  ;;  %1178 = vst.msk [vmem:[%s2811_s5 + $0x148] sm:$0xff] %vm1136_vm2, %v1113_v0  ;;  %v1112_v8 = vmax.f32 %v558_v4, 0.0  ;;  %v573_v10 = vadd.f32 %v1666_v6, %v2159_v2 }
 0x11b   :  { %1306 = vst.msk [vmem:[%s2812_s6 + $0x148] sm:$0xff] %vm1136_vm2, %v1242_v1  ;;  %v1241_v9 = vmax.f32 %v954_v5, 0.0  ;;  %v969_v11 = vadd.f32 %v1764_v7, %v2164_v3  ;;  %v567_v12 = vpop.f32.mrf.mxu0 }
 0x11c   :  { %v963_v13 = vpop.f32.mrf.mxu1  ;;  %1177 = vst.msk [vmem:[%s2811_s5 + $0x140] sm:$0xff] %vm1136_vm2, %v1112_v8  ;;  %v1115_v14 = vmax.f32 %v573_v10, 0.0  ;;  %v568_v16 = vadd.f32 %v2159_v2, %v567_v12 }
 0x11d   :  { %1305 = vst.msk [vmem:[%s2812_s6 + $0x140] sm:$0xff] %vm1136_vm2, %v1241_v9  ;;  %v1244_v15 = vmax.f32 %v969_v11, 0.0  ;;  %v964_v17 = vadd.f32 %v2164_v3, %v963_v13  ;;  %v1669_v18 = vpop.f32.mrf.mxu0 }
 0x11e   :  { %v1767_v19 = vpop.f32.mrf.mxu1  ;;  %1180 = vst.msk [vmem:[%s2811_s5 + $0x158] sm:$0xff] %vm1136_vm2, %v1115_v14  ;;  %v1114_v20 = vmax.f32 %v568_v16, 0.0  ;;  %v583_v22 = vadd.f32 %v1669_v18, %v2159_v2 }
 0x11f   :  { %1308 = vst.msk [vmem:[%s2812_s6 + $0x158] sm:$0xff] %vm1136_vm2, %v1244_v15  ;;  %v1243_v21 = vmax.f32 %v964_v17, 0.0  ;;  %v979_v23 = vadd.f32 %v1767_v19, %v2164_v3  ;;  %v577_v24 = vpop.f32.mrf.mxu0 }
 0x120   :  { %v973_v25 = vpop.f32.mrf.mxu1  ;;  %1179 = vst.msk [vmem:[%s2811_s5 + $0x150] sm:$0xff] %vm1136_vm2, %v1114_v20  ;;  %v1117_v26 = vmax.f32 %v583_v22, 0.0  ;;  %v578_v28 = vadd.f32 %v2159_v2, %v577_v24 }
 0x121   :  { %1307 = vst.msk [vmem:[%s2812_s6 + $0x150] sm:$0xff] %vm1136_vm2, %v1243_v21  ;;  %v1246_v27 = vmax.f32 %v979_v23, 0.0  ;;  %v974_v29 = vadd.f32 %v2164_v3, %v973_v25  ;;  %v1672_v30 = vpop.f32.mrf.mxu0 }
 0x122   :  { %v1770_v31 = vpop.f32.mrf.mxu1  ;;  %1182 = vst.msk [vmem:[%s2811_s5 + $0x168] sm:$0xff] %vm1136_vm2, %v1117_v26  ;;  %v1116_v32 = vmax.f32 %v578_v28, 0.0  ;;  %v593_v34 = vadd.f32 %v1672_v30, %v2159_v2 }
 0x123   :  { %1310 = vst.msk [vmem:[%s2812_s6 + $0x168] sm:$0xff] %vm1136_vm2, %v1246_v27  ;;  %v1245_v33 = vmax.f32 %v974_v29, 0.0  ;;  %v989_v35 = vadd.f32 %v1770_v31, %v2164_v3  ;;  %v587_v36 = vpop.f32.mrf.mxu0 }
 0x124   :  { %v983_v37 = vpop.f32.mrf.mxu1  ;;  %1181 = vst.msk [vmem:[%s2811_s5 + $0x160] sm:$0xff] %vm1136_vm2, %v1116_v32  ;;  %v1119_v38 = vmax.f32 %v593_v34, 0.0  ;;  %v588_v40 = vadd.f32 %v2159_v2, %v587_v36 }
 0x125   :  { %1309 = vst.msk [vmem:[%s2812_s6 + $0x160] sm:$0xff] %vm1136_vm2, %v1245_v33  ;;  %v1248_v39 = vmax.f32 %v989_v35, 0.0  ;;  %v984_v41 = vadd.f32 %v2164_v3, %v983_v37  ;;  %v1675_v42 = vpop.f32.mrf.mxu0 }
 0x126   :  { %v1773_v43 = vpop.f32.mrf.mxu1  ;;  %1184 = vst.msk [vmem:[%s2811_s5 + $0x178] sm:$0xff] %vm1136_vm2, %v1119_v38  ;;  %v1118_v44 = vmax.f32 %v588_v40, 0.0  ;;  %v603_v46 = vadd.f32 %v1675_v42, %v2159_v2 }
 0x127   :  { %1312 = vst.msk [vmem:[%s2812_s6 + $0x178] sm:$0xff] %vm1136_vm2, %v1248_v39  ;;  %v1247_v45 = vmax.f32 %v984_v41, 0.0  ;;  %v999_v47 = vadd.f32 %v1773_v43, %v2164_v3  ;;  %v597_v48 = vpop.f32.mrf.mxu0 }
 0x128   :  { %v993_v49 = vpop.f32.mrf.mxu1  ;;  %1183 = vst.msk [vmem:[%s2811_s5 + $0x170] sm:$0xff] %vm1136_vm2, %v1118_v44  ;;  %v1121_v50 = vmax.f32 %v603_v46, 0.0  ;;  %v598_v52 = vadd.f32 %v2159_v2, %v597_v48 }
 0x129   :  { %1311 = vst.msk [vmem:[%s2812_s6 + $0x170] sm:$0xff] %vm1136_vm2, %v1247_v45  ;;  %v1250_v51 = vmax.f32 %v999_v47, 0.0  ;;  %v994_v53 = vadd.f32 %v2164_v3, %v993_v49  ;;  %v1678_v54 = vpop.f32.mrf.mxu0 }
 0x12a   :  { %v1776_v55 = vpop.f32.mrf.mxu1  ;;  %1186 = vst.msk [vmem:[%s2811_s5 + $0x188] sm:$0xff] %vm1136_vm2, %v1121_v50  ;;  %v1120_v56 = vmax.f32 %v598_v52, 0.0  ;;  %v613_v58 = vadd.f32 %v1678_v54, %v2159_v2 }
 0x12b   :  { %1314 = vst.msk [vmem:[%s2812_s6 + $0x188] sm:$0xff] %vm1136_vm2, %v1250_v51  ;;  %v1249_v57 = vmax.f32 %v994_v53, 0.0  ;;  %v1009_v59 = vadd.f32 %v1776_v55, %v2164_v3  ;;  %v607_v60 = vpop.f32.mrf.mxu0 }
 0x12c   :  { %v1003_v61 = vpop.f32.mrf.mxu1  ;;  %1185 = vst.msk [vmem:[%s2811_s5 + $0x180] sm:$0xff] %vm1136_vm2, %v1120_v56  ;;  %v1123_v62 = vmax.f32 %v613_v58, 0.0  ;;  %v608_v0 = vadd.f32 %v2159_v2, %v607_v60 }
 0x12d   :  { %1313 = vst.msk [vmem:[%s2812_s6 + $0x180] sm:$0xff] %vm1136_vm2, %v1249_v57  ;;  %v1252_v63 = vmax.f32 %v1009_v59, 0.0  ;;  %v1004_v1 = vadd.f32 %v2164_v3, %v1003_v61  ;;  %v1681_v4 = vpop.f32.mrf.mxu0 }
 0x12e   :  { %v1779_v5 = vpop.f32.mrf.mxu1  ;;  %1188 = vst.msk [vmem:[%s2811_s5 + $0x198] sm:$0xff] %vm1136_vm2, %v1123_v62  ;;  %v1122_v6 = vmax.f32 %v608_v0, 0.0  ;;  %v623_v8 = vadd.f32 %v1681_v4, %v2159_v2 }
 0x12f   :  { %1316 = vst.msk [vmem:[%s2812_s6 + $0x198] sm:$0xff] %vm1136_vm2, %v1252_v63  ;;  %v1251_v7 = vmax.f32 %v1004_v1, 0.0  ;;  %v1019_v9 = vadd.f32 %v1779_v5, %v2164_v3  ;;  %v617_v10 = vpop.f32.mrf.mxu0 }
 0x130   :  { %v1013_v11 = vpop.f32.mrf.mxu1  ;;  %1187 = vst.msk [vmem:[%s2811_s5 + $0x190] sm:$0xff] %vm1136_vm2, %v1122_v6  ;;  %v1125_v12 = vmax.f32 %v623_v8, 0.0  ;;  %v618_v14 = vadd.f32 %v2159_v2, %v617_v10 }
 0x131   :  { %1315 = vst.msk [vmem:[%s2812_s6 + $0x190] sm:$0xff] %vm1136_vm2, %v1251_v7  ;;  %v1254_v13 = vmax.f32 %v1019_v9, 0.0  ;;  %v1014_v15 = vadd.f32 %v2164_v3, %v1013_v11  ;;  %v1684_v16 = vpop.f32.mrf.mxu0 }
 0x132   :  { %v1782_v17 = vpop.f32.mrf.mxu1  ;;  %1190 = vst.msk [vmem:[%s2811_s5 + $0x1a8] sm:$0xff] %vm1136_vm2, %v1125_v12  ;;  %v1124_v18 = vmax.f32 %v618_v14, 0.0  ;;  %v633_v20 = vadd.f32 %v1684_v16, %v2159_v2 }
 0x133   :  { %1318 = vst.msk [vmem:[%s2812_s6 + $0x1a8] sm:$0xff] %vm1136_vm2, %v1254_v13  ;;  %v1253_v19 = vmax.f32 %v1014_v15, 0.0  ;;  %v1029_v21 = vadd.f32 %v1782_v17, %v2164_v3  ;;  %v627_v22 = vpop.f32.mrf.mxu0 }
 0x134   :  { %v1023_v23 = vpop.f32.mrf.mxu1  ;;  %1189 = vst.msk [vmem:[%s2811_s5 + $0x1a0] sm:$0xff] %vm1136_vm2, %v1124_v18  ;;  %v1127_v24 = vmax.f32 %v633_v20, 0.0  ;;  %v628_v26 = vadd.f32 %v2159_v2, %v627_v22 }
 0x135   :  { %1317 = vst.msk [vmem:[%s2812_s6 + $0x1a0] sm:$0xff] %vm1136_vm2, %v1253_v19  ;;  %v1256_v25 = vmax.f32 %v1029_v21, 0.0  ;;  %v1024_v27 = vadd.f32 %v2164_v3, %v1023_v23  ;;  %v1687_v28 = vpop.f32.mrf.mxu0 }
 0x136   :  { %v1785_v29 = vpop.f32.mrf.mxu1  ;;  %1192 = vst.msk [vmem:[%s2811_s5 + $0x1b8] sm:$0xff] %vm1136_vm2, %v1127_v24  ;;  %v1126_v30 = vmax.f32 %v628_v26, 0.0  ;;  %v643_v32 = vadd.f32 %v1687_v28, %v2159_v2 }
 0x137   :  { %1320 = vst.msk [vmem:[%s2812_s6 + $0x1b8] sm:$0xff] %vm1136_vm2, %v1256_v25  ;;  %v1255_v31 = vmax.f32 %v1024_v27, 0.0  ;;  %v1039_v33 = vadd.f32 %v1785_v29, %v2164_v3  ;;  %v637_v34 = vpop.f32.mrf.mxu0 }
 0x138   :  { %v1033_v35 = vpop.f32.mrf.mxu1  ;;  %1191 = vst.msk [vmem:[%s2811_s5 + $0x1b0] sm:$0xff] %vm1136_vm2, %v1126_v30  ;;  %v1129_v36 = vmax.f32 %v643_v32, 0.0  ;;  %v638_v38 = vadd.f32 %v2159_v2, %v637_v34 }
 0x139   :  { %1319 = vst.msk [vmem:[%s2812_s6 + $0x1b0] sm:$0xff] %vm1136_vm2, %v1255_v31  ;;  %v1258_v37 = vmax.f32 %v1039_v33, 0.0  ;;  %v1034_v39 = vadd.f32 %v2164_v3, %v1033_v35  ;;  %v1690_v40 = vpop.f32.mrf.mxu0 }
 0x13a   :  { %v1788_v41 = vpop.f32.mrf.mxu1  ;;  %1194 = vst.msk [vmem:[%s2811_s5 + $0x1c8] sm:$0xff] %vm1136_vm2, %v1129_v36  ;;  %v1128_v42 = vmax.f32 %v638_v38, 0.0  ;;  %v653_v44 = vadd.f32 %v1690_v40, %v2159_v2 }
 0x13b   :  { %1322 = vst.msk [vmem:[%s2812_s6 + $0x1c8] sm:$0xff] %vm1136_vm2, %v1258_v37  ;;  %v1257_v43 = vmax.f32 %v1034_v39, 0.0  ;;  %v1049_v45 = vadd.f32 %v1788_v41, %v2164_v3  ;;  %v647_v46 = vpop.f32.mrf.mxu0 }
 0x13c   :  { %v1043_v47 = vpop.f32.mrf.mxu1  ;;  %1193 = vst.msk [vmem:[%s2811_s5 + $0x1c0] sm:$0xff] %vm1136_vm2, %v1128_v42  ;;  %v1131_v48 = vmax.f32 %v653_v44, 0.0  ;;  %v648_v50 = vadd.f32 %v2159_v2, %v647_v46 }
 0x13d   :  { %1321 = vst.msk [vmem:[%s2812_s6 + $0x1c0] sm:$0xff] %vm1136_vm2, %v1257_v43  ;;  %v1260_v49 = vmax.f32 %v1049_v45, 0.0  ;;  %v1044_v51 = vadd.f32 %v2164_v3, %v1043_v47  ;;  %v1693_v52 = vpop.f32.mrf.mxu0 }
 0x13e   :  { %v1791_v53 = vpop.f32.mrf.mxu1  ;;  %1196 = vst.msk [vmem:[%s2811_s5 + $0x1d8] sm:$0xff] %vm1136_vm2, %v1131_v48  ;;  %v1130_v54 = vmax.f32 %v648_v50, 0.0  ;;  %v663_v56 = vadd.f32 %v1693_v52, %v2159_v2 }
 0x13f   :  { %1324 = vst.msk [vmem:[%s2812_s6 + $0x1d8] sm:$0xff] %vm1136_vm2, %v1260_v49  ;;  %v1259_v55 = vmax.f32 %v1044_v51, 0.0  ;;  %v1059_v57 = vadd.f32 %v1791_v53, %v2164_v3  ;;  %v657_v58 = vpop.f32.mrf.mxu0 }
 0x140   :  { %v1053_v59 = vpop.f32.mrf.mxu1  ;;  %1195 = vst.msk [vmem:[%s2811_s5 + $0x1d0] sm:$0xff] %vm1136_vm2, %v1130_v54  ;;  %v1133_v60 = vmax.f32 %v663_v56, 0.0  ;;  %v658_v62 = vadd.f32 %v2159_v2, %v657_v58 }
 0x141   :  { %1323 = vst.msk [vmem:[%s2812_s6 + $0x1d0] sm:$0xff] %vm1136_vm2, %v1259_v55  ;;  %v1262_v61 = vmax.f32 %v1059_v57, 0.0  ;;  %v1054_v63 = vadd.f32 %v2164_v3, %v1053_v59  ;;  %v1696_v0 = vpop.f32.mrf.mxu0 }
 0x142   :  { %v1794_v1 = vpop.f32.mrf.mxu1  ;;  %1198 = vst.msk [vmem:[%s2811_s5 + $0x1e8] sm:$0xff] %vm1136_vm2, %v1133_v60  ;;  %v1132_v4 = vmax.f32 %v658_v62, 0.0  ;;  %v673_v6 = vadd.f32 %v1696_v0, %v2159_v2 }
 0x143   :  { %1326 = vst.msk [vmem:[%s2812_s6 + $0x1e8] sm:$0xff] %vm1136_vm2, %v1262_v61  ;;  %v1261_v5 = vmax.f32 %v1054_v63, 0.0  ;;  %v1069_v7 = vadd.f32 %v1794_v1, %v2164_v3  ;;  %v667_v8 = vpop.f32.mrf.mxu0 }
 0x144   :  { %v1063_v9 = vpop.f32.mrf.mxu1  ;;  %1197 = vst.msk [vmem:[%s2811_s5 + $0x1e0] sm:$0xff] %vm1136_vm2, %v1132_v4  ;;  %v1135_v10 = vmax.f32 %v673_v6, 0.0  ;;  %v668_v12 = vadd.f32 %v2159_v2, %v667_v8 }
 0x145   :  { %1325 = vst.msk [vmem:[%s2812_s6 + $0x1e0] sm:$0xff] %vm1136_vm2, %v1261_v5  ;;  %v1264_v11 = vmax.f32 %v1069_v7, 0.0  ;;  %v1064_v13 = vadd.f32 %v2164_v3, %v1063_v9 }
 0x146   :  { %1200 = vst.msk [vmem:[%s2811_s5 + $0x1f8] sm:$0xff] %vm1136_vm2, %v1135_v10  ;;  %v1134_v14 = vmax.f32 %v668_v12, 0.0 }
 0x147   :  { %1328 = vst.msk [vmem:[%s2812_s6 + $0x1f8] sm:$0xff] %vm1136_vm2, %v1264_v11  ;;  %v1263_v15 = vmax.f32 %v1064_v13, 0.0 }
 0x148   :  { %1199 = vst.msk [vmem:[%s2811_s5 + $0x1f0] sm:$0xff] %vm1136_vm2, %v1134_v14 }
 0x149   :  { %1327 = vst.msk [vmem:[%s2812_s6 + $0x1f0] sm:$0xff] %vm1136_vm2, %v1263_v15 }

// kernel: forward.8
= control target key start
LH: loop header
LB: loop body
LE: loop exit
PB: predicated region body
PF: predicated region fallthrough
CT: control target
= control target key end

     0   :  { %s3961_s12 = smov 0   ;;  %s3963_s13 = smov 0   ;;  %s5871_s0 = inlined_call_operand.vmem [shape: f32[2,256,32], index: 0, kind: input, shape index: {}]   ;;  %s5872_s1 = inlined_call_operand.vmem [shape: f32[2,256,32], index: 1, kind: input, shape index: {}]   ;;  %s5873_s2 = inlined_call_operand.vmem [shape: f32[2,256,32], index: 2, kind: input, shape index: {}]   ;;  %s5874_s3 = inlined_call_operand.vmem [shape: f32[2,256,32], index: 3, kind: output, shape index: {}]  }
   0x1   :  { %s3965_s14 = smov 0   ;;  %s3967_s15 = smov 0  }
   0x2   :  { %s3969_s16 = smov 0  }
   0x3 LB: > { %s25_s17 = sadd.s32 1, %s3927_s14  ;;  %s32_s18 = sadd.s32 1, %s3931_s15  ;;  %s3935_s16 = sphi %s3969_s16, %s13_s16   ;;  %s3931_s15 = sphi %s3967_s15, %s5988_s15   ;;  %s3927_s14 = sphi %s3965_s14, %s5987_s14   ;;  %s3923_s13 = sphi %s3963_s13, %s5986_s13   ;;  %s3919_s12 = sphi %s3961_s12, %s5985_s12  }
   0x4   : > { %p26_p0 = scmp.ge.s32.totalorder %s25_s17, 2  ;;  %p3165_p1 = scmp.ge.s32.totalorder %s3935_s16, 1 }
   0x5   : > { %p199_p2 = scmp.lt.s32.totalorder %s3935_s16, 5 }
   0x6   : > { %s5990_s17 = smov (%p26_p0, %s25_s17), 0  ;;  %s5992_s18 = smov (!%p26_p0, %s32_s18), %s3931_s15 }
   0x7   : > { %p200_p3 = pnand %p3165_p1, %p199_p2  ;;  %p34_p4 = scmp.ge.s32.totalorder %s5992_s18, 2 }
   0x9   : > { %s5994_s18 = smov (%p34_p4, %s5992_s18), 0  ;;  %203 = sbr.rel (%p200_p3) target bundleno = 1277 (0x4fd), region = 32 }
   0xe   : > { %p250_p5 = scmp.lt.s32.totalorder %s3923_s13, 1  ;;  %s3168_s19 = sshll.u32 %s3919_s12, 4 }
   0xf   : > { %p262_p6 = scmp.lt.s32.totalorder %s3168_s19, 31  ;;  %p3176_p7 = scmp.ne.s32.totalorder %s3919_s12, 0 }
  0x10   : > { %s5996_s13 = smov (!%p250_p5, %s3923_s13), 1 }
  0x11   : > { %s5998_s19 = smov (!%p262_p6, %s3168_s19), 31  ;;  %s3228_s20 = sshll.u32 %s5996_s13, 8 }
  0x12   : > { %s3169_s21 = sshll.u32 %s5996_s13, 5  ;;  %s3997_s24 = scalar_lea.vmem %s5871_s0, %s3228_s20 }
  0x13   : > { %s265_s25 = sadd.s32 %s3169_s21, %s5998_s19  ;;  %s4002_s29 = scalar_lea.vmem %s5874_s3, %s3228_s20 }
  0x14   : > { %s3170_s26 = sshll.u32 %s265_s25, 3  ;;  %293 = sbr.rel (%p3176_p7) target bundleno = 74 (0x4a), region = 36 }
  0x15   : > { %s4007_s5 = scalar_lea.vmem %s5872_s1, %s3170_s26  ;;  %s4012_s8 = scalar_lea.vmem %s5873_s2, %s3170_s26 }
  0x19   : > { %vm294_vm0 = vcmask 7168   ;;  %vm359_vm1 = vcmask 261120   ;;  %v3937_v0 = vmov -inf   ;;  %v3938_v1 = vmov 0.0  }
  0x1a   : > { %295 = vst.msk [vmem:[#allocation2] sm:$0xff] %vm294_vm0, %v3937_v0  ;;  %296 = vst.msk [vmem:[#allocation2 + $0x8] sm:$0xff] %vm294_vm0, %v3937_v0 }
  0x1b   : > { %297 = vst.msk [vmem:[#allocation2 + $0x10] sm:$0xff] %vm294_vm0, %v3937_v0  ;;  %298 = vst.msk [vmem:[#allocation2 + $0x18] sm:$0xff] %vm294_vm0, %v3937_v0 }
  0x1c   : > { %299 = vst.msk [vmem:[#allocation2 + $0x20] sm:$0xff] %vm294_vm0, %v3937_v0  ;;  %300 = vst.msk [vmem:[#allocation2 + $0x28] sm:$0xff] %vm294_vm0, %v3937_v0 }
  0x1d   : > { %301 = vst.msk [vmem:[#allocation2 + $0x30] sm:$0xff] %vm294_vm0, %v3937_v0  ;;  %302 = vst.msk [vmem:[#allocation2 + $0x38] sm:$0xff] %vm294_vm0, %v3937_v0 }
  0x1e   : > { %303 = vst.msk [vmem:[#allocation2 + $0x40] sm:$0xff] %vm294_vm0, %v3937_v0  ;;  %304 = vst.msk [vmem:[#allocation2 + $0x48] sm:$0xff] %vm294_vm0, %v3937_v0 }
  0x1f   : > { %305 = vst.msk [vmem:[#allocation2 + $0x50] sm:$0xff] %vm294_vm0, %v3937_v0  ;;  %306 = vst.msk [vmem:[#allocation2 + $0x58] sm:$0xff] %vm294_vm0, %v3937_v0 }
  0x20   : > { %307 = vst.msk [vmem:[#allocation2 + $0x60] sm:$0xff] %vm294_vm0, %v3937_v0  ;;  %308 = vst.msk [vmem:[#allocation2 + $0x68] sm:$0xff] %vm294_vm0, %v3937_v0 }
  0x21   : > { %309 = vst.msk [vmem:[#allocation2 + $0x70] sm:$0xff] %vm294_vm0, %v3937_v0  ;;  %310 = vst.msk [vmem:[#allocation2 + $0x78] sm:$0xff] %vm294_vm0, %v3937_v0 }
  0x22   : > { %311 = vst.msk [vmem:[#allocation2 + $0x80] sm:$0xff] %vm294_vm0, %v3937_v0  ;;  %312 = vst.msk [vmem:[#allocation2 + $0x88] sm:$0xff] %vm294_vm0, %v3937_v0 }
  0x23   : > { %313 = vst.msk [vmem:[#allocation2 + $0x90] sm:$0xff] %vm294_vm0, %v3937_v0  ;;  %314 = vst.msk [vmem:[#allocation2 + $0x98] sm:$0xff] %vm294_vm0, %v3937_v0 }
  0x24   : > { %315 = vst.msk [vmem:[#allocation2 + $0xa0] sm:$0xff] %vm294_vm0, %v3937_v0  ;;  %316 = vst.msk [vmem:[#allocation2 + $0xa8] sm:$0xff] %vm294_vm0, %v3937_v0 }
  0x25   : > { %317 = vst.msk [vmem:[#allocation2 + $0xb0] sm:$0xff] %vm294_vm0, %v3937_v0  ;;  %318 = vst.msk [vmem:[#allocation2 + $0xb8] sm:$0xff] %vm294_vm0, %v3937_v0 }
  0x26   : > { %319 = vst.msk [vmem:[#allocation2 + $0xc0] sm:$0xff] %vm294_vm0, %v3937_v0  ;;  %320 = vst.msk [vmem:[#allocation2 + $0xc8] sm:$0xff] %vm294_vm0, %v3937_v0 }
  0x27   : > { %321 = vst.msk [vmem:[#allocation2 + $0xd0] sm:$0xff] %vm294_vm0, %v3937_v0  ;;  %322 = vst.msk [vmem:[#allocation2 + $0xd8] sm:$0xff] %vm294_vm0, %v3937_v0 }
  0x28   : > { %323 = vst.msk [vmem:[#allocation2 + $0xe0] sm:$0xff] %vm294_vm0, %v3937_v0  ;;  %324 = vst.msk [vmem:[#allocation2 + $0xe8] sm:$0xff] %vm294_vm0, %v3937_v0 }
  0x29   : > { %325 = vst.msk [vmem:[#allocation2 + $0xf0] sm:$0xff] %vm294_vm0, %v3937_v0  ;;  %326 = vst.msk [vmem:[#allocation2 + $0xf8] sm:$0xff] %vm294_vm0, %v3937_v0 }
  0x2a   : > { %327 = vst.msk [vmem:[#allocation3] sm:$0xff] %vm294_vm0, %v3938_v1  ;;  %328 = vst.msk [vmem:[#allocation3 + $0x8] sm:$0xff] %vm294_vm0, %v3938_v1 }
  0x2b   : > { %329 = vst.msk [vmem:[#allocation3 + $0x10] sm:$0xff] %vm294_vm0, %v3938_v1  ;;  %330 = vst.msk [vmem:[#allocation3 + $0x18] sm:$0xff] %vm294_vm0, %v3938_v1 }
  0x2c   : > { %331 = vst.msk [vmem:[#allocation3 + $0x20] sm:$0xff] %vm294_vm0, %v3938_v1  ;;  %332 = vst.msk [vmem:[#allocation3 + $0x28] sm:$0xff] %vm294_vm0, %v3938_v1 }
  0x2d   : > { %333 = vst.msk [vmem:[#allocation3 + $0x30] sm:$0xff] %vm294_vm0, %v3938_v1  ;;  %334 = vst.msk [vmem:[#allocation3 + $0x38] sm:$0xff] %vm294_vm0, %v3938_v1 }
  0x2e   : > { %335 = vst.msk [vmem:[#allocation3 + $0x40] sm:$0xff] %vm294_vm0, %v3938_v1  ;;  %336 = vst.msk [vmem:[#allocation3 + $0x48] sm:$0xff] %vm294_vm0, %v3938_v1 }
  0x2f   : > { %337 = vst.msk [vmem:[#allocation3 + $0x50] sm:$0xff] %vm294_vm0, %v3938_v1  ;;  %338 = vst.msk [vmem:[#allocation3 + $0x58] sm:$0xff] %vm294_vm0, %v3938_v1 }
  0x30   : > { %339 = vst.msk [vmem:[#allocation3 + $0x60] sm:$0xff] %vm294_vm0, %v3938_v1  ;;  %340 = vst.msk [vmem:[#allocation3 + $0x68] sm:$0xff] %vm294_vm0, %v3938_v1 }
  0x31   : > { %341 = vst.msk [vmem:[#allocation3 + $0x70] sm:$0xff] %vm294_vm0, %v3938_v1  ;;  %342 = vst.msk [vmem:[#allocation3 + $0x78] sm:$0xff] %vm294_vm0, %v3938_v1 }
  0x32   : > { %343 = vst.msk [vmem:[#allocation3 + $0x80] sm:$0xff] %vm294_vm0, %v3938_v1  ;;  %344 = vst.msk [vmem:[#allocation3 + $0x88] sm:$0xff] %vm294_vm0, %v3938_v1 }
  0x33   : > { %345 = vst.msk [vmem:[#allocation3 + $0x90] sm:$0xff] %vm294_vm0, %v3938_v1  ;;  %346 = vst.msk [vmem:[#allocation3 + $0x98] sm:$0xff] %vm294_vm0, %v3938_v1 }
  0x34   : > { %347 = vst.msk [vmem:[#allocation3 + $0xa0] sm:$0xff] %vm294_vm0, %v3938_v1  ;;  %348 = vst.msk [vmem:[#allocation3 + $0xa8] sm:$0xff] %vm294_vm0, %v3938_v1 }
  0x35   : > { %349 = vst.msk [vmem:[#allocation3 + $0xb0] sm:$0xff] %vm294_vm0, %v3938_v1  ;;  %350 = vst.msk [vmem:[#allocation3 + $0xb8] sm:$0xff] %vm294_vm0, %v3938_v1 }
  0x36   : > { %351 = vst.msk [vmem:[#allocation3 + $0xc0] sm:$0xff] %vm294_vm0, %v3938_v1  ;;  %352 = vst.msk [vmem:[#allocation3 + $0xc8] sm:$0xff] %vm294_vm0, %v3938_v1 }
  0x37   : > { %353 = vst.msk [vmem:[#allocation3 + $0xd0] sm:$0xff] %vm294_vm0, %v3938_v1  ;;  %354 = vst.msk [vmem:[#allocation3 + $0xd8] sm:$0xff] %vm294_vm0, %v3938_v1 }
  0x38   : > { %355 = vst.msk [vmem:[#allocation3 + $0xe0] sm:$0xff] %vm294_vm0, %v3938_v1  ;;  %356 = vst.msk [vmem:[#allocation3 + $0xe8] sm:$0xff] %vm294_vm0, %v3938_v1 }
  0x39   : > { %357 = vst.msk [vmem:[#allocation3 + $0xf0] sm:$0xff] %vm294_vm0, %v3938_v1  ;;  %358 = vst.msk [vmem:[#allocation3 + $0xf8] sm:$0xff] %vm294_vm0, %v3938_v1 }
  0x3a   : > { %360 = vst.msk [vmem:[#allocation4] sm:$0xff] %vm359_vm1, %v3938_v1  ;;  %361 = vst.msk [vmem:[#allocation4 + $0x8] sm:$0xff] %vm359_vm1, %v3938_v1 }
  0x3b   : > { %362 = vst.msk [vmem:[#allocation4 + $0x10] sm:$0xff] %vm359_vm1, %v3938_v1  ;;  %363 = vst.msk [vmem:[#allocation4 + $0x18] sm:$0xff] %vm359_vm1, %v3938_v1 }
  0x3c   : > { %364 = vst.msk [vmem:[#allocation4 + $0x20] sm:$0xff] %vm359_vm1, %v3938_v1  ;;  %365 = vst.msk [vmem:[#allocation4 + $0x28] sm:$0xff] %vm359_vm1, %v3938_v1 }
  0x3d   : > { %366 = vst.msk [vmem:[#allocation4 + $0x30] sm:$0xff] %vm359_vm1, %v3938_v1  ;;  %367 = vst.msk [vmem:[#allocation4 + $0x38] sm:$0xff] %vm359_vm1, %v3938_v1 }
  0x3e   : > { %368 = vst.msk [vmem:[#allocation4 + $0x40] sm:$0xff] %vm359_vm1, %v3938_v1  ;;  %369 = vst.msk [vmem:[#allocation4 + $0x48] sm:$0xff] %vm359_vm1, %v3938_v1 }
  0x3f   : > { %370 = vst.msk [vmem:[#allocation4 + $0x50] sm:$0xff] %vm359_vm1, %v3938_v1  ;;  %371 = vst.msk [vmem:[#allocation4 + $0x58] sm:$0xff] %vm359_vm1, %v3938_v1 }
  0x40   : > { %372 = vst.msk [vmem:[#allocation4 + $0x60] sm:$0xff] %vm359_vm1, %v3938_v1  ;;  %373 = vst.msk [vmem:[#allocation4 + $0x68] sm:$0xff] %vm359_vm1, %v3938_v1 }
  0x41   : > { %374 = vst.msk [vmem:[#allocation4 + $0x70] sm:$0xff] %vm359_vm1, %v3938_v1  ;;  %375 = vst.msk [vmem:[#allocation4 + $0x78] sm:$0xff] %vm359_vm1, %v3938_v1 }
  0x42   : > { %376 = vst.msk [vmem:[#allocation4 + $0x80] sm:$0xff] %vm359_vm1, %v3938_v1  ;;  %377 = vst.msk [vmem:[#allocation4 + $0x88] sm:$0xff] %vm359_vm1, %v3938_v1 }
  0x43   : > { %378 = vst.msk [vmem:[#allocation4 + $0x90] sm:$0xff] %vm359_vm1, %v3938_v1  ;;  %379 = vst.msk [vmem:[#allocation4 + $0x98] sm:$0xff] %vm359_vm1, %v3938_v1 }
  0x44   : > { %380 = vst.msk [vmem:[#allocation4 + $0xa0] sm:$0xff] %vm359_vm1, %v3938_v1  ;;  %381 = vst.msk [vmem:[#allocation4 + $0xa8] sm:$0xff] %vm359_vm1, %v3938_v1 }
  0x45   : > { %382 = vst.msk [vmem:[#allocation4 + $0xb0] sm:$0xff] %vm359_vm1, %v3938_v1  ;;  %383 = vst.msk [vmem:[#allocation4 + $0xb8] sm:$0xff] %vm359_vm1, %v3938_v1 }
  0x46   : > { %384 = vst.msk [vmem:[#allocation4 + $0xc0] sm:$0xff] %vm359_vm1, %v3938_v1  ;;  %385 = vst.msk [vmem:[#allocation4 + $0xc8] sm:$0xff] %vm359_vm1, %v3938_v1 }
  0x47   : > { %386 = vst.msk [vmem:[#allocation4 + $0xd0] sm:$0xff] %vm359_vm1, %v3938_v1  ;;  %387 = vst.msk [vmem:[#allocation4 + $0xd8] sm:$0xff] %vm359_vm1, %v3938_v1 }
  0x48   : > { %388 = vst.msk [vmem:[#allocation4 + $0xe0] sm:$0xff] %vm359_vm1, %v3938_v1  ;;  %389 = vst.msk [vmem:[#allocation4 + $0xe8] sm:$0xff] %vm359_vm1, %v3938_v1 }
  0x49   : > { %390 = vst.msk [vmem:[#allocation4 + $0xf0] sm:$0xff] %vm359_vm1, %v3938_v1  ;;  %391 = vst.msk [vmem:[#allocation4 + $0xf8] sm:$0xff] %vm359_vm1, %v3938_v1 }
  0x4a PF: > { %v4176_v2 = vld [vmem:[%s4007_s5 + $0x78] sm:$0xff]  ;;  %vm472_vm2 = vcmask 261120   ;;  %v4179_v3 = vld [vmem:[%s4007_s5 + $0x68] sm:$0xff]  ;;  %v4182_v4 = vld [vmem:[%s4007_s5 + $0x70] sm:$0xff]  ;;  %p3225_p8 = scmp.ne.s32.totalorder %s3919_s12, 1 }
  0x4b   : > { %v904_v5 = vmul.f32 %v4176_v2, %v4176_v2  ;;  %v902_v6 = vmul.f32 %v4179_v3, %v4179_v3  ;;  %v903_v7 = vmul.f32 %v4182_v4, %v4182_v4  ;;  %v4191_v8 = vld [vmem:[%s4007_s5 + $0x60] sm:$0xff]  ;;  %v4196_v10 = vld [vmem:[%s4007_s5 + $0x58] sm:$0xff]  ;;  %v4199_v11 = vld [vmem:[%s4007_s5 + $0x50] sm:$0xff] }
  0x4c   : > { %v901_v9 = vmul.f32 %v4191_v8, %v4191_v8  ;;  %v900_v16 = vmul.f32 %v4196_v10, %v4196_v10  ;;  %v899_v17 = vmul.f32 %v4199_v11, %v4199_v11  ;;  %v4210_v18 = vld [vmem:[%s4007_s5 + $0x48] sm:$0xff]  ;;  %v4213_v19 = vld [vmem:[%s4007_s5 + $0x40] sm:$0xff]  ;;  %v4222_v24 = vld [vmem:[%s4007_s5 + $0x38] sm:$0xff] }
  0x4d   : > { %v950_v12 = vsel %vm472_vm2, %v904_v5, 0.0  ;;  %v944_v13 = vsel %vm472_vm2, %v902_v6, 0.0  ;;  %v947_v14 = vsel %vm472_vm2, %v903_v7, 0.0  ;;  %v898_v22 = vmul.f32 %v4210_v18, %v4210_v18  ;;  %v4225_v25 = vld [vmem:[%s4007_s5 + $0x30] sm:$0xff]  ;;  %v4234_v30 = vld [vmem:[%s4007_s5 + $0x28] sm:$0xff]  ;;  %v4237_v31 = vld [vmem:[%s4007_s5 + $0x20] sm:$0xff] }
  0x4e   : > { %951 = vadd.xlane.f32.xlu0 %v950_v12  ;;  %945 = vadd.xlane.f32.xlu1 %v944_v13  ;;  %v941_v15 = vsel %vm472_vm2, %v901_v9, 0.0  ;;  %v938_v20 = vsel %vm472_vm2, %v900_v16, 0.0  ;;  %v935_v21 = vsel %vm472_vm2, %v899_v17, 0.0  ;;  %v897_v23 = vmul.f32 %v4213_v19, %v4213_v19  ;;  %v427_v36 = vld [vmem:[%s4007_s5 + $0x18] sm:$0xff]  ;;  %v426_v37 = vld [vmem:[%s4007_s5 + $0x10] sm:$0xff]  ;;  %v425_v42 = vld [vmem:[%s4007_s5 + $0x8] sm:$0xff] }
  0x4f   : > { %v932_v26 = vsel %vm472_vm2, %v898_v22, 0.0  ;;  %v896_v28 = vmul.f32 %v4222_v24, %v4222_v24  ;;  %v895_v29 = vmul.f32 %v4225_v25, %v4225_v25  ;;  %v894_v34 = vmul.f32 %v4234_v30, %v4234_v30  ;;  %v424_v43 = vld [vmem:[%s4007_s5] sm:$0xff]  ;;  %v393_v49 = vld [vmem:[%s3997_s24 + $0x8] sm:$0xff]  ;;  %v394_v54 = vld [vmem:[%s3997_s24 + $0x10] sm:$0xff] }
  0x50   : > { %v929_v27 = vsel %vm472_vm2, %v897_v23, 0.0  ;;  %v893_v35 = vmul.f32 %v4237_v31, %v4237_v31  ;;  %v892_v40 = vmul.f32 %v427_v36, %v427_v36  ;;  %v891_v41 = vmul.f32 %v426_v37, %v426_v37  ;;  %v4254_v48 = vld [vmem:[%s3997_s24] sm:$0xff]  ;;  %v395_v55 = vld [vmem:[%s3997_s24 + $0x18] sm:$0xff]  ;;  %v397_v61 = vld [vmem:[%s3997_s24 + $0x28] sm:$0xff] }
  0x51   : > { %v926_v32 = vsel %vm472_vm2, %v896_v28, 0.0  ;;  %v923_v33 = vsel %vm472_vm2, %v895_v29, 0.0  ;;  %v920_v38 = vsel %vm472_vm2, %v894_v34, 0.0  ;;  %v890_v46 = vmul.f32 %v425_v42, %v425_v42  ;;  %v396_v60 = vld [vmem:[%s3997_s24 + $0x20] sm:$0xff]  ;;  %v398_v5 = vld [vmem:[%s3997_s24 + $0x30] sm:$0xff]  ;;  %v399_v6 = vld [vmem:[%s3997_s24 + $0x38] sm:$0xff] }
  0x52   : > { %948 = vadd.xlane.f32.xlu0 %v947_v14  ;;  %942 = vadd.xlane.f32.xlu1 %v941_v15  ;;  %v917_v39 = vsel %vm472_vm2, %v893_v35, 0.0  ;;  %v914_v44 = vsel %vm472_vm2, %v892_v40, 0.0  ;;  %v911_v45 = vsel %vm472_vm2, %v891_v41, 0.0  ;;  %v889_v47 = vmul.f32 %v424_v43, %v424_v43  ;;  %v400_v14 = vld [vmem:[%s3997_s24 + $0x40] sm:$0xff]  ;;  %v401_v15 = vld [vmem:[%s3997_s24 + $0x48] sm:$0xff]  ;;  %v402_v22 = vld [vmem:[%s3997_s24 + $0x50] sm:$0xff] }
  0x53   : > { %v908_v50 = vsel %vm472_vm2, %v890_v46, 0.0  ;;  %v440_v52 = vmul.f32 %v4254_v48, %v4254_v48  ;;  %v441_v53 = vmul.f32 %v393_v49, %v393_v49  ;;  %v442_v58 = vmul.f32 %v394_v54, %v394_v54  ;;  %v403_v23 = vld [vmem:[%s3997_s24 + $0x58] sm:$0xff] }
  0x54   : > { %v905_v51 = vsel %vm472_vm2, %v889_v47, 0.0  ;;  %v443_v59 = vmul.f32 %v395_v55, %v395_v55  ;;  %v444_v0 = vmul.f32 %v396_v60, %v396_v60  ;;  %v445_v1 = vmul.f32 %v397_v61, %v397_v61 }
  0x55   : > { %v473_v56 = vsel %vm472_vm2, %v440_v52, 0.0  ;;  %v476_v57 = vsel %vm472_vm2, %v441_v53, 0.0  ;;  %v479_v62 = vsel %vm472_vm2, %v442_v58, 0.0  ;;  %v446_v12 = vmul.f32 %v398_v5, %v398_v5  ;;  %v411_v52 = vld [vmem:[%s3997_s24 + $0x98] sm:$0xff]  ;;  %v413_v58 = vld [vmem:[%s3997_s24 + $0xa8] sm:$0xff] }
  0x56   : > { %939 = vadd.xlane.f32.xlu0 %v938_v20  ;;  %936 = vadd.xlane.f32.xlu1 %v935_v21  ;;  %v482_v63 = vsel %vm472_vm2, %v443_v59, 0.0  ;;  %v485_v7 = vsel %vm472_vm2, %v444_v0, 0.0  ;;  %v488_v9 = vsel %vm472_vm2, %v445_v1, 0.0  ;;  %v447_v13 = vmul.f32 %v399_v6, %v399_v6  ;;  %v415_v0 = vld [vmem:[%s3997_s24 + $0xb8] sm:$0xff] }
  0x57   : > { %v491_v16 = vsel %vm472_vm2, %v446_v12, 0.0  ;;  %v448_v20 = vmul.f32 %v400_v14, %v400_v14  ;;  %v449_v21 = vmul.f32 %v401_v15, %v401_v15  ;;  %v450_v28 = vmul.f32 %v402_v22, %v402_v22  ;;  %v417_v12 = vld [vmem:[%s3997_s24 + $0xc8] sm:$0xff] }
  0x58   : > { %v494_v17 = vsel %vm472_vm2, %v447_v13, 0.0  ;;  %v451_v29 = vmul.f32 %v403_v23, %v403_v23 }
  0x59   : > { %v503_v34 = vsel %vm472_vm2, %v450_v28, 0.0  ;;  %v421_v28 = vld [vmem:[%s3997_s24 + $0xe8] sm:$0xff] }
  0x5a   : > { %933 = vadd.xlane.f32.xlu0 %v932_v26  ;;  %930 = vadd.xlane.f32.xlu1 %v929_v27  ;;  %v497_v26 = vsel %vm472_vm2, %v448_v20, 0.0  ;;  %v500_v27 = vsel %vm472_vm2, %v449_v21, 0.0  ;;  %v506_v35 = vsel %vm472_vm2, %v451_v29, 0.0  ;;  %v419_v20 = vld [vmem:[%s3997_s24 + $0xd8] sm:$0xff] }
  0x5e   : > { %927 = vadd.xlane.f32.xlu0 %v926_v32  ;;  %924 = vadd.xlane.f32.xlu1 %v923_v33  ;;  %v404_v32 = vld [vmem:[%s3997_s24 + $0x60] sm:$0xff]  ;;  %v405_v33 = vld [vmem:[%s3997_s24 + $0x68] sm:$0xff] }
  0x5f   : > { %v452_v36 = vmul.f32 %v404_v32, %v404_v32  ;;  %v453_v37 = vmul.f32 %v405_v33, %v405_v33 }
  0x61   : > { %v509_v40 = vsel %vm472_vm2, %v452_v36, 0.0  ;;  %v512_v41 = vsel %vm472_vm2, %v453_v37, 0.0  ;;  %v423_v36 = vld [vmem:[%s3997_s24 + $0xf8] sm:$0xff] }
  0x62   : > { %921 = vadd.xlane.f32.xlu0 %v920_v38  ;;  %918 = vadd.xlane.f32.xlu1 %v917_v39  ;;  %v406_v38 = vld [vmem:[%s3997_s24 + $0x70] sm:$0xff]  ;;  %v407_v39 = vld [vmem:[%s3997_s24 + $0x78] sm:$0xff] }
  0x63   : > { %v454_v42 = vmul.f32 %v406_v38, %v406_v38  ;;  %v455_v43 = vmul.f32 %v407_v39, %v407_v39 }
  0x65   : > { %v515_v46 = vsel %vm472_vm2, %v454_v42, 0.0  ;;  %v518_v47 = vsel %vm472_vm2, %v455_v43, 0.0 }
  0x66   : > { %915 = vadd.xlane.f32.xlu0 %v914_v44  ;;  %912 = vadd.xlane.f32.xlu1 %v911_v45  ;;  %v408_v44 = vld [vmem:[%s3997_s24 + $0x80] sm:$0xff]  ;;  %v409_v45 = vld [vmem:[%s3997_s24 + $0x88] sm:$0xff] }
  0x67   : > { %v456_v49 = vmul.f32 %v408_v44, %v408_v44 }
  0x69   : > { %v521_v53 = vsel %vm472_vm2, %v456_v49, 0.0 }
  0x6a   : > { %909 = vadd.xlane.f32.xlu0 %v908_v50  ;;  %906 = vadd.xlane.f32.xlu1 %v905_v51  ;;  %v457_v50 = vmul.f32 %v409_v45, %v409_v45  ;;  %v410_v51 = vld [vmem:[%s3997_s24 + $0x90] sm:$0xff] }
  0x6b   : > { %v458_v55 = vmul.f32 %v410_v51, %v410_v51 }
  0x6c   : > { %v524_v54 = vsel %vm472_vm2, %v457_v50, 0.0 }
  0x6d   : > { %v527_v59 = vsel %vm472_vm2, %v458_v55, 0.0 }
  0x6e   : > { %474 = vadd.xlane.f32.xlu0 %v473_v56  ;;  %477 = vadd.xlane.f32.xlu1 %v476_v57  ;;  %v459_v56 = vmul.f32 %v411_v52, %v411_v52  ;;  %v412_v57 = vld [vmem:[%s3997_s24 + $0xa0] sm:$0xff] }
  0x6f   : > { %v460_v61 = vmul.f32 %v412_v57, %v412_v57 }
  0x70   : > { %v530_v60 = vsel %vm472_vm2, %v459_v56, 0.0 }
  0x71   : > { %v533_v1 = vsel %vm472_vm2, %v460_v61, 0.0 }
  0x72   : > { %480 = vadd.xlane.f32.xlu0 %v479_v62  ;;  %483 = vadd.xlane.f32.xlu1 %v482_v63  ;;  %v461_v62 = vmul.f32 %v413_v58, %v413_v58  ;;  %v414_v63 = vld [vmem:[%s3997_s24 + $0xb0] sm:$0xff] }
  0x73   : > { %v462_v6 = vmul.f32 %v414_v63, %v414_v63 }
  0x74   : > { %v536_v5 = vsel %vm472_vm2, %v461_v62, 0.0 }
  0x75   : > { %v539_v13 = vsel %vm472_vm2, %v462_v6, 0.0 }
  0x76   : > { %486 = vadd.xlane.f32.xlu0 %v485_v7  ;;  %489 = vadd.xlane.f32.xlu1 %v488_v9  ;;  %v463_v7 = vmul.f32 %v415_v0, %v415_v0  ;;  %v416_v9 = vld [vmem:[%s3997_s24 + $0xc0] sm:$0xff] }
  0x77   : > { %v464_v15 = vmul.f32 %v416_v9, %v416_v9 }
  0x78   : > { %v542_v14 = vsel %vm472_vm2, %v463_v7, 0.0 }
  0x79   : > { %v545_v21 = vsel %vm472_vm2, %v464_v15, 0.0 }
  0x7a   : > { %492 = vadd.xlane.f32.xlu0 %v491_v16  ;;  %495 = vadd.xlane.f32.xlu1 %v494_v17  ;;  %v465_v16 = vmul.f32 %v417_v12, %v417_v12  ;;  %v418_v17 = vld [vmem:[%s3997_s24 + $0xd0] sm:$0xff] }
  0x7b   : > { %v466_v23 = vmul.f32 %v418_v17, %v418_v17 }
  0x7c   : > { %v548_v22 = vsel %vm472_vm2, %v465_v16, 0.0 }
  0x7d   : > { %v551_v29 = vsel %vm472_vm2, %v466_v23, 0.0 }
  0x7e   : > { %498 = vadd.xlane.f32.xlu0 %v497_v26  ;;  %501 = vadd.xlane.f32.xlu1 %v500_v27  ;;  %v467_v26 = vmul.f32 %v419_v20, %v419_v20  ;;  %v420_v27 = vld [vmem:[%s3997_s24 + $0xe0] sm:$0xff] }
  0x7f   : > { %v468_v33 = vmul.f32 %v420_v27, %v420_v27 }
  0x80   : > { %v554_v32 = vsel %vm472_vm2, %v467_v26, 0.0 }
  0x81   : > { %v557_v37 = vsel %vm472_vm2, %v468_v33, 0.0 }
  0x82   : > { %504 = vadd.xlane.f32.xlu0 %v503_v34  ;;  %507 = vadd.xlane.f32.xlu1 %v506_v35  ;;  %v469_v34 = vmul.f32 %v421_v28, %v421_v28  ;;  %v422_v35 = vld [vmem:[%s3997_s24 + $0xf0] sm:$0xff] }
  0x83   : > { %v470_v39 = vmul.f32 %v422_v35, %v422_v35 }
  0x84   : > { %v560_v38 = vsel %vm472_vm2, %v469_v34, 0.0 }
  0x86   : > { %510 = vadd.xlane.f32.xlu0 %v509_v40  ;;  %513 = vadd.xlane.f32.xlu1 %v512_v41  ;;  %v471_v40 = vmul.f32 %v423_v36, %v423_v36  ;;  %v563_v41 = vsel %vm472_vm2, %v470_v39, 0.0 }
  0x88   : > { %v566_v42 = vsel %vm472_vm2, %v471_v40, 0.0 }
  0x8a   : > { %516 = vadd.xlane.f32.xlu0 %v515_v46  ;;  %519 = vadd.xlane.f32.xlu1 %v518_v47 }
  0x8e   : > { %522 = vadd.xlane.f32.xlu0 %v521_v53  ;;  %525 = vadd.xlane.f32.xlu1 %v524_v54 }
  0x92   : > { %528 = vadd.xlane.f32.xlu0 %v527_v59  ;;  %531 = vadd.xlane.f32.xlu1 %v530_v60 }
  0x96   : > { %534 = vadd.xlane.f32.xlu0 %v533_v1  ;;  %537 = vadd.xlane.f32.xlu1 %v536_v5 }
  0x9a   : > { %540 = vadd.xlane.f32.xlu0 %v539_v13  ;;  %543 = vadd.xlane.f32.xlu1 %v542_v14 }
  0x9e   : > { %546 = vadd.xlane.f32.xlu0 %v545_v21  ;;  %549 = vadd.xlane.f32.xlu1 %v548_v22 }
  0xa2   : > { %552 = vadd.xlane.f32.xlu0 %v551_v29  ;;  %555 = vadd.xlane.f32.xlu1 %v554_v32 }
  0xa6   : > { %558 = vadd.xlane.f32.xlu0 %v557_v37  ;;  %561 = vadd.xlane.f32.xlu1 %v560_v38 }
  0xaa   : > { %564 = vadd.xlane.f32.xlu0 %v563_v41  ;;  %567 = vadd.xlane.f32.xlu1 %v566_v42 }
  0xd7   : > { %v952_v43 = vpop.xlane.xlu0 %951  ;;  %v946_v44 = vpop.xlane.xlu1 %945 }
  0xd8   : > { %3476 = vrsqrt.f32 %v952_v43  ;;  %vm1060_vm4 = vcmp.eq.f32.partialorder %v952_v43, inf  ;;  %v1063_v6 = vand.u32 2147483648, %v952_v43  ;;  %vm1062_vm6 = vcmp.eq.f32.partialorder %v952_v43, 0.0 }
  0xd9   : > { %vm1046_vm7 = vcmp.eq.f32.partialorder %v946_v44, inf  ;;  %v1049_v20 = vand.u32 2147483648, %v946_v44  ;;  %vm1048_vm9 = vcmp.eq.f32.partialorder %v946_v44, 0.0 }
  0xdb   : > { %v949_v45 = vpop.xlane.xlu0 %948  ;;  %v943_v46 = vpop.xlane.xlu1 %942 }
  0xdc   : > { %3478 = vrsqrt.f32 %v949_v45  ;;  %vm1053_vm3 = vcmp.eq.f32.partialorder %v949_v45, inf  ;;  %v1056_v63 = vand.u32 2147483648, %v949_v45  ;;  %vm1055_vm5 = vcmp.eq.f32.partialorder %v949_v45, 0.0 }
  0xdd   : > { %3480 = vrsqrt.f32 %v946_v44  ;;  %vm1039_vm8 = vcmp.eq.f32.partialorder %v943_v46, inf  ;;  %v1042_v27 = vand.u32 2147483648, %v943_v46  ;;  %vm1041_vm10 = vcmp.eq.f32.partialorder %v943_v46, 0.0 }
  0xde   : > { %3482 = vrsqrt.f32 %v943_v46 }
  0xdf   : > { %v4323_v47 = vpop.xlane.xlu0 %939  ;;  %v4325_v49 = vpop.xlane.xlu1 %936 }
  0xe0   : > { %3484 = vrsqrt.f32 %v4323_v47  ;;  %vm1032_vm11 = vcmp.eq.f32.partialorder %v4323_v47, inf  ;;  %v1035_v41 = vand.u32 2147483648, %v4323_v47  ;;  %vm1034_vm12 = vcmp.eq.f32.partialorder %v4323_v47, 0.0 }
  0xe1   : > { %3486 = vrsqrt.f32 %v4325_v49  ;;  %vm1025_vm13 = vcmp.eq.f32.partialorder %v4325_v49, inf  ;;  %vm1027_vm14 = vcmp.eq.f32.partialorder %v4325_v49, 0.0 }
  0xe3   : > { %v4327_v50 = vpop.xlane.xlu0 %933  ;;  %v4329_v51 = vpop.xlane.xlu1 %930 }
  0xe4   : > { %3488 = vrsqrt.f32 %v4327_v50  ;;  %vm1018_vm15 = vcmp.eq.f32.partialorder %v4327_v50, inf  ;;  %vm1011_vm0 = vcmp.eq.f32.partialorder %v4329_v51, inf }
  0xe5   : > { %v3477_v53 = vpop.eup %3476  ;;  %3490 = vrsqrt.f32 %v4329_v51 }
  0xe6   : > { %v1059_v58 = vmul.f32 %v3477_v53, %v952_v43 }
  0xe7   : > { %v4332_v52 = vpop.xlane.xlu0 %927  ;;  %v4334_v55 = vpop.xlane.xlu1 %924 }
  0xe8   : > { %v1061_v1 = vsel %vm1060_vm4, %v952_v43, %v1059_v58  ;;  %3492 = vrsqrt.f32 %v4332_v52  ;;  %vm1004_vm1 = vcmp.eq.f32.partialorder %v4332_v52, inf  ;;  %vm997_vm4 = vcmp.eq.f32.partialorder %v4334_v55, inf }
  0xe9   : > { %v3479_v54 = vpop.eup %3478  ;;  %3494 = vrsqrt.f32 %v4334_v55  ;;  %v1064_v13 = vsel %vm1062_vm6, %v1063_v6, %v1061_v1  ;;  %vm1006_vm6 = vcmp.eq.f32.partialorder %v4332_v52, 0.0 }
  0xea   : > { %v1052_v56 = vmul.f32 %v3479_v54, %v949_v45  ;;  %v3481_v59 = vpop.eup %3480  ;;  %v1080_v23 = vadd.f32 2.220446e-16, %v1064_v13 }
  0xeb   : > { %v4337_v57 = vpop.xlane.xlu0 %921  ;;  %v4339_v60 = vpop.xlane.xlu1 %918  ;;  %v1045_v5 = vmul.f32 %v3481_v59, %v946_v44 }
  0xec   : > { %v1054_v61 = vsel %vm1053_vm3, %v949_v45, %v1052_v56  ;;  %v3483_v62 = vpop.eup %3482  ;;  %v1021_v56 = vand.u32 2147483648, %v4327_v50  ;;  %vm1013_vm3 = vcmp.eq.f32.partialorder %v4329_v51, 0.0 }
  0xed   : > { %v1057_v7 = vsel %vm1055_vm5, %v1056_v63, %v1054_v61  ;;  %v1038_v12 = vmul.f32 %v3483_v62, %v943_v46  ;;  %v3485_v15 = vpop.eup %3484  ;;  %v1047_v16 = vsel %vm1046_vm7, %v946_v44, %v1045_v5  ;;  %v1028_v44 = vand.u32 2147483648, %v4325_v49 }
  0xee   : > { %v1079_v17 = vadd.f32 2.220446e-16, %v1057_v7  ;;  %v1050_v26 = vsel %vm1048_vm9, %v1049_v20, %v1047_v16  ;;  %v1031_v28 = vmul.f32 %v3485_v15, %v4323_v47  ;;  %v3487_v29 = vpop.eup %3486  ;;  %v1014_v61 = vand.u32 2147483648, %v4329_v51 }
  0xef   : > { %v4343_v0 = vpop.xlane.xlu0 %915  ;;  %v4346_v9 = vpop.xlane.xlu1 %912  ;;  %v1040_v22 = vsel %vm1039_vm8, %v943_v46, %v1038_v12  ;;  %v1078_v34 = vadd.f32 2.220446e-16, %v1050_v26  ;;  %v1024_v37 = vmul.f32 %v3487_v29, %v4325_v49  ;;  %v1007_v12 = vand.u32 2147483648, %v4332_v52 }
  0xf0   : > { %3496 = vrcp.f32 %v1079_v17  ;;  %v1043_v33 = vsel %vm1041_vm10, %v1042_v27, %v1040_v22  ;;  %v1033_v36 = vsel %vm1032_vm11, %v4323_v47, %v1031_v28  ;;  %vm1020_vm5 = vcmp.eq.f32.partialorder %v4327_v50, 0.0 }
  0xf1   : > { %3498 = vrsqrt.f32 %v4337_v57  ;;  %v3489_v35 = vpop.eup %3488  ;;  %v1077_v40 = vadd.f32 2.220446e-16, %v1043_v33  ;;  %v1036_v43 = vsel %vm1034_vm12, %v1035_v41, %v1033_v36  ;;  %v1026_v54 = vsel %vm1025_vm13, %v4325_v49, %v1024_v37 }
  0xf2   : > { %3500 = vrcp.f32 %v1080_v23  ;;  %v3491_v39 = vpop.eup %3490  ;;  %v1017_v45 = vmul.f32 %v3489_v35, %v4327_v50  ;;  %v1076_v59 = vadd.f32 2.220446e-16, %v1036_v43  ;;  %v1029_v63 = vsel %vm1027_vm14, %v1028_v44, %v1026_v54 }
  0xf3   : > { %v4349_v14 = vpop.xlane.xlu0 %909  ;;  %v4351_v21 = vpop.xlane.xlu1 %906  ;;  %3502 = vrsqrt.f32 %v4339_v60  ;;  %v1010_v47 = vmul.f32 %v3491_v39, %v4329_v51  ;;  %v1075_v15 = vadd.f32 2.220446e-16, %v1029_v63  ;;  %v1000_v17 = vand.u32 2147483648, %v4334_v55 }
  0xf4   : > { %3504 = vrsqrt.f32 %v4343_v0  ;;  %v1019_v1 = vsel %vm1018_vm15, %v4327_v50, %v1017_v45  ;;  %vm999_vm7 = vcmp.eq.f32.partialorder %v4334_v55, 0.0  ;;  %vm990_vm8 = vcmp.eq.f32.partialorder %v4337_v57, inf }
  0xf5   : > { %v3493_v42 = vpop.eup %3492  ;;  %3506 = vrcp.f32 %v1078_v34  ;;  %v1012_v7 = vsel %vm1011_vm0, %v4329_v51, %v1010_v47  ;;  %v1022_v16 = vsel %vm1020_vm5, %v1021_v56, %v1019_v1  ;;  %vm992_vm9 = vcmp.eq.f32.partialorder %v4337_v57, 0.0 }
  0xf6   : > { %v3495_v53 = vpop.eup %3494  ;;  %3508 = vrsqrt.f32 %v4346_v9  ;;  %v1003_v58 = vmul.f32 %v3493_v42, %v4332_v52  ;;  %v1015_v51 = vsel %vm1013_vm3, %v1014_v61, %v1012_v7  ;;  %v1074_v28 = vadd.f32 2.220446e-16, %v1022_v16 }
  0xf7   : > { %v4354_v32 = vpop.xlane.xlu0 %474  ;;  %v4360_v38 = vpop.xlane.xlu1 %477  ;;  %3510 = vrcp.f32 %v1077_v40  ;;  %v996_v5 = vmul.f32 %v3495_v53, %v4334_v55  ;;  %v1073_v34 = vadd.f32 2.220446e-16, %v1015_v51  ;;  %vm983_vm10 = vcmp.eq.f32.partialorder %v4339_v60, inf }
  0xf8   : > { %3512 = vrsqrt.f32 %v4349_v14  ;;  %v1005_v49 = vsel %vm1004_vm1, %v4332_v52, %v1003_v58  ;;  %vm985_vm11 = vcmp.eq.f32.partialorder %v4339_v60, 0.0  ;;  %v986_v44 = vand.u32 2147483648, %v4339_v60 }
  0xf9   : > { %3514 = vrsqrt.f32 %v4351_v21  ;;  %v998_v23 = vsel %vm997_vm4, %v4334_v55, %v996_v5  ;;  %v1008_v27 = vsel %vm1006_vm6, %v1007_v12, %v1005_v49  ;;  %v993_v55 = vand.u32 2147483648, %v4337_v57 }
  0xfa   : > { %3516 = vrcp.f32 %v1076_v59  ;;  %v1001_v35 = vsel %vm999_vm7, %v1000_v17, %v998_v23  ;;  %v1072_v40 = vadd.f32 2.220446e-16, %v1008_v27  ;;  %vm976_vm12 = vcmp.eq.f32.partialorder %v4343_v0, inf }
  0xfb   : > { %v4370_v46 = vpop.xlane.xlu0 %480  ;;  %v4382_v62 = vpop.xlane.xlu1 %483  ;;  %3518 = vrcp.f32 %v1075_v15  ;;  %v1071_v42 = vadd.f32 2.220446e-16, %v1001_v35  ;;  %vm978_vm13 = vcmp.eq.f32.partialorder %v4343_v0, 0.0  ;;  %v979_v58 = vand.u32 2147483648, %v4343_v0 }
  0xfc   : > { %3520 = vrsqrt.f32 %v4354_v32  ;;  %vm969_vm14 = vcmp.eq.f32.partialorder %v4346_v9, inf  ;;  %vm971_vm15 = vcmp.eq.f32.partialorder %v4346_v9, 0.0  ;;  %vm962_vm0 = vcmp.eq.f32.partialorder %v4349_v14, inf }
  0xfd   : > { %v3497_v13 = vpop.eup %3496  ;;  %3522 = vrsqrt.f32 %v4360_v38  ;;  %vm955_vm1 = vcmp.eq.f32.partialorder %v4351_v21, inf  ;;  %vm964_vm3 = vcmp.eq.f32.partialorder %v4349_v14, 0.0  ;;  %v965_v23 = vand.u32 2147483648, %v4349_v14 }
  0xfe   : > { %v3499_v22 = vpop.eup %3498  ;;  %v1110_v29 = vmul.f32 %v3497_v13, %v4182_v4  ;;  %3524 = vrcp.f32 %v1074_v28  ;;  %vm957_vm4 = vcmp.eq.f32.partialorder %v4351_v21, 0.0  ;;  %vm571_vm5 = vcmp.eq.f32.partialorder %v4354_v32, inf }
  0xff   : > { %v4389_v6 = vpop.xlane.xlu0 %486  ;;  %v4399_v20 = vpop.xlane.xlu1 %489  ;;  %v989_v36 = vmul.f32 %v3499_v22, %v4337_v57  ;;  %3526 = vrcp.f32 %v1073_v34  ;;  %vm573_vm6 = vcmp.eq.f32.partialorder %v4354_v32, 0.0  ;;  %vm578_vm7 = vcmp.eq.f32.partialorder %v4360_v38, inf }
 0x100   : > { %v3501_v50 = vpop.eup %3500  ;;  %3528 = vrcp.f32 %v1072_v40 }
 0x101   : > { %v1112_v52 = vmul.f32 %v3501_v50, %v4176_v2  ;;  %v3503_v33 = vpop.eup %3502  ;;  %v991_v53 = vsel %vm990_vm8, %v4337_v57, %v989_v36  ;;  %3530 = vrsqrt.f32 %v4370_v46  ;;  %v958_v50 = vand.u32 2147483648, %v4351_v21 }
 0x102   : > { %v3505_v39 = vpop.eup %3504  ;;  %v982_v43 = vmul.f32 %v3503_v33, %v4339_v60  ;;  %3532 = vrcp.f32 %v1071_v42  ;;  %v994_v1 = vsel %vm992_vm9, %v993_v55, %v991_v53  ;;  %vm580_vm8 = vcmp.eq.f32.partialorder %v4360_v38, 0.0 }
 0x103   : > { %v4403_v26 = vpop.xlane.xlu0 %492  ;;  %v4408_v37 = vpop.xlane.xlu1 %495  ;;  %3302 = vmatprep.subr.msk.mxu0 %vm472_vm2, %v1112_v52  ;;  %v975_v54 = vmul.f32 %v3505_v39, %v4343_v0  ;;  %3534 = vrsqrt.f32 %v4382_v62  ;;  %v1070_v16 = vadd.f32 2.220446e-16, %v994_v1  ;;  %v574_v39 = vand.u32 2147483648, %v4354_v32 }
 0x104   : > { %v3507_v4 = vpop.eup %3506  ;;  %3303 = vmatpush3.xpose.msk.msra.mxu0 %vm472_vm2, %v1112_v52  ;;  %v984_v5 = vsel %vm983_vm10, %v4339_v60, %v982_v43  ;;  %3536 = vrsqrt.f32 %v4389_v6  ;;  %v581_v55 = vand.u32 2147483648, %v4360_v38  ;;  %vm585_vm9 = vcmp.eq.f32.partialorder %v4370_v46, inf }
 0x105   : > { %v3509_v41 = vpop.eup %3508  ;;  %3304 = vmatprep.subr.msk.mxu0 %vm472_vm2, %v1110_v29  ;;  %v1108_v59 = vmul.f32 %v3507_v4, %v4179_v3  ;;  %v972_v3 = vand.u32 2147483648, %v4346_v9  ;;  %v977_v12 = vsel %vm976_vm12, %v4343_v0, %v975_v54  ;;  %v987_v17 = vsel %vm985_vm11, %v986_v44, %v984_v5 }
 0x106   : > { %v3511_v45 = vpop.eup %3510  ;;  %v968_v63 = vmul.f32 %v3509_v41, %v4346_v9  ;;  %3538 = vrsqrt.f32 %v4399_v20  ;;  %v1069_v27 = vadd.f32 2.220446e-16, %v987_v17  ;;  %v588_v42 = vand.u32 2147483648, %v4370_v46 }
 0x107   : > { %v4414_v2 = vpop.xlane.xlu0 %498  ;;  %v4429_v47 = vpop.xlane.xlu1 %501  ;;  %v1106_v13 = vmul.f32 %v3511_v45, %v4191_v8  ;;  %v980_v8 = vsel %vm978_vm13, %v979_v58, %v977_v12  ;;  %3540 = vrsqrt.f32 %v4403_v26  ;;  %vm587_vm10 = vcmp.eq.f32.partialorder %v4370_v46, 0.0 }
 0x108   : > { %v3513_v56 = vpop.eup %3512  ;;  %3305 = vmatpush3.xpose.msk.msra.mxu0 %vm472_vm2, %v1110_v29  ;;  %v970_v22 = vsel %vm969_vm14, %v4346_v9, %v968_v63  ;;  %3542 = vrsqrt.f32 %v4408_v37  ;;  %v1068_v35 = vadd.f32 2.220446e-16, %v980_v8  ;;  %vm592_vm11 = vcmp.eq.f32.partialorder %v4382_v62, inf }
 0x109   : > { %v3515_v61 = vpop.eup %3514  ;;  %3306 = vmatprep.subr.msk.mxu0 %vm472_vm2, %v1108_v59  ;;  %v961_v49 = vmul.f32 %v3513_v56, %v4349_v14  ;;  %v973_v28 = vsel %vm971_vm15, %v972_v3, %v970_v22  ;;  %3544 = vrcp.f32 %v1070_v16  ;;  %v595_v58 = vand.u32 2147483648, %v4382_v62 }
 0x10a   : > { %v954_v57 = vmul.f32 %v3515_v61, %v4351_v21  ;;  %v3517_v15 = vpop.eup %3516  ;;  %3546 = vrsqrt.f32 %v4414_v2  ;;  %v1067_v40 = vadd.f32 2.220446e-16, %v973_v28  ;;  %vm594_vm12 = vcmp.eq.f32.partialorder %v4382_v62, 0.0 }
 0x10b   : > { %v4446_v7 = vpop.xlane.xlu0 %504  ;;  %v4465_v51 = vpop.xlane.xlu1 %507  ;;  %v963_v60 = vsel %vm962_vm0, %v4349_v14, %v961_v49  ;;  %v1104_v29 = vmul.f32 %v3517_v15, %v4196_v10  ;;  %3548 = vrcp.f32 %v1069_v27  ;;  %vm599_vm13 = vcmp.eq.f32.partialorder %v4389_v6, inf }
 0x10c   : > { %3307 = vmatpush3.xpose.msk.msra.mxu0 %vm472_vm2, %v1108_v59  ;;  %v3519_v0 = vpop.eup %3518  ;;  %v956_v52 = vsel %vm955_vm1, %v4351_v21, %v954_v57  ;;  %v966_v9 = vsel %vm964_vm3, %v965_v23, %v963_v60  ;;  %3550 = vrcp.f32 %v1068_v35  ;;  %v602_v61 = vand.u32 2147483648, %v4389_v6 }
 0x10d   : > { %3308 = vmatprep.subr.msk.mxu0 %vm472_vm2, %v1106_v13  ;;  %v3521_v34 = vpop.eup %3520  ;;  %v959_v4 = vsel %vm957_vm4, %v958_v50, %v956_v52  ;;  %v1102_v43 = vmul.f32 %v3519_v0, %v4199_v11  ;;  %v1066_v45 = vadd.f32 2.220446e-16, %v966_v9  ;;  %3552 = vrsqrt.f32 %v4429_v47 }
 0x10e   : > { %v3523_v36 = vpop.eup %3522  ;;  %v570_v21 = vmul.f32 %v3521_v34, %v4354_v32  ;;  %v1065_v56 = vadd.f32 2.220446e-16, %v959_v4  ;;  %3554 = vrcp.f32 %v1067_v40  ;;  %vm606_vm14 = vcmp.eq.f32.partialorder %v4399_v20, inf }
 0x10f   : > { %v4485_v33 = vpop.xlane.xlu0 %510  ;;  %v3525_v10 = vpop.eup %3524  ;;  %v577_v53 = vmul.f32 %v3523_v36, %v4360_v38  ;;  %vm601_vm15 = vcmp.eq.f32.partialorder %v4389_v6, 0.0  ;;  %v609_v1 = vand.u32 2147483648, %v4399_v20  ;;  %vm613_vm0 = vcmp.eq.f32.partialorder %v4403_v26, inf }
 0x110   : > { %3309 = vmatpush3.xpose.msk.msra.mxu0 %vm472_vm2, %v1106_v13  ;;  %v4500_v41 = vpop.xlane.xlu1 %513  ;;  %v3527_v14 = vpop.eup %3526  ;;  %v1100_v5 = vmul.f32 %v3525_v10, %v4210_v18  ;;  %3556 = vrcp.f32 %v1066_v45  ;;  %v572_v49 = vsel %vm571_vm5, %v4354_v32, %v570_v21  ;;  %vm608_vm1 = vcmp.eq.f32.partialorder %v4399_v20, 0.0 }
 0x111   : > { %3310 = vmatprep.subr.msk.mxu0 %vm472_vm2, %v1104_v29  ;;  %v3529_v44 = vpop.eup %3528  ;;  %v1098_v3 = vmul.f32 %v3527_v14, %v4213_v19  ;;  %v579_v57 = vsel %vm578_vm7, %v4360_v38, %v577_v53  ;;  %3558 = vrcp.f32 %v1065_v56  ;;  %vm615_vm3 = vcmp.eq.f32.partialorder %v4403_v26, 0.0 }
 0x112   : > { %v3531_v54 = vpop.eup %3530  ;;  %v616_v15 = vand.u32 2147483648, %v4403_v26  ;;  %vm620_vm4 = vcmp.eq.f32.partialorder %v4408_v37, inf  ;;  %vm622_vm5 = vcmp.eq.f32.partialorder %v4408_v37, 0.0  ;;  %v623_v22 = vand.u32 2147483648, %v4408_v37 }
 0x113   : > { %v4513_v11 = vpop.xlane.xlu0 %516  ;;  %v3533_v59 = vpop.eup %3532  ;;  %v584_v13 = vmul.f32 %v3531_v54, %v4370_v46  ;;  %3560 = vrsqrt.f32 %v4446_v7  ;;  %v582_v23 = vsel %vm580_vm8, %v581_v55, %v579_v57  ;;  %v575_v50 = vsel %vm573_vm6, %v574_v39, %v572_v49 }
 0x114   : > { %3311 = vmatpush3.xpose.msk.msra.mxu0 %vm472_vm2, %v1104_v29  ;;  %v3535_v63 = vpop.eup %3534  ;;  %v4533_v18 = vpop.xlane.xlu1 %519  ;;  %3562 = vrsqrt.f32 %v4465_v51  ;;  %v793_v38 = vadd.f32 2.220446e-16, %v575_v50  ;;  %v1096_v32 = vmul.f32 %v3529_v44, %v4222_v24  ;;  %v4563_v34 = vmul.f32 %v3533_v59, %v4225_v25 }
 0x115   : > { %3312 = vmatprep.subr.msk.mxu0 %vm472_vm2, %v1102_v43  ;;  %v3537_v12 = vpop.eup %3536  ;;  %v591_v17 = vmul.f32 %v3535_v63, %v4382_v62  ;;  %v586_v27 = vsel %vm585_vm9, %v4370_v46, %v584_v13  ;;  %3564 = vrsqrt.f32 %v4485_v33  ;;  %v794_v36 = vadd.f32 2.220446e-16, %v582_v23 }
 0x116   : > { %v3539_v19 = vpop.eup %3538  ;;  %v598_v60 = vmul.f32 %v3537_v12, %v4389_v6  ;;  %3566 = vrsqrt.f32 %v4500_v41  ;;  %v589_v24 = vsel %vm587_vm10, %v588_v42, %v586_v27  ;;  %vm627_vm6 = vcmp.eq.f32.partialorder %v4414_v2, inf }
 0x117   : > { %v3541_v16 = vpop.eup %3540  ;;  %v4551_v0 = vpop.xlane.xlu0 %522  ;;  %v605_v28 = vmul.f32 %v3539_v19, %v4399_v20  ;;  %v593_v9 = vsel %vm592_vm11, %v4382_v62, %v591_v17  ;;  %3568 = vrcp.f32 %v793_v38  ;;  %vm629_vm7 = vcmp.eq.f32.partialorder %v4414_v2, 0.0 }
 0x118   : > { %3313 = vmatpush3.xpose.msk.msra.mxu0 %vm472_vm2, %v1102_v43  ;;  %v3543_v8 = vpop.eup %3542  ;;  %v612_v29 = vmul.f32 %v3541_v16, %v4403_v26  ;;  %v4570_v10 = vpop.xlane.xlu1 %525  ;;  %v600_v25 = vsel %vm599_vm13, %v4389_v6, %v598_v60  ;;  %3570 = vrsqrt.f32 %v4513_v11  ;;  %v630_v46 = vand.u32 2147483648, %v4414_v2 }
 0x119   : > { %3314 = vmatprep.subr.msk.mxu0 %vm472_vm2, %v1100_v5  ;;  %v3545_v52 = vpop.eup %3544  ;;  %v619_v39 = vmul.f32 %v3543_v8, %v4408_v37  ;;  %v607_v4 = vsel %vm606_vm14, %v4399_v20, %v605_v28  ;;  %vm634_vm8 = vcmp.eq.f32.partialorder %v4429_v47, inf  ;;  %v596_v14 = vsel %vm594_vm12, %v595_v58, %v593_v9 }
 0x11a   : > { %v3547_v35 = vpop.eup %3546  ;;  %v614_v42 = vsel %vm613_vm0, %v4403_v26, %v612_v29  ;;  %vm636_vm9 = vcmp.eq.f32.partialorder %v4429_v47, 0.0  ;;  %3572 = vrsqrt.f32 %v4533_v18  ;;  %v795_v21 = vadd.f32 2.220446e-16, %v589_v24  ;;  %v3796_v29 = vld [vmem:[%s4007_s5 + $0x18] sm:$0xff] }
 0x11b   : > { %v3549_v40 = vpop.eup %3548  ;;  %v626_v43 = vmul.f32 %v3547_v35, %v4414_v2  ;;  %v4601_v44 = vpop.xlane.xlu0 %528  ;;  %3574 = vrcp.f32 %v794_v36  ;;  %v603_v62 = vsel %vm601_vm15, %v602_v61, %v600_v25  ;;  %v621_v53 = vsel %vm620_vm4, %v4408_v37, %v619_v39 }
 0x11c   : > { %3315 = vmatpush3.xpose.msk.msra.mxu0 %vm472_vm2, %v1100_v5  ;;  %v4588_v55 = vpop.eup %3550  ;;  %v610_v56 = vsel %vm608_vm1, %v609_v1, %v607_v4  ;;  %v637_v58 = vand.u32 2147483648, %v4429_v47  ;;  %v1092_v59 = vmul.f32 %v3545_v52, %v4234_v30  ;;  %3576 = vrsqrt.f32 %v4551_v0  ;;  %v4624_v61 = vpop.xlane.xlu1 %531 }
 0x11d   : > { %3316 = vmatprep.subr.msk.mxu0 %vm472_vm2, %v1098_v3  ;;  %v3553_v45 = vpop.eup %3552  ;;  %v796_v63 = vadd.f32 2.220446e-16, %v596_v14  ;;  %v617_v6 = vsel %vm615_vm3, %v616_v15, %v614_v42  ;;  %vm641_vm10 = vcmp.eq.f32.partialorder %v4446_v7, inf  ;;  %3578 = vrsqrt.f32 %v4570_v10 }
 0x11e   : > { %v4610_v54 = vpop.eup %3554  ;;  %v797_v1 = vadd.f32 2.220446e-16, %v603_v62  ;;  %v624_v30 = vsel %vm622_vm5, %v623_v22, %v621_v53  ;;  %v628_v26 = vsel %vm627_vm6, %v4414_v2, %v626_v43  ;;  %v633_v5 = vmul.f32 %v3553_v45, %v4429_v47  ;;  %v3797_v45 = vld [vmem:[%s4007_s5 + $0x10] sm:$0xff] }
 0x11f   : > { %v4626_v20 = vpop.eup %3556  ;;  %3580 = vrcp.f32 %v795_v21  ;;  %v798_v12 = vadd.f32 2.220446e-16, %v610_v56  ;;  %vm643_vm11 = vcmp.eq.f32.partialorder %v4446_v7, 0.0  ;;  %v644_v49 = vand.u32 2147483648, %v4446_v7  ;;  %v4644_v15 = vpop.xlane.xlu0 %534 }
 0x120   : > { %3317 = vmatpush3.xpose.msk.msra.mxu0 %vm472_vm2, %v1098_v3  ;;  %v4636_v3 = vpop.eup %3558  ;;  %vm648_vm12 = vcmp.eq.f32.partialorder %v4465_v51, inf  ;;  %v799_v57 = vadd.f32 2.220446e-16, %v617_v6  ;;  %vm650_vm13 = vcmp.eq.f32.partialorder %v4465_v51, 0.0  ;;  %v651_v13 = vand.u32 2147483648, %v4465_v51  ;;  %v4661_v27 = vpop.xlane.xlu1 %537 }
 0x121   : > { %3318 = vmatprep.subr.msk.mxu0 %vm472_vm2, %v1096_v32  ;;  %v3561_v37 = vpop.eup %3560  ;;  %v1090_v19 = vmul.f32 %v3549_v40, %v4237_v31  ;;  %3582 = vrcp.f32 %v796_v63  ;;  %v800_v17 = vadd.f32 2.220446e-16, %v624_v30  ;;  %v631_v22 = vsel %vm629_vm7, %v630_v46, %v628_v26 }
 0x122   : > { %v3563_v16 = vpop.eup %3562  ;;  %vm655_vm14 = vcmp.eq.f32.partialorder %v4485_v33, inf  ;;  %3584 = vrcp.f32 %v797_v1  ;;  %v635_v31 = vsel %vm634_vm8, %v4429_v47, %v633_v5  ;;  %vm657_vm15 = vcmp.eq.f32.partialorder %v4485_v33, 0.0 }
 0x123   : > { %v3565_v8 = vpop.eup %3564  ;;  %v658_v23 = vand.u32 2147483648, %v4485_v33  ;;  %vm662_vm0 = vcmp.eq.f32.partialorder %v4500_v41, inf  ;;  %3586 = vrcp.f32 %v798_v12  ;;  %v640_v60 = vmul.f32 %v3561_v37, %v4446_v7  ;;  %v4676_v24 = vpop.xlane.xlu0 %540 }
 0x124   : > { %3319 = vmatpush3.xpose.msk.msra.mxu0 %vm472_vm2, %v1096_v32  ;;  %v3567_v2 = vpop.eup %3566  ;;  %vm664_vm1 = vcmp.eq.f32.partialorder %v4500_v41, 0.0  ;;  %v665_v50 = vand.u32 2147483648, %v4500_v41  ;;  %3588 = vrcp.f32 %v799_v57  ;;  %v801_v38 = vadd.f32 2.220446e-16, %v631_v22  ;;  %v4696_v62 = vpop.xlane.xlu1 %543 }
 0x125   : > { %3320 = vmatprep.subr.msk.mxu0 %vm472_vm2, %v4563_v34  ;;  %v3569_v28 = vpop.eup %3568  ;;  %v647_v52 = vmul.f32 %v3563_v16, %v4465_v51  ;;  %v1088_v32 = vmul.f32 %v3796_v29, %v4588_v55  ;;  %3590 = vrcp.f32 %v800_v17  ;;  %v638_v35 = vsel %vm636_vm9, %v637_v58, %v635_v31  ;;  %v3798_v31 = vld [vmem:[%s4007_s5 + $0x8] sm:$0xff] }
 0x126   : > { %vm669_vm3 = vcmp.eq.f32.partialorder %v4513_v11, inf  ;;  %v826_v36 = vmul.f32 %v3569_v28, %v4254_v48  ;;  %v654_v9 = vmul.f32 %v3565_v8, %v4485_v33  ;;  %vm671_vm4 = vcmp.eq.f32.partialorder %v4513_v11, 0.0 }
 0x127   : > { %v672_v39 = vand.u32 2147483648, %v4513_v11  ;;  %3592 = vrsqrt.f32 %v4601_v44  ;;  %v642_v25 = vsel %vm641_vm10, %v4446_v7, %v640_v60  ;;  %v661_v48 = vmul.f32 %v3567_v2, %v4500_v41 }
 0x128   : > { %3321 = vmatpush3.xpose.msk.msra.mxu0 %vm472_vm2, %v4563_v34  ;;  %v3571_v34 = vpop.eup %3570  ;;  %vm676_vm5 = vcmp.eq.f32.partialorder %v4533_v18, inf  ;;  %v1113_v40 = vmul.f32 200.0, %v826_v36  ;;  %3594 = vrcp.f32 %v801_v38  ;;  %v802_v46 = vadd.f32 2.220446e-16, %v638_v35  ;;  %v3799_v35 = vld [vmem:[%s4007_s5] sm:$0xff] }
 0x129   : > { %3322 = vmatprep.subr.msk.mxu0 %vm472_vm2, %v1092_v59  ;;  %v3573_v47 = vpop.eup %3572  ;;  %v649_v55 = vsel %vm648_vm12, %v4465_v51, %v647_v52  ;;  %v668_v14 = vmul.f32 %v3571_v34, %v4513_v11  ;;  %vm678_vm6 = vcmp.eq.f32.partialorder %v4533_v18, 0.0  ;;  %v679_v43 = vand.u32 2147483648, %v4533_v18  ;;  %v4724_v51 = vpop.xlane.xlu0 %546 }
 0x12a   : > { %v4683_v4 = vpop.eup %3574  ;;  %3334 = vmatprep.mubr.msk.f32.mxu0 %vm472_vm2, %v1113_v40  ;;  %v1086_v21 = vmul.f32 %v3797_v45, %v4610_v54  ;;  %3596 = vrsqrt.f32 %v4624_v61  ;;  %v645_v56 = vsel %vm643_vm11, %v644_v49, %v642_v25  ;;  %v656_v58 = vsel %vm655_vm14, %v4485_v33, %v654_v9 }
 0x12b   : > { %v3577_v42 = vpop.eup %3576  ;;  %3598 = vrsqrt.f32 %v4644_v15  ;;  %v652_v54 = vsel %vm650_vm13, %v651_v13, %v649_v55  ;;  %v663_v7 = vsel %vm662_vm0, %v4500_v41, %v661_v48  ;;  %vm683_vm7 = vcmp.eq.f32.partialorder %v4551_v0, inf  ;;  %v4751_v41 = vpop.xlane.xlu1 %549 }
 0x12c   : > { %3323 = vmatpush3.xpose.msk.msra.mxu0 %vm472_vm2, %v1092_v59  ;;  %v3579_v53 = vpop.eup %3578  ;;  %v675_v59 = vmul.f32 %v3573_v47, %v4533_v18  ;;  %3600 = vrsqrt.f32 %v4661_v27  ;;  %v670_v6 = vsel %vm669_vm3, %v4513_v11, %v668_v14  ;;  %v682_v1 = vmul.f32 %v3577_v42, %v4551_v0 }
 0x12d   : > { %3324 = vmatprep.subr.msk.mxu0 %vm472_vm2, %v1090_v19  ;;  %v4717_v63 = vpop.eup %3580  ;;  %3602 = vrcp.f32 %v802_v46  ;;  %vm685_vm8 = vcmp.eq.f32.partialorder %v4551_v0, 0.0  ;;  %v803_v30 = vadd.f32 2.220446e-16, %v645_v56  ;;  %v659_v26 = vsel %vm657_vm15, %v658_v23, %v656_v58 }
 0x12e   : > { %v689_v5 = vmul.f32 %v3579_v53, %v4570_v10  ;;  %vm690_vm9 = vcmp.eq.f32.partialorder %v4570_v10, inf  ;;  %v4733_v12 = vpop.eup %3582  ;;  %v804_v49 = vadd.f32 2.220446e-16, %v652_v54  ;;  %v666_v37 = vsel %vm664_vm1, %v665_v50, %v663_v7  ;;  %v3802_v7 = vld [vmem:[%s3997_s24 + $0x18] sm:$0xff] }
 0x12f   : > { %v677_v33 = vsel %vm676_vm5, %v4533_v18, %v675_v59  ;;  %3604 = vrsqrt.f32 %v4676_v24  ;;  %v4744_v57 = vpop.eup %3584  ;;  %v673_v13 = vsel %vm671_vm4, %v672_v39, %v670_v6  ;;  %vm692_vm10 = vcmp.eq.f32.partialorder %v4570_v10, 0.0  ;;  %v3800_v39 = vld [vmem:[%s3997_s24 + $0x8] sm:$0xff]  ;;  %v4792_v25 = vpop.xlane.xlu1 %555 }
 0x130   : > { %3325 = vmatpush3.xpose.msk.msra.mxu0 %vm472_vm2, %v1090_v19  ;;  %v686_v19 = vand.u32 2147483648, %v4551_v0  ;;  %3606 = vrsqrt.f32 %v4696_v62  ;;  %v4753_v16 = vpop.eup %3586  ;;  %v805_v17 = vadd.f32 2.220446e-16, %v659_v26  ;;  %v684_v22 = vsel %vm683_vm7, %v4551_v0, %v682_v1  ;;  %v3803_v26 = vld [vmem:[%s3997_s24 + $0x20] sm:$0xff] }
 0x131   : > { %3326 = vmatprep.subr.msk.mxu0 %vm472_vm2, %v1088_v32  ;;  %v693_v8 = vand.u32 2147483648, %v4570_v10  ;;  %v1084_v11 = vmul.f32 %v3798_v31, %v4626_v20  ;;  %v4761_v23 = vpop.eup %3588  ;;  %3608 = vrcp.f32 %v803_v30  ;;  %v806_v2 = vadd.f32 2.220446e-16, %v666_v37  ;;  %v4774_v20 = vpop.xlane.xlu0 %552 }
 0x132   : > { %v680_v60 = vsel %vm678_vm6, %v679_v43, %v677_v33  ;;  %v691_v50 = vsel %vm690_vm9, %v4570_v10, %v689_v5  ;;  %v4769_v28 = vpop.eup %3590  ;;  %3610 = vrcp.f32 %v804_v49  ;;  %v807_v38 = vadd.f32 2.220446e-16, %v673_v13 }
 0x133   : > { %vm697_vm11 = vcmp.eq.f32.partialorder %v4601_v44, inf  ;;  %vm699_vm12 = vcmp.eq.f32.partialorder %v4601_v44, 0.0  ;;  %v687_v52 = vsel %vm685_vm8, %v686_v19, %v684_v22  ;;  %v700_v29 = vand.u32 2147483648, %v4601_v44  ;;  %v4824_v49 = vpop.xlane.xlu1 %561  ;;  %v3804_v22 = vld [vmem:[%s3997_s24 + $0x28] sm:$0xff] }
 0x134   : > { %3327 = vmatpush3.xpose.msk.msra.mxu0 %vm472_vm2, %v1088_v32  ;;  %v3593_v18 = vpop.eup %3592  ;;  %vm704_vm13 = vcmp.eq.f32.partialorder %v4624_v61, inf  ;;  %3612 = vrsqrt.f32 %v4724_v51  ;;  %v808_v32 = vadd.f32 2.220446e-16, %v680_v60  ;;  %v694_v34 = vsel %vm692_vm10, %v693_v8, %v691_v50 }
 0x135   : > { %3328 = vmatprep.subr.msk.mxu0 %vm472_vm2, %v1086_v21  ;;  %3614 = vrcp.f32 %v805_v17  ;;  %v1082_v36 = vmul.f32 %v3799_v35, %v4636_v3  ;;  %v4785_v9 = vpop.eup %3594  ;;  %v707_v0 = vand.u32 2147483648, %v4624_v61  ;;  %vm711_vm14 = vcmp.eq.f32.partialorder %v4644_v15, inf  ;;  %v4806_v45 = vpop.xlane.xlu0 %558 }
 0x136   : > { %3616 = vrcp.f32 %v806_v2  ;;  %v828_v47 = vmul.f32 %v3800_v39, %v4683_v4  ;;  %v809_v48 = vadd.f32 2.220446e-16, %v687_v52  ;;  %v696_v3 = vmul.f32 %v3593_v18, %v4601_v44  ;;  %v3801_v4 = vld [vmem:[%s3997_s24 + $0x10] sm:$0xff] }
 0x137   : > { %v3597_v10 = vpop.eup %3596  ;;  %3618 = vrcp.f32 %v807_v38  ;;  %vm706_vm15 = vcmp.eq.f32.partialorder %v4624_v61, 0.0  ;;  %vm713_vm0 = vcmp.eq.f32.partialorder %v4644_v15, 0.0  ;;  %v714_v40 = vand.u32 2147483648, %v4644_v15  ;;  %v3805_v38 = vld [vmem:[%s3997_s24 + $0x30] sm:$0xff]  ;;  %v4872_v35 = vpop.xlane.xlu1 %567 }
 0x138   : > { %3329 = vmatpush3.xpose.msk.msra.mxu0 %vm472_vm2, %v1086_v21  ;;  %v3599_v46 = vpop.eup %3598  ;;  %v810_v55 = vadd.f32 2.220446e-16, %v694_v34  ;;  %vm718_vm1 = vcmp.eq.f32.partialorder %v4661_v27, inf  ;;  %v830_v14 = vmul.f32 %v3801_v4, %v4717_v63  ;;  %3620 = vrsqrt.f32 %v4751_v41 }
 0x139   : > { %3330 = vmatprep.subr.msk.mxu0 %vm472_vm2, %v1084_v11  ;;  %v3601_v42 = vpop.eup %3600  ;;  %3622 = vrcp.f32 %v808_v32  ;;  %vm720_vm3 = vcmp.eq.f32.partialorder %v4661_v27, 0.0  ;;  %v721_v43 = vand.u32 2147483648, %v4661_v27  ;;  %vm725_vm4 = vcmp.eq.f32.partialorder %v4676_v24, inf  ;;  %v4845_v31 = vpop.xlane.xlu0 %564 }
 0x13a   : > { %v4808_v21 = vpop.eup %3602  ;;  %v703_v53 = vmul.f32 %v3597_v10, %v4624_v61  ;;  %v728_v56 = vand.u32 2147483648, %v4676_v24  ;;  %v1114_v58 = vmul.f32 200.0, %v828_v47  ;;  %3624 = vrsqrt.f32 %v4774_v20  ;;  %v3806_v47 = vld [vmem:[%s3997_s24 + $0x38] sm:$0xff] }
 0x13b   : > { %3626 = vrcp.f32 %v809_v48  ;;  %v698_v59 = vsel %vm697_vm11, %v4601_v44, %v696_v3  ;;  %v710_v54 = vmul.f32 %v3599_v46, %v4644_v15  ;;  %vm727_vm5 = vcmp.eq.f32.partialorder %v4676_v24, 0.0 }
 0x13c   : > { %3331 = vmatpush3.xpose.msk.msra.mxu0 %vm472_vm2, %v1084_v11  ;;  %v832_v63 = vmul.f32 %v3802_v7, %v4733_v12  ;;  %v3605_v6 = vpop.eup %3604  ;;  %3628 = vrcp.f32 %v810_v55  ;;  %v717_v1 = vmul.f32 %v3601_v42, %v4661_v27  ;;  %v1115_v30 = vmul.f32 200.0, %v830_v14 }
 0x13d   : > { %3332 = vmatprep.subr.msk.mxu0 %vm472_vm2, %v1082_v36  ;;  %v834_v5 = vmul.f32 %v3803_v26, %v4744_v57  ;;  %v3607_v37 = vpop.eup %3606  ;;  %vm732_vm6 = vcmp.eq.f32.partialorder %v4696_v62, inf  ;;  %vm734_vm7 = vcmp.eq.f32.partialorder %v4696_v62, 0.0  ;;  %v735_v33 = vand.u32 2147483648, %v4696_v62 }
 0x13e   : > { %3630 = vrsqrt.f32 %v4792_v25  ;;  %v701_v12 = vsel %vm699_vm12, %v700_v29, %v698_v59  ;;  %v705_v57 = vsel %vm704_vm13, %v4624_v61, %v703_v53  ;;  %vm739_vm8 = vcmp.eq.f32.partialorder %v4724_v51, inf  ;;  %v3609_v13 = vpop.eup %3608 }
 0x13f   : > { %3632 = vrsqrt.f32 %v4806_v45  ;;  %v712_v19 = vsel %vm711_vm14, %v4644_v15, %v710_v54  ;;  %v724_v17 = vmul.f32 %v3605_v6, %v4676_v24  ;;  %v1116_v44 = vmul.f32 200.0, %v832_v63  ;;  %v4847_v11 = vpop.eup %3610  ;;  %v3808_v54 = vld [vmem:[%s3997_s24 + $0x48] sm:$0xff] }
 0x140   : > { %3333 = vmatpush3.xpose.msk.msra.mxu0 %vm472_vm2, %v1082_v36  ;;  %v836_v8 = vmul.f32 %v3804_v22, %v4753_v16  ;;  %v719_v2 = vsel %vm718_vm1, %v4661_v27, %v717_v1  ;;  %v731_v60 = vmul.f32 %v3607_v37, %v4696_v62  ;;  %v1117_v50 = vmul.f32 200.0, %v834_v5  ;;  %v3809_v1 = vld [vmem:[%s3997_s24 + $0x50] sm:$0xff] }
 0x141   : > { %v838_v18 = vmul.f32 %v3805_v38, %v4761_v23  ;;  %v3613_v52 = vpop.eup %3612  ;;  %vm741_vm9 = vcmp.eq.f32.partialorder %v4724_v51, 0.0  ;;  %v742_v16 = vand.u32 2147483648, %v4724_v51  ;;  %vm746_vm10 = vcmp.eq.f32.partialorder %v4751_v41, inf }
 0x142   : > { %3634 = vrsqrt.f32 %v4824_v49  ;;  %v4860_v29 = vpop.eup %3614  ;;  %v811_v32 = vadd.f32 2.220446e-16, %v701_v12  ;;  %v708_v23 = vsel %vm706_vm15, %v707_v0, %v705_v57  ;;  %v715_v34 = vsel %vm713_vm0, %v714_v40, %v712_v19  ;;  %v3807_v40 = vld [vmem:[%s3997_s24 + $0x40] sm:$0xff] }
 0x143   : > { %3335 = vmatmul.mubr.msk.f32.vlgmr.msra.gmra.mxu0 %vm472_vm2, %v1114_v58  ;;  %3636 = vrsqrt.f32 %v4845_v31  ;;  %v4874_v36 = vpop.eup %3616  ;;  %v722_v39 = vsel %vm720_vm3, %v721_v43, %v719_v2  ;;  %v726_v61 = vsel %vm725_vm4, %v4676_v24, %v724_v17  ;;  %v1118_v0 = vmul.f32 200.0, %v836_v8  ;;  %v3810_v17 = vld [vmem:[%s3997_s24 + $0x58] sm:$0xff]  ;;  %v3811_v2 = vld [vmem:[%s3997_s24 + $0x60] sm:$0xff] }
 0x144   : > { %3337 = vmatprep.mubr.msk.f32.mxu0 %vm472_vm2, %v1115_v30  ;;  %v840_v15 = vmul.f32 %v3806_v47, %v4769_v28  ;;  %v4883_v10 = vpop.eup %3618  ;;  %v733_v48 = vsel %vm732_vm6, %v4696_v62, %v731_v60  ;;  %v738_v3 = vmul.f32 %v3613_v52, %v4724_v51  ;;  %vm748_vm11 = vcmp.eq.f32.partialorder %v4751_v41, 0.0 }
 0x145   : > { %v1119_v27 = vmul.f32 200.0, %v838_v18  ;;  %v842_v46 = vmul.f32 %v3807_v40, %v4785_v9  ;;  %v3621_v55 = vpop.eup %3620  ;;  %v812_v4 = vadd.f32 2.220446e-16, %v708_v23  ;;  %v749_v14 = vand.u32 2147483648, %v4751_v41  ;;  %v3812_v23 = vld [vmem:[%s3997_s24 + $0x68] sm:$0xff] }
 0x146   : > { %vm753_vm12 = vcmp.eq.f32.partialorder %v4774_v20, inf  ;;  %3638 = vrsqrt.f32 %v4872_v35  ;;  %v4896_v28 = vpop.eup %3622  ;;  %v813_v42 = vadd.f32 2.220446e-16, %v715_v34  ;;  %v729_v9 = vsel %vm727_vm5, %v728_v56, %v726_v61  ;;  %v3813_v61 = vld [vmem:[%s3997_s24 + $0x70] sm:$0xff] }
 0x147   : > { %3338 = vmatmul.mubr.msk.f32.gmra.mxu0 %vm472_vm2, %v1116_v44  ;;  %3640 = vrcp.f32 %v811_v32  ;;  %vm755_vm13 = vcmp.eq.f32.partialorder %v4774_v20, 0.0  ;;  %v3625_v43 = vpop.eup %3624  ;;  %v814_v53 = vadd.f32 2.220446e-16, %v722_v39  ;;  %v736_v58 = vsel %vm734_vm7, %v735_v33, %v733_v48 }
 0x148   : > { %3340 = vmatprep.mubr.msk.f32.mxu0 %vm472_vm2, %v1117_v50  ;;  %v1120_v59 = vmul.f32 200.0, %v840_v15  ;;  %v844_v7 = vmul.f32 %v3808_v54, %v4808_v21  ;;  %v4908_v63 = vpop.eup %3626  ;;  %v740_v24 = vsel %vm739_vm8, %v4724_v51, %v738_v3  ;;  %v745_v56 = vmul.f32 %v3621_v55, %v4751_v41 }
 0x149   : > { %v1121_v6 = vmul.f32 200.0, %v842_v46  ;;  %v846_v30 = vmul.f32 %v3809_v1, %v3609_v13  ;;  %v4915_v26 = vpop.eup %3628  ;;  %3642 = vrcp.f32 %v812_v4  ;;  %v815_v62 = vadd.f32 2.220446e-16, %v729_v9  ;;  %v3814_v46 = vld [vmem:[%s3997_s24 + $0x78] sm:$0xff]  ;;  %v3815_v9 = vld [vmem:[%s3997_s24 + $0x80] sm:$0xff]  ;;  %v3817_v1 = vld [vmem:[%s3997_s24 + $0x90] sm:$0xff] }
 0x14a   : > { %v756_v5 = vand.u32 2147483648, %v4774_v20  ;;  %vm760_vm14 = vcmp.eq.f32.partialorder %v4792_v25, inf  ;;  %3644 = vrcp.f32 %v813_v42  ;;  %v816_v37 = vadd.f32 2.220446e-16, %v736_v58 }
 0x14b   : > { %3341 = vmatmul.mubr.msk.f32.gmra.mxu0 %vm472_vm2, %v1118_v0  ;;  %v3631_v21 = vpop.eup %3630  ;;  %v752_v33 = vmul.f32 %v3625_v43, %v4774_v20  ;;  %vm762_vm15 = vcmp.eq.f32.partialorder %v4792_v25, 0.0  ;;  %v743_v57 = vsel %vm741_vm9, %v742_v16, %v740_v24  ;;  %v763_v13 = vand.u32 2147483648, %v4792_v25 }
 0x14c   : > { %3343 = vmatprep.mubr.msk.f32.mxu0 %vm472_vm2, %v1119_v27  ;;  %v3633_v12 = vpop.eup %3632  ;;  %v1122_v19 = vmul.f32 200.0, %v844_v7  ;;  %v848_v44 = vmul.f32 %v3810_v17, %v4847_v11  ;;  %3646 = vrcp.f32 %v814_v53  ;;  %v747_v22 = vsel %vm746_vm10, %v4751_v41, %v745_v56  ;;  %v3816_v56 = vld [vmem:[%s3997_s24 + $0x88] sm:$0xff] }
 0x14d   : > { %v1123_v8 = vmul.f32 200.0, %v846_v30  ;;  %v850_v60 = vmul.f32 %v3811_v2, %v4860_v29  ;;  %3648 = vrcp.f32 %v815_v62  ;;  %v759_v51 = vmul.f32 %v3631_v21, %v4792_v25 }
 0x14e   : > { %vm767_vm0 = vcmp.eq.f32.partialorder %v4806_v45, inf  ;;  %vm769_vm1 = vcmp.eq.f32.partialorder %v4806_v45, 0.0  ;;  %3650 = vrcp.f32 %v816_v37  ;;  %v817_v50 = vadd.f32 2.220446e-16, %v743_v57  ;;  %v3818_v57 = vld [vmem:[%s3997_s24 + $0x98] sm:$0xff] }
 0x14f   : > { %3344 = vmatmul.mubr.msk.f32.gmra.mxu0 %vm472_vm2, %v1120_v59  ;;  %v3635_v11 = vpop.eup %3634  ;;  %v754_v38 = vsel %vm753_vm12, %v4774_v20, %v752_v33  ;;  %v766_v18 = vmul.f32 %v3633_v12, %v4806_v45  ;;  %v750_v16 = vsel %vm748_vm11, %v749_v14, %v747_v22  ;;  %v770_v29 = vand.u32 2147483648, %v4806_v45 }
 0x150   : > { %3346 = vmatprep.mubr.msk.f32.mxu0 %vm472_vm2, %v1121_v6  ;;  %v3637_v52 = vpop.eup %3636  ;;  %v1124_v32 = vmul.f32 200.0, %v848_v44  ;;  %v852_v34 = vmul.f32 %v3812_v23, %v4874_v36  ;;  %vm774_vm3 = vcmp.eq.f32.partialorder %v4824_v49, inf  ;;  %vm776_vm4 = vcmp.eq.f32.partialorder %v4824_v49, 0.0 }
 0x151   : > { %v1125_v39 = vmul.f32 200.0, %v850_v60  ;;  %v854_v0 = vmul.f32 %v3813_v61, %v4883_v10  ;;  %v757_v47 = vsel %vm755_vm13, %v756_v5, %v754_v38  ;;  %v761_v41 = vsel %vm760_vm14, %v4792_v25, %v759_v51 }
 0x152   : > { %v773_v15 = vmul.f32 %v3635_v11, %v4824_v49  ;;  %v777_v36 = vand.u32 2147483648, %v4824_v49  ;;  %3652 = vrcp.f32 %v817_v50  ;;  %v818_v3 = vadd.f32 2.220446e-16, %v750_v16  ;;  %v3820_v11 = vld [vmem:[%s3997_s24 + $0xa8] sm:$0xff] }
 0x153   : > { %3347 = vmatmul.mubr.msk.f32.gmra.mxu0 %vm472_vm2, %v1122_v19  ;;  %v3639_v48 = vpop.eup %3638  ;;  %v768_v20 = vsel %vm767_vm0, %v4806_v45, %v766_v18  ;;  %v780_v10 = vmul.f32 %v3637_v52, %v4845_v31  ;;  %vm781_vm5 = vcmp.eq.f32.partialorder %v4845_v31, inf  ;;  %vm783_vm6 = vcmp.eq.f32.partialorder %v4845_v31, 0.0  ;;  %v3821_v18 = vld [vmem:[%s3997_s24 + $0xb0] sm:$0xff] }
 0x154   : > { %3349 = vmatprep.mubr.msk.f32.mxu0 %vm472_vm2, %v1123_v8  ;;  %v3641_v27 = vpop.eup %3640  ;;  %v1126_v40 = vmul.f32 200.0, %v852_v34  ;;  %v856_v55 = vmul.f32 %v3814_v46, %v4896_v28  ;;  %v819_v4 = vadd.f32 2.220446e-16, %v757_v47  ;;  %v764_v14 = vsel %vm762_vm15, %v763_v13, %v761_v41  ;;  %v3819_v8 = vld [vmem:[%s3997_s24 + $0xa0] sm:$0xff]  ;;  %v3824_v41 = vld [vmem:[%s3997_s24 + $0xc8] sm:$0xff] }
 0x155   : > { %v1127_v42 = vmul.f32 200.0, %v854_v0  ;;  %v858_v43 = vmul.f32 %v3815_v9, %v4908_v63  ;;  %v771_v53 = vsel %vm769_vm1, %v770_v29, %v768_v20  ;;  %v775_v58 = vsel %vm774_vm3, %v4824_v49, %v773_v15 }
 0x156   : > { %v784_v59 = vand.u32 2147483648, %v4845_v31  ;;  %v787_v28 = vmul.f32 %v3639_v48, %v4872_v35  ;;  %v3643_v25 = vpop.eup %3642  ;;  %3654 = vrcp.f32 %v818_v3  ;;  %v782_v54 = vsel %vm781_vm5, %v4845_v31, %v780_v10  ;;  %v3825_v3 = vld [vmem:[%s3997_s24 + $0xd0] sm:$0xff] }
 0x157   : > { %3350 = vmatmul.mubr.msk.f32.gmra.mxu0 %vm472_vm2, %v1124_v32  ;;  %vm788_vm7 = vcmp.eq.f32.partialorder %v4872_v35, inf  ;;  %v791_v45 = vand.u32 2147483648, %v4872_v35  ;;  %v3645_v7 = vpop.eup %3644  ;;  %v820_v63 = vadd.f32 2.220446e-16, %v764_v14  ;;  %v1128_v24 = vmul.f32 200.0, %v856_v55  ;;  %v3822_v32 = vld [vmem:[%s3997_s24 + $0xb8] sm:$0xff]  ;;  %v3827_v14 = vld [vmem:[%s3997_s24 + $0xe0] sm:$0xff] }
 0x158   : > { %3352 = vmatprep.mubr.msk.f32.mxu0 %vm472_vm2, %v1125_v39  ;;  %v860_v6 = vmul.f32 %v3816_v56, %v4915_v26  ;;  %v862_v30 = vmul.f32 %v3817_v1, %v3641_v27  ;;  %3656 = vrcp.f32 %v819_v4  ;;  %v821_v62 = vadd.f32 2.220446e-16, %v771_v53  ;;  %v3823_v39 = vld [vmem:[%s3997_s24 + $0xc0] sm:$0xff]  ;;  %v3828_v53 = vld [vmem:[%s3997_s24 + $0xe8] sm:$0xff] }
 0x159   : > { %v778_v5 = vsel %vm776_vm4, %v777_v36, %v775_v58  ;;  %v1129_v21 = vmul.f32 200.0, %v858_v43  ;;  %v3647_v37 = vpop.eup %3646  ;;  %v785_v33 = vsel %vm783_vm6, %v784_v59, %v782_v54  ;;  %v789_v12 = vsel %vm788_vm7, %v4872_v35, %v787_v28 }
 0x15a   : > { %vm790_vm8 = vcmp.eq.f32.partialorder %v4872_v35, 0.0  ;;  %v3649_v26 = vpop.eup %3648  ;;  %v864_v49 = vmul.f32 %v3818_v57, %v3643_v25  ;;  %3658 = vrcp.f32 %v820_v63  ;;  %v822_v19 = vadd.f32 2.220446e-16, %v778_v5  ;;  %v3829_v25 = vld [vmem:[%s3997_s24 + $0xf0] sm:$0xff] }
 0x15b   : > { %3353 = vmatmul.mubr.msk.f32.gmra.mxu0 %vm472_vm2, %v1126_v40  ;;  %v3651_v13 = vpop.eup %3650  ;;  %v1130_v31 = vmul.f32 200.0, %v860_v6  ;;  %v1131_v17 = vmul.f32 200.0, %v862_v30  ;;  %3660 = vrcp.f32 %v821_v62  ;;  %v823_v44 = vadd.f32 2.220446e-16, %v785_v33  ;;  %v3826_v40 = vld [vmem:[%s3997_s24 + $0xd8] sm:$0xff] }
 0x15c   : > { %3355 = vmatprep.mubr.msk.f32.mxu0 %vm472_vm2, %v1127_v42  ;;  %v792_v22 = vsel %vm790_vm8, %v791_v45, %v789_v12  ;;  %v866_v2 = vmul.f32 %v3819_v8, %v3645_v7  ;;  %3662 = vrcp.f32 %v822_v19  ;;  %v1132_v51 = vmul.f32 200.0, %v864_v49  ;;  %v3830_v7 = vld [vmem:[%s3997_s24 + $0xf8] sm:$0xff] }
 0x15d   : > { %v824_v60 = vadd.f32 2.220446e-16, %v792_v22  ;;  %v868_v50 = vmul.f32 %v3820_v11, %v3647_v37  ;;  %3664 = vrcp.f32 %v823_v44  ;;  %v870_v52 = vmul.f32 %v3821_v18, %v3649_v26 }
 0x15e   : > { %v1133_v38 = vmul.f32 200.0, %v866_v2  ;;  %v872_v23 = vmul.f32 %v3822_v32, %v3651_v13  ;;  %v3939_v33 = vmov 0   ;;  %vm2154_vm9 = vcmask 7168  }
 0x15f   : > { %3356 = vmatmul.mubr.msk.f32.gmra.mxu0 %vm472_vm2, %v1128_v24  ;;  %v3653_v35 = vpop.eup %3652  ;;  %3666 = vrcp.f32 %v824_v60  ;;  %v1134_v29 = vmul.f32 200.0, %v868_v50  ;;  %v1135_v34 = vmul.f32 200.0, %v870_v52  ;;  %3474 = vset.pattern.permute.xlu0 %v3939_v33 }
 0x160   : > { %3358 = vmatprep.mubr.msk.f32.mxu0 %vm472_vm2, %v1129_v21  ;;  %v874_v61 = vmul.f32 %v3823_v39, %v3653_v35  ;;  %v1136_v47 = vmul.f32 200.0, %v872_v23  ;;  %3475 = vset.pattern.permute.xlu1 %v3939_v33  ;;  %v2201_v39 = vld [vmem:[%s4012_s8 + $0x70] sm:$0xff]  ;;  %v5171_v33 = vld [vmem:[#allocation2 + $0x38] sm:$0xff] }
 0x162   : > { %v1137_v48 = vmul.f32 200.0, %v874_v61  ;;  %v2202_v61 = vld [vmem:[%s4012_s8 + $0x78] sm:$0xff] }
 0x163   : > { %3359 = vmatmul.mubr.msk.f32.gmra.mxu0 %vm472_vm2, %v1130_v31  ;;  %v3655_v16 = vpop.eup %3654 }
 0x164   : > { %3361 = vmatprep.mubr.msk.f32.mxu0 %vm472_vm2, %v1131_v17  ;;  %v876_v15 = vmul.f32 %v3824_v41, %v3655_v16  ;;  %v2200_v41 = vld [vmem:[%s4012_s8 + $0x68] sm:$0xff] }
 0x165   : > { %v3657_v0 = vpop.eup %3656 }
 0x166   : > { %v878_v20 = vmul.f32 %v3825_v3, %v3657_v0  ;;  %v1138_v27 = vmul.f32 200.0, %v876_v15  ;;  %v2226_v0 = vpack.c.bf16 %v2202_v61, %v2201_v39  ;;  %v5127_v15 = vld [vmem:[#allocation2 + $0x8] sm:$0xff]  ;;  %v5129_v3 = vld [vmem:[#allocation2] sm:$0xff] }
 0x167   : > { %3362 = vmatmul.mubr.msk.f32.gmra.mxu0 %vm472_vm2, %v1132_v51  ;;  %v3659_v36 = vpop.eup %3658 }
 0x168   : > { %3364 = vmatprep.mubr.msk.f32.mxu0 %vm472_vm2, %v1133_v38  ;;  %v3661_v10 = vpop.eup %3660  ;;  %v880_v46 = vmul.f32 %v3826_v40, %v3659_v36  ;;  %v1139_v4 = vmul.f32 200.0, %v878_v20  ;;  %3382 = vmatprep.subr.bf16.mxu1 %v2226_v0 }
 0x169   : > { %v3663_v55 = vpop.eup %3662  ;;  %v882_v42 = vmul.f32 %v3827_v14, %v3661_v10  ;;  %3383 = vmatpush3.bf16.msra.mxu1 %v2226_v0  ;;  %v2197_v10 = vld [vmem:[%s4012_s8 + $0x50] sm:$0xff] }
 0x16a   : > { %v3665_v9 = vpop.eup %3664  ;;  %v1140_v43 = vmul.f32 200.0, %v880_v46  ;;  %v884_v58 = vmul.f32 %v3828_v53, %v3663_v55  ;;  %v5136_v46 = vld [vmem:[#allocation2 + $0x18] sm:$0xff]  ;;  %v2196_v53 = vld [vmem:[%s4012_s8 + $0x48] sm:$0xff] }
 0x16b   : > { %3365 = vmatmul.mubr.msk.f32.gmra.mxu0 %vm472_vm2, %v1134_v29  ;;  %v1141_v28 = vmul.f32 200.0, %v882_v42  ;;  %v886_v54 = vmul.f32 %v3829_v25, %v3665_v9  ;;  %v5144_v42 = vld [vmem:[#allocation2 + $0x10] sm:$0xff] }
 0x16c   : > { %3367 = vmatprep.mubr.msk.f32.mxu0 %vm472_vm2, %v1135_v34  ;;  %v3667_v59 = vpop.eup %3666  ;;  %v1142_v45 = vmul.f32 200.0, %v884_v58 }
 0x16d   : > { %v888_v63 = vmul.f32 %v3830_v7, %v3667_v59  ;;  %v1143_v24 = vmul.f32 200.0, %v886_v54  ;;  %v5154_v59 = vld [vmem:[#allocation2 + $0x28] sm:$0xff] }
 0x16f   : > { %3368 = vmatmul.mubr.msk.f32.gmra.mxu0 %vm472_vm2, %v1136_v47  ;;  %v1144_v56 = vmul.f32 200.0, %v888_v63  ;;  %v2199_v47 = vld [vmem:[%s4012_s8 + $0x60] sm:$0xff]  ;;  %v2193_v63 = vld [vmem:[%s4012_s8 + $0x30] sm:$0xff] }
 0x170   : > { %3370 = vmatprep.mubr.msk.f32.mxu0 %vm472_vm2, %v1137_v48  ;;  %v2225_v36 = vpack.c.bf16 %v2200_v41, %v2199_v47  ;;  %v5179_v47 = vld [vmem:[#allocation2 + $0x30] sm:$0xff] }
 0x172   : > { %3384 = vmatprep.subr.bf16.mxu1 %v2225_v36 }
 0x173   : > { %3371 = vmatmul.mubr.msk.f32.gmra.mxu0 %vm472_vm2, %v1138_v27  ;;  %3385 = vmatpush3.bf16.msra.mxu1 %v2225_v36  ;;  %v2198_v27 = vld [vmem:[%s4012_s8 + $0x58] sm:$0xff]  ;;  %v2191_v36 = vld [vmem:[%s4012_s8 + $0x20] sm:$0xff] }
 0x174   : > { %3373 = vmatprep.mubr.msk.f32.mxu0 %vm472_vm2, %v1139_v4  ;;  %v2224_v55 = vpack.c.bf16 %v2198_v27, %v2197_v10  ;;  %v5188_v27 = vld [vmem:[#allocation2 + $0x48] sm:$0xff] }
 0x176   : > { %3386 = vmatprep.subr.bf16.mxu1 %v2224_v55 }
 0x177   : > { %3374 = vmatmul.mubr.msk.f32.gmra.mxu0 %vm472_vm2, %v1140_v43  ;;  %3387 = vmatpush3.bf16.msra.mxu1 %v2224_v55  ;;  %v2195_v43 = vld [vmem:[%s4012_s8 + $0x40] sm:$0xff] }
 0x178   : > { %3376 = vmatprep.mubr.msk.f32.mxu0 %vm472_vm2, %v1141_v28  ;;  %v2223_v28 = vpack.c.bf16 %v2196_v53, %v2195_v43  ;;  %v5196_v43 = vld [vmem:[#allocation2 + $0x40] sm:$0xff] }
 0x17a   : > { %3388 = vmatprep.subr.bf16.mxu1 %v2223_v28 }
 0x17b   : > { %3377 = vmatmul.mubr.msk.f32.gmra.mxu0 %vm472_vm2, %v1142_v45  ;;  %v5162_v45 = vld [vmem:[#allocation2 + $0x20] sm:$0xff]  ;;  %3389 = vmatpush3.bf16.msra.mxu1 %v2223_v28  ;;  %v2190_v28 = vld [vmem:[%s4012_s8 + $0x18] sm:$0xff] }
 0x17c   : > { %3379 = vmatprep.mubr.msk.f32.mxu0 %vm472_vm2, %v1143_v24  ;;  %v2194_v24 = vld [vmem:[%s4012_s8 + $0x38] sm:$0xff] }
 0x17d   : > { %v2222_v39 = vpack.c.bf16 %v2194_v24, %v2193_v63  ;;  %v5205_v63 = vld [vmem:[#allocation2 + $0x58] sm:$0xff] }
 0x17f   : > { %3380 = vmatmul.mubr.msk.f32.gmra.mxu0 %vm472_vm2, %v1144_v56  ;;  %3390 = vmatprep.subr.bf16.mxu1 %v2222_v39 }
 0x180   : > { %3391 = vmatpush3.bf16.msra.mxu1 %v2222_v39 }
 0x203   : > { %v5027_v6 = vpop.f32.mrf.mxu0 }
 0x204   : > { %1548 = vmax.xlane.f32.xlu1 %v5027_v6 }
 0x205   : > { %v5030_v1 = vpop.f32.mrf.mxu0 }
 0x206   : > { %1546 = vmax.xlane.f32.xlu0 %v5030_v1 }
 0x207   : > { %v5033_v30 = vpop.f32.mrf.mxu0 }
 0x208   : > { %5905 = vst [vmem:[#allocation5_spill] sm:$0xff] %v5033_v30  ;;  %1552 = vmax.xlane.f32.xlu1 %v5033_v30 }
 0x209   : > { %v5036_v62 = vpop.f32.mrf.mxu0 }
 0x20a   : > { %5906 = vst [vmem:[#allocation6_spill] sm:$0xff] %v5036_v62  ;;  %1550 = vmax.xlane.f32.xlu0 %v5036_v62  ;;  %v5377_v62 = vld [vmem:[#allocation2 + $0xf8] sm:$0xff] }
 0x20b   : > { %v5039_v5 = vpop.f32.mrf.mxu0 }
 0x20c   : > { %5907 = vst [vmem:[#allocation7_spill] sm:$0xff] %v5039_v5  ;;  %1556 = vmax.xlane.f32.xlu1 %v5039_v5 }
 0x20d   : > { %v5042_v21 = vpop.f32.mrf.mxu0 }
 0x20e   : > { %5908 = vst [vmem:[#allocation8_spill] sm:$0xff] %v5042_v21  ;;  %1554 = vmax.xlane.f32.xlu0 %v5042_v21 }
 0x20f   : > { %v5045_v37 = vpop.f32.mrf.mxu0 }
 0x210   : > { %5909 = vst [vmem:[#allocation9_spill] sm:$0xff] %v5045_v37  ;;  %1560 = vmax.xlane.f32.xlu1 %v5045_v37  ;;  %v5357_v37 = vld [vmem:[#allocation2 + $0xe8] sm:$0xff] }
 0x211   : > { %v5048_v12 = vpop.f32.mrf.mxu0 }
 0x212   : > { %5910 = vst [vmem:[#allocation10_spill] sm:$0xff] %v5048_v12  ;;  %1558 = vmax.xlane.f32.xlu0 %v5048_v12 }
 0x213   : > { %v5051_v26 = vpop.f32.mrf.mxu0 }
 0x214   : > { %5911 = vst [vmem:[#allocation11_spill] sm:$0xff] %v5051_v26  ;;  %1564 = vmax.xlane.f32.xlu1 %v5051_v26 }
 0x215   : > { %v5054_v57 = vpop.f32.mrf.mxu0 }
 0x216   : > { %5912 = vst [vmem:[#allocation12_spill] sm:$0xff] %v5054_v57  ;;  %1562 = vmax.xlane.f32.xlu0 %v5054_v57 }
 0x217   : > { %v5057_v49 = vpop.f32.mrf.mxu0 }
 0x218   : > { %5913 = vst [vmem:[#allocation13_spill] sm:$0xff] %v5057_v49  ;;  %1568 = vmax.xlane.f32.xlu1 %v5057_v49 }
 0x219   : > { %v5060_v13 = vpop.f32.mrf.mxu0 }
 0x21a   : > { %5914 = vst [vmem:[#allocation14_spill] sm:$0xff] %v5060_v13  ;;  %1566 = vmax.xlane.f32.xlu0 %v5060_v13  ;;  %v5321_v13 = vld [vmem:[#allocation2 + $0xc8] sm:$0xff] }
 0x21b   : > { %v5063_v19 = vpop.f32.mrf.mxu0 }
 0x21c   : > { %5915 = vst [vmem:[#allocation15_spill] sm:$0xff] %v5063_v19  ;;  %1572 = vmax.xlane.f32.xlu1 %v5063_v19 }
 0x21d   : > { %v5066_v31 = vpop.f32.mrf.mxu0 }
 0x21e   : > { %5916 = vst [vmem:[#allocation16_spill] sm:$0xff] %v5066_v31  ;;  %1570 = vmax.xlane.f32.xlu0 %v5066_v31 }
 0x21f   : > { %v5069_v17 = vpop.f32.mrf.mxu0 }
 0x220   : > { %5917 = vst [vmem:[#allocation17_spill] sm:$0xff] %v5069_v17  ;;  %1576 = vmax.xlane.f32.xlu1 %v5069_v17 }
 0x221   : > { %v5072_v44 = vpop.f32.mrf.mxu0 }
 0x222   : > { %5918 = vst [vmem:[#allocation18_spill] sm:$0xff] %v5072_v44  ;;  %1574 = vmax.xlane.f32.xlu0 %v5072_v44 }
 0x223   : > { %v5075_v22 = vpop.f32.mrf.mxu0 }
 0x224   : > { %5919 = vst [vmem:[#allocation19_spill] sm:$0xff] %v5075_v22  ;;  %1580 = vmax.xlane.f32.xlu1 %v5075_v22  ;;  %v5312_v22 = vld [vmem:[#allocation2 + $0xb0] sm:$0xff] }
 0x225   : > { %v5078_v8 = vpop.f32.mrf.mxu0 }
 0x226   : > { %5920 = vst [vmem:[#allocation20_spill] sm:$0xff] %v5078_v8  ;;  %1578 = vmax.xlane.f32.xlu0 %v5078_v8 }
 0x227   : > { %v5081_v2 = vpop.f32.mrf.mxu0 }
 0x228   : > { %5921 = vst [vmem:[#allocation21_spill] sm:$0xff] %v5081_v2  ;;  %1584 = vmax.xlane.f32.xlu1 %v5081_v2  ;;  %v5303_v2 = vld [vmem:[#allocation2 + $0xb8] sm:$0xff] }
 0x229   : > { %v5084_v35 = vpop.f32.mrf.mxu0 }
 0x22a   : > { %5922 = vst [vmem:[#allocation22_spill] sm:$0xff] %v5084_v35  ;;  %1582 = vmax.xlane.f32.xlu0 %v5084_v35 }
 0x22b   : > { %v5087_v60 = vpop.f32.mrf.mxu0 }
 0x22c   : > { %5923 = vst [vmem:[#allocation23_spill] sm:$0xff] %v5087_v60  ;;  %1588 = vmax.xlane.f32.xlu1 %v5087_v60  ;;  %v5296_v60 = vld [vmem:[#allocation2 + $0xa0] sm:$0xff] }
 0x22d   : > { %v5090_v51 = vpop.f32.mrf.mxu0 }
 0x22e   : > { %5924 = vst [vmem:[#allocation24_spill] sm:$0xff] %v5090_v51  ;;  %1586 = vmax.xlane.f32.xlu0 %v5090_v51 }
 0x22f   : > { %v5093_v11 = vpop.f32.mrf.mxu0 }
 0x230   : > { %5925 = vst [vmem:[#allocation25_spill] sm:$0xff] %v5093_v11  ;;  %1592 = vmax.xlane.f32.xlu1 %v5093_v11  ;;  %v5287_v11 = vld [vmem:[#allocation2 + $0xa8] sm:$0xff] }
 0x231   : > { %v5096_v50 = vpop.f32.mrf.mxu0 }
 0x232   : > { %5926 = vst [vmem:[#allocation26_spill] sm:$0xff] %v5096_v50  ;;  %1590 = vmax.xlane.f32.xlu0 %v5096_v50 }
 0x233   : > { %v5099_v38 = vpop.f32.mrf.mxu0 }
 0x234   : > { %5927 = vst [vmem:[#allocation27_spill] sm:$0xff] %v5099_v38  ;;  %1596 = vmax.xlane.f32.xlu1 %v5099_v38  ;;  %v5280_v38 = vld [vmem:[#allocation2 + $0x90] sm:$0xff] }
 0x235   : > { %v5102_v18 = vpop.f32.mrf.mxu0 }
 0x236   : > { %5928 = vst [vmem:[#allocation28_spill] sm:$0xff] %v5102_v18  ;;  %1594 = vmax.xlane.f32.xlu0 %v5102_v18 }
 0x237   : > { %v5105_v52 = vpop.f32.mrf.mxu0 }
 0x238   : > { %5929 = vst [vmem:[#allocation29_spill] sm:$0xff] %v5105_v52  ;;  %1600 = vmax.xlane.f32.xlu1 %v5105_v52  ;;  %v5271_v52 = vld [vmem:[#allocation2 + $0x98] sm:$0xff] }
 0x239   : > { %v5108_v16 = vpop.f32.mrf.mxu0 }
 0x23a   : > { %5930 = vst [vmem:[#allocation30_spill] sm:$0xff] %v5108_v16  ;;  %1598 = vmax.xlane.f32.xlu0 %v5108_v16 }
 0x23b   : > { %v5111_v29 = vpop.f32.mrf.mxu0 }
 0x23c   : > { %5931 = vst [vmem:[#allocation31_spill] sm:$0xff] %v5111_v29  ;;  %1604 = vmax.xlane.f32.xlu1 %v5111_v29  ;;  %v5264_v29 = vld [vmem:[#allocation2 + $0x80] sm:$0xff] }
 0x23d   : > { %v5114_v32 = vpop.f32.mrf.mxu0 }
 0x23e   : > { %5932 = vst [vmem:[#allocation32_spill] sm:$0xff] %v5114_v32  ;;  %1602 = vmax.xlane.f32.xlu0 %v5114_v32  ;;  %v5248_v32 = vld [vmem:[#allocation2 + $0x70] sm:$0xff] }
 0x23f   : > { %v5117_v23 = vpop.f32.mrf.mxu0 }
 0x240   : > { %5933 = vst [vmem:[#allocation33_spill] sm:$0xff] %v5117_v23  ;;  %1608 = vmax.xlane.f32.xlu1 %v5117_v23  ;;  %v5255_v23 = vld [vmem:[#allocation2 + $0x88] sm:$0xff] }
 0x241   : > { %v5120_v34 = vpop.f32.mrf.mxu0 }
 0x242   : > { %5934 = vst [vmem:[#allocation34_spill] sm:$0xff] %v5120_v34  ;;  %1606 = vmax.xlane.f32.xlu0 %v5120_v34 }
 0x28d   : > { %v1549_v48 = vpop.xlane.xlu1 %1548 }
 0x28e   : > { %v5132_v20 = vmax.f32 %v5127_v15, %v1549_v48  ;;  %v2192_v48 = vld [vmem:[%s4012_s8 + $0x28] sm:$0xff] }
 0x28f   : > { %v1547_v40 = vpop.xlane.xlu0 %1546 }
 0x290   : > { %2677 = vst.msk [vmem:[#allocation2 + $0x8] sm:$0xff] %vm2154_vm9, %v5132_v20  ;;  %v5141_v4 = vmax.f32 %v5129_v3, %v1547_v40  ;;  %1745 = vperm.xlu1 %3475, %v5132_v20   ;;  %v2221_v40 = vpack.c.bf16 %v2192_v48, %v2191_v36  ;;  %v2187_v48 = vld [vmem:[%s4012_s8] sm:$0xff] }
 0x291   : > { %v1553_v14 = vpop.xlane.xlu1 %1552 }
 0x292   : > { %2676 = vst.msk [vmem:[#allocation2] sm:$0xff] %vm2154_vm9, %v5141_v4  ;;  %v5149_v9 = vmax.f32 %v5136_v46, %v1553_v14  ;;  %1740 = vperm.xlu0 %3474, %v5141_v4   ;;  %3392 = vmatprep.subr.bf16.mxu1 %v2221_v40 }
 0x293   : > { %v1551_v58 = vpop.xlane.xlu0 %1550  ;;  %3393 = vmatpush3.bf16.msra.mxu1 %v2221_v40 }
 0x294   : > { %2679 = vst.msk [vmem:[#allocation2 + $0x18] sm:$0xff] %vm2154_vm9, %v5149_v9  ;;  %v5159_v25 = vmax.f32 %v5144_v42, %v1551_v58  ;;  %1755 = vperm.xlu1 %3475, %v5149_v9   ;;  %v2189_v58 = vld [vmem:[%s4012_s8 + $0x10] sm:$0xff] }
 0x295   : > { %v1557_v54 = vpop.xlane.xlu1 %1556  ;;  %v2220_v24 = vpack.c.bf16 %v2190_v28, %v2189_v58 }
 0x296   : > { %2678 = vst.msk [vmem:[#allocation2 + $0x10] sm:$0xff] %vm2154_vm9, %v5159_v25  ;;  %v5167_v7 = vmax.f32 %v5154_v59, %v1557_v54 }
 0x297   : > { %v1555_v56 = vpop.xlane.xlu0 %1554  ;;  %3394 = vmatprep.subr.bf16.mxu1 %v2220_v24 }
 0x298   : > { %2681 = vst.msk [vmem:[#allocation2 + $0x28] sm:$0xff] %vm2154_vm9, %v5167_v7  ;;  %v5176_v61 = vmax.f32 %v5162_v45, %v1555_v56  ;;  %1750 = vperm.xlu1 %3475, %v5159_v25   ;;  %3395 = vmatpush3.bf16.msra.mxu1 %v2220_v24 }
 0x299   : > { %v1561_v0 = vpop.xlane.xlu1 %1560 }
 0x29a   : > { %2680 = vst.msk [vmem:[#allocation2 + $0x20] sm:$0xff] %vm2154_vm9, %v5176_v61  ;;  %v5184_v41 = vmax.f32 %v5171_v33, %v1561_v0  ;;  %v5214_v0 = vld [vmem:[#allocation2 + $0x50] sm:$0xff] }
 0x29b   : > { %v1559_v10 = vpop.xlane.xlu0 %1558 }
 0x29c   : > { %2683 = vst.msk [vmem:[#allocation2 + $0x38] sm:$0xff] %vm2154_vm9, %v5184_v41  ;;  %v5193_v55 = vmax.f32 %v5179_v47, %v1559_v10  ;;  %1765 = vperm.xlu1 %3475, %v5167_v7   ;;  %v2188_v10 = vld [vmem:[%s4012_s8 + $0x8] sm:$0xff] }
 0x29d   : > { %v1565_v14 = vpop.xlane.xlu1 %1564  ;;  %v2219_v58 = vpack.c.bf16 %v2188_v10, %v2187_v48  ;;  %v5239_v10 = vld [vmem:[#allocation2 + $0x78] sm:$0xff] }
 0x29e   : > { %2682 = vst.msk [vmem:[#allocation2 + $0x30] sm:$0xff] %vm2154_vm9, %v5193_v55  ;;  %v5201_v53 = vmax.f32 %v5188_v27, %v1565_v14  ;;  %v5223_v14 = vld [vmem:[#allocation2 + $0x68] sm:$0xff] }
 0x29f   : > { %v1563_v54 = vpop.xlane.xlu0 %1562  ;;  %3396 = vmatprep.subr.bf16.mxu1 %v2219_v58 }
 0x2a0   : > { %2685 = vst.msk [vmem:[#allocation2 + $0x48] sm:$0xff] %vm2154_vm9, %v5201_v53  ;;  %v5210_v56 = vmax.f32 %v5196_v43, %v1563_v54  ;;  %1785 = vperm.xlu0 %3474, %v5201_v53   ;;  %1760 = vperm.xlu1 %3475, %v5176_v61  }
 0x2a1   : > { %v1569_v39 = vpop.xlane.xlu1 %1568  ;;  %3397 = vmatpush3.bf16.msra.mxu1 %v2219_v58 }
 0x2a2   : > { %2684 = vst.msk [vmem:[#allocation2 + $0x40] sm:$0xff] %vm2154_vm9, %v5210_v56  ;;  %v5219_v36 = vmax.f32 %v5205_v63, %v1569_v39  ;;  %v5232_v39 = vld [vmem:[#allocation2 + $0x60] sm:$0xff] }
 0x2a3   : > { %v1567_v40 = vpop.xlane.xlu0 %1566 }
 0x2a4   : > { %2687 = vst.msk [vmem:[#allocation2 + $0x58] sm:$0xff] %vm2154_vm9, %v5219_v36  ;;  %v5228_v28 = vmax.f32 %v5214_v0, %v1567_v40  ;;  %1795 = vperm.xlu0 %3474, %v5219_v36   ;;  %1775 = vperm.xlu1 %3475, %v5184_v41  }
 0x2a5   : > { %v1573_v54 = vpop.xlane.xlu1 %1572 }
 0x2a6   : > { %2686 = vst.msk [vmem:[#allocation2 + $0x50] sm:$0xff] %vm2154_vm9, %v5228_v28  ;;  %v5237_v24 = vmax.f32 %v5223_v14, %v1573_v54 }
 0x2a7   : > { %v1571_v48 = vpop.xlane.xlu0 %1570 }
 0x2a8   : > { %2689 = vst.msk [vmem:[#allocation2 + $0x68] sm:$0xff] %vm2154_vm9, %v5237_v24  ;;  %v5244_v40 = vmax.f32 %v5232_v39, %v1571_v48  ;;  %1805 = vperm.xlu0 %3474, %v5237_v24   ;;  %1770 = vperm.xlu1 %3475, %v5193_v55  }
 0x2a9   : > { %v1577_v34 = vpop.xlane.xlu1 %1576 }
 0x2aa   : > { %2688 = vst.msk [vmem:[#allocation2 + $0x60] sm:$0xff] %vm2154_vm9, %v5244_v40  ;;  %v5253_v58 = vmax.f32 %v5239_v10, %v1577_v34 }
 0x2ab   : > { %v1575_v54 = vpop.xlane.xlu0 %1574 }
 0x2ac   : > { %2691 = vst.msk [vmem:[#allocation2 + $0x78] sm:$0xff] %vm2154_vm9, %v5253_v58  ;;  %v5260_v48 = vmax.f32 %v5248_v32, %v1575_v54  ;;  %1815 = vperm.xlu0 %3474, %v5253_v58   ;;  %1780 = vperm.xlu1 %3475, %v5210_v56  }
 0x2ad   : > { %v1581_v16 = vpop.xlane.xlu1 %1580 }
 0x2ae   : > { %2690 = vst.msk [vmem:[#allocation2 + $0x70] sm:$0xff] %vm2154_vm9, %v5260_v48  ;;  %v5269_v34 = vmax.f32 %v5255_v23, %v1581_v16 }
 0x2af   : > { %v1579_v18 = vpop.xlane.xlu0 %1578 }
 0x2b0   : > { %2693 = vst.msk [vmem:[#allocation2 + $0x88] sm:$0xff] %vm2154_vm9, %v5269_v34  ;;  %v5276_v54 = vmax.f32 %v5264_v29, %v1579_v18  ;;  %1825 = vperm.xlu0 %3474, %v5269_v34   ;;  %1790 = vperm.xlu1 %3475, %v5228_v28  }
 0x2b1   : > { %v1585_v50 = vpop.xlane.xlu1 %1584 }
 0x2b2   : > { %2692 = vst.msk [vmem:[#allocation2 + $0x80] sm:$0xff] %vm2154_vm9, %v5276_v54  ;;  %v5285_v16 = vmax.f32 %v5271_v52, %v1585_v50 }
 0x2b3   : > { %v1583_v51 = vpop.xlane.xlu0 %1582 }
 0x2b4   : > { %2695 = vst.msk [vmem:[#allocation2 + $0x98] sm:$0xff] %vm2154_vm9, %v5285_v16  ;;  %v5292_v18 = vmax.f32 %v5280_v38, %v1583_v51  ;;  %1835 = vperm.xlu0 %3474, %v5285_v16   ;;  %1800 = vperm.xlu1 %3475, %v5244_v40  }
 0x2b5   : > { %v1589_v35 = vpop.xlane.xlu1 %1588 }
 0x2b6   : > { %2694 = vst.msk [vmem:[#allocation2 + $0x90] sm:$0xff] %vm2154_vm9, %v5292_v18  ;;  %v5301_v50 = vmax.f32 %v5287_v11, %v1589_v35  ;;  %v1642_v35 = vsub.f32 %v5129_v3, %v5141_v4  ;;  %v5330_v4 = vld [vmem:[#allocation2 + $0xc0] sm:$0xff] }
 0x2b7   : > { %v1587_v8 = vpop.xlane.xlu0 %1586 }
 0x2b8   : > { %2697 = vst.msk [vmem:[#allocation2 + $0xa8] sm:$0xff] %vm2154_vm9, %v5301_v50  ;;  %v5308_v51 = vmax.f32 %v5296_v60, %v1587_v8  ;;  %1845 = vperm.xlu0 %3474, %v5301_v50   ;;  %1810 = vperm.xlu1 %3475, %v5260_v48   ;;  %v1674_v19 = vmul.f32 1.442695, %v1642_v35 }
 0x2b9   : > { %v1593_v44 = vpop.xlane.xlu1 %1592 }
 0x2ba   : > { %2696 = vst.msk [vmem:[#allocation2 + $0xa0] sm:$0xff] %vm2154_vm9, %v5308_v51  ;;  %v5319_v31 = vmax.f32 %v5303_v2, %v1593_v44  ;;  %v1645_v44 = vsub.f32 %v5136_v46, %v5149_v9  ;;  %v5348_v9 = vld [vmem:[#allocation2 + $0xd0] sm:$0xff]  ;;  %3668 = vpow2.f32 %v1674_v19  ;;  %v1643_v19 = vsub.f32 %v5127_v15, %v5132_v20 }
 0x2bb   : > { %v1591_v17 = vpop.xlane.xlu0 %1590 }
 0x2bc   : > { %2699 = vst.msk [vmem:[#allocation2 + $0xb8] sm:$0xff] %vm2154_vm9, %v5319_v31  ;;  %v5326_v8 = vmax.f32 %v5312_v22, %v1591_v17  ;;  %1855 = vperm.xlu0 %3474, %v5319_v31   ;;  %1820 = vperm.xlu1 %3475, %v5276_v54   ;;  %v5339_v17 = vld [vmem:[#allocation2 + $0xd8] sm:$0xff]  ;;  %v1680_v35 = vmul.f32 1.442695, %v1645_v44  ;;  %v1676_v20 = vmul.f32 1.442695, %v1643_v19 }
 0x2bd   : > { %v1597_v3 = vpop.xlane.xlu1 %1596 }
 0x2be   : > { %2698 = vst.msk [vmem:[#allocation2 + $0xb0] sm:$0xff] %vm2154_vm9, %v5326_v8  ;;  %v5337_v57 = vmax.f32 %v5321_v13, %v1597_v3  ;;  %v1647_v3 = vsub.f32 %v5154_v59, %v5167_v7  ;;  %v5368_v7 = vld [vmem:[#allocation2 + $0xe0] sm:$0xff]  ;;  %3670 = vpow2.f32 %v1680_v35  ;;  %v5388_v35 = vld [vmem:[#allocation2 + $0xf0] sm:$0xff] }
 0x2bf   : > { %v1595_v49 = vpop.xlane.xlu0 %1594 }
 0x2c0   : > { %2701 = vst.msk [vmem:[#allocation2 + $0xc8] sm:$0xff] %vm2154_vm9, %v5337_v57  ;;  %v5344_v12 = vmax.f32 %v5330_v4, %v1595_v49  ;;  %1865 = vperm.xlu0 %3474, %v5337_v57   ;;  %1830 = vperm.xlu1 %3475, %v5292_v18   ;;  %v1684_v44 = vmul.f32 1.442695, %v1647_v3 }
 0x2c1   : > { %v1601_v46 = vpop.xlane.xlu1 %1600 }
 0x2c2   : > { %2700 = vst.msk [vmem:[#allocation2 + $0xc0] sm:$0xff] %vm2154_vm9, %v5344_v12  ;;  %v5355_v26 = vmax.f32 %v5339_v17, %v1601_v46  ;;  %v1649_v46 = vsub.f32 %v5171_v33, %v5184_v41  ;;  %v1644_v33 = vsub.f32 %v5144_v42, %v5159_v25  ;;  %3672 = vpow2.f32 %v1684_v44 }
 0x2c3   : > { %v1599_v49 = vpop.xlane.xlu0 %1598  ;;  %3674 = vpow2.f32 %v1676_v20  ;;  %v1653_v44 = vsub.f32 %v5205_v63, %v5219_v36  ;;  %v1655_v63 = vsub.f32 %v5223_v14, %v5237_v24  ;;  %v1652_v24 = vsub.f32 %v5214_v0, %v5228_v28 }
 0x2c4   : > { %2703 = vst.msk [vmem:[#allocation2 + $0xd8] sm:$0xff] %vm2154_vm9, %v5355_v26  ;;  %v5362_v21 = vmax.f32 %v5348_v9, %v1599_v49  ;;  %1875 = vperm.xlu0 %3474, %v5355_v26   ;;  %1840 = vperm.xlu1 %3475, %v5308_v51   ;;  %v1688_v3 = vmul.f32 1.442695, %v1649_v46  ;;  %v1678_v25 = vmul.f32 1.442695, %v1644_v33  ;;  %v1661_v28 = vsub.f32 %v5271_v52, %v5285_v16 }
 0x2c5   : > { %v1605_v59 = vpop.xlane.xlu1 %1604  ;;  %v1658_v16 = vsub.f32 %v5264_v29, %v5276_v54  ;;  %v1667_v54 = vsub.f32 %v5321_v13, %v5337_v57  ;;  %v1664_v13 = vsub.f32 %v5312_v22, %v5326_v8  ;;  %v1666_v22 = vsub.f32 %v5330_v4, %v5344_v12 }
 0x2c6   : > { %2702 = vst.msk [vmem:[#allocation2 + $0xd0] sm:$0xff] %vm2154_vm9, %v5362_v21  ;;  %v5375_v49 = vmax.f32 %v5357_v37, %v1605_v59  ;;  %v1651_v59 = vsub.f32 %v5188_v27, %v5201_v53  ;;  %v1646_v27 = vsub.f32 %v5162_v45, %v5176_v61  ;;  %3676 = vpow2.f32 %v1688_v3 }
 0x2c7   : > { %v1603_v5 = vpop.xlane.xlu0 %1602  ;;  %3678 = vpow2.f32 %v1678_v25  ;;  %v1648_v45 = vsub.f32 %v5179_v47, %v5193_v55  ;;  %v1696_v61 = vmul.f32 1.442695, %v1653_v44  ;;  %v1700_v3 = vmul.f32 1.442695, %v1655_v63 }
 0x2c8   : > { %2705 = vst.msk [vmem:[#allocation2 + $0xe8] sm:$0xff] %vm2154_vm9, %v5375_v49  ;;  %v5382_v15 = vmax.f32 %v5368_v7, %v1603_v5  ;;  %1885 = vperm.xlu0 %3474, %v5375_v49   ;;  %1850 = vperm.xlu1 %3475, %v5326_v8   ;;  %v1692_v53 = vmul.f32 1.442695, %v1651_v59  ;;  %v1682_v20 = vmul.f32 1.442695, %v1646_v27  ;;  %v1657_v47 = vsub.f32 %v5239_v10, %v5253_v58 }
 0x2c9   : > { %v1609_v41 = vpop.xlane.xlu1 %1608  ;;  %v1686_v33 = vmul.f32 1.442695, %v1648_v45  ;;  %v1694_v10 = vmul.f32 1.442695, %v1652_v24  ;;  %v1654_v58 = vsub.f32 %v5232_v39, %v5244_v40  ;;  %v1712_v39 = vmul.f32 1.442695, %v1661_v28 }
 0x2ca   : > { %2704 = vst.msk [vmem:[#allocation2 + $0xe0] sm:$0xff] %vm2154_vm9, %v5382_v15  ;;  %v5395_v5 = vmax.f32 %v5377_v62, %v1609_v41  ;;  %3680 = vpow2.f32 %v1692_v53  ;;  %v1650_v41 = vsub.f32 %v5196_v43, %v5210_v56  ;;  %v1704_v43 = vmul.f32 1.442695, %v1657_v47 }
 0x2cb   : > { %v1607_v30 = vpop.xlane.xlu0 %1606  ;;  %3682 = vpow2.f32 %v1682_v20  ;;  %v1659_v56 = vsub.f32 %v5255_v23, %v5269_v34  ;;  %v1698_v23 = vmul.f32 1.442695, %v1654_v58  ;;  %v1656_v34 = vsub.f32 %v5248_v32, %v5260_v48 }
 0x2cc   : > { %v1673_v19 = vsub.f32 %v5377_v62, %v5395_v5  ;;  %2707 = vst.msk [vmem:[#allocation2 + $0xf8] sm:$0xff] %vm2154_vm9, %v5395_v5  ;;  %v5402_v42 = vmax.f32 %v5388_v35, %v1607_v30  ;;  %1895 = vperm.xlu0 %3474, %v5395_v5   ;;  %1860 = vperm.xlu1 %3475, %v5344_v12   ;;  %v5414_v30 = vpop.eup %3668  ;;  %3684 = vpow2.f32 %v1696_v61  ;;  %v1690_v14 = vmul.f32 1.442695, %v1650_v41 }
 0x2cd   : > { %v5422_v36 = vpop.eup %3670  ;;  %3686 = vpow2.f32 %v1686_v33  ;;  %v1708_v0 = vmul.f32 1.442695, %v1659_v56  ;;  %v1663_v40 = vsub.f32 %v5287_v11, %v5301_v50  ;;  %v1702_v52 = vmul.f32 1.442695, %v1656_v34 }
 0x2ce   : > { %v1672_v46 = vsub.f32 %v5388_v35, %v5402_v42  ;;  %2706 = vst.msk [vmem:[#allocation2 + $0xf0] sm:$0xff] %vm2154_vm9, %v5402_v42  ;;  %3688 = vpow2.f32 %v1700_v3  ;;  %v1665_v48 = vsub.f32 %v5303_v2, %v5319_v31  ;;  %v1706_v11 = vmul.f32 1.442695, %v1658_v16 }
 0x2cf   : > { %v5430_v55 = vpop.eup %3672  ;;  %3690 = vpow2.f32 %v1690_v14  ;;  %v1716_v32 = vmul.f32 1.442695, %v1663_v40  ;;  %v1660_v50 = vsub.f32 %v5280_v38, %v5292_v18  ;;  %v1662_v2 = vsub.f32 %v5296_v60, %v5308_v51 }
 0x2d0   : > { %2261 = vperm.xlu0 %3474, %v5414_v30   ;;  %1870 = vperm.xlu1 %3475, %v5362_v21   ;;  %v5436_v59 = vpop.eup %3674  ;;  %3692 = vpow2.f32 %v1704_v43  ;;  %v1720_v29 = vmul.f32 1.442695, %v1665_v48  ;;  %v1724_v38 = vmul.f32 1.442695, %v1667_v54  ;;  %v1669_v18 = vsub.f32 %v5339_v17, %v5355_v26 }
 0x2d1   : > { %3694 = vpow2.f32 %v1694_v10  ;;  %v1710_v31 = vmul.f32 1.442695, %v1660_v50  ;;  %v1714_v57 = vmul.f32 1.442695, %v1662_v2  ;;  %v1671_v51 = vsub.f32 %v5357_v37, %v5375_v49 }
 0x2d2   : > { %3696 = vpow2.f32 %v1708_v0  ;;  %v1728_v60 = vmul.f32 1.442695, %v1669_v18  ;;  %v1718_v26 = vmul.f32 1.442695, %v1664_v13  ;;  %v1722_v49 = vmul.f32 1.442695, %v1666_v22 }
 0x2d3   : > { %v5440_v25 = vpop.eup %3676  ;;  %3698 = vpow2.f32 %v1698_v23  ;;  %v1732_v8 = vmul.f32 1.442695, %v1671_v51  ;;  %v1668_v43 = vsub.f32 %v5348_v9, %v5362_v21  ;;  %v1670_v10 = vsub.f32 %v5368_v7, %v5382_v15  ;;  %v5937_v18 = vld [vmem:[#allocation7_spill] sm:$0xff] }
 0x2d4   : > { %2276 = vperm.xlu0 %3474, %v5422_v36   ;;  %1880 = vperm.xlu1 %3475, %v5382_v15   ;;  %v5446_v27 = vpop.eup %3678  ;;  %3700 = vpow2.f32 %v1712_v39 }
 0x2d5   : > { %3702 = vpow2.f32 %v1702_v52  ;;  %v1726_v4 = vmul.f32 1.442695, %v1668_v43  ;;  %v1730_v9 = vmul.f32 1.442695, %v1670_v10 }
 0x2d6   : > { %3704 = vpow2.f32 %v1716_v32 }
 0x2d7   : > { %v5450_v53 = vpop.eup %3680  ;;  %3706 = vpow2.f32 %v1706_v11  ;;  %v5935_v11 = vld [vmem:[#allocation5_spill] sm:$0xff] }
 0x2d8   : > { %2286 = vperm.xlu0 %3474, %v5430_v55   ;;  %1890 = vperm.xlu1 %3475, %v5402_v42   ;;  %v5456_v44 = vpop.eup %3682  ;;  %3708 = vpow2.f32 %v1720_v29 }
 0x2d9   : > { %v5460_v20 = vpop.eup %3684  ;;  %3710 = vpow2.f32 %v1710_v31  ;;  %v5936_v31 = vld [vmem:[#allocation6_spill] sm:$0xff] }
 0x2da   : > { %v5466_v45 = vpop.eup %3686  ;;  %3712 = vpow2.f32 %v1724_v38 }
 0x2db   : > { %v5470_v61 = vpop.eup %3688  ;;  %3714 = vpow2.f32 %v1714_v57 }
 0x2dc   : > { %2296 = vperm.xlu0 %3474, %v5440_v25   ;;  %2266 = vperm.xlu1 %3475, %v5436_v59   ;;  %v5476_v63 = vpop.eup %3690  ;;  %3716 = vpow2.f32 %v1728_v60 }
 0x2dd   : > { %v5480_v33 = vpop.eup %3692  ;;  %3718 = vpow2.f32 %v1718_v26  ;;  %v5938_v26 = vld [vmem:[#allocation8_spill] sm:$0xff] }
 0x2de   : > { %v5486_v41 = vpop.eup %3694  ;;  %3720 = vpow2.f32 %v1732_v8 }
 0x2df   : > { %v5490_v3 = vpop.eup %3696  ;;  %3722 = vpow2.f32 %v1722_v49 }
 0x2e0   : > { %2306 = vperm.xlu0 %3474, %v5450_v53   ;;  %2271 = vperm.xlu1 %3475, %v5446_v27   ;;  %v5496_v47 = vpop.eup %3698  ;;  %3724 = vpow2.f32 %v1726_v4 }
 0x2e1   : > { %v5500_v14 = vpop.eup %3700  ;;  %3726 = vpow2.f32 %v1730_v9  ;;  %v5939_v9 = vld [vmem:[#allocation9_spill] sm:$0xff] }
 0x2e2   : > { %v5504_v17 = vpop.eup %3702 }
 0x2e3   : > { %v5508_v24 = vpop.eup %3704 }
 0x2e4   : > { %2316 = vperm.xlu0 %3474, %v5460_v20   ;;  %2281 = vperm.xlu1 %3475, %v5456_v44   ;;  %v5512_v37 = vpop.eup %3706 }
 0x2e5   : > { %v5516_v56 = vpop.eup %3708 }
 0x2e6   : > { %v5520_v12 = vpop.eup %3710 }
 0x2e7   : > { %v5524_v58 = vpop.eup %3712 }
 0x2e8   : > { %2326 = vperm.xlu0 %3474, %v5470_v61   ;;  %2291 = vperm.xlu1 %3475, %v5466_v45   ;;  %v5528_v21 = vpop.eup %3714 }
 0x2e9   : > { %v5530_v0 = vpop.eup %3716 }
 0x2ea   : > { %v5534_v28 = vpop.eup %3718 }
 0x2eb   : > { %v5536_v7 = vpop.eup %3720 }
 0x2ec   : > { %2336 = vperm.xlu0 %3474, %v5480_v33   ;;  %2301 = vperm.xlu1 %3475, %v5476_v63   ;;  %v5540_v15 = vpop.eup %3722 }
 0x2ed   : > { %v5545_v16 = vpop.eup %3724 }
 0x2ee   : > { %v5549_v29 = vpop.eup %3726 }
 0x2f0   : > { %2346 = vperm.xlu0 %3474, %v5490_v3   ;;  %2311 = vperm.xlu1 %3475, %v5486_v41  }
 0x2f4   : > { %2356 = vperm.xlu0 %3474, %v5500_v14   ;;  %2321 = vperm.xlu1 %3475, %v5496_v47  }
 0x2f8   : > { %2366 = vperm.xlu0 %3474, %v5508_v24   ;;  %2331 = vperm.xlu1 %3475, %v5504_v17  }
 0x2fc   : > { %2376 = vperm.xlu0 %3474, %v5516_v56   ;;  %2341 = vperm.xlu1 %3475, %v5512_v37  }
 0x300   : > { %2386 = vperm.xlu0 %3474, %v5524_v58   ;;  %2351 = vperm.xlu1 %3475, %v5520_v12  }
 0x304   : > { %2396 = vperm.xlu0 %3474, %v5530_v0   ;;  %2361 = vperm.xlu1 %3475, %v5528_v21  }
 0x308   : > { %2406 = vperm.xlu0 %3474, %v5536_v7   ;;  %2371 = vperm.xlu1 %3475, %v5534_v28  }
 0x30b   : > { %v1746_v23 = vpop.permute.xlu1 %1745 }
 0x30c   : > { %v1899_v34 = vsub.f32 %v5027_v6, %v1746_v23  ;;  %2381 = vperm.xlu1 %3475, %v5540_v15  }
 0x30d   : > { %v1741_v39 = vpop.permute.xlu0 %1740 }
 0x30e   : > { %v1932_v40 = vmul.f32 1.442695, %v1899_v34  ;;  %v1898_v52 = vsub.f32 %v5030_v1, %v1741_v39  ;;  %v5940_v39 = vld [vmem:[#allocation11_spill] sm:$0xff] }
 0x30f   : > { %v1756_v32 = vpop.permute.xlu1 %1755 }
 0x310   : > { %v1930_v48 = vmul.f32 1.442695, %v1898_v52  ;;  %v1901_v50 = vsub.f32 %v5935_v11, %v1756_v32  ;;  %2391 = vperm.xlu1 %3475, %v5545_v16   ;;  %3728 = vpow2.f32 %v1932_v40 }
 0x312   : > { %3730 = vpow2.f32 %v1930_v48  ;;  %v1936_v54 = vmul.f32 1.442695, %v1901_v50  ;;  %v5941_v50 = vld [vmem:[#allocation10_spill] sm:$0xff] }
 0x313   : > { %v1751_v6 = vpop.permute.xlu1 %1750 }
 0x314   : > { %v1900_v2 = vsub.f32 %v5936_v31, %v1751_v6  ;;  %2401 = vperm.xlu1 %3475, %v5549_v29   ;;  %3732 = vpow2.f32 %v1936_v54 }
 0x316   : > { %v1934_v38 = vmul.f32 1.442695, %v1900_v2 }
 0x317   : > { %v1766_v1 = vpop.permute.xlu1 %1765 }
 0x318   : > { %3734 = vpow2.f32 %v1934_v38  ;;  %v1903_v57 = vsub.f32 %v5937_v18, %v1766_v1  ;;  %v5942_v1 = vld [vmem:[#allocation13_spill] sm:$0xff] }
 0x31a   : > { %v1940_v13 = vmul.f32 1.442695, %v1903_v57 }
 0x31b   : > { %v1761_v60 = vpop.permute.xlu1 %1760  ;;  %v1786_v51 = vpop.permute.xlu0 %1785 }
 0x31c   : > { %v1902_v22 = vsub.f32 %v5938_v26, %v1761_v60  ;;  %3736 = vpow2.f32 %v1940_v13  ;;  %v1907_v40 = vsub.f32 %v5940_v39, %v1786_v51  ;;  %v5943_v60 = vld [vmem:[#allocation12_spill] sm:$0xff]  ;;  %v5945_v39 = vld [vmem:[#allocation14_spill] sm:$0xff] }
 0x31d   : > { %v3729_v8 = vpop.eup %3728 }
 0x31e   : > { %v1938_v49 = vmul.f32 1.442695, %v1902_v22  ;;  %v1948_v38 = vmul.f32 1.442695, %v1907_v40 }
 0x31f   : > { %v5555_v43 = vpop.eup %3730  ;;  %v1776_v4 = vpop.permute.xlu1 %1775 }
 0x320   : > { %v1796_v10 = vpop.permute.xlu0 %1795  ;;  %3738 = vpow2.f32 %v1938_v49  ;;  %v1905_v23 = vsub.f32 %v5939_v9, %v1776_v4  ;;  %v2203_v34 = vpack.c.bf16 %v3729_v8, %v5555_v43  ;;  %v5944_v49 = vld [vmem:[#allocation15_spill] sm:$0xff] }
 0x321   : > { %v5560_v11 = vpop.eup %3732  ;;  %v1909_v18 = vsub.f32 %v5942_v1, %v1796_v10 }
 0x322   : > { %3398 = vmatprep.mubr.bf16.mxu1 %v2203_v34  ;;  %v1944_v52 = vmul.f32 1.442695, %v1905_v23 }
 0x323   : > { %v1771_v32 = vpop.permute.xlu1 %1770  ;;  %v1952_v22 = vmul.f32 1.442695, %v1909_v18  ;;  %v5948_v18 = vld [vmem:[#allocation19_spill] sm:$0xff] }
 0x324   : > { %v1806_v48 = vpop.permute.xlu0 %1805  ;;  %v1904_v54 = vsub.f32 %v5941_v50, %v1771_v32  ;;  %3740 = vpow2.f32 %v1944_v52  ;;  %v5946_v50 = vld [vmem:[#allocation17_spill] sm:$0xff] }
 0x325   : > { %v3735_v6 = vpop.eup %3734  ;;  %v1911_v4 = vsub.f32 %v5944_v49, %v1806_v48  ;;  %v5947_v48 = vld [vmem:[#allocation16_spill] sm:$0xff] }
 0x326   : > { %v1942_v31 = vmul.f32 1.442695, %v1904_v54  ;;  %v2204_v2 = vpack.c.bf16 %v5560_v11, %v3735_v6 }
 0x327   : > { %2060 = vadd.xlane.f32.xlu0 %v3729_v8  ;;  %v1781_v57 = vpop.permute.xlu1 %1780  ;;  %v1956_v32 = vmul.f32 1.442695, %v1911_v4 }
 0x328   : > { %v1816_v13 = vpop.permute.xlu0 %1815  ;;  %3742 = vpow2.f32 %v1942_v31  ;;  %v1906_v51 = vsub.f32 %v5943_v60, %v1781_v57  ;;  %3399 = vmatmul.mubr.bf16.vlgmr.msra.gmra.mxu1 %v2204_v2 }
 0x329   : > { %3744 = vpow2.f32 %v1948_v38  ;;  %v5567_v34 = vpop.eup %3736  ;;  %v1913_v54 = vsub.f32 %v5946_v50, %v1816_v13  ;;  %v5951_v50 = vld [vmem:[#allocation20_spill] sm:$0xff] }
 0x32a   : > { %v1946_v26 = vmul.f32 1.442695, %v1906_v51 }
 0x32b   : > { %2062 = vadd.xlane.f32.xlu0 %v3735_v6  ;;  %v1791_v9 = vpop.permute.xlu1 %1790  ;;  %v1960_v1 = vmul.f32 1.442695, %v1913_v54 }
 0x32c   : > { %v1826_v23 = vpop.permute.xlu0 %1825  ;;  %3746 = vpow2.f32 %v1946_v26  ;;  %v1908_v10 = vsub.f32 %v5945_v39, %v1791_v9 }
 0x32d   : > { %v3739_v8 = vpop.eup %3738  ;;  %3748 = vpow2.f32 %v1952_v22  ;;  %v1915_v57 = vsub.f32 %v5948_v18, %v1826_v23  ;;  %v5949_v22 = vld [vmem:[#allocation18_spill] sm:$0xff] }
 0x32e   : > { %v1950_v40 = vmul.f32 1.442695, %v1908_v10  ;;  %v2205_v52 = vpack.c.bf16 %v5567_v34, %v3739_v8  ;;  %v5950_v10 = vld [vmem:[#allocation21_spill] sm:$0xff] }
 0x32f   : > { %2066 = vadd.xlane.f32.xlu0 %v3739_v8  ;;  %v1801_v31 = vpop.permute.xlu1 %1800  ;;  %v1964_v39 = vmul.f32 1.442695, %v1915_v57 }
 0x330   : > { %v1836_v2 = vpop.permute.xlu0 %1835  ;;  %3750 = vpow2.f32 %v1950_v40  ;;  %v1910_v6 = vsub.f32 %v5947_v48, %v1801_v31  ;;  %3402 = vmatprep.mubr.bf16.mxu1 %v2205_v52 }
 0x331   : > { %3752 = vpow2.f32 %v1956_v32  ;;  %v3741_v26 = vpop.eup %3740  ;;  %v1917_v8 = vsub.f32 %v5950_v10, %v1836_v2 }
 0x332   : > { %v1954_v38 = vmul.f32 1.442695, %v1910_v6 }
 0x333   : > { %v1811_v60 = vpop.permute.xlu1 %1810  ;;  %v1968_v6 = vmul.f32 1.442695, %v1917_v8 }
 0x334   : > { %v1846_v51 = vpop.permute.xlu0 %1845  ;;  %3754 = vpow2.f32 %v1954_v38  ;;  %v1912_v49 = vsub.f32 %v5949_v22, %v1811_v60  ;;  %v5952_v38 = vld [vmem:[#allocation23_spill] sm:$0xff]  ;;  %v5953_v60 = vld [vmem:[#allocation22_spill] sm:$0xff] }
 0x335   : > { %v3743_v4 = vpop.eup %3742  ;;  %3756 = vpow2.f32 %v1960_v1  ;;  %v1919_v1 = vsub.f32 %v5952_v38, %v1846_v51  ;;  %v5955_v51 = vld [vmem:[#allocation24_spill] sm:$0xff] }
 0x336   : > { %v1958_v13 = vmul.f32 1.442695, %v1912_v49  ;;  %2070 = vadd.xlane.f32.xlu0 %v3743_v4  ;;  %v2206_v9 = vpack.c.bf16 %v3741_v26, %v3743_v4  ;;  %v3745_v32 = vpop.eup %3744 }
 0x337   : > { %v1821_v40 = vpop.permute.xlu1 %1820 }
 0x338   : > { %v1856_v52 = vpop.permute.xlu0 %1855  ;;  %3758 = vpow2.f32 %v1958_v13  ;;  %v1914_v23 = vsub.f32 %v5951_v50, %v1821_v40  ;;  %2058 = vadd.xlane.f32.xlu1 %v5555_v43  ;;  %3403 = vmatmul.mubr.bf16.gmra.mxu1 %v2206_v9  ;;  %v1972_v13 = vmul.f32 1.442695, %v1919_v1  ;;  %v5954_v9 = vld [vmem:[#allocation25_spill] sm:$0xff] }
 0x339   : > { %v3747_v54 = vpop.eup %3746  ;;  %3760 = vpow2.f32 %v1964_v39  ;;  %v1921_v39 = vsub.f32 %v5954_v9, %v1856_v52  ;;  %v5957_v52 = vld [vmem:[#allocation26_spill] sm:$0xff] }
 0x33a   : > { %v1962_v31 = vmul.f32 1.442695, %v1914_v23  ;;  %2074 = vadd.xlane.f32.xlu0 %v3747_v54  ;;  %v2207_v48 = vpack.c.bf16 %v3745_v32, %v3747_v54  ;;  %v3749_v2 = vpop.eup %3748 }
 0x33b   : > { %v1831_v18 = vpop.permute.xlu1 %1830 }
 0x33c   : > { %v1866_v57 = vpop.permute.xlu0 %1865  ;;  %3762 = vpow2.f32 %v1962_v31  ;;  %v1916_v22 = vsub.f32 %v5953_v60, %v1831_v18  ;;  %2064 = vadd.xlane.f32.xlu1 %v5560_v11  ;;  %3406 = vmatprep.mubr.bf16.mxu1 %v2207_v48  ;;  %v1976_v31 = vmul.f32 1.442695, %v1921_v39  ;;  %v5956_v48 = vld [vmem:[#allocation27_spill] sm:$0xff] }
 0x33d   : > { %v3751_v49 = vpop.eup %3750  ;;  %3764 = vpow2.f32 %v1968_v6  ;;  %v1923_v6 = vsub.f32 %v5956_v48, %v1866_v57  ;;  %v5959_v57 = vld [vmem:[#allocation28_spill] sm:$0xff] }
 0x33e   : > { %v1966_v43 = vmul.f32 1.442695, %v1916_v22  ;;  %2078 = vadd.xlane.f32.xlu0 %v3751_v49  ;;  %v2208_v4 = vpack.c.bf16 %v3749_v2, %v3751_v49  ;;  %v3753_v8 = vpop.eup %3752 }
 0x33f   : > { %v1841_v10 = vpop.permute.xlu1 %1840 }
 0x340   : > { %3766 = vpow2.f32 %v1966_v43  ;;  %v1918_v40 = vsub.f32 %v5955_v51, %v1841_v10  ;;  %v1876_v50 = vpop.permute.xlu0 %1875  ;;  %2068 = vadd.xlane.f32.xlu1 %v5567_v34  ;;  %3407 = vmatmul.mubr.bf16.gmra.mxu1 %v2208_v4  ;;  %v1980_v43 = vmul.f32 1.442695, %v1923_v6  ;;  %v5958_v4 = vld [vmem:[#allocation29_spill] sm:$0xff] }
 0x341   : > { %v3755_v23 = vpop.eup %3754  ;;  %3768 = vpow2.f32 %v1972_v13  ;;  %v1925_v9 = vsub.f32 %v5958_v4, %v1876_v50  ;;  %v5961_v50 = vld [vmem:[#allocation30_spill] sm:$0xff] }
 0x342   : > { %v1970_v11 = vmul.f32 1.442695, %v1918_v40  ;;  %2082 = vadd.xlane.f32.xlu0 %v3755_v23  ;;  %v2209_v54 = vpack.c.bf16 %v3753_v8, %v3755_v23  ;;  %v3757_v1 = vpop.eup %3756 }
 0x343   : > { %v1851_v38 = vpop.permute.xlu1 %1850  ;;  %v1984_v23 = vmul.f32 1.442695, %v1925_v9 }
 0x344   : > { %3770 = vpow2.f32 %v1970_v11  ;;  %v1920_v18 = vsub.f32 %v5957_v52, %v1851_v38  ;;  %2072 = vadd.xlane.f32.xlu1 %v3741_v26  ;;  %3410 = vmatprep.mubr.bf16.mxu1 %v2209_v54  ;;  %v1886_v49 = vpop.permute.xlu0 %1885  ;;  %v5960_v11 = vld [vmem:[#allocation31_spill] sm:$0xff] }
 0x345   : > { %v3759_v60 = vpop.eup %3758  ;;  %3772 = vpow2.f32 %v1976_v31  ;;  %v1927_v54 = vsub.f32 %v5960_v11, %v1886_v49  ;;  %v5963_v49 = vld [vmem:[#allocation32_spill] sm:$0xff] }
 0x346   : > { %v1974_v22 = vmul.f32 1.442695, %v1920_v18  ;;  %2086 = vadd.xlane.f32.xlu0 %v3759_v60  ;;  %v2210_v34 = vpack.c.bf16 %v3757_v1, %v3759_v60  ;;  %v3761_v39 = vpop.eup %3760 }
 0x347   : > { %v1861_v13 = vpop.permute.xlu1 %1860  ;;  %v1988_v60 = vmul.f32 1.442695, %v1927_v54 }
 0x348   : > { %3774 = vpow2.f32 %v1974_v22  ;;  %v1922_v10 = vsub.f32 %v5959_v57, %v1861_v13  ;;  %2076 = vadd.xlane.f32.xlu1 %v3745_v32  ;;  %3411 = vmatmul.mubr.bf16.gmra.mxu1 %v2210_v34  ;;  %v1896_v6 = vpop.permute.xlu0 %1895  ;;  %v5962_v22 = vld [vmem:[#allocation33_spill] sm:$0xff] }
 0x349   : > { %v3763_v51 = vpop.eup %3762  ;;  %3776 = vpow2.f32 %v1980_v43  ;;  %v1929_v34 = vsub.f32 %v5962_v22, %v1896_v6 }
 0x34a   : > { %v1978_v40 = vmul.f32 1.442695, %v1922_v10  ;;  %2090 = vadd.xlane.f32.xlu0 %v3763_v51  ;;  %v2211_v26 = vpack.c.bf16 %v3761_v39, %v3763_v51  ;;  %v3765_v31 = vpop.eup %3764 }
 0x34b   : > { %v1871_v48 = vpop.permute.xlu1 %1870  ;;  %v1992_v10 = vmul.f32 1.442695, %v1929_v34 }
 0x34c   : > { %3778 = vpow2.f32 %v1978_v40  ;;  %v1924_v38 = vsub.f32 %v5961_v50, %v1871_v48  ;;  %2080 = vadd.xlane.f32.xlu1 %v3749_v2  ;;  %3414 = vmatprep.mubr.bf16.mxu1 %v2211_v26  ;;  %v5964_v26 = vld [vmem:[#allocation34_spill] sm:$0xff]  ;;  %v5593_v6 = vpop.permute.xlu0 %2261 }
 0x34d   : > { %v3767_v52 = vpop.eup %3766  ;;  %3780 = vpow2.f32 %v1984_v23 }
 0x34e   : > { %v1982_v18 = vmul.f32 1.442695, %v1924_v38  ;;  %2094 = vadd.xlane.f32.xlu0 %v3767_v52  ;;  %v2212_v32 = vpack.c.bf16 %v3765_v31, %v3767_v52  ;;  %v3769_v4 = vpop.eup %3768 }
 0x34f   : > { %v1881_v43 = vpop.permute.xlu1 %1880 }
 0x350   : > { %3782 = vpow2.f32 %v1982_v18  ;;  %v1926_v9 = vsub.f32 %v5963_v49, %v1881_v43  ;;  %2084 = vadd.xlane.f32.xlu1 %v3753_v8  ;;  %3415 = vmatmul.mubr.bf16.gmra.mxu1 %v2212_v32 }
 0x351   : > { %v3771_v13 = vpop.eup %3770  ;;  %3784 = vpow2.f32 %v1988_v60 }
 0x352   : > { %v1986_v57 = vmul.f32 1.442695, %v1926_v9  ;;  %2098 = vadd.xlane.f32.xlu0 %v3771_v13  ;;  %v2213_v2 = vpack.c.bf16 %v3769_v4, %v3771_v13  ;;  %v3773_v40 = vpop.eup %3772 }
 0x353   : > { %v1891_v51 = vpop.permute.xlu1 %1890 }
 0x354   : > { %3786 = vpow2.f32 %v1986_v57  ;;  %v1928_v23 = vsub.f32 %v5964_v26, %v1891_v51  ;;  %2088 = vadd.xlane.f32.xlu1 %v3757_v1  ;;  %3418 = vmatprep.mubr.bf16.mxu1 %v2213_v2  ;;  %v5595_v1 = vpop.permute.xlu0 %2276 }
 0x355   : > { %v3775_v11 = vpop.eup %3774  ;;  %3788 = vpow2.f32 %v1992_v10  ;;  %v1734_v10 = vmul.f32 1.442695, %v1672_v46 }
 0x356   : > { %v1990_v54 = vmul.f32 1.442695, %v1928_v23  ;;  %2102 = vadd.xlane.f32.xlu0 %v3775_v11  ;;  %v2214_v48 = vpack.c.bf16 %v3773_v40, %v3775_v11  ;;  %v3777_v8 = vpop.eup %3776 }
 0x357   : > { %v5599_v9 = vpop.permute.xlu1 %2266 }
 0x358   : > { %3790 = vpow2.f32 %v1990_v54  ;;  %2092 = vadd.xlane.f32.xlu1 %v3761_v39  ;;  %3419 = vmatmul.mubr.bf16.gmra.mxu1 %v2214_v48  ;;  %v5597_v39 = vpop.permute.xlu0 %2286 }
 0x359   : > { %v3779_v50 = vpop.eup %3778 }
 0x35a   : > { %2106 = vadd.xlane.f32.xlu0 %v3779_v50  ;;  %v2215_v38 = vpack.c.bf16 %v3777_v8, %v3779_v50  ;;  %v3781_v52 = vpop.eup %3780 }
 0x35b   : > { %v5606_v57 = vpop.permute.xlu1 %2271 }
 0x35c   : > { %2096 = vadd.xlane.f32.xlu1 %v3765_v31  ;;  %3422 = vmatprep.mubr.bf16.mxu1 %v2215_v38  ;;  %v5604_v13 = vpop.permute.xlu0 %2296 }
 0x35d   : > { %v3783_v18 = vpop.eup %3782 }
 0x35e   : > { %2110 = vadd.xlane.f32.xlu0 %v3783_v18  ;;  %v2216_v32 = vpack.c.bf16 %v3781_v52, %v3783_v18  ;;  %v3785_v60 = vpop.eup %3784 }
 0x35f   : > { %v5613_v51 = vpop.permute.xlu1 %2281 }
 0x360   : > { %2100 = vadd.xlane.f32.xlu1 %v3769_v4  ;;  %3423 = vmatmul.mubr.bf16.gmra.mxu1 %v2216_v32  ;;  %v1736_v4 = vmul.f32 1.442695, %v1673_v19  ;;  %v5608_v2 = vpop.permute.xlu0 %2306 }
 0x361   : > { %v3787_v22 = vpop.eup %3786 }
 0x362   : > { %2114 = vadd.xlane.f32.xlu0 %v3787_v22  ;;  %v2217_v34 = vpack.c.bf16 %v3785_v60, %v3787_v22  ;;  %v3789_v43 = vpop.eup %3788  ;;  %3792 = vpow2.f32 %v1736_v4  ;;  %v1996_v4 = vld [vmem:[#allocation3 + $0x10] sm:$0xff] }
 0x363   : > { %3794 = vpow2.f32 %v1734_v10  ;;  %v5619_v5 = vpop.permute.xlu1 %2291 }
 0x364   : > { %2104 = vadd.xlane.f32.xlu1 %v3773_v40  ;;  %3426 = vmatprep.mubr.bf16.mxu1 %v2217_v34  ;;  %v5615_v40 = vpop.permute.xlu0 %2316 }
 0x365   : > { %v3791_v49 = vpop.eup %3790 }
 0x366   : > { %2118 = vadd.xlane.f32.xlu0 %v3791_v49  ;;  %v2218_v31 = vpack.c.bf16 %v3789_v43, %v3791_v49 }
 0x367   : > { %v5624_v26 = vpop.permute.xlu1 %2301 }
 0x368   : > { %2108 = vadd.xlane.f32.xlu1 %v3777_v8  ;;  %3427 = vmatmul.mubr.bf16.gmra.mxu1 %v2218_v31  ;;  %v5621_v19 = vpop.permute.xlu0 %2326 }
 0x36b   : > { %v5631_v42 = vpop.permute.xlu1 %2311 }
 0x36c   : > { %2112 = vadd.xlane.f32.xlu1 %v3781_v52  ;;  %v5626_v23 = vpop.permute.xlu0 %2336 }
 0x36f   : > { %v5617_v62 = vpop.eup %3792  ;;  %v5635_v11 = vpop.permute.xlu1 %2321 }
 0x370   : > { %2116 = vadd.xlane.f32.xlu1 %v3785_v60  ;;  %v5628_v35 = vpop.eup %3794  ;;  %v5633_v46 = vpop.permute.xlu0 %2346 }
 0x371   : > { %5965 = vst [vmem:[#allocation5_spill] sm:$0xff] %v5633_v46 }
 0x373   : > { %v5639_v48 = vpop.permute.xlu1 %2331 }
 0x374   : > { %2120 = vadd.xlane.f32.xlu1 %v3789_v43  ;;  %v5637_v54 = vpop.permute.xlu0 %2356  ;;  %v1995_v43 = vld [vmem:[#allocation3 + $0x8] sm:$0xff] }
 0x375   : > { %v2027_v49 = vmul.f32 %v5436_v59, %v1995_v43  ;;  %v2000_v43 = vld [vmem:[#allocation3 + $0x30] sm:$0xff] }
 0x377   : > { %v5643_v50 = vpop.permute.xlu1 %2341 }
 0x378   : > { %v5641_v8 = vpop.permute.xlu0 %2366 }
 0x379   : > { %5966 = vst [vmem:[#allocation6_spill] sm:$0xff] %v5641_v8 }
 0x37b   : > { %v5647_v52 = vpop.permute.xlu1 %2351 }
 0x37c   : > { %2416 = vperm.xlu0 %3474, %v5617_v62   ;;  %v5645_v38 = vpop.permute.xlu0 %2376 }
 0x37d   : > { %5967 = vst [vmem:[#allocation7_spill] sm:$0xff] %v5645_v38 }
 0x37f   : > { %v5651_v32 = vpop.permute.xlu1 %2361 }
 0x380   : > { %v5649_v18 = vpop.permute.xlu0 %2386  ;;  %5969 = vst [vmem:[#allocation9_spill] sm:$0xff] %v5651_v32  ;;  %v1998_v32 = vld [vmem:[#allocation3 + $0x20] sm:$0xff] }
 0x381   : > { %5968 = vst [vmem:[#allocation8_spill] sm:$0xff] %v5649_v18  ;;  %v2028_v18 = vmul.f32 %v5446_v27, %v1996_v4 }
 0x383   : > { %v5655_v22 = vpop.permute.xlu1 %2371 }
 0x384   : > { %v5653_v60 = vpop.permute.xlu0 %2396  ;;  %5971 = vst [vmem:[#allocation10_spill] sm:$0xff] %v5655_v22 }
 0x385   : > { %2411 = vperm.xlu1 %3475, %v5628_v35   ;;  %5970 = vst [vmem:[#allocation11_spill] sm:$0xff] %v5653_v60 }
 0x387   : > { %v5660_v10 = vpop.permute.xlu1 %2381 }
 0x388   : > { %v5657_v34 = vpop.permute.xlu0 %2406  ;;  %5973 = vst [vmem:[#allocation12_spill] sm:$0xff] %v5660_v10 }
 0x389   : > { %5972 = vst [vmem:[#allocation13_spill] sm:$0xff] %v5657_v34  ;;  %v2030_v34 = vmul.f32 %v5456_v44, %v1998_v32 }
 0x38b   : > { %v5664_v60 = vpop.permute.xlu1 %2391 }
 0x38c   : > { %5974 = vst [vmem:[#allocation15_spill] sm:$0xff] %v5664_v60  ;;  %v1997_v60 = vld [vmem:[#allocation3 + $0x18] sm:$0xff] }
 0x38f   : > { %v5669_v10 = vpop.permute.xlu1 %2401 }
 0x3b0   : > { %v2061_v31 = vpop.xlane.xlu0 %2060 }
 0x3b1   : > { %v2123_v8 = vadd.f32 %v2061_v31, %v2027_v49  ;;  %v1994_v49 = vld [vmem:[#allocation3] sm:$0xff] }
 0x3b2   : > { %v2002_v31 = vld [vmem:[#allocation3 + $0x40] sm:$0xff] }
 0x3b3   : > { %2156 = vst.msk [vmem:[#allocation3 + $0x8] sm:$0xff] %vm2154_vm9, %v2123_v8  ;;  %v2032_v8 = vmul.f32 %v5466_v45, %v2000_v43  ;;  %v1999_v43 = vld [vmem:[#allocation3 + $0x28] sm:$0xff] }
 0x3b4   : > { %v2063_v38 = vpop.xlane.xlu0 %2062 }
 0x3b5   : > { %v2124_v46 = vadd.f32 %v2063_v38, %v2028_v18  ;;  %v2026_v38 = vmul.f32 %v5414_v30, %v1994_v49 }
 0x3b7   : > { %2157 = vst.msk [vmem:[#allocation3 + $0x10] sm:$0xff] %vm2154_vm9, %v2124_v46  ;;  %v2034_v46 = vmul.f32 %v5476_v63, %v2002_v31  ;;  %v2031_v63 = vmul.f32 %v5430_v55, %v1999_v43 }
 0x3b8   : > { %v2067_v22 = vpop.xlane.xlu0 %2066 }
 0x3b9   : > { %v2126_v59 = vadd.f32 %v2067_v22, %v2030_v34  ;;  %v2004_v22 = vld [vmem:[#allocation3 + $0x50] sm:$0xff] }
 0x3ba   : > { %v2036_v30 = vmul.f32 %v5486_v41, %v2004_v22  ;;  %v2003_v22 = vld [vmem:[#allocation3 + $0x48] sm:$0xff] }
 0x3bb   : > { %2159 = vst.msk [vmem:[#allocation3 + $0x20] sm:$0xff] %vm2154_vm9, %v2126_v59  ;;  %v2029_v59 = vmul.f32 %v5422_v36, %v1997_v60 }
 0x3bf   : > { %v2071_v27 = vpop.xlane.xlu0 %2070 }
 0x3c0   : > { %v2128_v4 = vadd.f32 %v2071_v27, %v2032_v8  ;;  %v2006_v27 = vld [vmem:[#allocation3 + $0x60] sm:$0xff] }
 0x3c1   : > { %v2059_v18 = vpop.xlane.xlu1 %2058  ;;  %v2038_v36 = vmul.f32 %v5496_v47, %v2006_v27  ;;  %v2035_v47 = vmul.f32 %v5450_v53, %v2003_v22 }
 0x3c2   : > { %2161 = vst.msk [vmem:[#allocation3 + $0x30] sm:$0xff] %vm2154_vm9, %v2128_v4  ;;  %v2122_v44 = vadd.f32 %v2059_v18, %v2026_v38  ;;  %v2001_v38 = vld [vmem:[#allocation3 + $0x38] sm:$0xff] }
 0x3c3   : > { %v2075_v32 = vpop.xlane.xlu0 %2074  ;;  %v2033_v41 = vmul.f32 %v5440_v25, %v2001_v38  ;;  %v2007_v38 = vld [vmem:[#allocation3 + $0x68] sm:$0xff] }
 0x3c4   : > { %2155 = vst.msk [vmem:[#allocation3] sm:$0xff] %vm2154_vm9, %v2122_v44  ;;  %v2130_v34 = vadd.f32 %v2075_v32, %v2034_v46  ;;  %v2008_v44 = vld [vmem:[#allocation3 + $0x70] sm:$0xff] }
 0x3c5   : > { %v2065_v45 = vpop.xlane.xlu1 %2064  ;;  %v2040_v55 = vmul.f32 %v5504_v17, %v2008_v44 }
 0x3c6   : > { %2163 = vst.msk [vmem:[#allocation3 + $0x40] sm:$0xff] %vm2154_vm9, %v2130_v34  ;;  %v2125_v8 = vadd.f32 %v2065_v45, %v2029_v59  ;;  %v2010_v45 = vld [vmem:[#allocation3 + $0x80] sm:$0xff] }
 0x3c7   : > { %v2079_v49 = vpop.xlane.xlu0 %2078  ;;  %v2042_v25 = vmul.f32 %v5512_v37, %v2010_v45  ;;  %v2039_v37 = vmul.f32 %v5470_v61, %v2007_v38  ;;  %v2011_v45 = vld [vmem:[#allocation3 + $0x88] sm:$0xff] }
 0x3c8   : > { %2158 = vst.msk [vmem:[#allocation3 + $0x18] sm:$0xff] %vm2154_vm9, %v2125_v8  ;;  %v2132_v4 = vadd.f32 %v2079_v49, %v2036_v30  ;;  %v2005_v30 = vld [vmem:[#allocation3 + $0x58] sm:$0xff] }
 0x3c9   : > { %v2069_v31 = vpop.xlane.xlu1 %2068  ;;  %v2037_v17 = vmul.f32 %v5460_v20, %v2005_v30 }
 0x3ca   : > { %2165 = vst.msk [vmem:[#allocation3 + $0x50] sm:$0xff] %vm2154_vm9, %v2132_v4  ;;  %v2127_v18 = vadd.f32 %v2069_v31, %v2031_v63  ;;  %v2012_v4 = vld [vmem:[#allocation3 + $0x90] sm:$0xff] }
 0x3cb   : > { %v2083_v60 = vpop.xlane.xlu0 %2082  ;;  %v2044_v53 = vmul.f32 %v5520_v12, %v2012_v4 }
 0x3cc   : > { %2160 = vst.msk [vmem:[#allocation3 + $0x28] sm:$0xff] %vm2154_vm9, %v2127_v18  ;;  %v2134_v46 = vadd.f32 %v2083_v60, %v2038_v36  ;;  %v2014_v60 = vld [vmem:[#allocation3 + $0xa0] sm:$0xff] }
 0x3cd   : > { %v2073_v32 = vpop.xlane.xlu1 %2072  ;;  %v2046_v20 = vmul.f32 %v5528_v21, %v2014_v60  ;;  %v2043_v21 = vmul.f32 %v5490_v3, %v2011_v45 }
 0x3ce   : > { %2167 = vst.msk [vmem:[#allocation3 + $0x60] sm:$0xff] %vm2154_vm9, %v2134_v46  ;;  %v2129_v34 = vadd.f32 %v2073_v32, %v2033_v41  ;;  %v2009_v41 = vld [vmem:[#allocation3 + $0x78] sm:$0xff] }
 0x3cf   : > { %v2087_v59 = vpop.xlane.xlu0 %2086  ;;  %v2041_v12 = vmul.f32 %v5480_v33, %v2009_v41 }
 0x3d0   : > { %2162 = vst.msk [vmem:[#allocation3 + $0x38] sm:$0xff] %vm2154_vm9, %v2129_v34  ;;  %v2136_v43 = vadd.f32 %v2087_v59, %v2040_v55  ;;  %v2016_v34 = vld [vmem:[#allocation3 + $0xb0] sm:$0xff] }
 0x3d1   : > { %v2077_v8 = vpop.xlane.xlu1 %2076  ;;  %v2048_v61 = vmul.f32 %v5534_v28, %v2016_v34  ;;  %v2017_v34 = vld [vmem:[#allocation3 + $0xb8] sm:$0xff] }
 0x3d2   : > { %2169 = vst.msk [vmem:[#allocation3 + $0x70] sm:$0xff] %vm2154_vm9, %v2136_v43  ;;  %v2131_v49 = vadd.f32 %v2077_v8, %v2035_v47  ;;  %v2018_v8 = vld [vmem:[#allocation3 + $0xc0] sm:$0xff] }
 0x3d3   : > { %v2091_v27 = vpop.xlane.xlu0 %2090  ;;  %v2050_v33 = vmul.f32 %v5540_v15, %v2018_v8  ;;  %v2022_v15 = vld [vmem:[#allocation3 + $0xe0] sm:$0xff] }
 0x3d4   : > { %2164 = vst.msk [vmem:[#allocation3 + $0x48] sm:$0xff] %vm2154_vm9, %v2131_v49  ;;  %v2138_v63 = vadd.f32 %v2091_v27, %v2042_v25  ;;  %v2013_v25 = vld [vmem:[#allocation3 + $0x98] sm:$0xff] }
 0x3d5   : > { %v2081_v31 = vpop.xlane.xlu1 %2080 }
 0x3d6   : > { %2171 = vst.msk [vmem:[#allocation3 + $0x80] sm:$0xff] %vm2154_vm9, %v2138_v63  ;;  %v2133_v18 = vadd.f32 %v2081_v31, %v2037_v17  ;;  %v2020_v63 = vld [vmem:[#allocation3 + $0xd0] sm:$0xff]  ;;  %v2045_v31 = vmul.f32 %v5500_v14, %v2013_v25 }
 0x3d7   : > { %v2095_v36 = vpop.xlane.xlu0 %2094  ;;  %v2229_v17 = vld [vmem:[#allocation4 + $0x10] sm:$0xff] }
 0x3d8   : > { %2166 = vst.msk [vmem:[#allocation3 + $0x58] sm:$0xff] %vm2154_vm9, %v2133_v18  ;;  %v2140_v44 = vadd.f32 %v2095_v36, %v2044_v53  ;;  %v2015_v18 = vld [vmem:[#allocation3 + $0xa8] sm:$0xff]  ;;  %v2227_v53 = vld [vmem:[#allocation4] sm:$0xff]  ;;  %v2052_v36 = vmul.f32 %v5545_v16, %v2020_v63  ;;  %v2421_v60 = vmul.f32 %v5606_v57, %v2229_v17  ;;  %v2054_v57 = vmul.f32 %v5549_v29, %v2022_v15  ;;  %v2021_v63 = vld [vmem:[#allocation3 + $0xd8] sm:$0xff] }
 0x3d9   : > { %v2085_v46 = vpop.xlane.xlu1 %2084  ;;  %v2419_v14 = vmul.f32 %v5593_v6, %v2227_v53  ;;  %v2019_v29 = vld [vmem:[#allocation3 + $0xc8] sm:$0xff] }
 0x3da   : > { %2173 = vst.msk [vmem:[#allocation3 + $0x90] sm:$0xff] %vm2154_vm9, %v2140_v44  ;;  %v2135_v32 = vadd.f32 %v2085_v46, %v2039_v37  ;;  %v2230_v37 = vld [vmem:[#allocation4 + $0x18] sm:$0xff] }
 0x3db   : > { %v2099_v22 = vpop.xlane.xlu0 %2098 }
 0x3dc   : > { %2168 = vst.msk [vmem:[#allocation3 + $0x68] sm:$0xff] %vm2154_vm9, %v2135_v32  ;;  %v2142_v55 = vadd.f32 %v2099_v22, %v2046_v20  ;;  %v2047_v32 = vmul.f32 %v5508_v24, %v2015_v18  ;;  %v2231_v18 = vld [vmem:[#allocation4 + $0x20] sm:$0xff] }
 0x3dd   : > { %v2089_v59 = vpop.xlane.xlu1 %2088 }
 0x3de   : > { %2175 = vst.msk [vmem:[#allocation3 + $0xa0] sm:$0xff] %vm2154_vm9, %v2142_v55  ;;  %v2137_v43 = vadd.f32 %v2089_v59, %v2041_v12  ;;  %v2228_v55 = vld [vmem:[#allocation4 + $0x8] sm:$0xff]  ;;  %v2422_v59 = vmul.f32 %v5595_v1, %v2230_v37 }
 0x3df   : > { %v2103_v47 = vpop.xlane.xlu0 %2102  ;;  %v2420_v8 = vmul.f32 %v5599_v9, %v2228_v55  ;;  %v2051_v9 = vmul.f32 %v5524_v58, %v2019_v29  ;;  %v2239_v29 = vld [vmem:[#allocation4 + $0x60] sm:$0xff] }
 0x3e0   : > { %2170 = vst.msk [vmem:[#allocation3 + $0x78] sm:$0xff] %vm2154_vm9, %v2137_v43  ;;  %v2144_v30 = vadd.f32 %v2103_v47, %v2048_v61  ;;  %v2024_v61 = vld [vmem:[#allocation3 + $0xf0] sm:$0xff]  ;;  %v2049_v47 = vmul.f32 %v5516_v56, %v2017_v34 }
 0x3e1   : > { %v2093_v49 = vpop.xlane.xlu1 %2092  ;;  %v2056_v25 = vmul.f32 %v5628_v35, %v2024_v61  ;;  %v2053_v35 = vmul.f32 %v5530_v0, %v2021_v63  ;;  %v2236_v61 = vld [vmem:[#allocation4 + $0x48] sm:$0xff]  ;;  %v2245_v63 = vld [vmem:[#allocation4 + $0x90] sm:$0xff] }
 0x3e2   : > { %2177 = vst.msk [vmem:[#allocation3 + $0xb0] sm:$0xff] %vm2154_vm9, %v2144_v30  ;;  %v2139_v27 = vadd.f32 %v2093_v49, %v2043_v21 }
 0x3e3   : > { %v2107_v4 = vpop.xlane.xlu0 %2106 }
 0x3e4   : > { %2172 = vst.msk [vmem:[#allocation3 + $0x88] sm:$0xff] %vm2154_vm9, %v2139_v27  ;;  %v2146_v28 = vadd.f32 %v2107_v4, %v2050_v33 }
 0x3e5   : > { %v2097_v38 = vpop.xlane.xlu1 %2096 }
 0x3e6   : > { %2179 = vst.msk [vmem:[#allocation3 + $0xc0] sm:$0xff] %vm2154_vm9, %v2146_v28  ;;  %v2141_v3 = vadd.f32 %v2097_v38, %v2045_v31  ;;  %v2233_v28 = vld [vmem:[#allocation4 + $0x30] sm:$0xff]  ;;  %v2023_v38 = vld [vmem:[#allocation3 + $0xe8] sm:$0xff] }
 0x3e7   : > { %v2111_v44 = vpop.xlane.xlu0 %2110 }
 0x3e8   : > { %2174 = vst.msk [vmem:[#allocation3 + $0x98] sm:$0xff] %vm2154_vm9, %v2141_v3  ;;  %v2148_v46 = vadd.f32 %v2111_v44, %v2052_v36  ;;  %v3400_v41 = vpop.f32.mrf.mxu1  ;;  %v2425_v3 = vmul.f32 %v5619_v5, %v2233_v28  ;;  %v2234_v36 = vld [vmem:[#allocation4 + $0x38] sm:$0xff]  ;;  %v2423_v44 = vmul.f32 %v5613_v51, %v2231_v18  ;;  %v2237_v5 = vld [vmem:[#allocation4 + $0x50] sm:$0xff] }
 0x3e9   : > { %v2614_v20 = vadd.f32 %v3400_v41, %v2421_v60  ;;  %v2101_v22 = vpop.xlane.xlu1 %2100  ;;  %v2055_v60 = vmul.f32 %v5536_v7, %v2023_v38  ;;  %v2232_v41 = vld [vmem:[#allocation4 + $0x28] sm:$0xff]  ;;  %v2246_v18 = vld [vmem:[#allocation4 + $0x98] sm:$0xff] }
 0x3ea   : > { %2181 = vst.msk [vmem:[#allocation3 + $0xd0] sm:$0xff] %vm2154_vm9, %v2148_v46  ;;  %v2143_v16 = vadd.f32 %v2101_v22, %v2047_v32  ;;  %v2485_v12 = vpop.f32.mrf.mxu1  ;;  %v2025_v46 = vld [vmem:[#allocation3 + $0xf8] sm:$0xff]  ;;  %v2424_v7 = vmul.f32 %v5597_v39, %v2232_v41  ;;  %v2247_v41 = vld [vmem:[#allocation4 + $0xa0] sm:$0xff] }
 0x3eb   : > { %2646 = vst.msk [vmem:[#allocation4 + $0x10] sm:$0xff] %vm472_vm2, %v2614_v20  ;;  %v2612_v45 = vadd.f32 %v2485_v12, %v2419_v14  ;;  %v2115_v43 = vpop.xlane.xlu0 %2114  ;;  %v2426_v14 = vmul.f32 %v5604_v13, %v2234_v36  ;;  %v2057_v34 = vmul.f32 %v5617_v62, %v2025_v46  ;;  %v2429_v13 = vmul.f32 %v5631_v42, %v2237_v5  ;;  %v2241_v42 = vld [vmem:[#allocation4 + $0x70] sm:$0xff]  ;;  %v2244_v36 = vld [vmem:[#allocation4 + $0x88] sm:$0xff] }
 0x3ec   : > { %2176 = vst.msk [vmem:[#allocation3 + $0xa8] sm:$0xff] %vm2154_vm9, %v2143_v16  ;;  %v2150_v24 = vadd.f32 %v2115_v43, %v2054_v57  ;;  %v3401_v6 = vpop.f32.mrf.mxu1  ;;  %v2235_v16 = vld [vmem:[#allocation4 + $0x40] sm:$0xff] }
 0x3ed   : > { %2644 = vst.msk [vmem:[#allocation4] sm:$0xff] %vm472_vm2, %v2612_v45  ;;  %v2615_v30 = vadd.f32 %v3401_v6, %v2422_v59  ;;  %v2105_v21 = vpop.xlane.xlu1 %2104  ;;  %v2238_v45 = vld [vmem:[#allocation4 + $0x58] sm:$0xff]  ;;  %v2427_v62 = vmul.f32 %v5624_v26, %v2235_v16  ;;  %v2433_v26 = vmul.f32 %v5639_v48, %v2241_v42 }
 0x3ee   : > { %2183 = vst.msk [vmem:[#allocation3 + $0xe0] sm:$0xff] %vm2154_vm9, %v2150_v24  ;;  %v2145_v1 = vadd.f32 %v2105_v21, %v2049_v47  ;;  %v2488_v49 = vpop.f32.mrf.mxu1  ;;  %v2430_v6 = vmul.f32 %v5615_v40, %v2238_v45  ;;  %v2431_v40 = vmul.f32 %v5635_v11, %v2239_v29  ;;  %v2437_v11 = vmul.f32 %v5647_v52, %v2245_v63  ;;  %v5975_v52 = vld [vmem:[#allocation5_spill] sm:$0xff]  ;;  %v2252_v29 = vld [vmem:[#allocation4 + $0xc8] sm:$0xff] }
 0x3ef   : > { %2647 = vst.msk [vmem:[#allocation4 + $0x18] sm:$0xff] %vm472_vm2, %v2615_v30  ;;  %v2613_v27 = vadd.f32 %v2488_v49, %v2420_v8  ;;  %v2119_v33 = vpop.xlane.xlu0 %2118  ;;  %v2428_v30 = vmul.f32 %v5608_v2, %v2236_v61  ;;  %v5980_v61 = vld [vmem:[#allocation15_spill] sm:$0xff] }
 0x3f0   : > { %2178 = vst.msk [vmem:[#allocation3 + $0xb8] sm:$0xff] %vm2154_vm9, %v2145_v1  ;;  %v2152_v56 = vadd.f32 %v2119_v33, %v2056_v25  ;;  %v2242_v25 = vld [vmem:[#allocation4 + $0x78] sm:$0xff] }
 0x3f1   : > { %2645 = vst.msk [vmem:[#allocation4 + $0x8] sm:$0xff] %vm472_vm2, %v2613_v27  ;;  %v2109_v4 = vpop.xlane.xlu1 %2108  ;;  %v2434_v2 = vmul.f32 %v5626_v23, %v2242_v25 }
 0x3f2   : > { %2185 = vst.msk [vmem:[#allocation3 + $0xf0] sm:$0xff] %vm2154_vm9, %v2152_v56  ;;  %v2147_v17 = vadd.f32 %v2109_v4, %v2051_v9  ;;  %v2240_v56 = vld [vmem:[#allocation4 + $0x68] sm:$0xff] }
 0x3f3   : > { %v2432_v48 = vmul.f32 %v5621_v19, %v2240_v56  ;;  %v2438_v19 = vmul.f32 %v5637_v54, %v2246_v18  ;;  %v5977_v54 = vld [vmem:[#allocation9_spill] sm:$0xff]  ;;  %v5983_v56 = vld [vmem:[#allocation8_spill] sm:$0xff]  ;;  %v2256_v18 = vld [vmem:[#allocation4 + $0xe8] sm:$0xff] }
 0x3f4   : > { %2180 = vst.msk [vmem:[#allocation3 + $0xc8] sm:$0xff] %vm2154_vm9, %v2147_v17 }
 0x3f5   : > { %v2113_v31 = vpop.xlane.xlu1 %2112 }
 0x3f6   : > { %v2149_v53 = vadd.f32 %v2113_v31, %v2053_v35  ;;  %v2243_v35 = vld [vmem:[#allocation4 + $0x80] sm:$0xff] }
 0x3f7   : > { %v2435_v23 = vmul.f32 %v5643_v50, %v2243_v35  ;;  %v5976_v50 = vld [vmem:[#allocation10_spill] sm:$0xff]  ;;  %v2417_v35 = vpop.permute.xlu0 %2416 }
 0x3f8   : > { %2182 = vst.msk [vmem:[#allocation3 + $0xd8] sm:$0xff] %vm2154_vm9, %v2149_v53  ;;  %v3404_v58 = vpop.f32.mrf.mxu1 }
 0x3f9   : > { %v2618_v15 = vadd.f32 %v3404_v58, %v2425_v3  ;;  %v2117_v37 = vpop.xlane.xlu1 %2116 }
 0x3fa   : > { %v2151_v32 = vadd.f32 %v2117_v37, %v2055_v60  ;;  %v2501_v0 = vpop.f32.mrf.mxu1  ;;  %v2436_v37 = vmul.f32 %v5975_v52, %v2244_v36 }
 0x3fb   : > { %2650 = vst.msk [vmem:[#allocation4 + $0x30] sm:$0xff] %vm472_vm2, %v2618_v15  ;;  %v2616_v20 = vadd.f32 %v2501_v0, %v2423_v44  ;;  %v2249_v44 = vld [vmem:[#allocation4 + $0xb0] sm:$0xff] }
 0x3fc   : > { %2184 = vst.msk [vmem:[#allocation3 + $0xe8] sm:$0xff] %vm2154_vm9, %v2151_v32  ;;  %v3405_v22 = vpop.f32.mrf.mxu1  ;;  %v2441_v0 = vmul.f32 %v5976_v50, %v2249_v44 }
 0x3fd   : > { %2648 = vst.msk [vmem:[#allocation4 + $0x20] sm:$0xff] %vm472_vm2, %v2616_v20  ;;  %v2619_v51 = vadd.f32 %v3405_v22, %v2426_v14  ;;  %v2121_v55 = vpop.xlane.xlu1 %2120  ;;  %v2250_v20 = vld [vmem:[#allocation4 + $0xb8] sm:$0xff]  ;;  %v2439_v22 = vmul.f32 %v5977_v54, %v2247_v41 }
 0x3fe   : > { %v2153_v12 = vadd.f32 %v2121_v55, %v2057_v34  ;;  %v2504_v57 = vpop.f32.mrf.mxu1  ;;  %v5978_v55 = vld [vmem:[#allocation7_spill] sm:$0xff] }
 0x3ff   : > { %2651 = vst.msk [vmem:[#allocation4 + $0x38] sm:$0xff] %vm472_vm2, %v2619_v51  ;;  %v2617_v59 = vadd.f32 %v2504_v57, %v2424_v7  ;;  %v2248_v7 = vld [vmem:[#allocation4 + $0xa8] sm:$0xff]  ;;  %v2442_v16 = vmul.f32 %v5978_v55, %v2250_v20  ;;  %v2253_v57 = vld [vmem:[#allocation4 + $0xd0] sm:$0xff] }
 0x400   : > { %2186 = vst.msk [vmem:[#allocation3 + $0xf8] sm:$0xff] %vm2154_vm9, %v2153_v12  ;;  %v3408_v43 = vpop.f32.mrf.mxu1 }
 0x401   : > { %2649 = vst.msk [vmem:[#allocation4 + $0x28] sm:$0xff] %vm472_vm2, %v2617_v59  ;;  %v2622_v39 = vadd.f32 %v3408_v43, %v2429_v13  ;;  %v5979_v59 = vld [vmem:[#allocation6_spill] sm:$0xff] }
 0x402   : > { %v2517_v24 = vpop.f32.mrf.mxu1  ;;  %v2440_v45 = vmul.f32 %v5979_v59, %v2248_v7 }
 0x403   : > { %2654 = vst.msk [vmem:[#allocation4 + $0x50] sm:$0xff] %vm472_vm2, %v2622_v39  ;;  %v2620_v47 = vadd.f32 %v2517_v24, %v2427_v62  ;;  %v2251_v62 = vld [vmem:[#allocation4 + $0xc0] sm:$0xff]  ;;  %v2445_v24 = vmul.f32 %v5980_v61, %v2253_v57 }
 0x404   : > { %v3409_v8 = vpop.f32.mrf.mxu1 }
 0x405   : > { %2652 = vst.msk [vmem:[#allocation4 + $0x40] sm:$0xff] %vm472_vm2, %v2620_v47  ;;  %v2623_v21 = vadd.f32 %v3409_v8, %v2430_v6  ;;  %v2254_v47 = vld [vmem:[#allocation4 + $0xd8] sm:$0xff] }
 0x406   : > { %v2520_v1 = vpop.f32.mrf.mxu1  ;;  %v5981_v8 = vld [vmem:[#allocation12_spill] sm:$0xff] }
 0x407   : > { %2655 = vst.msk [vmem:[#allocation4 + $0x58] sm:$0xff] %vm472_vm2, %v2623_v21  ;;  %v2621_v49 = vadd.f32 %v2520_v1, %v2428_v30  ;;  %v2443_v30 = vmul.f32 %v5981_v8, %v2251_v62 }
 0x408   : > { %v3412_v27 = vpop.f32.mrf.mxu1 }
 0x409   : > { %2653 = vst.msk [vmem:[#allocation4 + $0x48] sm:$0xff] %vm472_vm2, %v2621_v49  ;;  %v2626_v33 = vadd.f32 %v3412_v27, %v2433_v26  ;;  %v5982_v26 = vld [vmem:[#allocation11_spill] sm:$0xff] }
 0x40a   : > { %v2533_v9 = vpop.f32.mrf.mxu1  ;;  %v2446_v49 = vmul.f32 %v5982_v26, %v2254_v47  ;;  %v2257_v27 = vld [vmem:[#allocation4 + $0xf0] sm:$0xff] }
 0x40b   : > { %2658 = vst.msk [vmem:[#allocation4 + $0x70] sm:$0xff] %vm472_vm2, %v2626_v33  ;;  %v2624_v4 = vadd.f32 %v2533_v9, %v2431_v40  ;;  %v2412_v40 = vpop.permute.xlu1 %2411  ;;  %v2444_v9 = vmul.f32 %v5983_v56, %v2252_v29 }
 0x40c   : > { %v3413_v17 = vpop.f32.mrf.mxu1 }
 0x40d   : > { %2656 = vst.msk [vmem:[#allocation4 + $0x60] sm:$0xff] %vm472_vm2, %v2624_v4  ;;  %v2627_v28 = vadd.f32 %v3413_v17, %v2434_v2  ;;  %v2255_v4 = vld [vmem:[#allocation4 + $0xe0] sm:$0xff]  ;;  %v2449_v17 = vmul.f32 %v2412_v40, %v2257_v27 }
 0x40e   : > { %v2536_v31 = vpop.f32.mrf.mxu1 }
 0x40f   : > { %2659 = vst.msk [vmem:[#allocation4 + $0x78] sm:$0xff] %vm472_vm2, %v2627_v28  ;;  %v2625_v38 = vadd.f32 %v2536_v31, %v2432_v48  ;;  %v2258_v28 = vld [vmem:[#allocation4 + $0xf8] sm:$0xff] }
 0x410   : > { %v3416_v53 = vpop.f32.mrf.mxu1 }
 0x411   : > { %2657 = vst.msk [vmem:[#allocation4 + $0x68] sm:$0xff] %vm472_vm2, %v2625_v38  ;;  %v2630_v3 = vadd.f32 %v3416_v53, %v2437_v11  ;;  %v2447_v11 = vmul.f32 %v5669_v10, %v2255_v4 }
 0x412   : > { %v2549_v58 = vpop.f32.mrf.mxu1 }
 0x413   : > { %2662 = vst.msk [vmem:[#allocation4 + $0x90] sm:$0xff] %vm472_vm2, %v2630_v3  ;;  %v2628_v60 = vadd.f32 %v2549_v58, %v2435_v23  ;;  %v2450_v23 = vmul.f32 %v2417_v35, %v2258_v28  ;;  %v5984_v58 = vld [vmem:[#allocation13_spill] sm:$0xff] }
 0x414   : > { %v3417_v15 = vpop.f32.mrf.mxu1 }
 0x415   : > { %2660 = vst.msk [vmem:[#allocation4 + $0x80] sm:$0xff] %vm472_vm2, %v2628_v60  ;;  %v2631_v46 = vadd.f32 %v3417_v15, %v2438_v19  ;;  %v2448_v19 = vmul.f32 %v5984_v58, %v2256_v18 }
 0x416   : > { %v2552_v32 = vpop.f32.mrf.mxu1 }
 0x417   : > { %2663 = vst.msk [vmem:[#allocation4 + $0x98] sm:$0xff] %vm472_vm2, %v2631_v46  ;;  %v2629_v14 = vadd.f32 %v2552_v32, %v2436_v37 }
 0x418   : > { %v3420_v5 = vpop.f32.mrf.mxu1 }
 0x419   : > { %2661 = vst.msk [vmem:[#allocation4 + $0x88] sm:$0xff] %vm472_vm2, %v2629_v14  ;;  %v2634_v34 = vadd.f32 %v3420_v5, %v2441_v0 }
 0x41a   : > { %v2565_v51 = vpop.f32.mrf.mxu1 }
 0x41b   : > { %2666 = vst.msk [vmem:[#allocation4 + $0xb0] sm:$0xff] %vm472_vm2, %v2634_v34  ;;  %v2632_v12 = vadd.f32 %v2565_v51, %v2439_v22 }
 0x41c   : > { %v3421_v13 = vpop.f32.mrf.mxu1 }
 0x41d   : > { %2664 = vst.msk [vmem:[#allocation4 + $0xa0] sm:$0xff] %vm472_vm2, %v2632_v12  ;;  %v2635_v43 = vadd.f32 %v3421_v13, %v2442_v16 }
 0x41e   : > { %v2568_v39 = vpop.f32.mrf.mxu1 }
 0x41f   : > { %2667 = vst.msk [vmem:[#allocation4 + $0xb8] sm:$0xff] %vm472_vm2, %v2635_v43  ;;  %v2633_v6 = vadd.f32 %v2568_v39, %v2440_v45 }
 0x420   : > { %v3424_v42 = vpop.f32.mrf.mxu1 }
 0x421   : > { %2665 = vst.msk [vmem:[#allocation4 + $0xa8] sm:$0xff] %vm472_vm2, %v2633_v6  ;;  %v2638_v21 = vadd.f32 %v3424_v42, %v2445_v24 }
 0x422   : > { %v2581_v1 = vpop.f32.mrf.mxu1 }
 0x423   : > { %2670 = vst.msk [vmem:[#allocation4 + $0xd0] sm:$0xff] %vm472_vm2, %v2638_v21  ;;  %v2636_v25 = vadd.f32 %v2581_v1, %v2443_v30 }
 0x424   : > { %v3425_v33 = vpop.f32.mrf.mxu1 }
 0x425   : > { %2668 = vst.msk [vmem:[#allocation4 + $0xc0] sm:$0xff] %vm472_vm2, %v2636_v25  ;;  %v2639_v2 = vadd.f32 %v3425_v33, %v2446_v49 }
 0x426   : > { %v2584_v63 = vpop.f32.mrf.mxu1 }
 0x427   : > { %2671 = vst.msk [vmem:[#allocation4 + $0xd8] sm:$0xff] %vm472_vm2, %v2639_v2  ;;  %v2637_v48 = vadd.f32 %v2584_v63, %v2444_v9 }
 0x428   : > { %v3428_v31 = vpop.f32.mrf.mxu1 }
 0x429   : > { %2669 = vst.msk [vmem:[#allocation4 + $0xc8] sm:$0xff] %vm472_vm2, %v2637_v48  ;;  %v2642_v38 = vadd.f32 %v3428_v31, %v2449_v17 }
 0x42a   : > { %v2597_v53 = vpop.f32.mrf.mxu1 }
 0x42b   : > { %2674 = vst.msk [vmem:[#allocation4 + $0xf0] sm:$0xff] %vm472_vm2, %v2642_v38  ;;  %v2640_v3 = vadd.f32 %v2597_v53, %v2447_v11 }
 0x42c   : > { %v3429_v36 = vpop.f32.mrf.mxu1 }
 0x42d   : > { %2672 = vst.msk [vmem:[#allocation4 + $0xe0] sm:$0xff] %vm472_vm2, %v2640_v3  ;;  %v2643_v60 = vadd.f32 %v3429_v36, %v2450_v23  ;;  %2711 = sbr.rel (%p3225_p8) target bundleno = 1277 (0x4fd), region = 40 }
 0x42e   : > { %v2600_v44 = vpop.f32.mrf.mxu1 }
 0x42f   : > { %2675 = vst.msk [vmem:[#allocation4 + $0xf8] sm:$0xff] %vm472_vm2, %v2643_v60  ;;  %v2641_v15 = vadd.f32 %v2600_v44, %v2448_v19 }
 0x431   : > { %2673 = vst.msk [vmem:[#allocation4 + $0xe8] sm:$0xff] %vm472_vm2, %v2641_v15 }
 0x432   : > { %v2746_v10 = vld [vmem:[#allocation3 + $0x10] sm:$0xff]  ;;  %v2744_v52 = vld [vmem:[#allocation3] sm:$0xff]  ;;  %v2747_v37 = vld [vmem:[#allocation3 + $0x18] sm:$0xff]  ;;  %v3940_v46 = vmov 0  }
 0x433   : > { %3832 = vset.pattern.permute.xlu1 %v3940_v46  ;;  %3831 = vset.pattern.permute.xlu0 %v3940_v46  ;;  %3833 = vrcp.f32 %v2746_v10  ;;  %v2745_v41 = vld [vmem:[#allocation3 + $0x8] sm:$0xff]  ;;  %v2748_v50 = vld [vmem:[#allocation3 + $0x20] sm:$0xff]  ;;  %v2751_v0 = vld [vmem:[#allocation3 + $0x38] sm:$0xff] }
 0x434   : > { %3835 = vrcp.f32 %v2744_v52  ;;  %v2749_v32 = vld [vmem:[#allocation3 + $0x28] sm:$0xff]  ;;  %v2750_v14 = vld [vmem:[#allocation3 + $0x30] sm:$0xff]  ;;  %v2752_v5 = vld [vmem:[#allocation3 + $0x40] sm:$0xff] }
 0x435   : > { %3837 = vrcp.f32 %v2747_v37  ;;  %v2753_v20 = vld [vmem:[#allocation3 + $0x48] sm:$0xff]  ;;  %v2755_v7 = vld [vmem:[#allocation3 + $0x58] sm:$0xff]  ;;  %v2754_v55 = vld [vmem:[#allocation3 + $0x50] sm:$0xff] }
 0x436   : > { %3839 = vrcp.f32 %v2745_v41  ;;  %v2757_v12 = vld [vmem:[#allocation3 + $0x68] sm:$0xff]  ;;  %v2756_v13 = vld [vmem:[#allocation3 + $0x60] sm:$0xff]  ;;  %v2759_v45 = vld [vmem:[#allocation3 + $0x78] sm:$0xff] }
 0x437   : > { %3841 = vrcp.f32 %v2749_v32  ;;  %v2758_v62 = vld [vmem:[#allocation3 + $0x70] sm:$0xff]  ;;  %v2761_v61 = vld [vmem:[#allocation3 + $0x88] sm:$0xff]  ;;  %v2760_v6 = vld [vmem:[#allocation3 + $0x80] sm:$0xff] }
 0x438   : > { %3843 = vrcp.f32 %v2748_v50  ;;  %v2763_v42 = vld [vmem:[#allocation3 + $0x98] sm:$0xff]  ;;  %v2762_v30 = vld [vmem:[#allocation3 + $0x90] sm:$0xff]  ;;  %v2765_v29 = vld [vmem:[#allocation3 + $0xa8] sm:$0xff] }
 0x439   : > { %3845 = vrcp.f32 %v2751_v0  ;;  %v2764_v26 = vld [vmem:[#allocation3 + $0xa0] sm:$0xff]  ;;  %v2767_v25 = vld [vmem:[#allocation3 + $0xb8] sm:$0xff]  ;;  %v2766_v40 = vld [vmem:[#allocation3 + $0xb0] sm:$0xff] }
 0x43a   : > { %3847 = vrcp.f32 %v2750_v14  ;;  %v2769_v56 = vld [vmem:[#allocation3 + $0xc8] sm:$0xff]  ;;  %v2768_v2 = vld [vmem:[#allocation3 + $0xc0] sm:$0xff]  ;;  %v2771_v63 = vld [vmem:[#allocation3 + $0xd8] sm:$0xff] }
 0x43b   : > { %3849 = vrcp.f32 %v2753_v20  ;;  %v2770_v48 = vld [vmem:[#allocation3 + $0xd0] sm:$0xff]  ;;  %v2773_v35 = vld [vmem:[#allocation3 + $0xe8] sm:$0xff]  ;;  %v2772_v11 = vld [vmem:[#allocation3 + $0xe0] sm:$0xff] }
 0x43c   : > { %3851 = vrcp.f32 %v2752_v5  ;;  %v2775_v18 = vld [vmem:[#allocation3 + $0xf8] sm:$0xff]  ;;  %v2774_v23 = vld [vmem:[#allocation3 + $0xf0] sm:$0xff]  ;;  %v2712_v37 = vld [vmem:[#allocation4] sm:$0xff] }
 0x43d   : > { %3853 = vrcp.f32 %v2755_v7  ;;  %v2714_v52 = vld [vmem:[#allocation4 + $0x10] sm:$0xff]  ;;  %v2715_v0 = vld [vmem:[#allocation4 + $0x18] sm:$0xff]  ;;  %v2713_v14 = vld [vmem:[#allocation4 + $0x8] sm:$0xff] }
 0x43e   : > { %3855 = vrcp.f32 %v2754_v55  ;;  %v2716_v7 = vld [vmem:[#allocation4 + $0x20] sm:$0xff] }
 0x43f   : > { %3857 = vrcp.f32 %v2757_v12 }
 0x440   : > { %v3834_v54 = vpop.eup %3833  ;;  %3859 = vrcp.f32 %v2756_v13  ;;  %v2718_v13 = vld [vmem:[#allocation4 + $0x30] sm:$0xff] }
 0x441   : > { %v3836_v22 = vpop.eup %3835  ;;  %2820 = vperm.xlu1 %3832, %v3834_v54   ;;  %3861 = vrcp.f32 %v2759_v45 }
 0x442   : > { %v3838_v34 = vpop.eup %3837  ;;  %2810 = vperm.xlu0 %3831, %v3836_v22   ;;  %3863 = vrcp.f32 %v2758_v62 }
 0x443   : > { %v3840_v51 = vpop.eup %3839  ;;  %3865 = vrcp.f32 %v2761_v61  ;;  %v2720_v61 = vld [vmem:[#allocation4 + $0x40] sm:$0xff] }
 0x444   : > { %v3842_v16 = vpop.eup %3841  ;;  %3867 = vrcp.f32 %v2760_v6 }
 0x445   : > { %2825 = vperm.xlu1 %3832, %v3838_v34   ;;  %v3844_v57 = vpop.eup %3843  ;;  %3869 = vrcp.f32 %v2763_v42  ;;  %v2717_v34 = vld [vmem:[#allocation4 + $0x28] sm:$0xff] }
 0x446   : > { %2815 = vperm.xlu0 %3831, %v3840_v51   ;;  %v3846_v59 = vpop.eup %3845  ;;  %3871 = vrcp.f32 %v2762_v30  ;;  %v2722_v30 = vld [vmem:[#allocation4 + $0x50] sm:$0xff] }
 0x447   : > { %v3848_v43 = vpop.eup %3847  ;;  %3873 = vrcp.f32 %v2765_v29 }
 0x448   : > { %v3850_v39 = vpop.eup %3849  ;;  %3875 = vrcp.f32 %v2764_v26 }
 0x449   : > { %2835 = vperm.xlu1 %3832, %v3842_v16   ;;  %v3852_v24 = vpop.eup %3851  ;;  %3877 = vrcp.f32 %v2767_v25  ;;  %v2724_v25 = vld [vmem:[#allocation4 + $0x60] sm:$0xff] }
 0x44a   : > { %2830 = vperm.xlu0 %3831, %v3844_v57   ;;  %v3854_v47 = vpop.eup %3853  ;;  %3879 = vrcp.f32 %v2766_v40  ;;  %v2719_v57 = vld [vmem:[#allocation4 + $0x38] sm:$0xff] }
 0x44b   : > { %v3856_v8 = vpop.eup %3855  ;;  %3881 = vrcp.f32 %v2769_v56 }
 0x44c   : > { %v3858_v21 = vpop.eup %3857  ;;  %3883 = vrcp.f32 %v2768_v2  ;;  %v2726_v2 = vld [vmem:[#allocation4 + $0x70] sm:$0xff] }
 0x44d   : > { %2845 = vperm.xlu1 %3832, %v3846_v59   ;;  %v3860_v1 = vpop.eup %3859  ;;  %3885 = vrcp.f32 %v2771_v63 }
 0x44e   : > { %2840 = vperm.xlu0 %3831, %v3848_v43   ;;  %v3862_v49 = vpop.eup %3861  ;;  %3887 = vrcp.f32 %v2770_v48 }
 0x44f   : > { %v3864_v27 = vpop.eup %3863  ;;  %3889 = vrcp.f32 %v2773_v35  ;;  %v2728_v35 = vld [vmem:[#allocation4 + $0x80] sm:$0xff] }
 0x450   : > { %v3866_v33 = vpop.eup %3865  ;;  %3891 = vrcp.f32 %v2772_v11 }
 0x451   : > { %2855 = vperm.xlu1 %3832, %v3850_v39   ;;  %v3868_v9 = vpop.eup %3867  ;;  %3893 = vrcp.f32 %v2775_v18  ;;  %v2721_v39 = vld [vmem:[#allocation4 + $0x48] sm:$0xff] }
 0x452   : > { %2850 = vperm.xlu0 %3831, %v3852_v24   ;;  %v3870_v4 = vpop.eup %3869  ;;  %3895 = vrcp.f32 %v2774_v23  ;;  %v2730_v23 = vld [vmem:[#allocation4 + $0x90] sm:$0xff] }
 0x453   : > { %v3872_v17 = vpop.eup %3871 }
 0x454   : > { %v3874_v28 = vpop.eup %3873 }
 0x455   : > { %2865 = vperm.xlu1 %3832, %v3854_v47   ;;  %v3876_v31 = vpop.eup %3875 }
 0x456   : > { %2860 = vperm.xlu0 %3831, %v3856_v8   ;;  %v3878_v38 = vpop.eup %3877  ;;  %v2723_v8 = vld [vmem:[#allocation4 + $0x58] sm:$0xff] }
 0x457   : > { %v3880_v53 = vpop.eup %3879 }
 0x458   : > { %v3882_v3 = vpop.eup %3881 }
 0x459   : > { %2875 = vperm.xlu1 %3832, %v3858_v21   ;;  %v3884_v36 = vpop.eup %3883 }
 0x45a   : > { %2870 = vperm.xlu0 %3831, %v3860_v1   ;;  %v3886_v58 = vpop.eup %3885 }
 0x45b   : > { %v3888_v19 = vpop.eup %3887 }
 0x45c   : > { %v3890_v60 = vpop.eup %3889 }
 0x45d   : > { %2885 = vperm.xlu1 %3832, %v3862_v49   ;;  %v3892_v44 = vpop.eup %3891  ;;  %v2725_v49 = vld [vmem:[#allocation4 + $0x68] sm:$0xff] }
 0x45e   : > { %2880 = vperm.xlu0 %3831, %v3864_v27   ;;  %v3894_v15 = vpop.eup %3893 }
 0x45f   : > { %v3896_v10 = vpop.eup %3895 }
 0x461   : > { %2895 = vperm.xlu1 %3832, %v3866_v33  }
 0x462   : > { %2890 = vperm.xlu0 %3831, %v3868_v9   ;;  %v2727_v9 = vld [vmem:[#allocation4 + $0x78] sm:$0xff] }
 0x465   : > { %2905 = vperm.xlu1 %3832, %v3870_v4  }
 0x466   : > { %2900 = vperm.xlu0 %3831, %v3872_v17  }
 0x469   : > { %2915 = vperm.xlu1 %3832, %v3874_v28   ;;  %v2729_v28 = vld [vmem:[#allocation4 + $0x88] sm:$0xff] }
 0x46a   : > { %2910 = vperm.xlu0 %3831, %v3876_v31  }
 0x46d   : > { %2925 = vperm.xlu1 %3832, %v3878_v38  }
 0x46e   : > { %2920 = vperm.xlu0 %3831, %v3880_v53   ;;  %v2731_v53 = vld [vmem:[#allocation4 + $0x98] sm:$0xff] }
 0x471   : > { %2935 = vperm.xlu1 %3832, %v3882_v3  }
 0x472   : > { %2930 = vperm.xlu0 %3831, %v3884_v36  }
 0x475   : > { %2945 = vperm.xlu1 %3832, %v3886_v58  }
 0x476   : > { %2940 = vperm.xlu0 %3831, %v3888_v19  }
 0x479   : > { %2955 = vperm.xlu1 %3832, %v3890_v60   ;;  %v2733_v60 = vld [vmem:[#allocation4 + $0xa8] sm:$0xff] }
 0x47a   : > { %2950 = vperm.xlu0 %3831, %v3892_v44   ;;  %v2732_v44 = vld [vmem:[#allocation4 + $0xa0] sm:$0xff] }
 0x47d   : > { %2965 = vperm.xlu1 %3832, %v3894_v15  }
 0x47e   : > { %2960 = vperm.xlu0 %3831, %v3896_v10  }
 0x4bc   : > { %v2821_v46 = vpop.permute.xlu1 %2820 }
 0x4bd   : > { %v2970_v41 = vmul.f32 %v2821_v46, %v2714_v52  ;;  %v2811_v32 = vpop.permute.xlu0 %2810  ;;  %v2735_v46 = vld [vmem:[#allocation4 + $0xb8] sm:$0xff] }
 0x4be   : > { %v2968_v50 = vmul.f32 %v2811_v32, %v2712_v37 }
 0x4bf   : > { %3002 = vst.msk [vmem:[%s4002_s29 + $0x10] sm:$0xff] %vm472_vm2, %v2970_v41  ;;  %v2734_v41 = vld [vmem:[#allocation4 + $0xb0] sm:$0xff] }
 0x4c0   : > { %3000 = vst.msk [vmem:[%s4002_s29] sm:$0xff] %vm472_vm2, %v2968_v50  ;;  %v2826_v20 = vpop.permute.xlu1 %2825 }
 0x4c1   : > { %v2971_v5 = vmul.f32 %v2826_v20, %v2715_v0  ;;  %v2816_v54 = vpop.permute.xlu0 %2815  ;;  %v2737_v20 = vld [vmem:[#allocation4 + $0xc8] sm:$0xff] }
 0x4c2   : > { %v2969_v22 = vmul.f32 %v2816_v54, %v2713_v14 }
 0x4c3   : > { %3003 = vst.msk [vmem:[%s4002_s29 + $0x18] sm:$0xff] %vm472_vm2, %v2971_v5  ;;  %v2736_v5 = vld [vmem:[#allocation4 + $0xc0] sm:$0xff] }
 0x4c4   : > { %3001 = vst.msk [vmem:[%s4002_s29 + $0x8] sm:$0xff] %vm472_vm2, %v2969_v22  ;;  %v2836_v51 = vpop.permute.xlu1 %2835 }
 0x4c5   : > { %v2973_v55 = vmul.f32 %v2836_v51, %v2717_v34  ;;  %v2831_v16 = vpop.permute.xlu0 %2830  ;;  %v2739_v51 = vld [vmem:[#allocation4 + $0xd8] sm:$0xff] }
 0x4c6   : > { %v2972_v12 = vmul.f32 %v2831_v16, %v2716_v7 }
 0x4c7   : > { %3005 = vst.msk [vmem:[%s4002_s29 + $0x28] sm:$0xff] %vm472_vm2, %v2973_v55  ;;  %v2738_v55 = vld [vmem:[#allocation4 + $0xd0] sm:$0xff] }
 0x4c8   : > { %3004 = vst.msk [vmem:[%s4002_s29 + $0x20] sm:$0xff] %vm472_vm2, %v2972_v12  ;;  %v2846_v59 = vpop.permute.xlu1 %2845 }
 0x4c9   : > { %v2975_v45 = vmul.f32 %v2846_v59, %v2719_v57  ;;  %v2841_v43 = vpop.permute.xlu0 %2840  ;;  %v2741_v59 = vld [vmem:[#allocation4 + $0xe8] sm:$0xff] }
 0x4ca   : > { %v2974_v62 = vmul.f32 %v2841_v43, %v2718_v13 }
 0x4cb   : > { %3007 = vst.msk [vmem:[%s4002_s29 + $0x38] sm:$0xff] %vm472_vm2, %v2975_v45  ;;  %v2740_v45 = vld [vmem:[#allocation4 + $0xe0] sm:$0xff] }
 0x4cc   : > { %3006 = vst.msk [vmem:[%s4002_s29 + $0x30] sm:$0xff] %vm472_vm2, %v2974_v62  ;;  %v2856_v24 = vpop.permute.xlu1 %2855 }
 0x4cd   : > { %v2977_v6 = vmul.f32 %v2856_v24, %v2721_v39  ;;  %v2851_v47 = vpop.permute.xlu0 %2850  ;;  %v2743_v24 = vld [vmem:[#allocation4 + $0xf8] sm:$0xff] }
 0x4ce   : > { %v2976_v42 = vmul.f32 %v2851_v47, %v2720_v61 }
 0x4cf   : > { %3009 = vst.msk [vmem:[%s4002_s29 + $0x48] sm:$0xff] %vm472_vm2, %v2977_v6  ;;  %v2742_v6 = vld [vmem:[#allocation4 + $0xf0] sm:$0xff] }
 0x4d0   : > { %3008 = vst.msk [vmem:[%s4002_s29 + $0x40] sm:$0xff] %vm472_vm2, %v2976_v42  ;;  %v2866_v21 = vpop.permute.xlu1 %2865 }
 0x4d1   : > { %v2979_v29 = vmul.f32 %v2866_v21, %v2723_v8  ;;  %v2861_v1 = vpop.permute.xlu0 %2860 }
 0x4d2   : > { %v2978_v26 = vmul.f32 %v2861_v1, %v2722_v30 }
 0x4d3   : > { %3011 = vst.msk [vmem:[%s4002_s29 + $0x58] sm:$0xff] %vm472_vm2, %v2979_v29 }
 0x4d4   : > { %3010 = vst.msk [vmem:[%s4002_s29 + $0x50] sm:$0xff] %vm472_vm2, %v2978_v26  ;;  %v2876_v27 = vpop.permute.xlu1 %2875 }
 0x4d5   : > { %v2981_v40 = vmul.f32 %v2876_v27, %v2725_v49  ;;  %v2871_v33 = vpop.permute.xlu0 %2870 }
 0x4d6   : > { %v2980_v56 = vmul.f32 %v2871_v33, %v2724_v25 }
 0x4d7   : > { %3013 = vst.msk [vmem:[%s4002_s29 + $0x68] sm:$0xff] %vm472_vm2, %v2981_v40 }
 0x4d8   : > { %3012 = vst.msk [vmem:[%s4002_s29 + $0x60] sm:$0xff] %vm472_vm2, %v2980_v56  ;;  %v2886_v4 = vpop.permute.xlu1 %2885 }
 0x4d9   : > { %v2983_v63 = vmul.f32 %v2886_v4, %v2727_v9  ;;  %v2881_v17 = vpop.permute.xlu0 %2880 }
 0x4da   : > { %v2982_v48 = vmul.f32 %v2881_v17, %v2726_v2 }
 0x4db   : > { %3015 = vst.msk [vmem:[%s4002_s29 + $0x78] sm:$0xff] %vm472_vm2, %v2983_v63 }
 0x4dc   : > { %3014 = vst.msk [vmem:[%s4002_s29 + $0x70] sm:$0xff] %vm472_vm2, %v2982_v48  ;;  %v2896_v31 = vpop.permute.xlu1 %2895 }
 0x4dd   : > { %v2985_v11 = vmul.f32 %v2896_v31, %v2729_v28  ;;  %v2891_v38 = vpop.permute.xlu0 %2890 }
 0x4de   : > { %v2984_v18 = vmul.f32 %v2891_v38, %v2728_v35 }
 0x4df   : > { %3017 = vst.msk [vmem:[%s4002_s29 + $0x88] sm:$0xff] %vm472_vm2, %v2985_v11 }
 0x4e0   : > { %3016 = vst.msk [vmem:[%s4002_s29 + $0x80] sm:$0xff] %vm472_vm2, %v2984_v18  ;;  %v2906_v3 = vpop.permute.xlu1 %2905 }
 0x4e1   : > { %v2987_v36 = vmul.f32 %v2906_v3, %v2731_v53  ;;  %v2901_v58 = vpop.permute.xlu0 %2900 }
 0x4e2   : > { %v2986_v19 = vmul.f32 %v2901_v58, %v2730_v23 }
 0x4e3   : > { %3019 = vst.msk [vmem:[%s4002_s29 + $0x98] sm:$0xff] %vm472_vm2, %v2987_v36 }
 0x4e4   : > { %3018 = vst.msk [vmem:[%s4002_s29 + $0x90] sm:$0xff] %vm472_vm2, %v2986_v19  ;;  %v2916_v15 = vpop.permute.xlu1 %2915 }
 0x4e5   : > { %v2989_v10 = vmul.f32 %v2916_v15, %v2733_v60  ;;  %v2911_v52 = vpop.permute.xlu0 %2910 }
 0x4e6   : > { %v2988_v37 = vmul.f32 %v2911_v52, %v2732_v44 }
 0x4e7   : > { %3021 = vst.msk [vmem:[%s4002_s29 + $0xa8] sm:$0xff] %vm472_vm2, %v2989_v10 }
 0x4e8   : > { %3020 = vst.msk [vmem:[%s4002_s29 + $0xa0] sm:$0xff] %vm472_vm2, %v2988_v37  ;;  %v2926_v32 = vpop.permute.xlu1 %2925 }
 0x4e9   : > { %v2991_v50 = vmul.f32 %v2926_v32, %v2735_v46  ;;  %v2921_v0 = vpop.permute.xlu0 %2920 }
 0x4ea   : > { %v2990_v14 = vmul.f32 %v2921_v0, %v2734_v41 }
 0x4eb   : > { %3023 = vst.msk [vmem:[%s4002_s29 + $0xb8] sm:$0xff] %vm472_vm2, %v2991_v50 }
 0x4ec   : > { %3022 = vst.msk [vmem:[%s4002_s29 + $0xb0] sm:$0xff] %vm472_vm2, %v2990_v14  ;;  %v2936_v54 = vpop.permute.xlu1 %2935 }
 0x4ed   : > { %v2993_v22 = vmul.f32 %v2936_v54, %v2737_v20  ;;  %v2931_v34 = vpop.permute.xlu0 %2930 }
 0x4ee   : > { %v2992_v7 = vmul.f32 %v2931_v34, %v2736_v5 }
 0x4ef   : > { %3025 = vst.msk [vmem:[%s4002_s29 + $0xc8] sm:$0xff] %vm472_vm2, %v2993_v22 }
 0x4f0   : > { %3024 = vst.msk [vmem:[%s4002_s29 + $0xc0] sm:$0xff] %vm472_vm2, %v2992_v7  ;;  %v2946_v16 = vpop.permute.xlu1 %2945 }
 0x4f1   : > { %v2995_v12 = vmul.f32 %v2946_v16, %v2739_v51  ;;  %v2941_v57 = vpop.permute.xlu0 %2940 }
 0x4f2   : > { %v2994_v13 = vmul.f32 %v2941_v57, %v2738_v55 }
 0x4f3   : > { %3027 = vst.msk [vmem:[%s4002_s29 + $0xd8] sm:$0xff] %vm472_vm2, %v2995_v12 }
 0x4f4   : > { %3026 = vst.msk [vmem:[%s4002_s29 + $0xd0] sm:$0xff] %vm472_vm2, %v2994_v13  ;;  %v2956_v43 = vpop.permute.xlu1 %2955 }
 0x4f5   : > { %v2997_v62 = vmul.f32 %v2956_v43, %v2741_v59  ;;  %v2951_v39 = vpop.permute.xlu0 %2950 }
 0x4f6   : > { %v2996_v61 = vmul.f32 %v2951_v39, %v2740_v45 }
 0x4f7   : > { %3029 = vst.msk [vmem:[%s4002_s29 + $0xe8] sm:$0xff] %vm472_vm2, %v2997_v62 }
 0x4f8   : > { %3028 = vst.msk [vmem:[%s4002_s29 + $0xe0] sm:$0xff] %vm472_vm2, %v2996_v61  ;;  %v2966_v47 = vpop.permute.xlu1 %2965 }
 0x4f9   : > { %v2999_v42 = vmul.f32 %v2966_v47, %v2743_v24  ;;  %v2961_v8 = vpop.permute.xlu0 %2960 }
 0x4fa   : > { %v2998_v30 = vmul.f32 %v2961_v8, %v2742_v6 }
 0x4fb   : > { %3031 = vst.msk [vmem:[%s4002_s29 + $0xf8] sm:$0xff] %vm472_vm2, %v2999_v42 }
 0x4fc   : > { %3030 = vst.msk [vmem:[%s4002_s29 + $0xf0] sm:$0xff] %vm472_vm2, %v2998_v30 }
 0x4fd PF: > { %s13_s16 = sadd.s32 1, %s3935_s16   ;;  %s5985_s12 = smov %s3927_s14 }
 0x4fe   : > { %p10_p9 = scmp.ge.s32.totalorder %s13_s16, 6   ;;  %s5986_s13 = smov %s3931_s15 }
 0x4ff   : > { %s5987_s14 = smov %s5990_s17  ;;  %s5988_s15 = smov %s5994_s18 }
 0x500   :  { %12 = sbr.rel (!%p10_p9) target bundleno = 3 (0x3), region = 76 }

// kernel: forward.11
= control target key start
LH: loop header
LB: loop body
LE: loop exit
PB: predicated region body
PF: predicated region fallthrough
CT: control target
= control target key end

     0   :  { %vm162_vm0 = vcmask 261120   ;;  %s4132_s3 = inlined_call_operand.vmem [shape: f32[32,32], index: 3, kind: input, shape index: {}]   ;;  %s4133_s1 = inlined_call_operand.vmem [shape: f32[512,32], index: 1, kind: input, shape index: {}]   ;;  %s4134_s2 = inlined_call_operand.vmem [shape: f32[32,32], index: 2, kind: input, shape index: {}]   ;;  %s4135_s0 = inlined_call_operand.vmem [shape: f32[512,32], index: 0, kind: input, shape index: {}]   ;;  %s4136_s5 = inlined_call_operand.vmem [shape: f32[32,128], index: 5, kind: input, shape index: {}]   ;;  %s4137_s4 = inlined_call_operand.vmem [shape: f32[1,32], index: 4, kind: input, shape index: {}]   ;;  %s4138_s6 = inlined_call_operand.vmem [shape: f32[1,128], index: 6, kind: input, shape index: {}]   ;;  %s4139_s7 = inlined_call_operand.vmem [shape: f32[512,128], index: 7, kind: output, shape index: {}]  }
   0x1   :  { %v161_v0 = vld [vmem:[%s4132_s3 + $0x18] sm:$0xff]  ;;  %v160_v1 = vld [vmem:[%s4132_s3 + $0x10] sm:$0xff]  ;;  %v126_v2 = vld [vmem:[%s4133_s1 + $0x100] sm:$0xff] }
   0x2   :  { %2882 = vmatprep.subr.mxu1 %v161_v0  ;;  %2570 = vmatprep.subr.mxu0 %v161_v0  ;;  %v159_v3 = vld [vmem:[%s4132_s3 + $0x8] sm:$0xff]  ;;  %v158_v4 = vld [vmem:[%s4132_s3] sm:$0xff]  ;;  %v93_v6 = vld [vmem:[%s4134_s2 + $0x18] sm:$0xff] }
   0x3   :  { %2886 = vmatpush3.msra.mxu1 %v161_v0  ;;  %2626 = vmatprep.mubr.msk.f32.mxu1 %vm162_vm0, %v126_v2  ;;  %v127_v5 = vld [vmem:[%s4133_s1 + $0x108] sm:$0xff]  ;;  %v128_v7 = vld [vmem:[%s4133_s1 + $0x110] sm:$0xff]  ;;  %v129_v9 = vld [vmem:[%s4133_s1 + $0x118] sm:$0xff] }
   0x4   :  { %2883 = vmatprep.subr.mxu1 %v160_v1  ;;  %2571 = vmatpush3.msra.mxu0 %v161_v0  ;;  %v92_v8 = vld [vmem:[%s4134_s2 + $0x10] sm:$0xff]  ;;  %v91_v10 = vld [vmem:[%s4134_s2 + $0x8] sm:$0xff]  ;;  %v130_v11 = vld [vmem:[%s4133_s1 + $0x120] sm:$0xff] }
   0x5   :  { %2887 = vmatpush3.msra.mxu1 %v160_v1  ;;  %2572 = vmatprep.subr.mxu0 %v160_v1  ;;  %v90_v12 = vld [vmem:[%s4134_s2] sm:$0xff]  ;;  %v95_v14 = vld [vmem:[%s4133_s1 + $0x8] sm:$0xff]  ;;  %v96_v16 = vld [vmem:[%s4133_s1 + $0x10] sm:$0xff] }
   0x6   :  { %2884 = vmatprep.subr.mxu1 %v159_v3  ;;  %2573 = vmatpush3.msra.mxu0 %v160_v1  ;;  %v94_v13 = vld [vmem:[%s4133_s1] sm:$0xff]  ;;  %v131_v15 = vld [vmem:[%s4133_s1 + $0x128] sm:$0xff]  ;;  %v132_v17 = vld [vmem:[%s4133_s1 + $0x130] sm:$0xff] }
   0x7   :  { %2888 = vmatpush3.msra.mxu1 %v159_v3  ;;  %2574 = vmatprep.subr.mxu0 %v159_v3  ;;  %v97_v18 = vld [vmem:[%s4133_s1 + $0x18] sm:$0xff]  ;;  %v98_v20 = vld [vmem:[%s4133_s1 + $0x20] sm:$0xff]  ;;  %v99_v22 = vld [vmem:[%s4133_s1 + $0x28] sm:$0xff] }
   0x8   :  { %2885 = vmatprep.subr.mxu1 %v158_v4  ;;  %2575 = vmatpush3.msra.mxu0 %v159_v3  ;;  %v133_v19 = vld [vmem:[%s4133_s1 + $0x138] sm:$0xff]  ;;  %v134_v21 = vld [vmem:[%s4133_s1 + $0x140] sm:$0xff]  ;;  %v135_v23 = vld [vmem:[%s4133_s1 + $0x148] sm:$0xff] }
   0x9   :  { %2889 = vmatpush3.msra.mxu1 %v158_v4  ;;  %2576 = vmatprep.subr.mxu0 %v158_v4  ;;  %v100_v24 = vld [vmem:[%s4133_s1 + $0x30] sm:$0xff]  ;;  %v101_v26 = vld [vmem:[%s4133_s1 + $0x38] sm:$0xff]  ;;  %v102_v28 = vld [vmem:[%s4133_s1 + $0x40] sm:$0xff] }
   0xa   :  { %2627 = vmatmul.mubr.msk.f32.vlgmr.msra.gmra.mxu1 %vm162_vm0, %v127_v5  ;;  %2674 = vmatprep.subr.mxu1 %v93_v6  ;;  %v136_v25 = vld [vmem:[%s4133_s1 + $0x150] sm:$0xff]  ;;  %v137_v27 = vld [vmem:[%s4133_s1 + $0x158] sm:$0xff]  ;;  %v138_v29 = vld [vmem:[%s4133_s1 + $0x160] sm:$0xff] }
   0xb   :  { %2675 = vmatpush3.msra.mxu1 %v93_v6  ;;  %2629 = vmatprep.mubr.msk.f32.mxu1 %vm162_vm0, %v128_v7  ;;  %v103_v30 = vld [vmem:[%s4133_s1 + $0x48] sm:$0xff]  ;;  %v104_v32 = vld [vmem:[%s4133_s1 + $0x50] sm:$0xff]  ;;  %v105_v34 = vld [vmem:[%s4133_s1 + $0x58] sm:$0xff] }
   0xc   :  { %2676 = vmatprep.subr.mxu1 %v92_v8  ;;  %2577 = vmatpush3.msra.mxu0 %v158_v4  ;;  %v139_v31 = vld [vmem:[%s4133_s1 + $0x168] sm:$0xff]  ;;  %v140_v33 = vld [vmem:[%s4133_s1 + $0x170] sm:$0xff]  ;;  %v141_v35 = vld [vmem:[%s4133_s1 + $0x178] sm:$0xff] }
   0xd   :  { %2677 = vmatpush3.msra.mxu1 %v92_v8  ;;  %2578 = vmatprep.mubr.msk.f32.mxu0 %vm162_vm0, %v94_v13  ;;  %v106_v36 = vld [vmem:[%s4133_s1 + $0x60] sm:$0xff]  ;;  %v107_v38 = vld [vmem:[%s4133_s1 + $0x68] sm:$0xff]  ;;  %v108_v40 = vld [vmem:[%s4133_s1 + $0x70] sm:$0xff] }
   0xe   :  { %2630 = vmatmul.mubr.msk.f32.gmra.mxu1 %vm162_vm0, %v129_v9  ;;  %2678 = vmatprep.subr.mxu1 %v91_v10  ;;  %v142_v37 = vld [vmem:[%s4133_s1 + $0x180] sm:$0xff]  ;;  %v143_v39 = vld [vmem:[%s4133_s1 + $0x188] sm:$0xff]  ;;  %v144_v41 = vld [vmem:[%s4133_s1 + $0x190] sm:$0xff] }
   0xf   :  { %2632 = vmatprep.mubr.msk.f32.mxu1 %vm162_vm0, %v130_v11  ;;  %2679 = vmatpush3.msra.mxu1 %v91_v10  ;;  %v109_v42 = vld [vmem:[%s4133_s1 + $0x78] sm:$0xff]  ;;  %v110_v44 = vld [vmem:[%s4133_s1 + $0x80] sm:$0xff]  ;;  %v111_v46 = vld [vmem:[%s4133_s1 + $0x88] sm:$0xff] }
  0x10   :  { %2680 = vmatprep.subr.mxu1 %v90_v12  ;;  %2579 = vmatmul.mubr.msk.f32.vlgmr.msra.gmra.mxu0 %vm162_vm0, %v95_v14  ;;  %v145_v43 = vld [vmem:[%s4133_s1 + $0x198] sm:$0xff]  ;;  %v146_v45 = vld [vmem:[%s4133_s1 + $0x1a0] sm:$0xff]  ;;  %v147_v47 = vld [vmem:[%s4133_s1 + $0x1a8] sm:$0xff] }
  0x11   :  { %2681 = vmatpush3.msra.mxu1 %v90_v12  ;;  %2581 = vmatprep.mubr.msk.f32.mxu0 %vm162_vm0, %v96_v16  ;;  %v112_v48 = vld [vmem:[%s4133_s1 + $0x90] sm:$0xff]  ;;  %v113_v50 = vld [vmem:[%s4133_s1 + $0x98] sm:$0xff]  ;;  %v114_v52 = vld [vmem:[%s4133_s1 + $0xa0] sm:$0xff] }
  0x12   :  { %2633 = vmatmul.mubr.msk.f32.gmra.mxu1 %vm162_vm0, %v131_v15  ;;  %v148_v49 = vld [vmem:[%s4133_s1 + $0x1b0] sm:$0xff]  ;;  %v149_v51 = vld [vmem:[%s4133_s1 + $0x1b8] sm:$0xff]  ;;  %v150_v53 = vld [vmem:[%s4133_s1 + $0x1c0] sm:$0xff] }
  0x13   :  { %2635 = vmatprep.mubr.msk.f32.mxu1 %vm162_vm0, %v132_v17  ;;  %v115_v54 = vld [vmem:[%s4133_s1 + $0xa8] sm:$0xff]  ;;  %v116_v56 = vld [vmem:[%s4133_s1 + $0xb0] sm:$0xff]  ;;  %v117_v58 = vld [vmem:[%s4133_s1 + $0xb8] sm:$0xff] }
  0x14   :  { %2582 = vmatmul.mubr.msk.f32.gmra.mxu0 %vm162_vm0, %v97_v18  ;;  %v151_v55 = vld [vmem:[%s4133_s1 + $0x1c8] sm:$0xff]  ;;  %v152_v57 = vld [vmem:[%s4133_s1 + $0x1d0] sm:$0xff]  ;;  %v153_v59 = vld [vmem:[%s4133_s1 + $0x1d8] sm:$0xff] }
  0x15   :  { %2584 = vmatprep.mubr.msk.f32.mxu0 %vm162_vm0, %v98_v20  ;;  %v118_v60 = vld [vmem:[%s4133_s1 + $0xc0] sm:$0xff]  ;;  %v119_v62 = vld [vmem:[%s4133_s1 + $0xc8] sm:$0xff]  ;;  %v120_v0 = vld [vmem:[%s4133_s1 + $0xd0] sm:$0xff] }
  0x16   :  { %2636 = vmatmul.mubr.msk.f32.gmra.mxu1 %vm162_vm0, %v133_v19  ;;  %v154_v61 = vld [vmem:[%s4133_s1 + $0x1e0] sm:$0xff]  ;;  %v155_v63 = vld [vmem:[%s4133_s1 + $0x1e8] sm:$0xff]  ;;  %v156_v1 = vld [vmem:[%s4133_s1 + $0x1f0] sm:$0xff] }
  0x17   :  { %2638 = vmatprep.mubr.msk.f32.mxu1 %vm162_vm0, %v134_v21  ;;  %v121_v2 = vld [vmem:[%s4133_s1 + $0xd8] sm:$0xff]  ;;  %v122_v4 = vld [vmem:[%s4133_s1 + $0xe0] sm:$0xff]  ;;  %v123_v6 = vld [vmem:[%s4133_s1 + $0xe8] sm:$0xff] }
  0x18   :  { %2585 = vmatmul.mubr.msk.f32.gmra.mxu0 %vm162_vm0, %v99_v22  ;;  %v157_v3 = vld [vmem:[%s4133_s1 + $0x1f8] sm:$0xff]  ;;  %v26_v5 = vld [vmem:[%s4135_s0] sm:$0xff]  ;;  %v27_v7 = vld [vmem:[%s4135_s0 + $0x8] sm:$0xff] }
  0x19   :  { %2587 = vmatprep.mubr.msk.f32.mxu0 %vm162_vm0, %v100_v24  ;;  %v124_v8 = vld [vmem:[%s4133_s1 + $0xf0] sm:$0xff]  ;;  %v125_v10 = vld [vmem:[%s4133_s1 + $0xf8] sm:$0xff]  ;;  %v30_v12 = vld [vmem:[%s4135_s0 + $0x20] sm:$0xff] }
  0x1a   :  { %2639 = vmatmul.mubr.msk.f32.gmra.mxu1 %vm162_vm0, %v135_v23  ;;  %v28_v9 = vld [vmem:[%s4135_s0 + $0x10] sm:$0xff]  ;;  %v29_v11 = vld [vmem:[%s4135_s0 + $0x18] sm:$0xff]  ;;  %v31_v13 = vld [vmem:[%s4135_s0 + $0x28] sm:$0xff] }
  0x1b   :  { %2641 = vmatprep.mubr.msk.f32.mxu1 %vm162_vm0, %v136_v25  ;;  %v32_v14 = vld [vmem:[%s4135_s0 + $0x30] sm:$0xff]  ;;  %v33_v15 = vld [vmem:[%s4135_s0 + $0x38] sm:$0xff]  ;;  %v34_v16 = vld [vmem:[%s4135_s0 + $0x40] sm:$0xff] }
  0x1c   :  { %2588 = vmatmul.mubr.msk.f32.gmra.mxu0 %vm162_vm0, %v101_v26  ;;  %v1455_v17 = vld [vmem:[%s4136_s5 + $0x18] sm:$0xff]  ;;  %v35_v18 = vld [vmem:[%s4135_s0 + $0x48] sm:$0xff]  ;;  %v36_v19 = vld [vmem:[%s4135_s0 + $0x50] sm:$0xff] }
  0x1d   :  { %2590 = vmatprep.mubr.msk.f32.mxu0 %vm162_vm0, %v102_v28  ;;  %2778 = vmatprep.subr.mxu0 %v1455_v17  ;;  %v37_v20 = vld [vmem:[%s4135_s0 + $0x58] sm:$0xff]  ;;  %v38_v21 = vld [vmem:[%s4135_s0 + $0x60] sm:$0xff]  ;;  %v39_v22 = vld [vmem:[%s4135_s0 + $0x68] sm:$0xff] }
  0x1e   :  { %2642 = vmatmul.mubr.msk.f32.gmra.mxu1 %vm162_vm0, %v137_v27  ;;  %2779 = vmatpush3.msra.mxu0 %v1455_v17  ;;  %v40_v23 = vld [vmem:[%s4135_s0 + $0x70] sm:$0xff]  ;;  %v41_v24 = vld [vmem:[%s4135_s0 + $0x78] sm:$0xff]  ;;  %v42_v25 = vld [vmem:[%s4135_s0 + $0x80] sm:$0xff] }
  0x1f   :  { %2644 = vmatprep.mubr.msk.f32.mxu1 %vm162_vm0, %v138_v29  ;;  %v1454_v26 = vld [vmem:[%s4136_s5 + $0x10] sm:$0xff]  ;;  %v43_v27 = vld [vmem:[%s4135_s0 + $0x88] sm:$0xff]  ;;  %v45_v29 = vld [vmem:[%s4135_s0 + $0x98] sm:$0xff] }
  0x20   :  { %2591 = vmatmul.mubr.msk.f32.gmra.mxu0 %vm162_vm0, %v103_v30  ;;  %2780 = vmatprep.subr.mxu0 %v1454_v26  ;;  %v44_v28 = vld [vmem:[%s4135_s0 + $0x90] sm:$0xff]  ;;  %v46_v30 = vld [vmem:[%s4135_s0 + $0xa0] sm:$0xff] }
  0x21   :  { %2593 = vmatprep.mubr.msk.f32.mxu0 %vm162_vm0, %v104_v32  ;;  %2781 = vmatpush3.msra.mxu0 %v1454_v26  ;;  %v48_v32 = vld [vmem:[%s4135_s0 + $0xb0] sm:$0xff] }
  0x22   :  { %2645 = vmatmul.mubr.msk.f32.gmra.mxu1 %vm162_vm0, %v139_v31  ;;  %v47_v31 = vld [vmem:[%s4135_s0 + $0xa8] sm:$0xff] }
  0x23   :  { %2647 = vmatprep.mubr.msk.f32.mxu1 %vm162_vm0, %v140_v33  ;;  %v49_v33 = vld [vmem:[%s4135_s0 + $0xb8] sm:$0xff] }
  0x24   :  { %2594 = vmatmul.mubr.msk.f32.gmra.mxu0 %vm162_vm0, %v105_v34  ;;  %v50_v34 = vld [vmem:[%s4135_s0 + $0xc0] sm:$0xff] }
  0x25   :  { %2596 = vmatprep.mubr.msk.f32.mxu0 %vm162_vm0, %v106_v36  ;;  %v51_v36 = vld [vmem:[%s4135_s0 + $0xc8] sm:$0xff] }
  0x26   :  { %2648 = vmatmul.mubr.msk.f32.gmra.mxu1 %vm162_vm0, %v141_v35  ;;  %v1453_v35 = vld [vmem:[%s4136_s5 + $0x8] sm:$0xff] }
  0x27   :  { %2650 = vmatprep.mubr.msk.f32.mxu1 %vm162_vm0, %v142_v37  ;;  %2782 = vmatprep.subr.mxu0 %v1453_v35  ;;  %v52_v37 = vld [vmem:[%s4135_s0 + $0xd0] sm:$0xff] }
  0x28   :  { %2597 = vmatmul.mubr.msk.f32.gmra.mxu0 %vm162_vm0, %v107_v38  ;;  %v53_v38 = vld [vmem:[%s4135_s0 + $0xd8] sm:$0xff] }
  0x29   :  { %2599 = vmatprep.mubr.msk.f32.mxu0 %vm162_vm0, %v108_v40  ;;  %2783 = vmatpush3.msra.mxu0 %v1453_v35  ;;  %v55_v40 = vld [vmem:[%s4135_s0 + $0xe8] sm:$0xff] }
  0x2a   :  { %2651 = vmatmul.mubr.msk.f32.gmra.mxu1 %vm162_vm0, %v143_v39  ;;  %v54_v39 = vld [vmem:[%s4135_s0 + $0xe0] sm:$0xff] }
  0x2b   :  { %2653 = vmatprep.mubr.msk.f32.mxu1 %vm162_vm0, %v144_v41  ;;  %v56_v41 = vld [vmem:[%s4135_s0 + $0xf0] sm:$0xff] }
  0x2c   :  { %2600 = vmatmul.mubr.msk.f32.gmra.mxu0 %vm162_vm0, %v109_v42  ;;  %v57_v42 = vld [vmem:[%s4135_s0 + $0xf8] sm:$0xff] }
  0x2d   :  { %2602 = vmatprep.mubr.msk.f32.mxu0 %vm162_vm0, %v110_v44  ;;  %v1452_v44 = vld [vmem:[%s4136_s5] sm:$0xff] }
  0x2e   :  { %2654 = vmatmul.mubr.msk.f32.gmra.mxu1 %vm162_vm0, %v145_v43  ;;  %v58_v43 = vld [vmem:[%s4135_s0 + $0x100] sm:$0xff]  ;;  %2784 = vmatprep.subr.mxu0 %v1452_v44 }
  0x2f   :  { %2656 = vmatprep.mubr.msk.f32.mxu1 %vm162_vm0, %v146_v45  ;;  %2785 = vmatpush3.msra.mxu0 %v1452_v44  ;;  %v59_v45 = vld [vmem:[%s4135_s0 + $0x108] sm:$0xff] }
  0x30   :  { %2603 = vmatmul.mubr.msk.f32.gmra.mxu0 %vm162_vm0, %v111_v46  ;;  %v60_v46 = vld [vmem:[%s4135_s0 + $0x110] sm:$0xff] }
  0x31   :  { %2605 = vmatprep.mubr.msk.f32.mxu0 %vm162_vm0, %v112_v48  ;;  %v62_v48 = vld [vmem:[%s4135_s0 + $0x120] sm:$0xff] }
  0x32   :  { %2657 = vmatmul.mubr.msk.f32.gmra.mxu1 %vm162_vm0, %v147_v47  ;;  %v61_v47 = vld [vmem:[%s4135_s0 + $0x118] sm:$0xff] }
  0x33   :  { %2659 = vmatprep.mubr.msk.f32.mxu1 %vm162_vm0, %v148_v49  ;;  %v63_v49 = vld [vmem:[%s4135_s0 + $0x128] sm:$0xff] }
  0x34   :  { %2606 = vmatmul.mubr.msk.f32.gmra.mxu0 %vm162_vm0, %v113_v50  ;;  %v64_v50 = vld [vmem:[%s4135_s0 + $0x130] sm:$0xff] }
  0x35   :  { %2608 = vmatprep.mubr.msk.f32.mxu0 %vm162_vm0, %v114_v52  ;;  %v66_v52 = vld [vmem:[%s4135_s0 + $0x140] sm:$0xff] }
  0x36   :  { %2660 = vmatmul.mubr.msk.f32.gmra.mxu1 %vm162_vm0, %v149_v51  ;;  %v65_v51 = vld [vmem:[%s4135_s0 + $0x138] sm:$0xff] }
  0x37   :  { %2662 = vmatprep.mubr.msk.f32.mxu1 %vm162_vm0, %v150_v53  ;;  %v67_v53 = vld [vmem:[%s4135_s0 + $0x148] sm:$0xff] }
  0x38   :  { %2609 = vmatmul.mubr.msk.f32.gmra.mxu0 %vm162_vm0, %v115_v54  ;;  %v68_v54 = vld [vmem:[%s4135_s0 + $0x150] sm:$0xff] }
  0x39   :  { %2611 = vmatprep.mubr.msk.f32.mxu0 %vm162_vm0, %v116_v56  ;;  %v70_v56 = vld [vmem:[%s4135_s0 + $0x160] sm:$0xff] }
  0x3a   :  { %2663 = vmatmul.mubr.msk.f32.gmra.mxu1 %vm162_vm0, %v151_v55  ;;  %v69_v55 = vld [vmem:[%s4135_s0 + $0x158] sm:$0xff] }
  0x3b   :  { %2665 = vmatprep.mubr.msk.f32.mxu1 %vm162_vm0, %v152_v57  ;;  %v71_v57 = vld [vmem:[%s4135_s0 + $0x168] sm:$0xff] }
  0x3c   :  { %2612 = vmatmul.mubr.msk.f32.gmra.mxu0 %vm162_vm0, %v117_v58  ;;  %v72_v58 = vld [vmem:[%s4135_s0 + $0x170] sm:$0xff] }
  0x3d   :  { %2614 = vmatprep.mubr.msk.f32.mxu0 %vm162_vm0, %v118_v60  ;;  %v74_v60 = vld [vmem:[%s4135_s0 + $0x180] sm:$0xff] }
  0x3e   :  { %2666 = vmatmul.mubr.msk.f32.gmra.mxu1 %vm162_vm0, %v153_v59  ;;  %v73_v59 = vld [vmem:[%s4135_s0 + $0x178] sm:$0xff] }
  0x3f   :  { %2668 = vmatprep.mubr.msk.f32.mxu1 %vm162_vm0, %v154_v61  ;;  %v75_v61 = vld [vmem:[%s4135_s0 + $0x188] sm:$0xff] }
  0x40   :  { %2615 = vmatmul.mubr.msk.f32.gmra.mxu0 %vm162_vm0, %v119_v62  ;;  %v76_v62 = vld [vmem:[%s4135_s0 + $0x190] sm:$0xff] }
  0x41   :  { %2617 = vmatprep.mubr.msk.f32.mxu0 %vm162_vm0, %v120_v0  ;;  %v78_v0 = vld [vmem:[%s4135_s0 + $0x1a0] sm:$0xff] }
  0x42   :  { %2669 = vmatmul.mubr.msk.f32.gmra.mxu1 %vm162_vm0, %v155_v63  ;;  %v77_v63 = vld [vmem:[%s4135_s0 + $0x198] sm:$0xff] }
  0x43   :  { %2671 = vmatprep.mubr.msk.f32.mxu1 %vm162_vm0, %v156_v1  ;;  %v79_v1 = vld [vmem:[%s4135_s0 + $0x1a8] sm:$0xff] }
  0x44   :  { %2618 = vmatmul.mubr.msk.f32.gmra.mxu0 %vm162_vm0, %v121_v2  ;;  %v80_v2 = vld [vmem:[%s4135_s0 + $0x1b0] sm:$0xff] }
  0x45   :  { %2620 = vmatprep.mubr.msk.f32.mxu0 %vm162_vm0, %v122_v4  ;;  %v82_v4 = vld [vmem:[%s4135_s0 + $0x1c0] sm:$0xff] }
  0x46   :  { %2672 = vmatmul.mubr.msk.f32.gmra.mxu1 %vm162_vm0, %v157_v3  ;;  %v81_v3 = vld [vmem:[%s4135_s0 + $0x1b8] sm:$0xff] }
  0x47   :  { %2682 = vmatprep.mubr.msk.f32.mxu1 %vm162_vm0, %v26_v5  ;;  %v83_v5 = vld [vmem:[%s4135_s0 + $0x1c8] sm:$0xff] }
  0x48   :  { %2621 = vmatmul.mubr.msk.f32.gmra.mxu0 %vm162_vm0, %v123_v6  ;;  %v84_v6 = vld [vmem:[%s4135_s0 + $0x1d0] sm:$0xff] }
  0x49   :  { %2623 = vmatprep.mubr.msk.f32.mxu0 %vm162_vm0, %v124_v8  ;;  %v86_v8 = vld [vmem:[%s4135_s0 + $0x1e0] sm:$0xff] }
  0x4a   :  { %2683 = vmatmul.mubr.msk.f32.vlgmr.msra.gmra.mxu1 %vm162_vm0, %v27_v7  ;;  %v85_v7 = vld [vmem:[%s4135_s0 + $0x1d8] sm:$0xff] }
  0x4b   :  { %2685 = vmatprep.mubr.msk.f32.mxu1 %vm162_vm0, %v28_v9  ;;  %v87_v9 = vld [vmem:[%s4135_s0 + $0x1e8] sm:$0xff] }
  0x4c   :  { %2624 = vmatmul.mubr.msk.f32.gmra.mxu0 %vm162_vm0, %v125_v10  ;;  %v88_v10 = vld [vmem:[%s4135_s0 + $0x1f0] sm:$0xff] }
  0x4e   :  { %2686 = vmatmul.mubr.msk.f32.gmra.mxu1 %vm162_vm0, %v29_v11  ;;  %v89_v11 = vld [vmem:[%s4135_s0 + $0x1f8] sm:$0xff] }
  0x4f   :  { %2688 = vmatprep.mubr.msk.f32.mxu1 %vm162_vm0, %v30_v12 }
  0x52   :  { %2689 = vmatmul.mubr.msk.f32.gmra.mxu1 %vm162_vm0, %v31_v13 }
  0x53   :  { %2691 = vmatprep.mubr.msk.f32.mxu1 %vm162_vm0, %v32_v14 }
  0x56   :  { %2692 = vmatmul.mubr.msk.f32.gmra.mxu1 %vm162_vm0, %v33_v15 }
  0x57   :  { %2694 = vmatprep.mubr.msk.f32.mxu1 %vm162_vm0, %v34_v16 }
  0x5a   :  { %2695 = vmatmul.mubr.msk.f32.gmra.mxu1 %vm162_vm0, %v35_v18 }
  0x5b   :  { %2697 = vmatprep.mubr.msk.f32.mxu1 %vm162_vm0, %v36_v19 }
  0x5e   :  { %2698 = vmatmul.mubr.msk.f32.gmra.mxu1 %vm162_vm0, %v37_v20 }
  0x5f   :  { %2700 = vmatprep.mubr.msk.f32.mxu1 %vm162_vm0, %v38_v21 }
  0x62   :  { %2701 = vmatmul.mubr.msk.f32.gmra.mxu1 %vm162_vm0, %v39_v22 }
  0x63   :  { %2703 = vmatprep.mubr.msk.f32.mxu1 %vm162_vm0, %v40_v23 }
  0x66   :  { %2704 = vmatmul.mubr.msk.f32.gmra.mxu1 %vm162_vm0, %v41_v24 }
  0x67   :  { %2706 = vmatprep.mubr.msk.f32.mxu1 %vm162_vm0, %v42_v25 }
  0x6a   :  { %2707 = vmatmul.mubr.msk.f32.gmra.mxu1 %vm162_vm0, %v43_v27 }
  0x6b   :  { %2709 = vmatprep.mubr.msk.f32.mxu1 %vm162_vm0, %v44_v28 }
  0x6e   :  { %2710 = vmatmul.mubr.msk.f32.gmra.mxu1 %vm162_vm0, %v45_v29 }
  0x6f   :  { %2712 = vmatprep.mubr.msk.f32.mxu1 %vm162_vm0, %v46_v30 }
  0x72   :  { %2713 = vmatmul.mubr.msk.f32.gmra.mxu1 %vm162_vm0, %v47_v31 }
  0x73   :  { %2715 = vmatprep.mubr.msk.f32.mxu1 %vm162_vm0, %v48_v32 }
  0x76   :  { %2716 = vmatmul.mubr.msk.f32.gmra.mxu1 %vm162_vm0, %v49_v33 }
  0x77   :  { %2718 = vmatprep.mubr.msk.f32.mxu1 %vm162_vm0, %v50_v34 }
  0x7a   :  { %2719 = vmatmul.mubr.msk.f32.gmra.mxu1 %vm162_vm0, %v51_v36 }
  0x7b   :  { %2721 = vmatprep.mubr.msk.f32.mxu1 %vm162_vm0, %v52_v37 }
  0x7e   :  { %2722 = vmatmul.mubr.msk.f32.gmra.mxu1 %vm162_vm0, %v53_v38 }
  0x7f   :  { %2724 = vmatprep.mubr.msk.f32.mxu1 %vm162_vm0, %v54_v39 }
  0x82   :  { %2725 = vmatmul.mubr.msk.f32.gmra.mxu1 %vm162_vm0, %v55_v40 }
  0x83   :  { %2727 = vmatprep.mubr.msk.f32.mxu1 %vm162_vm0, %v56_v41 }
  0x86   :  { %2728 = vmatmul.mubr.msk.f32.gmra.mxu1 %vm162_vm0, %v57_v42 }
  0x87   :  { %2730 = vmatprep.mubr.msk.f32.mxu1 %vm162_vm0, %v58_v43 }
  0x8a   :  { %2731 = vmatmul.mubr.msk.f32.gmra.mxu1 %vm162_vm0, %v59_v45 }
  0x8b   :  { %2733 = vmatprep.mubr.msk.f32.mxu1 %vm162_vm0, %v60_v46 }
  0x8e   :  { %2734 = vmatmul.mubr.msk.f32.gmra.mxu1 %vm162_vm0, %v61_v47 }
  0x8f   :  { %2736 = vmatprep.mubr.msk.f32.mxu1 %vm162_vm0, %v62_v48 }
  0x92   :  { %2737 = vmatmul.mubr.msk.f32.gmra.mxu1 %vm162_vm0, %v63_v49 }
  0x93   :  { %2739 = vmatprep.mubr.msk.f32.mxu1 %vm162_vm0, %v64_v50 }
  0x96   :  { %2740 = vmatmul.mubr.msk.f32.gmra.mxu1 %vm162_vm0, %v65_v51 }
  0x97   :  { %2742 = vmatprep.mubr.msk.f32.mxu1 %vm162_vm0, %v66_v52 }
  0x9a   :  { %2743 = vmatmul.mubr.msk.f32.gmra.mxu1 %vm162_vm0, %v67_v53 }
  0x9b   :  { %2745 = vmatprep.mubr.msk.f32.mxu1 %vm162_vm0, %v68_v54 }
  0x9e   :  { %2746 = vmatmul.mubr.msk.f32.gmra.mxu1 %vm162_vm0, %v69_v55 }
  0x9f   :  { %2748 = vmatprep.mubr.msk.f32.mxu1 %vm162_vm0, %v70_v56 }
  0xa2   :  { %2749 = vmatmul.mubr.msk.f32.gmra.mxu1 %vm162_vm0, %v71_v57 }
  0xa3   :  { %2751 = vmatprep.mubr.msk.f32.mxu1 %vm162_vm0, %v72_v58 }
  0xa6   :  { %2752 = vmatmul.mubr.msk.f32.gmra.mxu1 %vm162_vm0, %v73_v59 }
  0xa7   :  { %2754 = vmatprep.mubr.msk.f32.mxu1 %vm162_vm0, %v74_v60 }
  0xaa   :  { %2755 = vmatmul.mubr.msk.f32.gmra.mxu1 %vm162_vm0, %v75_v61 }
  0xab   :  { %2757 = vmatprep.mubr.msk.f32.mxu1 %vm162_vm0, %v76_v62  ;;  %v3689_v62 = vld [vmem:[%s4137_s4] ss:$0 sm:$0xff] }
  0xae   :  { %2758 = vmatmul.mubr.msk.f32.gmra.mxu1 %vm162_vm0, %v77_v63 }
  0xaf   :  { %2760 = vmatprep.mubr.msk.f32.mxu1 %vm162_vm0, %v78_v0 }
  0xb2   :  { %2761 = vmatmul.mubr.msk.f32.gmra.mxu1 %vm162_vm0, %v79_v1 }
  0xb3   :  { %2763 = vmatprep.mubr.msk.f32.mxu1 %vm162_vm0, %v80_v2 }
  0xb6   :  { %2764 = vmatmul.mubr.msk.f32.gmra.mxu1 %vm162_vm0, %v81_v3 }
  0xb7   :  { %2766 = vmatprep.mubr.msk.f32.mxu1 %vm162_vm0, %v82_v4 }
  0xba   :  { %2767 = vmatmul.mubr.msk.f32.gmra.mxu1 %vm162_vm0, %v83_v5 }
  0xbb   :  { %2769 = vmatprep.mubr.msk.f32.mxu1 %vm162_vm0, %v84_v6 }
  0xbe   :  { %2770 = vmatmul.mubr.msk.f32.gmra.mxu1 %vm162_vm0, %v85_v7 }
  0xbf   :  { %2772 = vmatprep.mubr.msk.f32.mxu1 %vm162_vm0, %v86_v8 }
  0xc2   :  { %2773 = vmatmul.mubr.msk.f32.gmra.mxu1 %vm162_vm0, %v87_v9 }
  0xc3   :  { %2775 = vmatprep.mubr.msk.f32.mxu1 %vm162_vm0, %v88_v10 }
  0xc6   :  { %2776 = vmatmul.mubr.msk.f32.gmra.mxu1 %vm162_vm0, %v89_v11 }
  0xca   :  { %v3606_v12 = vpop.f32.mrf.mxu1 }
  0xcc   :  { %v3608_v13 = vpop.f32.mrf.mxu1 }
  0xce   :  { %v3610_v14 = vpop.f32.mrf.mxu1 }
  0xd0   :  { %v3612_v15 = vpop.f32.mrf.mxu1  ;;  %v2580_v16 = vpop.f32.mrf.mxu0 }
  0xd2   :  { %v3614_v17 = vpop.f32.mrf.mxu1  ;;  %v421_v18 = vpop.f32.mrf.mxu0 }
  0xd4   :  { %v3616_v19 = vpop.f32.mrf.mxu1  ;;  %v2583_v20 = vpop.f32.mrf.mxu0 }
  0xd6   :  { %v3618_v21 = vpop.f32.mrf.mxu1  ;;  %v431_v23 = vpop.f32.mrf.mxu0 }
  0xd8   :  { %v3620_v22 = vpop.f32.mrf.mxu1  ;;  %v2586_v26 = vpop.f32.mrf.mxu0 }
  0xda   :  { %v3622_v24 = vpop.f32.mrf.mxu1  ;;  %v441_v29 = vpop.f32.mrf.mxu0 }
  0xdc   :  { %v3624_v25 = vpop.f32.mrf.mxu1  ;;  %v2589_v32 = vpop.f32.mrf.mxu0 }
  0xde   :  { %v3626_v27 = vpop.f32.mrf.mxu1  ;;  %v451_v35 = vpop.f32.mrf.mxu0 }
  0xe0   :  { %v3628_v28 = vpop.f32.mrf.mxu1  ;;  %v3642_v38 = vpop.f32.mrf.mxu0 }
  0xe2   :  { %v3630_v30 = vpop.f32.mrf.mxu1  ;;  %v3648_v41 = vpop.f32.mrf.mxu0 }
  0xe4   :  { %v3632_v31 = vpop.f32.mrf.mxu1  ;;  %v3654_v44 = vpop.f32.mrf.mxu0 }
  0xe6   :  { %v3634_v33 = vpop.f32.mrf.mxu1  ;;  %v3660_v47 = vpop.f32.mrf.mxu0 }
  0xe8   :  { %v3636_v34 = vpop.f32.mrf.mxu1  ;;  %v3666_v50 = vpop.f32.mrf.mxu0 }
  0xea   :  { %v3638_v36 = vpop.f32.mrf.mxu1  ;;  %v3672_v53 = vpop.f32.mrf.mxu0 }
  0xec   :  { %v3640_v37 = vpop.f32.mrf.mxu1  ;;  %v3678_v56 = vpop.f32.mrf.mxu0 }
  0xee   :  { %v3644_v39 = vpop.f32.mrf.mxu1  ;;  %v3684_v59 = vpop.f32.mrf.mxu0 }
  0xf0   :  { %v3646_v40 = vpop.f32.mrf.mxu1  ;;  %v3691_v0 = vpop.f32.mrf.mxu0 }
  0xf2   :  { %v3650_v42 = vpop.f32.mrf.mxu1  ;;  %v3695_v7 = vpop.f32.mrf.mxu0 }
  0xf4   :  { %v3652_v43 = vpop.f32.mrf.mxu1 }
  0xf6   :  { %v3656_v45 = vpop.f32.mrf.mxu1 }
  0xf8   :  { %v3658_v46 = vpop.f32.mrf.mxu1 }
  0xfa   :  { %v3662_v48 = vpop.f32.mrf.mxu1 }
  0xfc   :  { %v3664_v49 = vpop.f32.mrf.mxu1 }
  0xfe   :  { %v3668_v51 = vpop.f32.mrf.mxu1 }
 0x100   :  { %v3670_v52 = vpop.f32.mrf.mxu1 }
 0x102   :  { %v3674_v54 = vpop.f32.mrf.mxu1 }
 0x104   :  { %v3676_v55 = vpop.f32.mrf.mxu1 }
 0x106   :  { %v3680_v57 = vpop.f32.mrf.mxu1 }
 0x108   :  { %v3682_v58 = vpop.f32.mrf.mxu1 }
 0x109   :  { %4140 = vst [vmem:[#allocation2_spill] sm:$0xff] %v3682_v58 }
 0x10a   :  { %v2684_v60 = vpop.f32.mrf.mxu1 }
 0x10b   :  { %v1004_v61 = vadd.f32 %v2684_v60, %v2580_v16 }
 0x10c   :  { %v998_v63 = vpop.f32.mrf.mxu1 }
 0x10d   :  { %v999_v1 = vadd.f32 %v998_v63, %v421_v18  ;;  %v1325_v2 = vadd.f32 %v3689_v62, %v1004_v61  ;;  %v3701_v61 = vpop.f32.mrf.mxu0 }
 0x10e   :  { %v2687_v3 = vpop.f32.mrf.mxu1 }
 0x10f   :  { %v1324_v4 = vadd.f32 %v3689_v62, %v999_v1  ;;  %v1014_v5 = vadd.f32 %v2687_v3, %v2583_v20  ;;  %v1389_v10 = vmax.f32 %v1325_v2, 0.0 }
 0x110   :  { %v1008_v6 = vpop.f32.mrf.mxu1 }
 0x111   :  { %v1388_v8 = vmax.f32 %v1324_v4, 0.0  ;;  %v1009_v9 = vadd.f32 %v1008_v6, %v431_v23  ;;  %v1327_v11 = vadd.f32 %v3689_v62, %v1014_v5 }
 0x112   :  { %v2690_v16 = vpop.f32.mrf.mxu1 }
 0x113   :  { %v1326_v60 = vadd.f32 %v3689_v62, %v1009_v9  ;;  %v1024_v58 = vadd.f32 %v2690_v16, %v2586_v26  ;;  %2786 = vmatprep.mubr.msk.f32.mxu0 %vm162_vm0, %v1388_v8  ;;  %v1391_v1 = vmax.f32 %v1327_v11, 0.0  ;;  %v3707_v26 = vpop.f32.mrf.mxu0 }
 0x114   :  { %v1018_v18 = vpop.f32.mrf.mxu1  ;;  %2787 = vmatmul.mubr.msk.f32.vlgmr.msra.gmra.mxu0 %vm162_vm0, %v1389_v10 }
 0x115   :  { %v1390_v20 = vmax.f32 %v1326_v60, 0.0  ;;  %v1019_v63 = vadd.f32 %v1018_v18, %v441_v29  ;;  %v1329_v3 = vadd.f32 %v3689_v62, %v1024_v58  ;;  %v2610_v16 = vpop.f32.mrf.mxu0 }
 0x116   :  { %v2693_v23 = vpop.f32.mrf.mxu1 }
 0x117   :  { %v1328_v2 = vadd.f32 %v3689_v62, %v1019_v63  ;;  %v1034_v4 = vadd.f32 %v2693_v23, %v2589_v32  ;;  %2789 = vmatprep.mubr.msk.f32.mxu0 %vm162_vm0, %v1390_v20  ;;  %v1393_v9 = vmax.f32 %v1329_v3, 0.0  ;;  %v521_v23 = vpop.f32.mrf.mxu0 }
 0x118   :  { %v1028_v5 = vpop.f32.mrf.mxu1  ;;  %2790 = vmatmul.mubr.msk.f32.gmra.mxu0 %vm162_vm0, %v1391_v1 }
 0x119   :  { %v1392_v6 = vmax.f32 %v1328_v2, 0.0  ;;  %v1029_v8 = vadd.f32 %v1028_v5, %v451_v35  ;;  %v1331_v10 = vadd.f32 %v3689_v62, %v1034_v4 }
 0x11a   :  { %v2696_v29 = vpop.f32.mrf.mxu1 }
 0x11b   :  { %v1330_v11 = vadd.f32 %v3689_v62, %v1029_v8  ;;  %v1044_v58 = vadd.f32 %v2696_v29, %v3642_v38  ;;  %2792 = vmatprep.mubr.msk.f32.mxu0 %vm162_vm0, %v1392_v6  ;;  %v1395_v20 = vmax.f32 %v1331_v10, 0.0  ;;  %v2613_v10 = vpop.f32.mrf.mxu0 }
 0x11c   :  { %v1038_v32 = vpop.f32.mrf.mxu1  ;;  %2793 = vmatmul.mubr.msk.f32.gmra.mxu0 %vm162_vm0, %v1393_v9 }
 0x11d   :  { %v1394_v60 = vmax.f32 %v1330_v11, 0.0  ;;  %v1039_v18 = vadd.f32 %v1038_v32, %v3648_v41  ;;  %v1333_v35 = vadd.f32 %v3689_v62, %v1044_v58 }
 0x11e   :  { %v2699_v63 = vpop.f32.mrf.mxu1 }
 0x11f   :  { %v1332_v1 = vadd.f32 %v3689_v62, %v1039_v18  ;;  %v1054_v3 = vadd.f32 %v2699_v63, %v3654_v44  ;;  %2795 = vmatprep.mubr.msk.f32.mxu0 %vm162_vm0, %v1394_v60  ;;  %v1397_v5 = vmax.f32 %v1333_v35, 0.0 }
 0x120   :  { %v1048_v38 = vpop.f32.mrf.mxu1  ;;  %2796 = vmatmul.mubr.msk.f32.gmra.mxu0 %vm162_vm0, %v1395_v20  ;;  %v531_v20 = vpop.f32.mrf.mxu0 }
 0x121   :  { %v1396_v2 = vmax.f32 %v1332_v1, 0.0  ;;  %v1049_v4 = vadd.f32 %v1048_v38, %v3660_v47  ;;  %v1335_v41 = vadd.f32 %v3689_v62, %v1054_v3 }
 0x122   :  { %v2702_v6 = vpop.f32.mrf.mxu1 }
 0x123   :  { %v1334_v8 = vadd.f32 %v3689_v62, %v1049_v4  ;;  %v1064_v9 = vadd.f32 %v2702_v6, %v3666_v50  ;;  %2798 = vmatprep.mubr.msk.f32.mxu0 %vm162_vm0, %v1396_v2  ;;  %v1399_v58 = vmax.f32 %v1335_v41, 0.0  ;;  %v2616_v4 = vpop.f32.mrf.mxu0 }
 0x124   :  { %v1058_v44 = vpop.f32.mrf.mxu1  ;;  %2799 = vmatmul.mubr.msk.f32.gmra.mxu0 %vm162_vm0, %v1397_v5 }
 0x125   :  { %v1398_v29 = vmax.f32 %v1334_v8, 0.0  ;;  %v1059_v11 = vadd.f32 %v1058_v44, %v3672_v53  ;;  %v1337_v47 = vadd.f32 %v3689_v62, %v1064_v9 }
 0x126   :  { %v2705_v32 = vpop.f32.mrf.mxu1 }
 0x127   :  { %v1336_v60 = vadd.f32 %v3689_v62, %v1059_v11  ;;  %v1074_v18 = vadd.f32 %v2705_v32, %v3678_v56  ;;  %2801 = vmatprep.mubr.msk.f32.mxu0 %vm162_vm0, %v1398_v29  ;;  %v1401_v1 = vmax.f32 %v1337_v47, 0.0  ;;  %v541_v29 = vpop.f32.mrf.mxu0 }
 0x128   :  { %v1068_v50 = vpop.f32.mrf.mxu1  ;;  %2802 = vmatmul.mubr.msk.f32.gmra.mxu0 %vm162_vm0, %v1399_v58 }
 0x129   :  { %v1400_v35 = vmax.f32 %v1336_v60, 0.0  ;;  %v1069_v63 = vadd.f32 %v1068_v50, %v3684_v59  ;;  %v1339_v53 = vadd.f32 %v3689_v62, %v1074_v18 }
 0x12a   :  { %v2708_v3 = vpop.f32.mrf.mxu1 }
 0x12b   :  { %v1338_v38 = vadd.f32 %v3689_v62, %v1069_v63  ;;  %v1084_v2 = vadd.f32 %v2708_v3, %v3691_v0  ;;  %2804 = vmatprep.mubr.msk.f32.mxu0 %vm162_vm0, %v1400_v35  ;;  %v1403_v6 = vmax.f32 %v1339_v53, 0.0 }
 0x12c   :  { %v1078_v56 = vpop.f32.mrf.mxu1  ;;  %2805 = vmatmul.mubr.msk.f32.gmra.mxu0 %vm162_vm0, %v1401_v1 }
 0x12d   :  { %v1402_v5 = vmax.f32 %v1338_v38, 0.0  ;;  %v1079_v41 = vadd.f32 %v1078_v56, %v3695_v7  ;;  %v1341_v59 = vadd.f32 %v3689_v62, %v1084_v2 }
 0x12e   :  { %v2711_v8 = vpop.f32.mrf.mxu1 }
 0x12f   :  { %v1340_v9 = vadd.f32 %v3689_v62, %v1079_v41  ;;  %v1094_v44 = vadd.f32 %v2711_v8, %v3701_v61  ;;  %2807 = vmatprep.mubr.msk.f32.mxu0 %vm162_vm0, %v1402_v5  ;;  %v1405_v47 = vmax.f32 %v1341_v59, 0.0  ;;  %v2619_v61 = vpop.f32.mrf.mxu0 }
 0x130   :  { %v1088_v0 = vpop.f32.mrf.mxu1  ;;  %2808 = vmatmul.mubr.msk.f32.gmra.mxu0 %vm162_vm0, %v1403_v6 }
 0x131   :  { %v1404_v11 = vmax.f32 %v1340_v9, 0.0  ;;  %v1089_v58 = vadd.f32 %v1088_v0, %v3707_v26  ;;  %v1343_v7 = vadd.f32 %v3689_v62, %v1094_v44 }
 0x132   :  { %v2714_v32 = vpop.f32.mrf.mxu1 }
 0x133   :  { %v1342_v60 = vadd.f32 %v3689_v62, %v1089_v58  ;;  %v1104_v18 = vadd.f32 %v2714_v32, %v2610_v16  ;;  %2810 = vmatprep.mubr.msk.f32.mxu0 %vm162_vm0, %v1404_v11  ;;  %v1407_v1 = vmax.f32 %v1343_v7, 0.0  ;;  %v551_v16 = vpop.f32.mrf.mxu0 }
 0x134   :  { %v1098_v50 = vpop.f32.mrf.mxu1  ;;  %2811 = vmatmul.mubr.msk.f32.gmra.mxu0 %vm162_vm0, %v1405_v47 }
 0x135   :  { %v1406_v35 = vmax.f32 %v1342_v60, 0.0  ;;  %v1099_v63 = vadd.f32 %v1098_v50, %v521_v23  ;;  %v1345_v53 = vadd.f32 %v3689_v62, %v1104_v18 }
 0x136   :  { %v2717_v3 = vpop.f32.mrf.mxu1 }
 0x137   :  { %v1344_v26 = vadd.f32 %v3689_v62, %v1099_v63  ;;  %v1114_v38 = vadd.f32 %v2717_v3, %v2613_v10  ;;  %2813 = vmatprep.mubr.msk.f32.mxu0 %vm162_vm0, %v1406_v35  ;;  %v1409_v41 = vmax.f32 %v1345_v53, 0.0  ;;  %v2622_v10 = vpop.f32.mrf.mxu0 }
 0x138   :  { %v1108_v2 = vpop.f32.mrf.mxu1  ;;  %2814 = vmatmul.mubr.msk.f32.gmra.mxu0 %vm162_vm0, %v1407_v1 }
 0x139   :  { %v1408_v56 = vmax.f32 %v1344_v26, 0.0  ;;  %v1109_v5 = vadd.f32 %v1108_v2, %v531_v20  ;;  %v1347_v6 = vadd.f32 %v3689_v62, %v1114_v38 }
 0x13a   :  { %v2720_v59 = vpop.f32.mrf.mxu1 }
 0x13b   :  { %v1346_v23 = vadd.f32 %v3689_v62, %v1109_v5  ;;  %v1124_v8 = vadd.f32 %v2720_v59, %v2616_v4  ;;  %2816 = vmatprep.mubr.msk.f32.mxu0 %vm162_vm0, %v1408_v56  ;;  %v1411_v11 = vmax.f32 %v1347_v6, 0.0  ;;  %v561_v4 = vpop.f32.mrf.mxu0 }
 0x13c   :  { %v1118_v9 = vpop.f32.mrf.mxu1  ;;  %2817 = vmatmul.mubr.msk.f32.gmra.mxu0 %vm162_vm0, %v1409_v41 }
 0x13d   :  { %v1410_v44 = vmax.f32 %v1346_v23, 0.0  ;;  %v1119_v0 = vadd.f32 %v1118_v9, %v541_v29  ;;  %v1349_v58 = vadd.f32 %v3689_v62, %v1124_v8 }
 0x13e   :  { %v2723_v47 = vpop.f32.mrf.mxu1 }
 0x13f   :  { %v1348_v20 = vadd.f32 %v3689_v62, %v1119_v0  ;;  %v1134_v7 = vadd.f32 %v2723_v47, %v2619_v61  ;;  %2819 = vmatprep.mubr.msk.f32.mxu0 %vm162_vm0, %v1410_v44  ;;  %v1413_v50 = vmax.f32 %v1349_v58, 0.0  ;;  %v2625_v61 = vpop.f32.mrf.mxu0 }
 0x140   :  { %v1128_v32 = vpop.f32.mrf.mxu1  ;;  %2820 = vmatmul.mubr.msk.f32.gmra.mxu0 %vm162_vm0, %v1411_v11 }
 0x141   :  { %v1412_v60 = vmax.f32 %v1348_v20, 0.0  ;;  %v1129_v18 = vadd.f32 %v1128_v32, %v551_v16  ;;  %v1351_v35 = vadd.f32 %v3689_v62, %v1134_v7  ;;  %v571_v41 = vpop.f32.mrf.mxu0 }
 0x142   :  { %v2726_v63 = vpop.f32.mrf.mxu1 }
 0x143   :  { %v1350_v29 = vadd.f32 %v3689_v62, %v1129_v18  ;;  %v1144_v1 = vadd.f32 %v2726_v63, %v2622_v10  ;;  %2822 = vmatprep.mubr.msk.f32.mxu0 %vm162_vm0, %v1412_v60  ;;  %v1415_v38 = vmax.f32 %v1351_v35, 0.0 }
 0x144   :  { %v1138_v53 = vpop.f32.mrf.mxu1  ;;  %2823 = vmatmul.mubr.msk.f32.gmra.mxu0 %vm162_vm0, %v1413_v50 }
 0x145   :  { %v1414_v3 = vmax.f32 %v1350_v29, 0.0  ;;  %v1139_v26 = vadd.f32 %v1138_v53, %v561_v4  ;;  %v1353_v2 = vadd.f32 %v3689_v62, %v1144_v1 }
 0x146   :  { %v2729_v56 = vpop.f32.mrf.mxu1 }
 0x147   :  { %v1352_v16 = vadd.f32 %v3689_v62, %v1139_v26  ;;  %v1154_v5 = vadd.f32 %v2729_v56, %v2625_v61  ;;  %2825 = vmatprep.mubr.msk.f32.mxu0 %vm162_vm0, %v1414_v3  ;;  %v1417_v8 = vmax.f32 %v1353_v2, 0.0 }
 0x148   :  { %v1148_v6 = vpop.f32.mrf.mxu1  ;;  %2826 = vmatmul.mubr.msk.f32.gmra.mxu0 %vm162_vm0, %v1415_v38 }
 0x149   :  { %v1416_v59 = vmax.f32 %v1352_v16, 0.0  ;;  %v1149_v23 = vadd.f32 %v1148_v6, %v571_v41  ;;  %v1355_v9 = vadd.f32 %v3689_v62, %v1154_v5 }
 0x14a   :  { %v2732_v10 = vpop.f32.mrf.mxu1 }
 0x14b   :  { %v1354_v44 = vadd.f32 %v3689_v62, %v1149_v23  ;;  %v1164_v0 = vadd.f32 %v2732_v10, %v3606_v12  ;;  %2828 = vmatprep.mubr.msk.f32.mxu0 %vm162_vm0, %v1416_v59  ;;  %v1419_v20 = vmax.f32 %v1355_v9, 0.0 }
 0x14c   :  { %v1158_v11 = vpop.f32.mrf.mxu1  ;;  %2829 = vmatmul.mubr.msk.f32.gmra.mxu0 %vm162_vm0, %v1417_v8 }
 0x14d   :  { %v1418_v58 = vmax.f32 %v1354_v44, 0.0  ;;  %v1159_v47 = vadd.f32 %v1158_v11, %v3608_v13  ;;  %v1357_v7 = vadd.f32 %v3689_v62, %v1164_v0 }
 0x14e   :  { %v2735_v32 = vpop.f32.mrf.mxu1 }
 0x14f   :  { %v1356_v4 = vadd.f32 %v3689_v62, %v1159_v47  ;;  %v1174_v60 = vadd.f32 %v2735_v32, %v3610_v14  ;;  %2831 = vmatprep.mubr.msk.f32.mxu0 %vm162_vm0, %v1418_v58  ;;  %v1421_v35 = vmax.f32 %v1357_v7, 0.0 }
 0x150   :  { %v1168_v18 = vpop.f32.mrf.mxu1  ;;  %2832 = vmatmul.mubr.msk.f32.gmra.mxu0 %vm162_vm0, %v1419_v20 }
 0x151   :  { %v1420_v12 = vmax.f32 %v1356_v4, 0.0  ;;  %v1169_v50 = vadd.f32 %v1168_v18, %v3612_v15  ;;  %v1359_v63 = vadd.f32 %v3689_v62, %v1174_v60 }
 0x152   :  { %v2738_v13 = vpop.f32.mrf.mxu1 }
 0x153   :  { %v1358_v29 = vadd.f32 %v3689_v62, %v1169_v50  ;;  %v1184_v1 = vadd.f32 %v2738_v13, %v3614_v17  ;;  %2834 = vmatprep.mubr.msk.f32.mxu0 %vm162_vm0, %v1420_v12  ;;  %v1423_v3 = vmax.f32 %v1359_v63, 0.0 }
 0x154   :  { %v1178_v53 = vpop.f32.mrf.mxu1  ;;  %2835 = vmatmul.mubr.msk.f32.gmra.mxu0 %vm162_vm0, %v1421_v35 }
 0x155   :  { %v1422_v14 = vmax.f32 %v1358_v29, 0.0  ;;  %v1179_v61 = vadd.f32 %v1178_v53, %v3616_v19  ;;  %v1361_v26 = vadd.f32 %v3689_v62, %v1184_v1 }
 0x156   :  { %v2741_v15 = vpop.f32.mrf.mxu1 }
 0x157   :  { %v1360_v38 = vadd.f32 %v3689_v62, %v1179_v61  ;;  %v1194_v2 = vadd.f32 %v2741_v15, %v3618_v21  ;;  %2837 = vmatprep.mubr.msk.f32.mxu0 %vm162_vm0, %v1422_v14  ;;  %v1425_v5 = vmax.f32 %v1361_v26, 0.0 }
 0x158   :  { %v1188_v56 = vpop.f32.mrf.mxu1  ;;  %2838 = vmatmul.mubr.msk.f32.gmra.mxu0 %vm162_vm0, %v1423_v3 }
 0x159   :  { %v1424_v17 = vmax.f32 %v1360_v38, 0.0  ;;  %v1189_v16 = vadd.f32 %v1188_v56, %v3620_v22  ;;  %v1363_v41 = vadd.f32 %v3689_v62, %v1194_v2 }
 0x15a   :  { %v2744_v19 = vpop.f32.mrf.mxu1 }
 0x15b   :  { %v1362_v6 = vadd.f32 %v3689_v62, %v1189_v16  ;;  %v1204_v59 = vadd.f32 %v2744_v19, %v3622_v24  ;;  %2840 = vmatprep.mubr.msk.f32.mxu0 %vm162_vm0, %v1424_v17  ;;  %v1427_v9 = vmax.f32 %v1363_v41, 0.0 }
 0x15c   :  { %v1198_v23 = vpop.f32.mrf.mxu1  ;;  %2841 = vmatmul.mubr.msk.f32.gmra.mxu0 %vm162_vm0, %v1425_v5 }
 0x15d   :  { %v1426_v21 = vmax.f32 %v1362_v6, 0.0  ;;  %v1199_v8 = vadd.f32 %v1198_v23, %v3624_v25  ;;  %v1365_v10 = vadd.f32 %v3689_v62, %v1204_v59 }
 0x15e   :  { %v2747_v22 = vpop.f32.mrf.mxu1 }
 0x15f   :  { %v1364_v44 = vadd.f32 %v3689_v62, %v1199_v8  ;;  %v1214_v0 = vadd.f32 %v2747_v22, %v3626_v27  ;;  %2843 = vmatprep.mubr.msk.f32.mxu0 %vm162_vm0, %v1426_v21  ;;  %v1429_v47 = vmax.f32 %v1365_v10, 0.0 }
 0x160   :  { %v1208_v11 = vpop.f32.mrf.mxu1  ;;  %2844 = vmatmul.mubr.msk.f32.gmra.mxu0 %vm162_vm0, %v1427_v9 }
 0x161   :  { %v1428_v24 = vmax.f32 %v1364_v44, 0.0  ;;  %v1209_v58 = vadd.f32 %v1208_v11, %v3628_v28  ;;  %v1367_v20 = vadd.f32 %v3689_v62, %v1214_v0 }
 0x162   :  { %v2750_v25 = vpop.f32.mrf.mxu1 }
 0x163   :  { %v1366_v7 = vadd.f32 %v3689_v62, %v1209_v58  ;;  %v1224_v32 = vadd.f32 %v2750_v25, %v3630_v30  ;;  %2846 = vmatprep.mubr.msk.f32.mxu0 %vm162_vm0, %v1428_v24  ;;  %v1431_v18 = vmax.f32 %v1367_v20, 0.0 }
 0x164   :  { %v1218_v4 = vpop.f32.mrf.mxu1  ;;  %2847 = vmatmul.mubr.msk.f32.gmra.mxu0 %vm162_vm0, %v1429_v47 }
 0x165   :  { %v1430_v27 = vmax.f32 %v1366_v7, 0.0  ;;  %v1219_v60 = vadd.f32 %v1218_v4, %v3632_v31  ;;  %v1369_v12 = vadd.f32 %v3689_v62, %v1224_v32 }
 0x166   :  { %v2753_v28 = vpop.f32.mrf.mxu1 }
 0x167   :  { %v1368_v50 = vadd.f32 %v3689_v62, %v1219_v60  ;;  %v1234_v35 = vadd.f32 %v2753_v28, %v3634_v33  ;;  %2849 = vmatprep.mubr.msk.f32.mxu0 %vm162_vm0, %v1430_v27  ;;  %v1433_v29 = vmax.f32 %v1369_v12, 0.0 }
 0x168   :  { %v1228_v63 = vpop.f32.mrf.mxu1  ;;  %2850 = vmatmul.mubr.msk.f32.gmra.mxu0 %vm162_vm0, %v1431_v18 }
 0x169   :  { %v1432_v30 = vmax.f32 %v1368_v50, 0.0  ;;  %v1229_v13 = vadd.f32 %v1228_v63, %v3636_v34  ;;  %v1371_v1 = vadd.f32 %v3689_v62, %v1234_v35 }
 0x16a   :  { %v2756_v31 = vpop.f32.mrf.mxu1 }
 0x16b   :  { %v1370_v53 = vadd.f32 %v3689_v62, %v1229_v13  ;;  %v1244_v14 = vadd.f32 %v2756_v31, %v3638_v36  ;;  %2852 = vmatprep.mubr.msk.f32.mxu0 %vm162_vm0, %v1432_v30  ;;  %v1435_v26 = vmax.f32 %v1371_v1, 0.0  ;;  %v4141_v31 = vld [vmem:[#allocation2_spill] sm:$0xff] }
 0x16c   :  { %v1238_v61 = vpop.f32.mrf.mxu1  ;;  %2853 = vmatmul.mubr.msk.f32.gmra.mxu0 %vm162_vm0, %v1433_v29 }
 0x16d   :  { %v1434_v33 = vmax.f32 %v1370_v53, 0.0  ;;  %v1239_v3 = vadd.f32 %v1238_v61, %v3640_v37  ;;  %v1373_v15 = vadd.f32 %v3689_v62, %v1244_v14 }
 0x16e   :  { %v2759_v34 = vpop.f32.mrf.mxu1 }
 0x16f   :  { %v1372_v38 = vadd.f32 %v3689_v62, %v1239_v3  ;;  %v1254_v2 = vadd.f32 %v2759_v34, %v3644_v39  ;;  %2855 = vmatprep.mubr.msk.f32.mxu0 %vm162_vm0, %v1434_v33  ;;  %v1437_v16 = vmax.f32 %v1373_v15, 0.0 }
 0x170   :  { %v1248_v56 = vpop.f32.mrf.mxu1  ;;  %2856 = vmatmul.mubr.msk.f32.gmra.mxu0 %vm162_vm0, %v1435_v26 }
 0x171   :  { %v1436_v36 = vmax.f32 %v1372_v38, 0.0  ;;  %v1249_v17 = vadd.f32 %v1248_v56, %v3646_v40  ;;  %v1375_v5 = vadd.f32 %v3689_v62, %v1254_v2 }
 0x172   :  { %v2762_v37 = vpop.f32.mrf.mxu1 }
 0x173   :  { %v1374_v41 = vadd.f32 %v3689_v62, %v1249_v17  ;;  %v1264_v19 = vadd.f32 %v2762_v37, %v3650_v42  ;;  %2858 = vmatprep.mubr.msk.f32.mxu0 %vm162_vm0, %v1436_v36  ;;  %v1439_v23 = vmax.f32 %v1375_v5, 0.0 }
 0x174   :  { %v1258_v6 = vpop.f32.mrf.mxu1  ;;  %2859 = vmatmul.mubr.msk.f32.gmra.mxu0 %vm162_vm0, %v1437_v16 }
 0x175   :  { %v1438_v39 = vmax.f32 %v1374_v41, 0.0  ;;  %v1259_v59 = vadd.f32 %v1258_v6, %v3652_v43  ;;  %v1377_v21 = vadd.f32 %v3689_v62, %v1264_v19 }
 0x176   :  { %v2765_v40 = vpop.f32.mrf.mxu1 }
 0x177   :  { %v1376_v8 = vadd.f32 %v3689_v62, %v1259_v59  ;;  %v1274_v9 = vadd.f32 %v2765_v40, %v3656_v45  ;;  %2861 = vmatprep.mubr.msk.f32.mxu0 %vm162_vm0, %v1438_v39  ;;  %v1441_v44 = vmax.f32 %v1377_v21, 0.0 }
 0x178   :  { %v1268_v10 = vpop.f32.mrf.mxu1  ;;  %2862 = vmatmul.mubr.msk.f32.gmra.mxu0 %vm162_vm0, %v1439_v23 }
 0x179   :  { %v1440_v42 = vmax.f32 %v1376_v8, 0.0  ;;  %v1269_v22 = vadd.f32 %v1268_v10, %v3658_v46  ;;  %v1379_v0 = vadd.f32 %v3689_v62, %v1274_v9 }
 0x17a   :  { %v2768_v43 = vpop.f32.mrf.mxu1 }
 0x17b   :  { %v1378_v11 = vadd.f32 %v3689_v62, %v1269_v22  ;;  %v1284_v24 = vadd.f32 %v2768_v43, %v3662_v48  ;;  %2864 = vmatprep.mubr.msk.f32.mxu0 %vm162_vm0, %v1440_v42  ;;  %v1443_v20 = vmax.f32 %v1379_v0, 0.0 }
 0x17c   :  { %v1278_v58 = vpop.f32.mrf.mxu1  ;;  %2865 = vmatmul.mubr.msk.f32.gmra.mxu0 %vm162_vm0, %v1441_v44 }
 0x17d   :  { %v1442_v45 = vmax.f32 %v1378_v11, 0.0  ;;  %v1279_v47 = vadd.f32 %v1278_v58, %v3664_v49  ;;  %v1381_v25 = vadd.f32 %v3689_v62, %v1284_v24 }
 0x17e   :  { %v2771_v46 = vpop.f32.mrf.mxu1 }
 0x17f   :  { %v1380_v7 = vadd.f32 %v3689_v62, %v1279_v47  ;;  %v1294_v32 = vadd.f32 %v2771_v46, %v3668_v51  ;;  %2867 = vmatprep.mubr.msk.f32.mxu0 %vm162_vm0, %v1442_v45  ;;  %v1445_v60 = vmax.f32 %v1381_v25, 0.0 }
 0x180   :  { %v1288_v4 = vpop.f32.mrf.mxu1  ;;  %2868 = vmatmul.mubr.msk.f32.gmra.mxu0 %vm162_vm0, %v1443_v20 }
 0x181   :  { %v1444_v48 = vmax.f32 %v1380_v7, 0.0  ;;  %v1289_v27 = vadd.f32 %v1288_v4, %v3670_v52  ;;  %v1383_v18 = vadd.f32 %v3689_v62, %v1294_v32 }
 0x182   :  { %v2774_v49 = vpop.f32.mrf.mxu1 }
 0x183   :  { %v1382_v12 = vadd.f32 %v3689_v62, %v1289_v27  ;;  %v1304_v28 = vadd.f32 %v2774_v49, %v3674_v54  ;;  %2870 = vmatprep.mubr.msk.f32.mxu0 %vm162_vm0, %v1444_v48  ;;  %v1447_v63 = vmax.f32 %v1383_v18, 0.0 }
 0x184   :  { %v1298_v50 = vpop.f32.mrf.mxu1  ;;  %2871 = vmatmul.mubr.msk.f32.gmra.mxu0 %vm162_vm0, %v1445_v60 }
 0x185   :  { %v1446_v51 = vmax.f32 %v1382_v12, 0.0  ;;  %v1299_v35 = vadd.f32 %v1298_v50, %v3676_v55  ;;  %v1385_v30 = vadd.f32 %v3689_v62, %v1304_v28 }
 0x186   :  { %v2777_v52 = vpop.f32.mrf.mxu1 }
 0x187   :  { %v1384_v13 = vadd.f32 %v3689_v62, %v1299_v35  ;;  %v1314_v29 = vadd.f32 %v2777_v52, %v3680_v57  ;;  %2873 = vmatprep.mubr.msk.f32.mxu0 %vm162_vm0, %v1446_v51  ;;  %v1449_v14 = vmax.f32 %v1385_v30, 0.0  ;;  %v3874_v57 = vld [vmem:[%s4138_s6] ss:$0 sm:$0xff] }
 0x188   :  { %v1308_v1 = vpop.f32.mrf.mxu1  ;;  %2874 = vmatmul.mubr.msk.f32.gmra.mxu0 %vm162_vm0, %v1447_v63 }
 0x189   :  { %v1448_v54 = vmax.f32 %v1384_v13, 0.0  ;;  %v1309_v53 = vadd.f32 %v1308_v1, %v4141_v31  ;;  %v1387_v61 = vadd.f32 %v3689_v62, %v1314_v29 }
 0x18b   :  { %v1386_v55 = vadd.f32 %v3689_v62, %v1309_v53  ;;  %2876 = vmatprep.mubr.msk.f32.mxu0 %vm162_vm0, %v1448_v54  ;;  %v1451_v3 = vmax.f32 %v1387_v61, 0.0 }
 0x18c   :  { %2877 = vmatmul.mubr.msk.f32.gmra.mxu0 %vm162_vm0, %v1449_v14 }
 0x18d   :  { %v1450_v33 = vmax.f32 %v1386_v55, 0.0 }
 0x18f   :  { %2879 = vmatprep.mubr.msk.f32.mxu0 %vm162_vm0, %v1450_v33 }
 0x190   :  { %2880 = vmatmul.mubr.msk.f32.gmra.mxu0 %vm162_vm0, %v1451_v3 }
 0x1d4   :  { %v2788_v26 = vpop.f32.mrf.mxu0 }
 0x1d5   :  { %v1727_v15 = vadd.f32 %v2788_v26, %v3874_v57 }
 0x1d6   :  { %v1721_v34 = vpop.f32.mrf.mxu0 }
 0x1d7   :  { %2890 = vtanh.f32 %v1727_v15  ;;  %v1722_v62 = vadd.f32 %v3874_v57, %v1721_v34 }
 0x1d8   :  { %v2791_v38 = vpop.f32.mrf.mxu0 }
 0x1d9   :  { %2892 = vtanh.f32 %v1722_v62  ;;  %v1737_v2 = vadd.f32 %v2791_v38, %v3874_v57 }
 0x1da   :  { %v1731_v56 = vpop.f32.mrf.mxu0 }
 0x1db   :  { %2894 = vtanh.f32 %v1737_v2  ;;  %v1732_v36 = vadd.f32 %v3874_v57, %v1731_v56 }
 0x1dc   :  { %v2794_v17 = vpop.f32.mrf.mxu0 }
 0x1dd   :  { %2896 = vtanh.f32 %v1732_v36  ;;  %v1747_v16 = vadd.f32 %v2794_v17, %v3874_v57 }
 0x1de   :  { %v1741_v5 = vpop.f32.mrf.mxu0 }
 0x1df   :  { %2898 = vtanh.f32 %v1747_v16  ;;  %v1742_v37 = vadd.f32 %v3874_v57, %v1741_v5 }
 0x1e0   :  { %v2797_v41 = vpop.f32.mrf.mxu0 }
 0x1e1   :  { %2900 = vtanh.f32 %v1742_v37  ;;  %v1757_v19 = vadd.f32 %v2797_v41, %v3874_v57 }
 0x1e2   :  { %v1751_v6 = vpop.f32.mrf.mxu0 }
 0x1e3   :  { %2902 = vtanh.f32 %v1757_v19  ;;  %v1752_v39 = vadd.f32 %v3874_v57, %v1751_v6 }
 0x1e4   :  { %v2891_v59 = vpop.eup %2890  ;;  %v2800_v23 = vpop.f32.mrf.mxu0 }
 0x1e5   :  { %2105 = vst [vmem:[%s4139_s7 + $0x8] sm:$0xff] %v2891_v59  ;;  %2904 = vtanh.f32 %v1752_v39  ;;  %v1767_v21 = vadd.f32 %v2800_v23, %v3874_v57 }
 0x1e6   :  { %v2893_v40 = vpop.eup %2892  ;;  %v1761_v8 = vpop.f32.mrf.mxu0 }
 0x1e7   :  { %2104 = vst [vmem:[%s4139_s7] sm:$0xff] %v2893_v40  ;;  %2906 = vtanh.f32 %v1767_v21  ;;  %v1762_v9 = vadd.f32 %v3874_v57, %v1761_v8 }
 0x1e8   :  { %v2895_v10 = vpop.eup %2894  ;;  %v2803_v42 = vpop.f32.mrf.mxu0 }
 0x1e9   :  { %2107 = vst [vmem:[%s4139_s7 + $0x18] sm:$0xff] %v2895_v10  ;;  %2908 = vtanh.f32 %v1762_v9  ;;  %v1777_v22 = vadd.f32 %v2803_v42, %v3874_v57 }
 0x1ea   :  { %v2897_v44 = vpop.eup %2896  ;;  %v1771_v0 = vpop.f32.mrf.mxu0 }
 0x1eb   :  { %2106 = vst [vmem:[%s4139_s7 + $0x10] sm:$0xff] %v2897_v44  ;;  %2910 = vtanh.f32 %v1777_v22  ;;  %v1772_v43 = vadd.f32 %v3874_v57, %v1771_v0 }
 0x1ec   :  { %v2899_v11 = vpop.eup %2898  ;;  %v2806_v24 = vpop.f32.mrf.mxu0 }
 0x1ed   :  { %2109 = vst [vmem:[%s4139_s7 + $0x28] sm:$0xff] %v2899_v11  ;;  %2912 = vtanh.f32 %v1772_v43  ;;  %v1787_v58 = vadd.f32 %v2806_v24, %v3874_v57 }
 0x1ee   :  { %v2901_v45 = vpop.eup %2900  ;;  %v1781_v47 = vpop.f32.mrf.mxu0 }
 0x1ef   :  { %2108 = vst [vmem:[%s4139_s7 + $0x20] sm:$0xff] %v2901_v45  ;;  %2914 = vtanh.f32 %v1787_v58  ;;  %v1782_v20 = vadd.f32 %v3874_v57, %v1781_v47 }
 0x1f0   :  { %v2903_v25 = vpop.eup %2902  ;;  %v2809_v46 = vpop.f32.mrf.mxu0 }
 0x1f1   :  { %2111 = vst [vmem:[%s4139_s7 + $0x38] sm:$0xff] %v2903_v25  ;;  %2916 = vtanh.f32 %v1782_v20  ;;  %v1797_v7 = vadd.f32 %v2809_v46, %v3874_v57 }
 0x1f2   :  { %v2905_v32 = vpop.eup %2904  ;;  %v1791_v4 = vpop.f32.mrf.mxu0 }
 0x1f3   :  { %2110 = vst [vmem:[%s4139_s7 + $0x30] sm:$0xff] %v2905_v32  ;;  %2918 = vtanh.f32 %v1797_v7  ;;  %v1792_v48 = vadd.f32 %v3874_v57, %v1791_v4 }
 0x1f4   :  { %v2907_v27 = vpop.eup %2906  ;;  %v2812_v60 = vpop.f32.mrf.mxu0 }
 0x1f5   :  { %2113 = vst [vmem:[%s4139_s7 + $0x48] sm:$0xff] %v2907_v27  ;;  %2920 = vtanh.f32 %v1792_v48  ;;  %v1807_v18 = vadd.f32 %v2812_v60, %v3874_v57 }
 0x1f6   :  { %v2909_v49 = vpop.eup %2908  ;;  %v1801_v12 = vpop.f32.mrf.mxu0 }
 0x1f7   :  { %2112 = vst [vmem:[%s4139_s7 + $0x40] sm:$0xff] %v2909_v49  ;;  %2922 = vtanh.f32 %v1807_v18  ;;  %v1802_v28 = vadd.f32 %v3874_v57, %v1801_v12 }
 0x1f8   :  { %v2911_v50 = vpop.eup %2910  ;;  %v2815_v51 = vpop.f32.mrf.mxu0 }
 0x1f9   :  { %2115 = vst [vmem:[%s4139_s7 + $0x58] sm:$0xff] %v2911_v50  ;;  %2924 = vtanh.f32 %v1802_v28  ;;  %v1817_v35 = vadd.f32 %v2815_v51, %v3874_v57 }
 0x1fa   :  { %v2913_v63 = vpop.eup %2912  ;;  %v1811_v30 = vpop.f32.mrf.mxu0 }
 0x1fb   :  { %2114 = vst [vmem:[%s4139_s7 + $0x50] sm:$0xff] %v2913_v63  ;;  %2926 = vtanh.f32 %v1817_v35  ;;  %v1812_v52 = vadd.f32 %v3874_v57, %v1811_v30 }
 0x1fc   :  { %v2915_v13 = vpop.eup %2914  ;;  %v2818_v29 = vpop.f32.mrf.mxu0 }
 0x1fd   :  { %2117 = vst [vmem:[%s4139_s7 + $0x68] sm:$0xff] %v2915_v13  ;;  %2928 = vtanh.f32 %v1812_v52  ;;  %v1827_v1 = vadd.f32 %v2818_v29, %v3874_v57 }
 0x1fe   :  { %v2917_v54 = vpop.eup %2916  ;;  %v1821_v31 = vpop.f32.mrf.mxu0 }
 0x1ff   :  { %2116 = vst [vmem:[%s4139_s7 + $0x60] sm:$0xff] %v2917_v54  ;;  %2930 = vtanh.f32 %v1827_v1  ;;  %v1822_v53 = vadd.f32 %v3874_v57, %v1821_v31 }
 0x200   :  { %v2919_v14 = vpop.eup %2918  ;;  %v2821_v61 = vpop.f32.mrf.mxu0 }
 0x201   :  { %2119 = vst [vmem:[%s4139_s7 + $0x78] sm:$0xff] %v2919_v14  ;;  %2932 = vtanh.f32 %v1822_v53  ;;  %v1837_v55 = vadd.f32 %v2821_v61, %v3874_v57 }
 0x202   :  { %v2921_v33 = vpop.eup %2920  ;;  %v1831_v3 = vpop.f32.mrf.mxu0 }
 0x203   :  { %2118 = vst [vmem:[%s4139_s7 + $0x70] sm:$0xff] %v2921_v33  ;;  %2934 = vtanh.f32 %v1837_v55  ;;  %v1832_v26 = vadd.f32 %v3874_v57, %v1831_v3 }
 0x204   :  { %v2923_v15 = vpop.eup %2922  ;;  %v2824_v34 = vpop.f32.mrf.mxu0 }
 0x205   :  { %2121 = vst [vmem:[%s4139_s7 + $0x88] sm:$0xff] %v2923_v15  ;;  %2936 = vtanh.f32 %v1832_v26  ;;  %v1847_v62 = vadd.f32 %v2824_v34, %v3874_v57 }
 0x206   :  { %v2925_v38 = vpop.eup %2924  ;;  %v1841_v2 = vpop.f32.mrf.mxu0 }
 0x207   :  { %2120 = vst [vmem:[%s4139_s7 + $0x80] sm:$0xff] %v2925_v38  ;;  %2938 = vtanh.f32 %v1847_v62  ;;  %v1842_v56 = vadd.f32 %v3874_v57, %v1841_v2 }
 0x208   :  { %v2927_v36 = vpop.eup %2926  ;;  %v2827_v17 = vpop.f32.mrf.mxu0 }
 0x209   :  { %2123 = vst [vmem:[%s4139_s7 + $0x98] sm:$0xff] %v2927_v36  ;;  %2940 = vtanh.f32 %v1842_v56  ;;  %v1857_v16 = vadd.f32 %v2827_v17, %v3874_v57 }
 0x20a   :  { %v2929_v5 = vpop.eup %2928  ;;  %v1851_v37 = vpop.f32.mrf.mxu0 }
 0x20b   :  { %2122 = vst [vmem:[%s4139_s7 + $0x90] sm:$0xff] %v2929_v5  ;;  %2942 = vtanh.f32 %v1857_v16  ;;  %v1852_v41 = vadd.f32 %v3874_v57, %v1851_v37 }
 0x20c   :  { %v2931_v19 = vpop.eup %2930  ;;  %v2830_v6 = vpop.f32.mrf.mxu0 }
 0x20d   :  { %2125 = vst [vmem:[%s4139_s7 + $0xa8] sm:$0xff] %v2931_v19  ;;  %2944 = vtanh.f32 %v1852_v41  ;;  %v1867_v39 = vadd.f32 %v2830_v6, %v3874_v57 }
 0x20e   :  { %v2933_v59 = vpop.eup %2932  ;;  %v1861_v23 = vpop.f32.mrf.mxu0 }
 0x20f   :  { %2124 = vst [vmem:[%s4139_s7 + $0xa0] sm:$0xff] %v2933_v59  ;;  %2946 = vtanh.f32 %v1867_v39  ;;  %v1862_v21 = vadd.f32 %v3874_v57, %v1861_v23 }
 0x210   :  { %v2935_v40 = vpop.eup %2934  ;;  %v2833_v8 = vpop.f32.mrf.mxu0 }
 0x211   :  { %2127 = vst [vmem:[%s4139_s7 + $0xb8] sm:$0xff] %v2935_v40  ;;  %2948 = vtanh.f32 %v1862_v21  ;;  %v1877_v9 = vadd.f32 %v2833_v8, %v3874_v57 }
 0x212   :  { %v2937_v10 = vpop.eup %2936  ;;  %v1871_v42 = vpop.f32.mrf.mxu0 }
 0x213   :  { %2126 = vst [vmem:[%s4139_s7 + $0xb0] sm:$0xff] %v2937_v10  ;;  %2950 = vtanh.f32 %v1877_v9  ;;  %v1872_v22 = vadd.f32 %v3874_v57, %v1871_v42 }
 0x214   :  { %v2939_v44 = vpop.eup %2938  ;;  %v2836_v0 = vpop.f32.mrf.mxu0 }
 0x215   :  { %2129 = vst [vmem:[%s4139_s7 + $0xc8] sm:$0xff] %v2939_v44  ;;  %2952 = vtanh.f32 %v1872_v22  ;;  %v1887_v43 = vadd.f32 %v2836_v0, %v3874_v57 }
 0x216   :  { %v2941_v11 = vpop.eup %2940  ;;  %v1881_v24 = vpop.f32.mrf.mxu0 }
 0x217   :  { %2128 = vst [vmem:[%s4139_s7 + $0xc0] sm:$0xff] %v2941_v11  ;;  %2954 = vtanh.f32 %v1887_v43  ;;  %v1882_v58 = vadd.f32 %v3874_v57, %v1881_v24 }
 0x218   :  { %v2943_v45 = vpop.eup %2942  ;;  %v2839_v47 = vpop.f32.mrf.mxu0 }
 0x219   :  { %2131 = vst [vmem:[%s4139_s7 + $0xd8] sm:$0xff] %v2943_v45  ;;  %2956 = vtanh.f32 %v1882_v58  ;;  %v1897_v20 = vadd.f32 %v2839_v47, %v3874_v57 }
 0x21a   :  { %v2945_v25 = vpop.eup %2944  ;;  %v1891_v46 = vpop.f32.mrf.mxu0 }
 0x21b   :  { %2130 = vst [vmem:[%s4139_s7 + $0xd0] sm:$0xff] %v2945_v25  ;;  %2958 = vtanh.f32 %v1897_v20  ;;  %v1892_v7 = vadd.f32 %v3874_v57, %v1891_v46 }
 0x21c   :  { %v2947_v32 = vpop.eup %2946  ;;  %v2842_v4 = vpop.f32.mrf.mxu0 }
 0x21d   :  { %2133 = vst [vmem:[%s4139_s7 + $0xe8] sm:$0xff] %v2947_v32  ;;  %2960 = vtanh.f32 %v1892_v7  ;;  %v1907_v48 = vadd.f32 %v2842_v4, %v3874_v57 }
 0x21e   :  { %v2949_v27 = vpop.eup %2948  ;;  %v1901_v60 = vpop.f32.mrf.mxu0 }
 0x21f   :  { %2132 = vst [vmem:[%s4139_s7 + $0xe0] sm:$0xff] %v2949_v27  ;;  %2962 = vtanh.f32 %v1907_v48  ;;  %v1902_v18 = vadd.f32 %v3874_v57, %v1901_v60 }
 0x220   :  { %v2951_v49 = vpop.eup %2950  ;;  %v2845_v12 = vpop.f32.mrf.mxu0 }
 0x221   :  { %2135 = vst [vmem:[%s4139_s7 + $0xf8] sm:$0xff] %v2951_v49  ;;  %2964 = vtanh.f32 %v1902_v18  ;;  %v1917_v28 = vadd.f32 %v2845_v12, %v3874_v57 }
 0x222   :  { %v2953_v50 = vpop.eup %2952  ;;  %v1911_v51 = vpop.f32.mrf.mxu0 }
 0x223   :  { %2134 = vst [vmem:[%s4139_s7 + $0xf0] sm:$0xff] %v2953_v50  ;;  %2966 = vtanh.f32 %v1917_v28  ;;  %v1912_v35 = vadd.f32 %v3874_v57, %v1911_v51 }
 0x224   :  { %v2955_v63 = vpop.eup %2954  ;;  %v2848_v30 = vpop.f32.mrf.mxu0 }
 0x225   :  { %2137 = vst [vmem:[%s4139_s7 + $0x108] sm:$0xff] %v2955_v63  ;;  %2968 = vtanh.f32 %v1912_v35  ;;  %v1927_v52 = vadd.f32 %v2848_v30, %v3874_v57 }
 0x226   :  { %v2957_v13 = vpop.eup %2956  ;;  %v1921_v29 = vpop.f32.mrf.mxu0 }
 0x227   :  { %2136 = vst [vmem:[%s4139_s7 + $0x100] sm:$0xff] %v2957_v13  ;;  %2970 = vtanh.f32 %v1927_v52  ;;  %v1922_v1 = vadd.f32 %v3874_v57, %v1921_v29 }
 0x228   :  { %v2959_v54 = vpop.eup %2958  ;;  %v2851_v31 = vpop.f32.mrf.mxu0 }
 0x229   :  { %2139 = vst [vmem:[%s4139_s7 + $0x118] sm:$0xff] %v2959_v54  ;;  %2972 = vtanh.f32 %v1922_v1  ;;  %v1937_v53 = vadd.f32 %v2851_v31, %v3874_v57 }
 0x22a   :  { %v2961_v14 = vpop.eup %2960  ;;  %v1931_v61 = vpop.f32.mrf.mxu0 }
 0x22b   :  { %2138 = vst [vmem:[%s4139_s7 + $0x110] sm:$0xff] %v2961_v14  ;;  %2974 = vtanh.f32 %v1937_v53  ;;  %v1932_v55 = vadd.f32 %v3874_v57, %v1931_v61 }
 0x22c   :  { %v2963_v33 = vpop.eup %2962  ;;  %v2854_v3 = vpop.f32.mrf.mxu0 }
 0x22d   :  { %2141 = vst [vmem:[%s4139_s7 + $0x128] sm:$0xff] %v2963_v33  ;;  %2976 = vtanh.f32 %v1932_v55  ;;  %v1947_v26 = vadd.f32 %v2854_v3, %v3874_v57 }
 0x22e   :  { %v2965_v15 = vpop.eup %2964  ;;  %v1941_v34 = vpop.f32.mrf.mxu0 }
 0x22f   :  { %2140 = vst [vmem:[%s4139_s7 + $0x120] sm:$0xff] %v2965_v15  ;;  %2978 = vtanh.f32 %v1947_v26  ;;  %v1942_v62 = vadd.f32 %v3874_v57, %v1941_v34 }
 0x230   :  { %v2967_v38 = vpop.eup %2966  ;;  %v2857_v2 = vpop.f32.mrf.mxu0 }
 0x231   :  { %2143 = vst [vmem:[%s4139_s7 + $0x138] sm:$0xff] %v2967_v38  ;;  %2980 = vtanh.f32 %v1942_v62  ;;  %v1957_v56 = vadd.f32 %v2857_v2, %v3874_v57 }
 0x232   :  { %v2969_v36 = vpop.eup %2968  ;;  %v1951_v17 = vpop.f32.mrf.mxu0 }
 0x233   :  { %2142 = vst [vmem:[%s4139_s7 + $0x130] sm:$0xff] %v2969_v36  ;;  %2982 = vtanh.f32 %v1957_v56  ;;  %v1952_v16 = vadd.f32 %v3874_v57, %v1951_v17 }
 0x234   :  { %v2971_v5 = vpop.eup %2970  ;;  %v2860_v37 = vpop.f32.mrf.mxu0 }
 0x235   :  { %2145 = vst [vmem:[%s4139_s7 + $0x148] sm:$0xff] %v2971_v5  ;;  %2984 = vtanh.f32 %v1952_v16  ;;  %v1967_v41 = vadd.f32 %v2860_v37, %v3874_v57 }
 0x236   :  { %v2973_v19 = vpop.eup %2972  ;;  %v1961_v6 = vpop.f32.mrf.mxu0 }
 0x237   :  { %2144 = vst [vmem:[%s4139_s7 + $0x140] sm:$0xff] %v2973_v19  ;;  %2986 = vtanh.f32 %v1967_v41  ;;  %v1962_v39 = vadd.f32 %v3874_v57, %v1961_v6 }
 0x238   :  { %v2975_v59 = vpop.eup %2974  ;;  %v2863_v23 = vpop.f32.mrf.mxu0 }
 0x239   :  { %2147 = vst [vmem:[%s4139_s7 + $0x158] sm:$0xff] %v2975_v59  ;;  %2988 = vtanh.f32 %v1962_v39  ;;  %v1977_v21 = vadd.f32 %v2863_v23, %v3874_v57 }
 0x23a   :  { %v2977_v40 = vpop.eup %2976  ;;  %v1971_v8 = vpop.f32.mrf.mxu0 }
 0x23b   :  { %2146 = vst [vmem:[%s4139_s7 + $0x150] sm:$0xff] %v2977_v40  ;;  %2990 = vtanh.f32 %v1977_v21  ;;  %v1972_v9 = vadd.f32 %v3874_v57, %v1971_v8 }
 0x23c   :  { %v2979_v10 = vpop.eup %2978  ;;  %v2866_v42 = vpop.f32.mrf.mxu0 }
 0x23d   :  { %2149 = vst [vmem:[%s4139_s7 + $0x168] sm:$0xff] %v2979_v10  ;;  %2992 = vtanh.f32 %v1972_v9  ;;  %v1987_v22 = vadd.f32 %v2866_v42, %v3874_v57 }
 0x23e   :  { %v2981_v44 = vpop.eup %2980  ;;  %v1981_v0 = vpop.f32.mrf.mxu0 }
 0x23f   :  { %2148 = vst [vmem:[%s4139_s7 + $0x160] sm:$0xff] %v2981_v44  ;;  %2994 = vtanh.f32 %v1987_v22  ;;  %v1982_v43 = vadd.f32 %v3874_v57, %v1981_v0 }
 0x240   :  { %v2983_v11 = vpop.eup %2982  ;;  %v2869_v24 = vpop.f32.mrf.mxu0 }
 0x241   :  { %2151 = vst [vmem:[%s4139_s7 + $0x178] sm:$0xff] %v2983_v11  ;;  %2996 = vtanh.f32 %v1982_v43  ;;  %v1997_v58 = vadd.f32 %v2869_v24, %v3874_v57 }
 0x242   :  { %v2985_v45 = vpop.eup %2984  ;;  %v1991_v47 = vpop.f32.mrf.mxu0 }
 0x243   :  { %2150 = vst [vmem:[%s4139_s7 + $0x170] sm:$0xff] %v2985_v45  ;;  %2998 = vtanh.f32 %v1997_v58  ;;  %v1992_v20 = vadd.f32 %v3874_v57, %v1991_v47 }
 0x244   :  { %v2987_v25 = vpop.eup %2986  ;;  %v2872_v46 = vpop.f32.mrf.mxu0 }
 0x245   :  { %2153 = vst [vmem:[%s4139_s7 + $0x188] sm:$0xff] %v2987_v25  ;;  %3000 = vtanh.f32 %v1992_v20  ;;  %v2007_v7 = vadd.f32 %v2872_v46, %v3874_v57 }
 0x246   :  { %v2989_v32 = vpop.eup %2988  ;;  %v2001_v4 = vpop.f32.mrf.mxu0 }
 0x247   :  { %2152 = vst [vmem:[%s4139_s7 + $0x180] sm:$0xff] %v2989_v32  ;;  %3002 = vtanh.f32 %v2007_v7  ;;  %v2002_v48 = vadd.f32 %v3874_v57, %v2001_v4 }
 0x248   :  { %v2991_v27 = vpop.eup %2990  ;;  %v2875_v60 = vpop.f32.mrf.mxu0 }
 0x249   :  { %2155 = vst [vmem:[%s4139_s7 + $0x198] sm:$0xff] %v2991_v27  ;;  %3004 = vtanh.f32 %v2002_v48  ;;  %v2017_v18 = vadd.f32 %v2875_v60, %v3874_v57 }
 0x24a   :  { %v2993_v49 = vpop.eup %2992  ;;  %v2011_v12 = vpop.f32.mrf.mxu0 }
 0x24b   :  { %2154 = vst [vmem:[%s4139_s7 + $0x190] sm:$0xff] %v2993_v49  ;;  %3006 = vtanh.f32 %v2017_v18  ;;  %v2012_v28 = vadd.f32 %v3874_v57, %v2011_v12 }
 0x24c   :  { %v2995_v50 = vpop.eup %2994  ;;  %v2878_v51 = vpop.f32.mrf.mxu0 }
 0x24d   :  { %2157 = vst [vmem:[%s4139_s7 + $0x1a8] sm:$0xff] %v2995_v50  ;;  %3008 = vtanh.f32 %v2012_v28  ;;  %v2027_v35 = vadd.f32 %v2878_v51, %v3874_v57 }
 0x24e   :  { %v2997_v63 = vpop.eup %2996  ;;  %v2021_v30 = vpop.f32.mrf.mxu0 }
 0x24f   :  { %2156 = vst [vmem:[%s4139_s7 + $0x1a0] sm:$0xff] %v2997_v63  ;;  %3010 = vtanh.f32 %v2027_v35  ;;  %v2022_v52 = vadd.f32 %v3874_v57, %v2021_v30 }
 0x250   :  { %v2999_v13 = vpop.eup %2998  ;;  %v2881_v29 = vpop.f32.mrf.mxu0 }
 0x251   :  { %2159 = vst [vmem:[%s4139_s7 + $0x1b8] sm:$0xff] %v2999_v13  ;;  %3012 = vtanh.f32 %v2022_v52  ;;  %v2037_v1 = vadd.f32 %v2881_v29, %v3874_v57 }
 0x252   :  { %v3001_v54 = vpop.eup %3000  ;;  %v2031_v31 = vpop.f32.mrf.mxu0 }
 0x253   :  { %2158 = vst [vmem:[%s4139_s7 + $0x1b0] sm:$0xff] %v3001_v54  ;;  %3014 = vtanh.f32 %v2037_v1  ;;  %v2032_v53 = vadd.f32 %v3874_v57, %v2031_v31 }
 0x254   :  { %v3003_v14 = vpop.eup %3002 }
 0x255   :  { %2161 = vst [vmem:[%s4139_s7 + $0x1c8] sm:$0xff] %v3003_v14  ;;  %3016 = vtanh.f32 %v2032_v53 }
 0x256   :  { %v3005_v61 = vpop.eup %3004 }
 0x257   :  { %2160 = vst [vmem:[%s4139_s7 + $0x1c0] sm:$0xff] %v3005_v61 }
 0x258   :  { %v3007_v55 = vpop.eup %3006 }
 0x259   :  { %2163 = vst [vmem:[%s4139_s7 + $0x1d8] sm:$0xff] %v3007_v55 }
 0x25a   :  { %v3009_v33 = vpop.eup %3008 }
 0x25b   :  { %2162 = vst [vmem:[%s4139_s7 + $0x1d0] sm:$0xff] %v3009_v33 }
 0x25c   :  { %v3011_v57 = vpop.eup %3010 }
 0x25d   :  { %2165 = vst [vmem:[%s4139_s7 + $0x1e8] sm:$0xff] %v3011_v57 }
 0x25e   :  { %v3013_v3 = vpop.eup %3012 }
 0x25f   :  { %2164 = vst [vmem:[%s4139_s7 + $0x1e0] sm:$0xff] %v3013_v3 }
 0x260   :  { %v3015_v26 = vpop.eup %3014 }
 0x261   :  { %2167 = vst [vmem:[%s4139_s7 + $0x1f8] sm:$0xff] %v3015_v26 }
 0x262   :  { %v3017_v15 = vpop.eup %3016 }
 0x263   :  { %2166 = vst [vmem:[%s4139_s7 + $0x1f0] sm:$0xff] %v3017_v15 }

</bundles_post_ra>
